<compile_context>
chip_gen: v7x
topology: tpu7x:2x2x1
jax: 0.10.0
libtpu: 0.0.40
codegen_flags: <defaults>
</compile_context>

<pallas_src>
import functools

import jax
import jax.numpy as jnp
from jax import lax
from jax.experimental import pallas as pl
from jax.experimental.pallas import tpu as pltpu

EPS = 1e-5          # BatchNorm eps (PyTorch default)
TM = 512            # row tile of the im2col-matmul / elementwise kernels
ROW_TILE = 16       # output-row tile of the direct conv kernel
MB = 1024 * 1024


def _round_up(x, m):
    return (x + m - 1) // m * m


def _row_tile(ho):
    """Largest divisor of ho that is <= ROW_TILE (so no masking is needed)."""
    for d in range(min(ROW_TILE, ho), 0, -1):
        if ho % d == 0:
            return d
    return 1


def _vmem_params(est_bytes, dims):
    limit = int(max(32 * MB, min(2 * est_bytes, 64 * MB)))
    return pltpu.CompilerParams(dimension_semantics=dims,
                                vmem_limit_bytes=limit)


# ------------------------------ Pallas kernels -------------------------------

def _direct_conv_kernel(*refs, kh, kw, wo, th, cin, cout,
                        in_affine, has_bias, act, with_stats):
    """Direct stride-1 conv: per output row, accumulate kh*kw tap matmuls of
    (Wo, Cin) x (Cin, Cout) into an f32 accumulator.  Optional fused input
    affine+ReLU (previous layer's BN), bias, tanh epilogue, BN partial stats."""
    it = iter(refs)
    x_ref = next(it)                             # (1, Hp, Wp, Cin) bf16
    w_ref = next(it)                             # (kh*kw, Cin, Cout) bf16
    sc_ref = next(it) if in_affine else None     # (1, Cin) f32
    sh_ref = next(it) if in_affine else None     # (1, Cin) f32
    b_ref = next(it) if has_bias else None       # (1, Cout) f32
    y_ref = next(it)                             # (1, th, Wo, Cout)
    st_ref = next(it) if with_stats else None    # (1, 2, Cout) f32

    row0 = pl.program_id(1) * th
    if in_affine:
        # hoist broadcasts out of the loops (JAX does not CSE broadcast_in_dim)
        scale = jnp.broadcast_to(sc_ref[...], (wo, cin))
        shift = jnp.broadcast_to(sh_ref[...], (wo, cin))

    def body(t, carry):
        s1, s2 = carry
        acc = jnp.zeros((wo, cout), jnp.float32)
        for tap in range(kh * kw):
            di, dj = divmod(tap, kw)
            lhs = x_ref[0, row0 + t + di, pl.ds(dj, wo), :]      # (Wo, Cin)
            if in_affine:
                lhs = jnp.maximum(lhs.astype(jnp.float32) * scale + shift, 0.0)
            acc = acc + jnp.dot(lhs.astype(jnp.bfloat16), w_ref[tap],
                                preferred_element_type=jnp.float32)
        if has_bias:
            acc = acc + b_ref[...]
        if act == "tanh":
            acc = jnp.tanh(acc)
        y_ref[0, t] = acc.astype(y_ref.dtype)
        if with_stats:
            s1 = s1 + jnp.sum(acc, axis=0, keepdims=True)
            s2 = s2 + jnp.sum(acc * acc, axis=0, keepdims=True)
        return s1, s2

    init = (jnp.zeros((1, cout), jnp.float32),
            jnp.zeros((1, cout), jnp.float32))
    s1, s2 = lax.fori_loop(0, th, body, init)
    if with_stats:
        st_ref[0, 0:1, :] = s1
        st_ref[0, 1:2, :] = s2


def _matmul_stats_kernel(x_ref, w_ref, y_ref, st_ref, *, block_m, m_true,
                         need_mask):
    """(patches @ weights) with per-tile BN partial sums (fully parallel grid)."""
    i = pl.program_id(0)
    acc = jnp.dot(x_ref[...], w_ref[...], preferred_element_type=jnp.float32)
    y_ref[...] = acc.astype(y_ref.dtype)
    st_ref[0, 0:1, :] = jnp.sum(acc, axis=0, keepdims=True)
    st_ref[0, 1:2, :] = jnp.sum(acc * acc, axis=0, keepdims=True)
    if need_mask:
        # only the last (partial) tile masks out-of-range rows from the stats
        @pl.when(i == pl.num_programs(0) - 1)
        def _():
            rows = lax.broadcasted_iota(jnp.int32, acc.shape, 0) + i * block_m
            accm = jnp.where(rows < m_true, acc, 0.0)
            st_ref[0, 0:1, :] = jnp.sum(accm, axis=0, keepdims=True)
            st_ref[0, 1:2, :] = jnp.sum(accm * accm, axis=0, keepdims=True)


def _residual_kernel(*refs, fuse_b):
    """out = (h * s_a + t_a) + [relu(x * s_b + t_b) | x]  -- bn2 + skip add."""
    it = iter(refs)
    h_ref = next(it)
    x_ref = next(it)
    sa_ref = next(it)
    ta_ref = next(it)
    if fuse_b:
        sb_ref = next(it)
        tb_ref = next(it)
    o_ref = next(it)
    a = h_ref[...].astype(jnp.float32) * sa_ref[...] + ta_ref[...]
    xb = x_ref[...].astype(jnp.float32)
    if fuse_b:
        xb = jnp.maximum(xb * sb_ref[...] + tb_ref[...], 0.0)
    o_ref[...] = (a + xb).astype(o_ref.dtype)


# ------------------------------ kernel wrappers -------------------------------

def direct_conv(x_pad, w_taps, *, kh, kw, ho, wo, in_affine=None, bias=None,
                act="none", with_stats=False, out_dtype=jnp.bfloat16):
    """Stride-1 conv on an already-padded NHWC bf16 image.

    x_pad:  (N, Hp, Wp, Cin) bf16
    w_taps: (kh*kw, Cin, Cout) bf16  (tap-major)
    in_affine: optional ((Cin,), (Cin,)) scale/shift of the PREVIOUS layer's
               BatchNorm, fused as ReLU(x*s+t) in the prologue.
    """
    n, hp, wp, cin = x_pad.shape
    cout = w_taps.shape[-1]
    th = _row_tile(ho)
    r = ho // th
    grid = (n, r)

    in_arrays = [x_pad, w_taps]
    in_specs = [pl.BlockSpec((1, hp, wp, cin), lambda ni, ri: (ni, 0, 0, 0)),
                pl.BlockSpec((kh * kw, cin, cout), lambda ni, ri: (0, 0, 0))]
    if in_affine is not None:
        s, t = in_affine
        in_arrays += [s.reshape(1, cin).astype(jnp.float32),
                      t.reshape(1, cin).astype(jnp.float32)]
        in_specs += [pl.BlockSpec((1, cin), lambda ni, ri: (0, 0))] * 2
    if bias is not None:
        in_arrays.append(bias.reshape(1, cout).astype(jnp.float32))
        in_specs.append(pl.BlockSpec((1, cout), lambda ni, ri: (0, 0)))

    if with_stats:
        out_shape = (jax.ShapeDtypeStruct((n, ho, wo, cout), out_dtype),
                     jax.ShapeDtypeStruct((n * r, 2, cout), jnp.float32))
        out_specs = (pl.BlockSpec((1, th, wo, cout),
                                  lambda ni, ri: (ni, ri, 0, 0)),
                     pl.BlockSpec((1, 2, cout),
                                  lambda ni, ri: (ni * r + ri, 0, 0)))
    else:
        out_shape = jax.ShapeDtypeStruct((n, ho, wo, cout), out_dtype)
        out_specs = pl.BlockSpec((1, th, wo, cout),
                                 lambda ni, ri: (ni, ri, 0, 0))

    kernel = functools.partial(_direct_conv_kernel, kh=kh, kw=kw, wo=wo, th=th,
                               cin=cin, cout=cout,
                               in_affine=in_affine is not None,
                               has_bias=bias is not None, act=act,
                               with_stats=with_stats)
    est = ((2 * hp * wp * cin + 2 * kh * kw * cin * cout
            + 2 * th * wo * cout) * 2 + wo * cout * 4)

    out = pl.pallas_call(
        kernel,
        out_shape=out_shape,
        grid=grid,
        in_specs=in_specs,
        out_specs=out_specs,
        compiler_params=_vmem_params(est, ("parallel", "parallel")),
    )(*in_arrays)
    if with_stats:
        return out[0], out[1]
    return out


def conv_matmul_stats(patches, w_packed):
    """y = patches @ w_packed (bf16 MXU, f32 acc) with per-tile BN partials."""
    m, k = patches.shape
    c = w_packed.shape[1]
    block_m = min(TM, _round_up(m, 16))
    grid_m = pl.cdiv(m, block_m)
    need_mask = (m % block_m) != 0
    kernel = functools.partial(_matmul_stats_kernel, block_m=block_m,
                               m_true=m, need_mask=need_mask)
    est = (2 * block_m * k + k * c + 2 * block_m * c) * 2 + block_m * c * 4
    y, st = pl.pallas_call(
        kernel,
        out_shape=(jax.ShapeDtypeStruct((m, c), jnp.bfloat16),
                   jax.ShapeDtypeStruct((grid_m, 2, c), jnp.float32)),
        grid=(grid_m,),
        in_specs=[pl.BlockSpec((block_m, k), lambda i: (i, 0)),
                  pl.BlockSpec((k, c), lambda i: (0, 0))],
        out_specs=(pl.BlockSpec((block_m, c), lambda i: (i, 0)),
                   pl.BlockSpec((1, 2, c), lambda i: (i, 0, 0))),
        compiler_params=_vmem_params(est, ("parallel",)),
    )(patches, w_packed)
    return y, st


def residual_add(h, x, a_affine, b_affine=None):
    """y = bn_a(h) + [relu(bn_b(x)) | x]  over NHWC tensors."""
    n, hh, ww, c = h.shape
    m = n * hh * ww
    block_m = min(TM, _round_up(m, 8))
    grid_m = pl.cdiv(m, block_m)
    sa, ta = a_affine
    in_arrays = [h.reshape(m, c), x.reshape(m, c),
                 sa.reshape(1, c).astype(jnp.float32),
                 ta.reshape(1, c).astype(jnp.float32)]
    in_specs = [pl.BlockSpec((block_m, c), lambda i: (i, 0)),
                pl.BlockSpec((block_m, c), lambda i: (i, 0)),
                pl.BlockSpec((1, c), lambda i: (0, 0)),
                pl.BlockSpec((1, c), lambda i: (0, 0))]
    if b_affine is not None:
        sb, tb = b_affine
        in_arrays += [sb.reshape(1, c).astype(jnp.float32),
                      tb.reshape(1, c).astype(jnp.float32)]
        in_specs += [pl.BlockSpec((1, c), lambda i: (0, 0))] * 2
    kernel = functools.partial(_residual_kernel, fuse_b=b_affine is not None)
    est = 3 * 2 * block_m * c * 2
    y = pl.pallas_call(
        kernel,
        out_shape=jax.ShapeDtypeStruct((m, c), jnp.bfloat16),
        grid=(grid_m,),
        in_specs=in_specs,
        out_specs=pl.BlockSpec((block_m, c), lambda i: (i, 0)),
        compiler_params=_vmem_params(est, ("parallel",)),
    )(*in_arrays)
    return y.reshape(n, hh, ww, c)


# ----------------------------- conv glue (NHWC) -------------------------------

def extract_patches(x, kh, kw, stride, pad, pad_mode):
    """x: NHWC bf16 -> ((N*Ho*Wo, kh*kw*C) bf16, (N, Ho, Wo)).  XLA glue,
    only used for the two stride-2 downsample convs."""
    if pad > 0:
        mode = "reflect" if pad_mode == "reflect" else "constant"
        x = jnp.pad(x, ((0, 0), (pad, pad), (pad, pad), (0, 0)), mode=mode)
    n, hp, wp, c = x.shape
    ho = (hp - kh) // stride + 1
    wo = (wp - kw) // stride + 1
    cols = [x[:, i:i + stride * ho:stride, j:j + stride * wo:stride, :]
            for i in range(kh) for j in range(kw)]
    p = jnp.concatenate(cols, axis=-1)          # tap-major, channel-minor
    return p.reshape(n * ho * wo, kh * kw * c), (n, ho, wo)


def _bn_params(stats, count, gamma, beta, fold_phases=1):
    """Per-channel BN scale/shift from per-tile partial sums.
    stats: (T, 2, C) with row 0 = sum, row 1 = sum-of-squares."""
    s1 = stats[:, 0, :].sum(0)
    s2 = stats[:, 1, :].sum(0)
    if fold_phases > 1:
        c = s1.shape[0] // fold_phases
        s1 = s1.reshape(fold_phases, c).sum(0)
        s2 = s2.reshape(fold_phases, c).sum(0)
    mean = s1 / count
    # TODO(synk): E[x^2]-E[x]^2 in f32 can cancel when |mean| >> std; a shifted
    # two-pass / Welford accumulation would match PyTorch's variance closer.
    var = jnp.maximum(s2 / count - mean * mean, 0.0)
    inv = lax.rsqrt(var + EPS)
    scale = gamma * inv
    shift = beta - mean * scale
    return scale.astype(jnp.float32), shift.astype(jnp.float32)


def _apply_affine_relu(y, affine):
    s, t = affine
    return jnp.maximum(y.astype(jnp.float32) * s + t, 0.0).astype(jnp.bfloat16)


# --------------------------- parameter packing --------------------------------

def _pack_conv_taps(w):
    """PyTorch Conv2d weight (Cout, Cin, kh, kw) -> (kh*kw, Cin, Cout) bf16."""
    cout, cin, kh, kw = w.shape
    return jnp.transpose(w, (2, 3, 1, 0)).reshape(kh * kw, cin, cout) \
              .astype(jnp.bfloat16)


def _pack_conv_im2col(w):
    """PyTorch Conv2d weight (Cout, Cin, kh, kw) -> (kh*kw*Cin, Cout) bf16,
    tap-major / channel-minor to match extract_patches."""
    cout, cin, kh, kw = w.shape
    return jnp.transpose(w, (2, 3, 1, 0)).reshape(kh * kw * cin, cout) \
              .astype(jnp.bfloat16)


def _pack_transpose_fused(w):
    """PyTorch ConvTranspose2d weight (Cin, Cout, 3, 3) -> fused sub-pixel
    weight (4 taps of a 2x2 stride-1 conv, Cin, 4*Cout) with output phases
    ordered [ee | eo | oe | oo]."""
    cin, cout = w.shape[0], w.shape[1]
    z = jnp.zeros((cin, cout), w.dtype)

    def tp(a, b):
        return w[:, :, a, b]
    tap0 = jnp.concatenate([tp(1, 1), tp(1, 2), tp(2, 1), tp(2, 2)], axis=1)
    tap1 = jnp.concatenate([z,        tp(1, 0), z,        tp(2, 0)], axis=1)
    tap2 = jnp.concatenate([z,        z,        tp(0, 1), tp(0, 2)], axis=1)
    tap3 = jnp.concatenate([z,        z,        z,        tp(0, 0)], axis=1)
    return jnp.stack([tap0, tap1, tap2, tap3], axis=0).astype(jnp.bfloat16)


def init_params(key, input_nc, output_nc, ngf, n_blocks):
    keys = iter(jax.random.split(key, 64))

    def rnd(shape):
        return 0.1 * jax.random.normal(next(keys), shape, jnp.float32)

    p = {}
    # stem: ReflectionPad(3) + Conv 7x7 (no bias) + BN + ReLU
    p["stem_w"] = _pack_conv_taps(rnd((ngf, input_nc, 7, 7)))
    p["stem_gamma"] = jnp.ones((ngf,), jnp.float32)
    p["stem_beta"] = jnp.zeros((ngf,), jnp.float32)
    # 2 downsampling convs (stride 2, pad 1, no bias) + BN + ReLU
    for i in range(2):
        mult = 2 ** i
        cin, cout = ngf * mult, ngf * mult * 2
        p[f"down{i}_w"] = _pack_conv_im2col(rnd((cout, cin, 3, 3)))
        p[f"down{i}_gamma"] = jnp.ones((cout,), jnp.float32)
        p[f"down{i}_beta"] = jnp.zeros((cout,), jnp.float32)
    # resnet blocks at ngf*4 channels
    dim = ngf * 4
    for i in range(n_blocks):
        p[f"blk{i}_w1"] = _pack_conv_taps(rnd((dim, dim, 3, 3)))
        p[f"blk{i}_g1"] = jnp.ones((dim,), jnp.float32)
        p[f"blk{i}_b1"] = jnp.zeros((dim,), jnp.float32)
        p[f"blk{i}_w2"] = _pack_conv_taps(rnd((dim, dim, 3, 3)))
        p[f"blk{i}_g2"] = jnp.ones((dim,), jnp.float32)
        p[f"blk{i}_b2"] = jnp.zeros((dim,), jnp.float32)
    # 2 upsampling ConvTranspose2d (no bias) + BN + ReLU (fused sub-pixel)
    for i in range(2):
        mult = 2 ** (2 - i)
        cin, cout = ngf * mult, ngf * mult // 2
        p[f"up{i}_w"] = _pack_transpose_fused(rnd((cin, cout, 3, 3)))
        p[f"up{i}_gamma"] = jnp.ones((cout,), jnp.float32)
        p[f"up{i}_beta"] = jnp.zeros((cout,), jnp.float32)
    # final: ReflectionPad(3) + Conv 7x7 (bias=True) + Tanh
    p["final_w"] = _pack_conv_taps(rnd((output_nc, ngf, 7, 7)))
    p["final_b"] = rnd((output_nc,))
    return p


# --------------------------------- forward -----------------------------------

def resnet_generator_forward(params, x_nchw, ngf, n_blocks):
    p = params
    x = jnp.transpose(x_nchw, (0, 2, 3, 1)).astype(jnp.bfloat16)  # NCHW -> NHWC
    n, h, w, _ = x.shape

    # ---- stem: ReflectionPad(3) + Conv7x7 + BN + ReLU(pending) ----
    xp = jnp.pad(x, ((0, 0), (3, 3), (3, 3), (0, 0)), mode="reflect")
    y, st = direct_conv(xp, p["stem_w"], kh=7, kw=7, ho=h, wo=w, with_stats=True)
    pend = _bn_params(st, n * h * w, p["stem_gamma"], p["stem_beta"])

    # ---- downsampling (stride-2, zero pad): im2col path; pending affine is
    #      materialised in glue (zero padding cannot absorb it) ----
    hc, wc = h, w
    for i in range(2):
        ya = _apply_affine_relu(y, pend)
        patches, (_, ho, wo) = extract_patches(ya, 3, 3, 2, 1, "zero")
        cout = p[f"down{i}_w"].shape[1]
        ym, st = conv_matmul_stats(patches, p[f"down{i}_w"])
        y = ym.reshape(n, ho, wo, cout)
        pend = _bn_params(st, n * ho * wo,
                          p[f"down{i}_gamma"], p[f"down{i}_beta"])
        hc, wc = ho, wo

    # ---- resnet blocks (reflect-padded 3x3 convs, skip connection) ----
    for i in range(n_blocks):
        yp = jnp.pad(y, ((0, 0), (1, 1), (1, 1), (0, 0)), mode="reflect")
        h1, st = direct_conv(yp, p[f"blk{i}_w1"], kh=3, kw=3, ho=hc, wo=wc,
                             in_affine=pend, with_stats=True)
        a1 = _bn_params(st, n * hc * wc, p[f"blk{i}_g1"], p[f"blk{i}_b1"])
        h1p = jnp.pad(h1, ((0, 0), (1, 1), (1, 1), (0, 0)), mode="reflect")
        h2, st = direct_conv(h1p, p[f"blk{i}_w2"], kh=3, kw=3, ho=hc, wo=wc,
                             in_affine=a1, with_stats=True)
        a2 = _bn_params(st, n * hc * wc, p[f"blk{i}_g2"], p[f"blk{i}_b2"])
        # y_out = bn2(h2) + [relu(pending_bn(y)) | y]
        y = residual_add(h2, y, a2, b_affine=pend)
        pend = None

    # ---- upsampling: fused single-matmul sub-pixel ConvTranspose2d ----
    for i in range(2):
        cin = y.shape[-1]
        cout = cin // 2
        if pend is not None:
            y = _apply_affine_relu(y, pend)   # zero pad cannot absorb the affine
            pend = None
        yp = jnp.pad(y, ((0, 0), (0, 1), (0, 1), (0, 0)))  # bottom/right zero pad
        yk, st = direct_conv(yp, p[f"up{i}_w"], kh=2, kw=2, ho=hc, wo=wc,
                             with_stats=True)
        # pixel shuffle: (N,H,W,4*Cout) -> (N,2H,2W,Cout), phases [ee,eo,oe,oo]
        y = yk.reshape(n, hc, wc, 2, 2, cout).transpose(0, 1, 3, 2, 4, 5) \
              .reshape(n, 2 * hc, 2 * wc, cout)
        hc, wc = 2 * hc, 2 * wc
        pend = _bn_params(st, n * hc * wc, p[f"up{i}_gamma"], p[f"up{i}_beta"],
                          fold_phases=4)

    # ---- final: ReflectionPad(3) + Conv7x7(bias) + Tanh, with up1's BN+ReLU
    #      fused into the prologue ----
    yp = jnp.pad(y, ((0, 0), (3, 3), (3, 3), (0, 0)), mode="reflect")
    y = direct_conv(yp, p["final_w"], kh=7, kw=7, ho=hc, wo=wc,
                    in_affine=pend, bias=p["final_b"], act="tanh",
                    with_stats=False, out_dtype=jnp.float32)
    return jnp.transpose(y, (0, 3, 1, 2))                          # NHWC -> NCHW


# --------------------------------- main --------------------------------------

if __name__ == "__main__":
    input_nc, output_nc = 4, 3
    ngf, n_blocks = 8, 2            # small synthetic configuration
    batch, spatial = 2, 16          # spatial must be divisible by 4

    key = jax.random.PRNGKey(0)
    k_param, k_input = jax.random.split(key)
    params = init_params(k_param, input_nc, output_nc, ngf, n_blocks)
    x = jax.random.normal(k_input, (batch, input_nc, spatial, spatial),
                          jnp.float32)

    fwd = jax.jit(functools.partial(resnet_generator_forward,
                                    ngf=ngf, n_blocks=n_blocks))
    out = fwd(params, x)
    jax.block_until_ready(out)
    assert out.shape == (batch, output_nc, spatial, spatial), out.shape
    assert bool(jnp.all(jnp.isfinite(out)))
    print("KERNEL_OK")
</pallas_src>

<mosaic_0001>
module attributes {stable_mosaic.version = 11 : i64} {
  func.func @_direct_conv_kernel(%arg0: i32, %arg1: i32, %arg2: memref<1x22x22x4xbf16, #tpu.memory_space<vmem>>, %arg3: memref<49x4x8xbf16, #tpu.memory_space<vmem>>, %arg4: memref<1x16x16x8xbf16, #tpu.memory_space<vmem>>, %arg5: memref<1x2x8xf32, #tpu.memory_space<vmem>>) attributes {dimension_semantics = [#tpu.dimension_semantics<parallel>, #tpu.dimension_semantics<parallel>], iteration_bounds = array<i64: 2, 1>, scalar_prefetch = 0 : i64, scratch_operands = 0 : i64, tpu.core_type = #tpu.core_type<tc>, window_params = [{transform_indices = @transform_0, window_bounds = array<i64: 1, 22, 22, 4>}, {pipeline_mode = #tpu.pipeline_mode<synchronous>, transform_indices = @transform_1, window_bounds = array<i64: 49, 4, 8>}, {transform_indices = @transform_2, window_bounds = array<i64: 1, 16, 16, 8>}, {transform_indices = @transform_3, window_bounds = array<i64: 1, 2, 8>}]} {
    %c16_i32 = arith.constant 16 : i32
    %0 = arith.muli %arg1, %c16_i32 : i32
    %cst = arith.constant 0.000000e+00 : f32
    %1 = vector.broadcast %cst : f32 to vector<1x8xf32>
    %cst_0 = arith.constant 0.000000e+00 : f32
    %2 = vector.broadcast %cst_0 : f32 to vector<1x8xf32>
    %c0_i32 = arith.constant 0 : i32
    %c16_i32_1 = arith.constant 16 : i32
    %3 = arith.addi %c0_i32, %c16_i32_1 : i32
    %c1_i32 = arith.constant 1 : i32
    %4:2 = scf.for %arg6 = %c0_i32 to %3 step %c1_i32 iter_args(%arg7 = %1, %arg8 = %2) -> (vector<1x8xf32>, vector<1x8xf32>)  : i32 {
      %cst_7 = arith.constant 0.000000e+00 : f32
      %11 = vector.broadcast %cst_7 : f32 to vector<16x8xf32>
      %12 = arith.addi %0, %arg6 : i32
      %c0_i32_8 = arith.constant 0 : i32
      %13 = arith.addi %12, %c0_i32_8 : i32
      %c0_9 = arith.constant 0 : index
      %14 = arith.index_cast %13 : i32 to index
      %c0_10 = arith.constant 0 : index
      %c0_11 = arith.constant 0 : index
      %15 = vector.load %arg2[%c0_9, %14, %c0_10, %c0_11] : memref<1x22x22x4xbf16, #tpu.memory_space<vmem>>, vector<1x1x16x4xbf16>
      %16 = vector.shape_cast %15 : vector<1x1x16x4xbf16> to vector<16x4xbf16>
      %c0_12 = arith.constant 0 : index
      %c0_13 = arith.constant 0 : index
      %c0_14 = arith.constant 0 : index
      %17 = vector.load %arg3[%c0_12, %c0_13, %c0_14] : memref<49x4x8xbf16, #tpu.memory_space<vmem>>, vector<1x4x8xbf16>
      %18 = vector.shape_cast %17 : vector<1x4x8xbf16> to vector<4x8xbf16>
      %cst_15 = arith.constant dense<0.000000e+00> : vector<16x8xf32>
      %19 = tpu.matmul %16, %18, %cst_15 {dimension_numbers = #tpu.dot_dimension_numbers<[1], [0], [0], [1], [0, 0, 1, 1], [], []>} : vector<16x4xbf16>, vector<4x8xbf16>, vector<16x8xf32> -> vector<16x8xf32>
      %20 = arith.addf %11, %19 : vector<16x8xf32>
      %21 = arith.addi %0, %arg6 : i32
      %c0_i32_16 = arith.constant 0 : i32
      %22 = arith.addi %21, %c0_i32_16 : i32
      %c0_17 = arith.constant 0 : index
      %23 = arith.index_cast %22 : i32 to index
      %c1_18 = arith.constant 1 : index
      %c0_19 = arith.constant 0 : index
      %24 = vector.load %arg2[%c0_17, %23, %c1_18, %c0_19] : memref<1x22x22x4xbf16, #tpu.memory_space<vmem>>, vector<1x1x16x4xbf16>
      %25 = vector.shape_cast %24 : vector<1x1x16x4xbf16> to vector<16x4xbf16>
      %c1_20 = arith.constant 1 : index
      %c0_21 = arith.constant 0 : index
      %c0_22 = arith.constant 0 : index
      %26 = vector.load %arg3[%c1_20, %c0_21, %c0_22] : memref<49x4x8xbf16, #tpu.memory_space<vmem>>, vector<1x4x8xbf16>
      %27 = vector.shape_cast %26 : vector<1x4x8xbf16> to vector<4x8xbf16>
      %cst_23 = arith.constant dense<0.000000e+00> : vector<16x8xf32>
      %28 = tpu.matmul %25, %27, %cst_23 {dimension_numbers = #tpu.dot_dimension_numbers<[1], [0], [0], [1], [0, 0, 1, 1], [], []>} : vector<16x4xbf16>, vector<4x8xbf16>, vector<16x8xf32> -> vector<16x8xf32>
      %29 = arith.addf %20, %28 : vector<16x8xf32>
      %30 = arith.addi %0, %arg6 : i32
      %c0_i32_24 = arith.constant 0 : i32
      %31 = arith.addi %30, %c0_i32_24 : i32
      %c0_25 = arith.constant 0 : index
      %32 = arith.index_cast %31 : i32 to index
      %c2 = arith.constant 2 : index
      %c0_26 = arith.constant 0 : index
      %33 = vector.load %arg2[%c0_25, %32, %c2, %c0_26] : memref<1x22x22x4xbf16, #tpu.memory_space<vmem>>, vector<1x1x16x4xbf16>
      %34 = vector.shape_cast %33 : vector<1x1x16x4xbf16> to vector<16x4xbf16>
      %c2_27 = arith.constant 2 : index
      %c0_28 = arith.constant 0 : index
      %c0_29 = arith.constant 0 : index
      %35 = vector.load %arg3[%c2_27, %c0_28, %c0_29] : memref<49x4x8xbf16, #tpu.memory_space<vmem>>, vector<1x4x8xbf16>
      %36 = vector.shape_cast %35 : vector<1x4x8xbf16> to vector<4x8xbf16>
      %cst_30 = arith.constant dense<0.000000e+00> : vector<16x8xf32>
      %37 = tpu.matmul %34, %36, %cst_30 {dimension_numbers = #tpu.dot_dimension_numbers<[1], [0], [0], [1], [0, 0, 1, 1], [], []>} : vector<16x4xbf16>, vector<4x8xbf16>, vector<16x8xf32> -> vector<16x8xf32>
      %38 = arith.addf %29, %37 : vector<16x8xf32>
      %39 = arith.addi %0, %arg6 : i32
      %c0_i32_31 = arith.constant 0 : i32
      %40 = arith.addi %39, %c0_i32_31 : i32
      %c0_32 = arith.constant 0 : index
      %41 = arith.index_cast %40 : i32 to index
      %c3 = arith.constant 3 : index
      %c0_33 = arith.constant 0 : index
      %42 = vector.load %arg2[%c0_32, %41, %c3, %c0_33] : memref<1x22x22x4xbf16, #tpu.memory_space<vmem>>, vector<1x1x16x4xbf16>
      %43 = vector.shape_cast %42 : vector<1x1x16x4xbf16> to vector<16x4xbf16>
      %c3_34 = arith.constant 3 : index
      %c0_35 = arith.constant 0 : index
      %c0_36 = arith.constant 0 : index
      %44 = vector.load %arg3[%c3_34, %c0_35, %c0_36] : memref<49x4x8xbf16, #tpu.memory_space<vmem>>, vector<1x4x8xbf16>
      %45 = vector.shape_cast %44 : vector<1x4x8xbf16> to vector<4x8xbf16>
      %cst_37 = arith.constant dense<0.000000e+00> : vector<16x8xf32>
      %46 = tpu.matmul %43, %45, %cst_37 {dimension_numbers = #tpu.dot_dimension_numbers<[1], [0], [0], [1], [0, 0, 1, 1], [], []>} : vector<16x4xbf16>, vector<4x8xbf16>, vector<16x8xf32> -> vector<16x8xf32>
      %47 = arith.addf %38, %46 : vector<16x8xf32>
      %48 = arith.addi %0, %arg6 : i32
      %c0_i32_38 = arith.constant 0 : i32
      %49 = arith.addi %48, %c0_i32_38 : i32
      %c0_39 = arith.constant 0 : index
      %50 = arith.index_cast %49 : i32 to index
      %c4 = arith.constant 4 : index
      %c0_40 = arith.constant 0 : index
      %51 = vector.load %arg2[%c0_39, %50, %c4, %c0_40] : memref<1x22x22x4xbf16, #tpu.memory_space<vmem>>, vector<1x1x16x4xbf16>
      %52 = vector.shape_cast %51 : vector<1x1x16x4xbf16> to vector<16x4xbf16>
      %c4_41 = arith.constant 4 : index
      %c0_42 = arith.constant 0 : index
      %c0_43 = arith.constant 0 : index
      %53 = vector.load %arg3[%c4_41, %c0_42, %c0_43] : memref<49x4x8xbf16, #tpu.memory_space<vmem>>, vector<1x4x8xbf16>
      %54 = vector.shape_cast %53 : vector<1x4x8xbf16> to vector<4x8xbf16>
      %cst_44 = arith.constant dense<0.000000e+00> : vector<16x8xf32>
      %55 = tpu.matmul %52, %54, %cst_44 {dimension_numbers = #tpu.dot_dimension_numbers<[1], [0], [0], [1], [0, 0, 1, 1], [], []>} : vector<16x4xbf16>, vector<4x8xbf16>, vector<16x8xf32> -> vector<16x8xf32>
      %56 = arith.addf %47, %55 : vector<16x8xf32>
      %57 = arith.addi %0, %arg6 : i32
      %c0_i32_45 = arith.constant 0 : i32
      %58 = arith.addi %57, %c0_i32_45 : i32
      %c0_46 = arith.constant 0 : index
      %59 = arith.index_cast %58 : i32 to index
      %c5 = arith.constant 5 : index
      %c0_47 = arith.constant 0 : index
      %60 = vector.load %arg2[%c0_46, %59, %c5, %c0_47] : memref<1x22x22x4xbf16, #tpu.memory_space<vmem>>, vector<1x1x16x4xbf16>
      %61 = vector.shape_cast %60 : vector<1x1x16x4xbf16> to vector<16x4xbf16>
      %c5_48 = arith.constant 5 : index
      %c0_49 = arith.constant 0 : index
      %c0_50 = arith.constant 0 : index
      %62 = vector.load %arg3[%c5_48, %c0_49, %c0_50] : memref<49x4x8xbf16, #tpu.memory_space<vmem>>, vector<1x4x8xbf16>
      %63 = vector.shape_cast %62 : vector<1x4x8xbf16> to vector<4x8xbf16>
      %cst_51 = arith.constant dense<0.000000e+00> : vector<16x8xf32>
      %64 = tpu.matmul %61, %63, %cst_51 {dimension_numbers = #tpu.dot_dimension_numbers<[1], [0], [0], [1], [0, 0, 1, 1], [], []>} : vector<16x4xbf16>, vector<4x8xbf16>, vector<16x8xf32> -> vector<16x8xf32>
      %65 = arith.addf %56, %64 : vector<16x8xf32>
      %66 = arith.addi %0, %arg6 : i32
      %c0_i32_52 = arith.constant 0 : i32
      %67 = arith.addi %66, %c0_i32_52 : i32
      %c0_53 = arith.constant 0 : index
      %68 = arith.index_cast %67 : i32 to index
      %c6 = arith.constant 6 : index
      %c0_54 = arith.constant 0 : index
      %69 = vector.load %arg2[%c0_53, %68, %c6, %c0_54] : memref<1x22x22x4xbf16, #tpu.memory_space<vmem>>, vector<1x1x16x4xbf16>
      %70 = vector.shape_cast %69 : vector<1x1x16x4xbf16> to vector<16x4xbf16>
      %c6_55 = arith.constant 6 : index
      %c0_56 = arith.constant 0 : index
      %c0_57 = arith.constant 0 : index
      %71 = vector.load %arg3[%c6_55, %c0_56, %c0_57] : memref<49x4x8xbf16, #tpu.memory_space<vmem>>, vector<1x4x8xbf16>
      %72 = vector.shape_cast %71 : vector<1x4x8xbf16> to vector<4x8xbf16>
      %cst_58 = arith.constant dense<0.000000e+00> : vector<16x8xf32>
      %73 = tpu.matmul %70, %72, %cst_58 {dimension_numbers = #tpu.dot_dimension_numbers<[1], [0], [0], [1], [0, 0, 1, 1], [], []>} : vector<16x4xbf16>, vector<4x8xbf16>, vector<16x8xf32> -> vector<16x8xf32>
      %74 = arith.addf %65, %73 : vector<16x8xf32>
      %75 = arith.addi %0, %arg6 : i32
      %c1_i32_59 = arith.constant 1 : i32
      %76 = arith.addi %75, %c1_i32_59 : i32
      %c0_60 = arith.constant 0 : index
      %77 = arith.index_cast %76 : i32 to index
      %c0_61 = arith.constant 0 : index
      %c0_62 = arith.constant 0 : index
      %78 = vector.load %arg2[%c0_60, %77, %c0_61, %c0_62] : memref<1x22x22x4xbf16, #tpu.memory_space<vmem>>, vector<1x1x16x4xbf16>
      %79 = vector.shape_cast %78 : vector<1x1x16x4xbf16> to vector<16x4xbf16>
      %c7 = arith.constant 7 : index
      %c0_63 = arith.constant 0 : index
      %c0_64 = arith.constant 0 : index
      %80 = vector.load %arg3[%c7, %c0_63, %c0_64] : memref<49x4x8xbf16, #tpu.memory_space<vmem>>, vector<1x4x8xbf16>
      %81 = vector.shape_cast %80 : vector<1x4x8xbf16> to vector<4x8xbf16>
      %cst_65 = arith.constant dense<0.000000e+00> : vector<16x8xf32>
      %82 = tpu.matmul %79, %81, %cst_65 {dimension_numbers = #tpu.dot_dimension_numbers<[1], [0], [0], [1], [0, 0, 1, 1], [], []>} : vector<16x4xbf16>, vector<4x8xbf16>, vector<16x8xf32> -> vector<16x8xf32>
      %83 = arith.addf %74, %82 : vector<16x8xf32>
      %84 = arith.addi %0, %arg6 : i32
      %c1_i32_66 = arith.constant 1 : i32
      %85 = arith.addi %84, %c1_i32_66 : i32
      %c0_67 = arith.constant 0 : index
      %86 = arith.index_cast %85 : i32 to index
      %c1_68 = arith.constant 1 : index
      %c0_69 = arith.constant 0 : index
      %87 = vector.load %arg2[%c0_67, %86, %c1_68, %c0_69] : memref<1x22x22x4xbf16, #tpu.memory_space<vmem>>, vector<1x1x16x4xbf16>
      %88 = vector.shape_cast %87 : vector<1x1x16x4xbf16> to vector<16x4xbf16>
      %c8 = arith.constant 8 : index
      %c0_70 = arith.constant 0 : index
      %c0_71 = arith.constant 0 : index
      %89 = vector.load %arg3[%c8, %c0_70, %c0_71] : memref<49x4x8xbf16, #tpu.memory_space<vmem>>, vector<1x4x8xbf16>
      %90 = vector.shape_cast %89 : vector<1x4x8xbf16> to vector<4x8xbf16>
      %cst_72 = arith.constant dense<0.000000e+00> : vector<16x8xf32>
      %91 = tpu.matmul %88, %90, %cst_72 {dimension_numbers = #tpu.dot_dimension_numbers<[1], [0], [0], [1], [0, 0, 1, 1], [], []>} : vector<16x4xbf16>, vector<4x8xbf16>, vector<16x8xf32> -> vector<16x8xf32>
      %92 = arith.addf %83, %91 : vector<16x8xf32>
      %93 = arith.addi %0, %arg6 : i32
      %c1_i32_73 = arith.constant 1 : i32
      %94 = arith.addi %93, %c1_i32_73 : i32
      %c0_74 = arith.constant 0 : index
      %95 = arith.index_cast %94 : i32 to index
      %c2_75 = arith.constant 2 : index
      %c0_76 = arith.constant 0 : index
      %96 = vector.load %arg2[%c0_74, %95, %c2_75, %c0_76] : memref<1x22x22x4xbf16, #tpu.memory_space<vmem>>, vector<1x1x16x4xbf16>
      %97 = vector.shape_cast %96 : vector<1x1x16x4xbf16> to vector<16x4xbf16>
      %c9 = arith.constant 9 : index
      %c0_77 = arith.constant 0 : index
      %c0_78 = arith.constant 0 : index
      %98 = vector.load %arg3[%c9, %c0_77, %c0_78] : memref<49x4x8xbf16, #tpu.memory_space<vmem>>, vector<1x4x8xbf16>
      %99 = vector.shape_cast %98 : vector<1x4x8xbf16> to vector<4x8xbf16>
      %cst_79 = arith.constant dense<0.000000e+00> : vector<16x8xf32>
      %100 = tpu.matmul %97, %99, %cst_79 {dimension_numbers = #tpu.dot_dimension_numbers<[1], [0], [0], [1], [0, 0, 1, 1], [], []>} : vector<16x4xbf16>, vector<4x8xbf16>, vector<16x8xf32> -> vector<16x8xf32>
      %101 = arith.addf %92, %100 : vector<16x8xf32>
      %102 = arith.addi %0, %arg6 : i32
      %c1_i32_80 = arith.constant 1 : i32
      %103 = arith.addi %102, %c1_i32_80 : i32
      %c0_81 = arith.constant 0 : index
      %104 = arith.index_cast %103 : i32 to index
      %c3_82 = arith.constant 3 : index
      %c0_83 = arith.constant 0 : index
      %105 = vector.load %arg2[%c0_81, %104, %c3_82, %c0_83] : memref<1x22x22x4xbf16, #tpu.memory_space<vmem>>, vector<1x1x16x4xbf16>
      %106 = vector.shape_cast %105 : vector<1x1x16x4xbf16> to vector<16x4xbf16>
      %c10 = arith.constant 10 : index
      %c0_84 = arith.constant 0 : index
      %c0_85 = arith.constant 0 : index
      %107 = vector.load %arg3[%c10, %c0_84, %c0_85] : memref<49x4x8xbf16, #tpu.memory_space<vmem>>, vector<1x4x8xbf16>
      %108 = vector.shape_cast %107 : vector<1x4x8xbf16> to vector<4x8xbf16>
      %cst_86 = arith.constant dense<0.000000e+00> : vector<16x8xf32>
      %109 = tpu.matmul %106, %108, %cst_86 {dimension_numbers = #tpu.dot_dimension_numbers<[1], [0], [0], [1], [0, 0, 1, 1], [], []>} : vector<16x4xbf16>, vector<4x8xbf16>, vector<16x8xf32> -> vector<16x8xf32>
      %110 = arith.addf %101, %109 : vector<16x8xf32>
      %111 = arith.addi %0, %arg6 : i32
      %c1_i32_87 = arith.constant 1 : i32
      %112 = arith.addi %111, %c1_i32_87 : i32
      %c0_88 = arith.constant 0 : index
      %113 = arith.index_cast %112 : i32 to index
      %c4_89 = arith.constant 4 : index
      %c0_90 = arith.constant 0 : index
      %114 = vector.load %arg2[%c0_88, %113, %c4_89, %c0_90] : memref<1x22x22x4xbf16, #tpu.memory_space<vmem>>, vector<1x1x16x4xbf16>
      %115 = vector.shape_cast %114 : vector<1x1x16x4xbf16> to vector<16x4xbf16>
      %c11 = arith.constant 11 : index
      %c0_91 = arith.constant 0 : index
      %c0_92 = arith.constant 0 : index
      %116 = vector.load %arg3[%c11, %c0_91, %c0_92] : memref<49x4x8xbf16, #tpu.memory_space<vmem>>, vector<1x4x8xbf16>
      %117 = vector.shape_cast %116 : vector<1x4x8xbf16> to vector<4x8xbf16>
      %cst_93 = arith.constant dense<0.000000e+00> : vector<16x8xf32>
      %118 = tpu.matmul %115, %117, %cst_93 {dimension_numbers = #tpu.dot_dimension_numbers<[1], [0], [0], [1], [0, 0, 1, 1], [], []>} : vector<16x4xbf16>, vector<4x8xbf16>, vector<16x8xf32> -> vector<16x8xf32>
      %119 = arith.addf %110, %118 : vector<16x8xf32>
      %120 = arith.addi %0, %arg6 : i32
      %c1_i32_94 = arith.constant 1 : i32
      %121 = arith.addi %120, %c1_i32_94 : i32
      %c0_95 = arith.constant 0 : index
      %122 = arith.index_cast %121 : i32 to index
      %c5_96 = arith.constant 5 : index
      %c0_97 = arith.constant 0 : index
      %123 = vector.load %arg2[%c0_95, %122, %c5_96, %c0_97] : memref<1x22x22x4xbf16, #tpu.memory_space<vmem>>, vector<1x1x16x4xbf16>
      %124 = vector.shape_cast %123 : vector<1x1x16x4xbf16> to vector<16x4xbf16>
      %c12 = arith.constant 12 : index
      %c0_98 = arith.constant 0 : index
      %c0_99 = arith.constant 0 : index
      %125 = vector.load %arg3[%c12, %c0_98, %c0_99] : memref<49x4x8xbf16, #tpu.memory_space<vmem>>, vector<1x4x8xbf16>
      %126 = vector.shape_cast %125 : vector<1x4x8xbf16> to vector<4x8xbf16>
      %cst_100 = arith.constant dense<0.000000e+00> : vector<16x8xf32>
      %127 = tpu.matmul %124, %126, %cst_100 {dimension_numbers = #tpu.dot_dimension_numbers<[1], [0], [0], [1], [0, 0, 1, 1], [], []>} : vector<16x4xbf16>, vector<4x8xbf16>, vector<16x8xf32> -> vector<16x8xf32>
      %128 = arith.addf %119, %127 : vector<16x8xf32>
      %129 = arith.addi %0, %arg6 : i32
      %c1_i32_101 = arith.constant 1 : i32
      %130 = arith.addi %129, %c1_i32_101 : i32
      %c0_102 = arith.constant 0 : index
      %131 = arith.index_cast %130 : i32 to index
      %c6_103 = arith.constant 6 : index
      %c0_104 = arith.constant 0 : index
      %132 = vector.load %arg2[%c0_102, %131, %c6_103, %c0_104] : memref<1x22x22x4xbf16, #tpu.memory_space<vmem>>, vector<1x1x16x4xbf16>
      %133 = vector.shape_cast %132 : vector<1x1x16x4xbf16> to vector<16x4xbf16>
      %c13 = arith.constant 13 : index
      %c0_105 = arith.constant 0 : index
      %c0_106 = arith.constant 0 : index
      %134 = vector.load %arg3[%c13, %c0_105, %c0_106] : memref<49x4x8xbf16, #tpu.memory_space<vmem>>, vector<1x4x8xbf16>
      %135 = vector.shape_cast %134 : vector<1x4x8xbf16> to vector<4x8xbf16>
      %cst_107 = arith.constant dense<0.000000e+00> : vector<16x8xf32>
      %136 = tpu.matmul %133, %135, %cst_107 {dimension_numbers = #tpu.dot_dimension_numbers<[1], [0], [0], [1], [0, 0, 1, 1], [], []>} : vector<16x4xbf16>, vector<4x8xbf16>, vector<16x8xf32> -> vector<16x8xf32>
      %137 = arith.addf %128, %136 : vector<16x8xf32>
      %138 = arith.addi %0, %arg6 : i32
      %c2_i32 = arith.constant 2 : i32
      %139 = arith.addi %138, %c2_i32 : i32
      %c0_108 = arith.constant 0 : index
      %140 = arith.index_cast %139 : i32 to index
      %c0_109 = arith.constant 0 : index
      %c0_110 = arith.constant 0 : index
      %141 = vector.load %arg2[%c0_108, %140, %c0_109, %c0_110] : memref<1x22x22x4xbf16, #tpu.memory_space<vmem>>, vector<1x1x16x4xbf16>
      %142 = vector.shape_cast %141 : vector<1x1x16x4xbf16> to vector<16x4xbf16>
      %c14 = arith.constant 14 : index
      %c0_111 = arith.constant 0 : index
      %c0_112 = arith.constant 0 : index
      %143 = vector.load %arg3[%c14, %c0_111, %c0_112] : memref<49x4x8xbf16, #tpu.memory_space<vmem>>, vector<1x4x8xbf16>
      %144 = vector.shape_cast %143 : vector<1x4x8xbf16> to vector<4x8xbf16>
      %cst_113 = arith.constant dense<0.000000e+00> : vector<16x8xf32>
      %145 = tpu.matmul %142, %144, %cst_113 {dimension_numbers = #tpu.dot_dimension_numbers<[1], [0], [0], [1], [0, 0, 1, 1], [], []>} : vector<16x4xbf16>, vector<4x8xbf16>, vector<16x8xf32> -> vector<16x8xf32>
      %146 = arith.addf %137, %145 : vector<16x8xf32>
      %147 = arith.addi %0, %arg6 : i32
      %c2_i32_114 = arith.constant 2 : i32
      %148 = arith.addi %147, %c2_i32_114 : i32
      %c0_115 = arith.constant 0 : index
      %149 = arith.index_cast %148 : i32 to index
      %c1_116 = arith.constant 1 : index
      %c0_117 = arith.constant 0 : index
      %150 = vector.load %arg2[%c0_115, %149, %c1_116, %c0_117] : memref<1x22x22x4xbf16, #tpu.memory_space<vmem>>, vector<1x1x16x4xbf16>
      %151 = vector.shape_cast %150 : vector<1x1x16x4xbf16> to vector<16x4xbf16>
      %c15 = arith.constant 15 : index
      %c0_118 = arith.constant 0 : index
      %c0_119 = arith.constant 0 : index
      %152 = vector.load %arg3[%c15, %c0_118, %c0_119] : memref<49x4x8xbf16, #tpu.memory_space<vmem>>, vector<1x4x8xbf16>
      %153 = vector.shape_cast %152 : vector<1x4x8xbf16> to vector<4x8xbf16>
      %cst_120 = arith.constant dense<0.000000e+00> : vector<16x8xf32>
      %154 = tpu.matmul %151, %153, %cst_120 {dimension_numbers = #tpu.dot_dimension_numbers<[1], [0], [0], [1], [0, 0, 1, 1], [], []>} : vector<16x4xbf16>, vector<4x8xbf16>, vector<16x8xf32> -> vector<16x8xf32>
      %155 = arith.addf %146, %154 : vector<16x8xf32>
      %156 = arith.addi %0, %arg6 : i32
      %c2_i32_121 = arith.constant 2 : i32
      %157 = arith.addi %156, %c2_i32_121 : i32
      %c0_122 = arith.constant 0 : index
      %158 = arith.index_cast %157 : i32 to index
      %c2_123 = arith.constant 2 : index
      %c0_124 = arith.constant 0 : index
      %159 = vector.load %arg2[%c0_122, %158, %c2_123, %c0_124] : memref<1x22x22x4xbf16, #tpu.memory_space<vmem>>, vector<1x1x16x4xbf16>
      %160 = vector.shape_cast %159 : vector<1x1x16x4xbf16> to vector<16x4xbf16>
      %c16 = arith.constant 16 : index
      %c0_125 = arith.constant 0 : index
      %c0_126 = arith.constant 0 : index
      %161 = vector.load %arg3[%c16, %c0_125, %c0_126] : memref<49x4x8xbf16, #tpu.memory_space<vmem>>, vector<1x4x8xbf16>
      %162 = vector.shape_cast %161 : vector<1x4x8xbf16> to vector<4x8xbf16>
      %cst_127 = arith.constant dense<0.000000e+00> : vector<16x8xf32>
      %163 = tpu.matmul %160, %162, %cst_127 {dimension_numbers = #tpu.dot_dimension_numbers<[1], [0], [0], [1], [0, 0, 1, 1], [], []>} : vector<16x4xbf16>, vector<4x8xbf16>, vector<16x8xf32> -> vector<16x8xf32>
      %164 = arith.addf %155, %163 : vector<16x8xf32>
      %165 = arith.addi %0, %arg6 : i32
      %c2_i32_128 = arith.constant 2 : i32
      %166 = arith.addi %165, %c2_i32_128 : i32
      %c0_129 = arith.constant 0 : index
      %167 = arith.index_cast %166 : i32 to index
      %c3_130 = arith.constant 3 : index
      %c0_131 = arith.constant 0 : index
      %168 = vector.load %arg2[%c0_129, %167, %c3_130, %c0_131] : memref<1x22x22x4xbf16, #tpu.memory_space<vmem>>, vector<1x1x16x4xbf16>
      %169 = vector.shape_cast %168 : vector<1x1x16x4xbf16> to vector<16x4xbf16>
      %c17 = arith.constant 17 : index
      %c0_132 = arith.constant 0 : index
      %c0_133 = arith.constant 0 : index
      %170 = vector.load %arg3[%c17, %c0_132, %c0_133] : memref<49x4x8xbf16, #tpu.memory_space<vmem>>, vector<1x4x8xbf16>
      %171 = vector.shape_cast %170 : vector<1x4x8xbf16> to vector<4x8xbf16>
      %cst_134 = arith.constant dense<0.000000e+00> : vector<16x8xf32>
      %172 = tpu.matmul %169, %171, %cst_134 {dimension_numbers = #tpu.dot_dimension_numbers<[1], [0], [0], [1], [0, 0, 1, 1], [], []>} : vector<16x4xbf16>, vector<4x8xbf16>, vector<16x8xf32> -> vector<16x8xf32>
      %173 = arith.addf %164, %172 : vector<16x8xf32>
      %174 = arith.addi %0, %arg6 : i32
      %c2_i32_135 = arith.constant 2 : i32
      %175 = arith.addi %174, %c2_i32_135 : i32
      %c0_136 = arith.constant 0 : index
      %176 = arith.index_cast %175 : i32 to index
      %c4_137 = arith.constant 4 : index
      %c0_138 = arith.constant 0 : index
      %177 = vector.load %arg2[%c0_136, %176, %c4_137, %c0_138] : memref<1x22x22x4xbf16, #tpu.memory_space<vmem>>, vector<1x1x16x4xbf16>
      %178 = vector.shape_cast %177 : vector<1x1x16x4xbf16> to vector<16x4xbf16>
      %c18 = arith.constant 18 : index
      %c0_139 = arith.constant 0 : index
      %c0_140 = arith.constant 0 : index
      %179 = vector.load %arg3[%c18, %c0_139, %c0_140] : memref<49x4x8xbf16, #tpu.memory_space<vmem>>, vector<1x4x8xbf16>
      %180 = vector.shape_cast %179 : vector<1x4x8xbf16> to vector<4x8xbf16>
      %cst_141 = arith.constant dense<0.000000e+00> : vector<16x8xf32>
      %181 = tpu.matmul %178, %180, %cst_141 {dimension_numbers = #tpu.dot_dimension_numbers<[1], [0], [0], [1], [0, 0, 1, 1], [], []>} : vector<16x4xbf16>, vector<4x8xbf16>, vector<16x8xf32> -> vector<16x8xf32>
      %182 = arith.addf %173, %181 : vector<16x8xf32>
      %183 = arith.addi %0, %arg6 : i32
      %c2_i32_142 = arith.constant 2 : i32
      %184 = arith.addi %183, %c2_i32_142 : i32
      %c0_143 = arith.constant 0 : index
      %185 = arith.index_cast %184 : i32 to index
      %c5_144 = arith.constant 5 : index
      %c0_145 = arith.constant 0 : index
      %186 = vector.load %arg2[%c0_143, %185, %c5_144, %c0_145] : memref<1x22x22x4xbf16, #tpu.memory_space<vmem>>, vector<1x1x16x4xbf16>
      %187 = vector.shape_cast %186 : vector<1x1x16x4xbf16> to vector<16x4xbf16>
      %c19 = arith.constant 19 : index
      %c0_146 = arith.constant 0 : index
      %c0_147 = arith.constant 0 : index
      %188 = vector.load %arg3[%c19, %c0_146, %c0_147] : memref<49x4x8xbf16, #tpu.memory_space<vmem>>, vector<1x4x8xbf16>
      %189 = vector.shape_cast %188 : vector<1x4x8xbf16> to vector<4x8xbf16>
      %cst_148 = arith.constant dense<0.000000e+00> : vector<16x8xf32>
      %190 = tpu.matmul %187, %189, %cst_148 {dimension_numbers = #tpu.dot_dimension_numbers<[1], [0], [0], [1], [0, 0, 1, 1], [], []>} : vector<16x4xbf16>, vector<4x8xbf16>, vector<16x8xf32> -> vector<16x8xf32>
      %191 = arith.addf %182, %190 : vector<16x8xf32>
      %192 = arith.addi %0, %arg6 : i32
      %c2_i32_149 = arith.constant 2 : i32
      %193 = arith.addi %192, %c2_i32_149 : i32
      %c0_150 = arith.constant 0 : index
      %194 = arith.index_cast %193 : i32 to index
      %c6_151 = arith.constant 6 : index
      %c0_152 = arith.constant 0 : index
      %195 = vector.load %arg2[%c0_150, %194, %c6_151, %c0_152] : memref<1x22x22x4xbf16, #tpu.memory_space<vmem>>, vector<1x1x16x4xbf16>
      %196 = vector.shape_cast %195 : vector<1x1x16x4xbf16> to vector<16x4xbf16>
      %c20 = arith.constant 20 : index
      %c0_153 = arith.constant 0 : index
      %c0_154 = arith.constant 0 : index
      %197 = vector.load %arg3[%c20, %c0_153, %c0_154] : memref<49x4x8xbf16, #tpu.memory_space<vmem>>, vector<1x4x8xbf16>
      %198 = vector.shape_cast %197 : vector<1x4x8xbf16> to vector<4x8xbf16>
      %cst_155 = arith.constant dense<0.000000e+00> : vector<16x8xf32>
      %199 = tpu.matmul %196, %198, %cst_155 {dimension_numbers = #tpu.dot_dimension_numbers<[1], [0], [0], [1], [0, 0, 1, 1], [], []>} : vector<16x4xbf16>, vector<4x8xbf16>, vector<16x8xf32> -> vector<16x8xf32>
      %200 = arith.addf %191, %199 : vector<16x8xf32>
      %201 = arith.addi %0, %arg6 : i32
      %c3_i32 = arith.constant 3 : i32
      %202 = arith.addi %201, %c3_i32 : i32
      %c0_156 = arith.constant 0 : index
      %203 = arith.index_cast %202 : i32 to index
      %c0_157 = arith.constant 0 : index
      %c0_158 = arith.constant 0 : index
      %204 = vector.load %arg2[%c0_156, %203, %c0_157, %c0_158] : memref<1x22x22x4xbf16, #tpu.memory_space<vmem>>, vector<1x1x16x4xbf16>
      %205 = vector.shape_cast %204 : vector<1x1x16x4xbf16> to vector<16x4xbf16>
      %c21 = arith.constant 21 : index
      %c0_159 = arith.constant 0 : index
      %c0_160 = arith.constant 0 : index
      %206 = vector.load %arg3[%c21, %c0_159, %c0_160] : memref<49x4x8xbf16, #tpu.memory_space<vmem>>, vector<1x4x8xbf16>
      %207 = vector.shape_cast %206 : vector<1x4x8xbf16> to vector<4x8xbf16>
      %cst_161 = arith.constant dense<0.000000e+00> : vector<16x8xf32>
      %208 = tpu.matmul %205, %207, %cst_161 {dimension_numbers = #tpu.dot_dimension_numbers<[1], [0], [0], [1], [0, 0, 1, 1], [], []>} : vector<16x4xbf16>, vector<4x8xbf16>, vector<16x8xf32> -> vector<16x8xf32>
      %209 = arith.addf %200, %208 : vector<16x8xf32>
      %210 = arith.addi %0, %arg6 : i32
      %c3_i32_162 = arith.constant 3 : i32
      %211 = arith.addi %210, %c3_i32_162 : i32
      %c0_163 = arith.constant 0 : index
      %212 = arith.index_cast %211 : i32 to index
      %c1_164 = arith.constant 1 : index
      %c0_165 = arith.constant 0 : index
      %213 = vector.load %arg2[%c0_163, %212, %c1_164, %c0_165] : memref<1x22x22x4xbf16, #tpu.memory_space<vmem>>, vector<1x1x16x4xbf16>
      %214 = vector.shape_cast %213 : vector<1x1x16x4xbf16> to vector<16x4xbf16>
      %c22 = arith.constant 22 : index
      %c0_166 = arith.constant 0 : index
      %c0_167 = arith.constant 0 : index
      %215 = vector.load %arg3[%c22, %c0_166, %c0_167] : memref<49x4x8xbf16, #tpu.memory_space<vmem>>, vector<1x4x8xbf16>
      %216 = vector.shape_cast %215 : vector<1x4x8xbf16> to vector<4x8xbf16>
      %cst_168 = arith.constant dense<0.000000e+00> : vector<16x8xf32>
      %217 = tpu.matmul %214, %216, %cst_168 {dimension_numbers = #tpu.dot_dimension_numbers<[1], [0], [0], [1], [0, 0, 1, 1], [], []>} : vector<16x4xbf16>, vector<4x8xbf16>, vector<16x8xf32> -> vector<16x8xf32>
      %218 = arith.addf %209, %217 : vector<16x8xf32>
      %219 = arith.addi %0, %arg6 : i32
      %c3_i32_169 = arith.constant 3 : i32
      %220 = arith.addi %219, %c3_i32_169 : i32
      %c0_170 = arith.constant 0 : index
      %221 = arith.index_cast %220 : i32 to index
      %c2_171 = arith.constant 2 : index
      %c0_172 = arith.constant 0 : index
      %222 = vector.load %arg2[%c0_170, %221, %c2_171, %c0_172] : memref<1x22x22x4xbf16, #tpu.memory_space<vmem>>, vector<1x1x16x4xbf16>
      %223 = vector.shape_cast %222 : vector<1x1x16x4xbf16> to vector<16x4xbf16>
      %c23 = arith.constant 23 : index
      %c0_173 = arith.constant 0 : index
      %c0_174 = arith.constant 0 : index
      %224 = vector.load %arg3[%c23, %c0_173, %c0_174] : memref<49x4x8xbf16, #tpu.memory_space<vmem>>, vector<1x4x8xbf16>
      %225 = vector.shape_cast %224 : vector<1x4x8xbf16> to vector<4x8xbf16>
      %cst_175 = arith.constant dense<0.000000e+00> : vector<16x8xf32>
      %226 = tpu.matmul %223, %225, %cst_175 {dimension_numbers = #tpu.dot_dimension_numbers<[1], [0], [0], [1], [0, 0, 1, 1], [], []>} : vector<16x4xbf16>, vector<4x8xbf16>, vector<16x8xf32> -> vector<16x8xf32>
      %227 = arith.addf %218, %226 : vector<16x8xf32>
      %228 = arith.addi %0, %arg6 : i32
      %c3_i32_176 = arith.constant 3 : i32
      %229 = arith.addi %228, %c3_i32_176 : i32
      %c0_177 = arith.constant 0 : index
      %230 = arith.index_cast %229 : i32 to index
      %c3_178 = arith.constant 3 : index
      %c0_179 = arith.constant 0 : index
      %231 = vector.load %arg2[%c0_177, %230, %c3_178, %c0_179] : memref<1x22x22x4xbf16, #tpu.memory_space<vmem>>, vector<1x1x16x4xbf16>
      %232 = vector.shape_cast %231 : vector<1x1x16x4xbf16> to vector<16x4xbf16>
      %c24 = arith.constant 24 : index
      %c0_180 = arith.constant 0 : index
      %c0_181 = arith.constant 0 : index
      %233 = vector.load %arg3[%c24, %c0_180, %c0_181] : memref<49x4x8xbf16, #tpu.memory_space<vmem>>, vector<1x4x8xbf16>
      %234 = vector.shape_cast %233 : vector<1x4x8xbf16> to vector<4x8xbf16>
      %cst_182 = arith.constant dense<0.000000e+00> : vector<16x8xf32>
      %235 = tpu.matmul %232, %234, %cst_182 {dimension_numbers = #tpu.dot_dimension_numbers<[1], [0], [0], [1], [0, 0, 1, 1], [], []>} : vector<16x4xbf16>, vector<4x8xbf16>, vector<16x8xf32> -> vector<16x8xf32>
      %236 = arith.addf %227, %235 : vector<16x8xf32>
      %237 = arith.addi %0, %arg6 : i32
      %c3_i32_183 = arith.constant 3 : i32
      %238 = arith.addi %237, %c3_i32_183 : i32
      %c0_184 = arith.constant 0 : index
      %239 = arith.index_cast %238 : i32 to index
      %c4_185 = arith.constant 4 : index
      %c0_186 = arith.constant 0 : index
      %240 = vector.load %arg2[%c0_184, %239, %c4_185, %c0_186] : memref<1x22x22x4xbf16, #tpu.memory_space<vmem>>, vector<1x1x16x4xbf16>
      %241 = vector.shape_cast %240 : vector<1x1x16x4xbf16> to vector<16x4xbf16>
      %c25 = arith.constant 25 : index
      %c0_187 = arith.constant 0 : index
      %c0_188 = arith.constant 0 : index
      %242 = vector.load %arg3[%c25, %c0_187, %c0_188] : memref<49x4x8xbf16, #tpu.memory_space<vmem>>, vector<1x4x8xbf16>
      %243 = vector.shape_cast %242 : vector<1x4x8xbf16> to vector<4x8xbf16>
      %cst_189 = arith.constant dense<0.000000e+00> : vector<16x8xf32>
      %244 = tpu.matmul %241, %243, %cst_189 {dimension_numbers = #tpu.dot_dimension_numbers<[1], [0], [0], [1], [0, 0, 1, 1], [], []>} : vector<16x4xbf16>, vector<4x8xbf16>, vector<16x8xf32> -> vector<16x8xf32>
      %245 = arith.addf %236, %244 : vector<16x8xf32>
      %246 = arith.addi %0, %arg6 : i32
      %c3_i32_190 = arith.constant 3 : i32
      %247 = arith.addi %246, %c3_i32_190 : i32
      %c0_191 = arith.constant 0 : index
      %248 = arith.index_cast %247 : i32 to index
      %c5_192 = arith.constant 5 : index
      %c0_193 = arith.constant 0 : index
      %249 = vector.load %arg2[%c0_191, %248, %c5_192, %c0_193] : memref<1x22x22x4xbf16, #tpu.memory_space<vmem>>, vector<1x1x16x4xbf16>
      %250 = vector.shape_cast %249 : vector<1x1x16x4xbf16> to vector<16x4xbf16>
      %c26 = arith.constant 26 : index
      %c0_194 = arith.constant 0 : index
      %c0_195 = arith.constant 0 : index
      %251 = vector.load %arg3[%c26, %c0_194, %c0_195] : memref<49x4x8xbf16, #tpu.memory_space<vmem>>, vector<1x4x8xbf16>
      %252 = vector.shape_cast %251 : vector<1x4x8xbf16> to vector<4x8xbf16>
      %cst_196 = arith.constant dense<0.000000e+00> : vector<16x8xf32>
      %253 = tpu.matmul %250, %252, %cst_196 {dimension_numbers = #tpu.dot_dimension_numbers<[1], [0], [0], [1], [0, 0, 1, 1], [], []>} : vector<16x4xbf16>, vector<4x8xbf16>, vector<16x8xf32> -> vector<16x8xf32>
      %254 = arith.addf %245, %253 : vector<16x8xf32>
      %255 = arith.addi %0, %arg6 : i32
      %c3_i32_197 = arith.constant 3 : i32
      %256 = arith.addi %255, %c3_i32_197 : i32
      %c0_198 = arith.constant 0 : index
      %257 = arith.index_cast %256 : i32 to index
      %c6_199 = arith.constant 6 : index
      %c0_200 = arith.constant 0 : index
      %258 = vector.load %arg2[%c0_198, %257, %c6_199, %c0_200] : memref<1x22x22x4xbf16, #tpu.memory_space<vmem>>, vector<1x1x16x4xbf16>
      %259 = vector.shape_cast %258 : vector<1x1x16x4xbf16> to vector<16x4xbf16>
      %c27 = arith.constant 27 : index
      %c0_201 = arith.constant 0 : index
      %c0_202 = arith.constant 0 : index
      %260 = vector.load %arg3[%c27, %c0_201, %c0_202] : memref<49x4x8xbf16, #tpu.memory_space<vmem>>, vector<1x4x8xbf16>
      %261 = vector.shape_cast %260 : vector<1x4x8xbf16> to vector<4x8xbf16>
      %cst_203 = arith.constant dense<0.000000e+00> : vector<16x8xf32>
      %262 = tpu.matmul %259, %261, %cst_203 {dimension_numbers = #tpu.dot_dimension_numbers<[1], [0], [0], [1], [0, 0, 1, 1], [], []>} : vector<16x4xbf16>, vector<4x8xbf16>, vector<16x8xf32> -> vector<16x8xf32>
      %263 = arith.addf %254, %262 : vector<16x8xf32>
      %264 = arith.addi %0, %arg6 : i32
      %c4_i32 = arith.constant 4 : i32
      %265 = arith.addi %264, %c4_i32 : i32
      %c0_204 = arith.constant 0 : index
      %266 = arith.index_cast %265 : i32 to index
      %c0_205 = arith.constant 0 : index
      %c0_206 = arith.constant 0 : index
      %267 = vector.load %arg2[%c0_204, %266, %c0_205, %c0_206] : memref<1x22x22x4xbf16, #tpu.memory_space<vmem>>, vector<1x1x16x4xbf16>
      %268 = vector.shape_cast %267 : vector<1x1x16x4xbf16> to vector<16x4xbf16>
      %c28 = arith.constant 28 : index
      %c0_207 = arith.constant 0 : index
      %c0_208 = arith.constant 0 : index
      %269 = vector.load %arg3[%c28, %c0_207, %c0_208] : memref<49x4x8xbf16, #tpu.memory_space<vmem>>, vector<1x4x8xbf16>
      %270 = vector.shape_cast %269 : vector<1x4x8xbf16> to vector<4x8xbf16>
      %cst_209 = arith.constant dense<0.000000e+00> : vector<16x8xf32>
      %271 = tpu.matmul %268, %270, %cst_209 {dimension_numbers = #tpu.dot_dimension_numbers<[1], [0], [0], [1], [0, 0, 1, 1], [], []>} : vector<16x4xbf16>, vector<4x8xbf16>, vector<16x8xf32> -> vector<16x8xf32>
      %272 = arith.addf %263, %271 : vector<16x8xf32>
      %273 = arith.addi %0, %arg6 : i32
      %c4_i32_210 = arith.constant 4 : i32
      %274 = arith.addi %273, %c4_i32_210 : i32
      %c0_211 = arith.constant 0 : index
      %275 = arith.index_cast %274 : i32 to index
      %c1_212 = arith.constant 1 : index
      %c0_213 = arith.constant 0 : index
      %276 = vector.load %arg2[%c0_211, %275, %c1_212, %c0_213] : memref<1x22x22x4xbf16, #tpu.memory_space<vmem>>, vector<1x1x16x4xbf16>
      %277 = vector.shape_cast %276 : vector<1x1x16x4xbf16> to vector<16x4xbf16>
      %c29 = arith.constant 29 : index
      %c0_214 = arith.constant 0 : index
      %c0_215 = arith.constant 0 : index
      %278 = vector.load %arg3[%c29, %c0_214, %c0_215] : memref<49x4x8xbf16, #tpu.memory_space<vmem>>, vector<1x4x8xbf16>
      %279 = vector.shape_cast %278 : vector<1x4x8xbf16> to vector<4x8xbf16>
      %cst_216 = arith.constant dense<0.000000e+00> : vector<16x8xf32>
      %280 = tpu.matmul %277, %279, %cst_216 {dimension_numbers = #tpu.dot_dimension_numbers<[1], [0], [0], [1], [0, 0, 1, 1], [], []>} : vector<16x4xbf16>, vector<4x8xbf16>, vector<16x8xf32> -> vector<16x8xf32>
      %281 = arith.addf %272, %280 : vector<16x8xf32>
      %282 = arith.addi %0, %arg6 : i32
      %c4_i32_217 = arith.constant 4 : i32
      %283 = arith.addi %282, %c4_i32_217 : i32
      %c0_218 = arith.constant 0 : index
      %284 = arith.index_cast %283 : i32 to index
      %c2_219 = arith.constant 2 : index
      %c0_220 = arith.constant 0 : index
      %285 = vector.load %arg2[%c0_218, %284, %c2_219, %c0_220] : memref<1x22x22x4xbf16, #tpu.memory_space<vmem>>, vector<1x1x16x4xbf16>
      %286 = vector.shape_cast %285 : vector<1x1x16x4xbf16> to vector<16x4xbf16>
      %c30 = arith.constant 30 : index
      %c0_221 = arith.constant 0 : index
      %c0_222 = arith.constant 0 : index
      %287 = vector.load %arg3[%c30, %c0_221, %c0_222] : memref<49x4x8xbf16, #tpu.memory_space<vmem>>, vector<1x4x8xbf16>
      %288 = vector.shape_cast %287 : vector<1x4x8xbf16> to vector<4x8xbf16>
      %cst_223 = arith.constant dense<0.000000e+00> : vector<16x8xf32>
      %289 = tpu.matmul %286, %288, %cst_223 {dimension_numbers = #tpu.dot_dimension_numbers<[1], [0], [0], [1], [0, 0, 1, 1], [], []>} : vector<16x4xbf16>, vector<4x8xbf16>, vector<16x8xf32> -> vector<16x8xf32>
      %290 = arith.addf %281, %289 : vector<16x8xf32>
      %291 = arith.addi %0, %arg6 : i32
      %c4_i32_224 = arith.constant 4 : i32
      %292 = arith.addi %291, %c4_i32_224 : i32
      %c0_225 = arith.constant 0 : index
      %293 = arith.index_cast %292 : i32 to index
      %c3_226 = arith.constant 3 : index
      %c0_227 = arith.constant 0 : index
      %294 = vector.load %arg2[%c0_225, %293, %c3_226, %c0_227] : memref<1x22x22x4xbf16, #tpu.memory_space<vmem>>, vector<1x1x16x4xbf16>
      %295 = vector.shape_cast %294 : vector<1x1x16x4xbf16> to vector<16x4xbf16>
      %c31 = arith.constant 31 : index
      %c0_228 = arith.constant 0 : index
      %c0_229 = arith.constant 0 : index
      %296 = vector.load %arg3[%c31, %c0_228, %c0_229] : memref<49x4x8xbf16, #tpu.memory_space<vmem>>, vector<1x4x8xbf16>
      %297 = vector.shape_cast %296 : vector<1x4x8xbf16> to vector<4x8xbf16>
      %cst_230 = arith.constant dense<0.000000e+00> : vector<16x8xf32>
      %298 = tpu.matmul %295, %297, %cst_230 {dimension_numbers = #tpu.dot_dimension_numbers<[1], [0], [0], [1], [0, 0, 1, 1], [], []>} : vector<16x4xbf16>, vector<4x8xbf16>, vector<16x8xf32> -> vector<16x8xf32>
      %299 = arith.addf %290, %298 : vector<16x8xf32>
      %300 = arith.addi %0, %arg6 : i32
      %c4_i32_231 = arith.constant 4 : i32
      %301 = arith.addi %300, %c4_i32_231 : i32
      %c0_232 = arith.constant 0 : index
      %302 = arith.index_cast %301 : i32 to index
      %c4_233 = arith.constant 4 : index
      %c0_234 = arith.constant 0 : index
      %303 = vector.load %arg2[%c0_232, %302, %c4_233, %c0_234] : memref<1x22x22x4xbf16, #tpu.memory_space<vmem>>, vector<1x1x16x4xbf16>
      %304 = vector.shape_cast %303 : vector<1x1x16x4xbf16> to vector<16x4xbf16>
      %c32 = arith.constant 32 : index
      %c0_235 = arith.constant 0 : index
      %c0_236 = arith.constant 0 : index
      %305 = vector.load %arg3[%c32, %c0_235, %c0_236] : memref<49x4x8xbf16, #tpu.memory_space<vmem>>, vector<1x4x8xbf16>
      %306 = vector.shape_cast %305 : vector<1x4x8xbf16> to vector<4x8xbf16>
      %cst_237 = arith.constant dense<0.000000e+00> : vector<16x8xf32>
      %307 = tpu.matmul %304, %306, %cst_237 {dimension_numbers = #tpu.dot_dimension_numbers<[1], [0], [0], [1], [0, 0, 1, 1], [], []>} : vector<16x4xbf16>, vector<4x8xbf16>, vector<16x8xf32> -> vector<16x8xf32>
      %308 = arith.addf %299, %307 : vector<16x8xf32>
      %309 = arith.addi %0, %arg6 : i32
      %c4_i32_238 = arith.constant 4 : i32
      %310 = arith.addi %309, %c4_i32_238 : i32
      %c0_239 = arith.constant 0 : index
      %311 = arith.index_cast %310 : i32 to index
      %c5_240 = arith.constant 5 : index
      %c0_241 = arith.constant 0 : index
      %312 = vector.load %arg2[%c0_239, %311, %c5_240, %c0_241] : memref<1x22x22x4xbf16, #tpu.memory_space<vmem>>, vector<1x1x16x4xbf16>
      %313 = vector.shape_cast %312 : vector<1x1x16x4xbf16> to vector<16x4xbf16>
      %c33 = arith.constant 33 : index
      %c0_242 = arith.constant 0 : index
      %c0_243 = arith.constant 0 : index
      %314 = vector.load %arg3[%c33, %c0_242, %c0_243] : memref<49x4x8xbf16, #tpu.memory_space<vmem>>, vector<1x4x8xbf16>
      %315 = vector.shape_cast %314 : vector<1x4x8xbf16> to vector<4x8xbf16>
      %cst_244 = arith.constant dense<0.000000e+00> : vector<16x8xf32>
      %316 = tpu.matmul %313, %315, %cst_244 {dimension_numbers = #tpu.dot_dimension_numbers<[1], [0], [0], [1], [0, 0, 1, 1], [], []>} : vector<16x4xbf16>, vector<4x8xbf16>, vector<16x8xf32> -> vector<16x8xf32>
      %317 = arith.addf %308, %316 : vector<16x8xf32>
      %318 = arith.addi %0, %arg6 : i32
      %c4_i32_245 = arith.constant 4 : i32
      %319 = arith.addi %318, %c4_i32_245 : i32
      %c0_246 = arith.constant 0 : index
      %320 = arith.index_cast %319 : i32 to index
      %c6_247 = arith.constant 6 : index
      %c0_248 = arith.constant 0 : index
      %321 = vector.load %arg2[%c0_246, %320, %c6_247, %c0_248] : memref<1x22x22x4xbf16, #tpu.memory_space<vmem>>, vector<1x1x16x4xbf16>
      %322 = vector.shape_cast %321 : vector<1x1x16x4xbf16> to vector<16x4xbf16>
      %c34 = arith.constant 34 : index
      %c0_249 = arith.constant 0 : index
      %c0_250 = arith.constant 0 : index
      %323 = vector.load %arg3[%c34, %c0_249, %c0_250] : memref<49x4x8xbf16, #tpu.memory_space<vmem>>, vector<1x4x8xbf16>
      %324 = vector.shape_cast %323 : vector<1x4x8xbf16> to vector<4x8xbf16>
      %cst_251 = arith.constant dense<0.000000e+00> : vector<16x8xf32>
      %325 = tpu.matmul %322, %324, %cst_251 {dimension_numbers = #tpu.dot_dimension_numbers<[1], [0], [0], [1], [0, 0, 1, 1], [], []>} : vector<16x4xbf16>, vector<4x8xbf16>, vector<16x8xf32> -> vector<16x8xf32>
      %326 = arith.addf %317, %325 : vector<16x8xf32>
      %327 = arith.addi %0, %arg6 : i32
      %c5_i32 = arith.constant 5 : i32
      %328 = arith.addi %327, %c5_i32 : i32
      %c0_252 = arith.constant 0 : index
      %329 = arith.index_cast %328 : i32 to index
      %c0_253 = arith.constant 0 : index
      %c0_254 = arith.constant 0 : index
      %330 = vector.load %arg2[%c0_252, %329, %c0_253, %c0_254] : memref<1x22x22x4xbf16, #tpu.memory_space<vmem>>, vector<1x1x16x4xbf16>
      %331 = vector.shape_cast %330 : vector<1x1x16x4xbf16> to vector<16x4xbf16>
      %c35 = arith.constant 35 : index
      %c0_255 = arith.constant 0 : index
      %c0_256 = arith.constant 0 : index
      %332 = vector.load %arg3[%c35, %c0_255, %c0_256] : memref<49x4x8xbf16, #tpu.memory_space<vmem>>, vector<1x4x8xbf16>
      %333 = vector.shape_cast %332 : vector<1x4x8xbf16> to vector<4x8xbf16>
      %cst_257 = arith.constant dense<0.000000e+00> : vector<16x8xf32>
      %334 = tpu.matmul %331, %333, %cst_257 {dimension_numbers = #tpu.dot_dimension_numbers<[1], [0], [0], [1], [0, 0, 1, 1], [], []>} : vector<16x4xbf16>, vector<4x8xbf16>, vector<16x8xf32> -> vector<16x8xf32>
      %335 = arith.addf %326, %334 : vector<16x8xf32>
      %336 = arith.addi %0, %arg6 : i32
      %c5_i32_258 = arith.constant 5 : i32
      %337 = arith.addi %336, %c5_i32_258 : i32
      %c0_259 = arith.constant 0 : index
      %338 = arith.index_cast %337 : i32 to index
      %c1_260 = arith.constant 1 : index
      %c0_261 = arith.constant 0 : index
      %339 = vector.load %arg2[%c0_259, %338, %c1_260, %c0_261] : memref<1x22x22x4xbf16, #tpu.memory_space<vmem>>, vector<1x1x16x4xbf16>
      %340 = vector.shape_cast %339 : vector<1x1x16x4xbf16> to vector<16x4xbf16>
      %c36 = arith.constant 36 : index
      %c0_262 = arith.constant 0 : index
      %c0_263 = arith.constant 0 : index
      %341 = vector.load %arg3[%c36, %c0_262, %c0_263] : memref<49x4x8xbf16, #tpu.memory_space<vmem>>, vector<1x4x8xbf16>
      %342 = vector.shape_cast %341 : vector<1x4x8xbf16> to vector<4x8xbf16>
      %cst_264 = arith.constant dense<0.000000e+00> : vector<16x8xf32>
      %343 = tpu.matmul %340, %342, %cst_264 {dimension_numbers = #tpu.dot_dimension_numbers<[1], [0], [0], [1], [0, 0, 1, 1], [], []>} : vector<16x4xbf16>, vector<4x8xbf16>, vector<16x8xf32> -> vector<16x8xf32>
      %344 = arith.addf %335, %343 : vector<16x8xf32>
      %345 = arith.addi %0, %arg6 : i32
      %c5_i32_265 = arith.constant 5 : i32
      %346 = arith.addi %345, %c5_i32_265 : i32
      %c0_266 = arith.constant 0 : index
      %347 = arith.index_cast %346 : i32 to index
      %c2_267 = arith.constant 2 : index
      %c0_268 = arith.constant 0 : index
      %348 = vector.load %arg2[%c0_266, %347, %c2_267, %c0_268] : memref<1x22x22x4xbf16, #tpu.memory_space<vmem>>, vector<1x1x16x4xbf16>
      %349 = vector.shape_cast %348 : vector<1x1x16x4xbf16> to vector<16x4xbf16>
      %c37 = arith.constant 37 : index
      %c0_269 = arith.constant 0 : index
      %c0_270 = arith.constant 0 : index
      %350 = vector.load %arg3[%c37, %c0_269, %c0_270] : memref<49x4x8xbf16, #tpu.memory_space<vmem>>, vector<1x4x8xbf16>
      %351 = vector.shape_cast %350 : vector<1x4x8xbf16> to vector<4x8xbf16>
      %cst_271 = arith.constant dense<0.000000e+00> : vector<16x8xf32>
      %352 = tpu.matmul %349, %351, %cst_271 {dimension_numbers = #tpu.dot_dimension_numbers<[1], [0], [0], [1], [0, 0, 1, 1], [], []>} : vector<16x4xbf16>, vector<4x8xbf16>, vector<16x8xf32> -> vector<16x8xf32>
      %353 = arith.addf %344, %352 : vector<16x8xf32>
      %354 = arith.addi %0, %arg6 : i32
      %c5_i32_272 = arith.constant 5 : i32
      %355 = arith.addi %354, %c5_i32_272 : i32
      %c0_273 = arith.constant 0 : index
      %356 = arith.index_cast %355 : i32 to index
      %c3_274 = arith.constant 3 : index
      %c0_275 = arith.constant 0 : index
      %357 = vector.load %arg2[%c0_273, %356, %c3_274, %c0_275] : memref<1x22x22x4xbf16, #tpu.memory_space<vmem>>, vector<1x1x16x4xbf16>
      %358 = vector.shape_cast %357 : vector<1x1x16x4xbf16> to vector<16x4xbf16>
      %c38 = arith.constant 38 : index
      %c0_276 = arith.constant 0 : index
      %c0_277 = arith.constant 0 : index
      %359 = vector.load %arg3[%c38, %c0_276, %c0_277] : memref<49x4x8xbf16, #tpu.memory_space<vmem>>, vector<1x4x8xbf16>
      %360 = vector.shape_cast %359 : vector<1x4x8xbf16> to vector<4x8xbf16>
      %cst_278 = arith.constant dense<0.000000e+00> : vector<16x8xf32>
      %361 = tpu.matmul %358, %360, %cst_278 {dimension_numbers = #tpu.dot_dimension_numbers<[1], [0], [0], [1], [0, 0, 1, 1], [], []>} : vector<16x4xbf16>, vector<4x8xbf16>, vector<16x8xf32> -> vector<16x8xf32>
      %362 = arith.addf %353, %361 : vector<16x8xf32>
      %363 = arith.addi %0, %arg6 : i32
      %c5_i32_279 = arith.constant 5 : i32
      %364 = arith.addi %363, %c5_i32_279 : i32
      %c0_280 = arith.constant 0 : index
      %365 = arith.index_cast %364 : i32 to index
      %c4_281 = arith.constant 4 : index
      %c0_282 = arith.constant 0 : index
      %366 = vector.load %arg2[%c0_280, %365, %c4_281, %c0_282] : memref<1x22x22x4xbf16, #tpu.memory_space<vmem>>, vector<1x1x16x4xbf16>
      %367 = vector.shape_cast %366 : vector<1x1x16x4xbf16> to vector<16x4xbf16>
      %c39 = arith.constant 39 : index
      %c0_283 = arith.constant 0 : index
      %c0_284 = arith.constant 0 : index
      %368 = vector.load %arg3[%c39, %c0_283, %c0_284] : memref<49x4x8xbf16, #tpu.memory_space<vmem>>, vector<1x4x8xbf16>
      %369 = vector.shape_cast %368 : vector<1x4x8xbf16> to vector<4x8xbf16>
      %cst_285 = arith.constant dense<0.000000e+00> : vector<16x8xf32>
      %370 = tpu.matmul %367, %369, %cst_285 {dimension_numbers = #tpu.dot_dimension_numbers<[1], [0], [0], [1], [0, 0, 1, 1], [], []>} : vector<16x4xbf16>, vector<4x8xbf16>, vector<16x8xf32> -> vector<16x8xf32>
      %371 = arith.addf %362, %370 : vector<16x8xf32>
      %372 = arith.addi %0, %arg6 : i32
      %c5_i32_286 = arith.constant 5 : i32
      %373 = arith.addi %372, %c5_i32_286 : i32
      %c0_287 = arith.constant 0 : index
      %374 = arith.index_cast %373 : i32 to index
      %c5_288 = arith.constant 5 : index
      %c0_289 = arith.constant 0 : index
      %375 = vector.load %arg2[%c0_287, %374, %c5_288, %c0_289] : memref<1x22x22x4xbf16, #tpu.memory_space<vmem>>, vector<1x1x16x4xbf16>
      %376 = vector.shape_cast %375 : vector<1x1x16x4xbf16> to vector<16x4xbf16>
      %c40 = arith.constant 40 : index
      %c0_290 = arith.constant 0 : index
      %c0_291 = arith.constant 0 : index
      %377 = vector.load %arg3[%c40, %c0_290, %c0_291] : memref<49x4x8xbf16, #tpu.memory_space<vmem>>, vector<1x4x8xbf16>
      %378 = vector.shape_cast %377 : vector<1x4x8xbf16> to vector<4x8xbf16>
      %cst_292 = arith.constant dense<0.000000e+00> : vector<16x8xf32>
      %379 = tpu.matmul %376, %378, %cst_292 {dimension_numbers = #tpu.dot_dimension_numbers<[1], [0], [0], [1], [0, 0, 1, 1], [], []>} : vector<16x4xbf16>, vector<4x8xbf16>, vector<16x8xf32> -> vector<16x8xf32>
      %380 = arith.addf %371, %379 : vector<16x8xf32>
      %381 = arith.addi %0, %arg6 : i32
      %c5_i32_293 = arith.constant 5 : i32
      %382 = arith.addi %381, %c5_i32_293 : i32
      %c0_294 = arith.constant 0 : index
      %383 = arith.index_cast %382 : i32 to index
      %c6_295 = arith.constant 6 : index
      %c0_296 = arith.constant 0 : index
      %384 = vector.load %arg2[%c0_294, %383, %c6_295, %c0_296] : memref<1x22x22x4xbf16, #tpu.memory_space<vmem>>, vector<1x1x16x4xbf16>
      %385 = vector.shape_cast %384 : vector<1x1x16x4xbf16> to vector<16x4xbf16>
      %c41 = arith.constant 41 : index
      %c0_297 = arith.constant 0 : index
      %c0_298 = arith.constant 0 : index
      %386 = vector.load %arg3[%c41, %c0_297, %c0_298] : memref<49x4x8xbf16, #tpu.memory_space<vmem>>, vector<1x4x8xbf16>
      %387 = vector.shape_cast %386 : vector<1x4x8xbf16> to vector<4x8xbf16>
      %cst_299 = arith.constant dense<0.000000e+00> : vector<16x8xf32>
      %388 = tpu.matmul %385, %387, %cst_299 {dimension_numbers = #tpu.dot_dimension_numbers<[1], [0], [0], [1], [0, 0, 1, 1], [], []>} : vector<16x4xbf16>, vector<4x8xbf16>, vector<16x8xf32> -> vector<16x8xf32>
      %389 = arith.addf %380, %388 : vector<16x8xf32>
      %390 = arith.addi %0, %arg6 : i32
      %c6_i32 = arith.constant 6 : i32
      %391 = arith.addi %390, %c6_i32 : i32
      %c0_300 = arith.constant 0 : index
      %392 = arith.index_cast %391 : i32 to index
      %c0_301 = arith.constant 0 : index
      %c0_302 = arith.constant 0 : index
      %393 = vector.load %arg2[%c0_300, %392, %c0_301, %c0_302] : memref<1x22x22x4xbf16, #tpu.memory_space<vmem>>, vector<1x1x16x4xbf16>
      %394 = vector.shape_cast %393 : vector<1x1x16x4xbf16> to vector<16x4xbf16>
      %c42 = arith.constant 42 : index
      %c0_303 = arith.constant 0 : index
      %c0_304 = arith.constant 0 : index
      %395 = vector.load %arg3[%c42, %c0_303, %c0_304] : memref<49x4x8xbf16, #tpu.memory_space<vmem>>, vector<1x4x8xbf16>
      %396 = vector.shape_cast %395 : vector<1x4x8xbf16> to vector<4x8xbf16>
      %cst_305 = arith.constant dense<0.000000e+00> : vector<16x8xf32>
      %397 = tpu.matmul %394, %396, %cst_305 {dimension_numbers = #tpu.dot_dimension_numbers<[1], [0], [0], [1], [0, 0, 1, 1], [], []>} : vector<16x4xbf16>, vector<4x8xbf16>, vector<16x8xf32> -> vector<16x8xf32>
      %398 = arith.addf %389, %397 : vector<16x8xf32>
      %399 = arith.addi %0, %arg6 : i32
      %c6_i32_306 = arith.constant 6 : i32
      %400 = arith.addi %399, %c6_i32_306 : i32
      %c0_307 = arith.constant 0 : index
      %401 = arith.index_cast %400 : i32 to index
      %c1_308 = arith.constant 1 : index
      %c0_309 = arith.constant 0 : index
      %402 = vector.load %arg2[%c0_307, %401, %c1_308, %c0_309] : memref<1x22x22x4xbf16, #tpu.memory_space<vmem>>, vector<1x1x16x4xbf16>
      %403 = vector.shape_cast %402 : vector<1x1x16x4xbf16> to vector<16x4xbf16>
      %c43 = arith.constant 43 : index
      %c0_310 = arith.constant 0 : index
      %c0_311 = arith.constant 0 : index
      %404 = vector.load %arg3[%c43, %c0_310, %c0_311] : memref<49x4x8xbf16, #tpu.memory_space<vmem>>, vector<1x4x8xbf16>
      %405 = vector.shape_cast %404 : vector<1x4x8xbf16> to vector<4x8xbf16>
      %cst_312 = arith.constant dense<0.000000e+00> : vector<16x8xf32>
      %406 = tpu.matmul %403, %405, %cst_312 {dimension_numbers = #tpu.dot_dimension_numbers<[1], [0], [0], [1], [0, 0, 1, 1], [], []>} : vector<16x4xbf16>, vector<4x8xbf16>, vector<16x8xf32> -> vector<16x8xf32>
      %407 = arith.addf %398, %406 : vector<16x8xf32>
      %408 = arith.addi %0, %arg6 : i32
      %c6_i32_313 = arith.constant 6 : i32
      %409 = arith.addi %408, %c6_i32_313 : i32
      %c0_314 = arith.constant 0 : index
      %410 = arith.index_cast %409 : i32 to index
      %c2_315 = arith.constant 2 : index
      %c0_316 = arith.constant 0 : index
      %411 = vector.load %arg2[%c0_314, %410, %c2_315, %c0_316] : memref<1x22x22x4xbf16, #tpu.memory_space<vmem>>, vector<1x1x16x4xbf16>
      %412 = vector.shape_cast %411 : vector<1x1x16x4xbf16> to vector<16x4xbf16>
      %c44 = arith.constant 44 : index
      %c0_317 = arith.constant 0 : index
      %c0_318 = arith.constant 0 : index
      %413 = vector.load %arg3[%c44, %c0_317, %c0_318] : memref<49x4x8xbf16, #tpu.memory_space<vmem>>, vector<1x4x8xbf16>
      %414 = vector.shape_cast %413 : vector<1x4x8xbf16> to vector<4x8xbf16>
      %cst_319 = arith.constant dense<0.000000e+00> : vector<16x8xf32>
      %415 = tpu.matmul %412, %414, %cst_319 {dimension_numbers = #tpu.dot_dimension_numbers<[1], [0], [0], [1], [0, 0, 1, 1], [], []>} : vector<16x4xbf16>, vector<4x8xbf16>, vector<16x8xf32> -> vector<16x8xf32>
      %416 = arith.addf %407, %415 : vector<16x8xf32>
      %417 = arith.addi %0, %arg6 : i32
      %c6_i32_320 = arith.constant 6 : i32
      %418 = arith.addi %417, %c6_i32_320 : i32
      %c0_321 = arith.constant 0 : index
      %419 = arith.index_cast %418 : i32 to index
      %c3_322 = arith.constant 3 : index
      %c0_323 = arith.constant 0 : index
      %420 = vector.load %arg2[%c0_321, %419, %c3_322, %c0_323] : memref<1x22x22x4xbf16, #tpu.memory_space<vmem>>, vector<1x1x16x4xbf16>
      %421 = vector.shape_cast %420 : vector<1x1x16x4xbf16> to vector<16x4xbf16>
      %c45 = arith.constant 45 : index
      %c0_324 = arith.constant 0 : index
      %c0_325 = arith.constant 0 : index
      %422 = vector.load %arg3[%c45, %c0_324, %c0_325] : memref<49x4x8xbf16, #tpu.memory_space<vmem>>, vector<1x4x8xbf16>
      %423 = vector.shape_cast %422 : vector<1x4x8xbf16> to vector<4x8xbf16>
      %cst_326 = arith.constant dense<0.000000e+00> : vector<16x8xf32>
      %424 = tpu.matmul %421, %423, %cst_326 {dimension_numbers = #tpu.dot_dimension_numbers<[1], [0], [0], [1], [0, 0, 1, 1], [], []>} : vector<16x4xbf16>, vector<4x8xbf16>, vector<16x8xf32> -> vector<16x8xf32>
      %425 = arith.addf %416, %424 : vector<16x8xf32>
      %426 = arith.addi %0, %arg6 : i32
      %c6_i32_327 = arith.constant 6 : i32
      %427 = arith.addi %426, %c6_i32_327 : i32
      %c0_328 = arith.constant 0 : index
      %428 = arith.index_cast %427 : i32 to index
      %c4_329 = arith.constant 4 : index
      %c0_330 = arith.constant 0 : index
      %429 = vector.load %arg2[%c0_328, %428, %c4_329, %c0_330] : memref<1x22x22x4xbf16, #tpu.memory_space<vmem>>, vector<1x1x16x4xbf16>
      %430 = vector.shape_cast %429 : vector<1x1x16x4xbf16> to vector<16x4xbf16>
      %c46 = arith.constant 46 : index
      %c0_331 = arith.constant 0 : index
      %c0_332 = arith.constant 0 : index
      %431 = vector.load %arg3[%c46, %c0_331, %c0_332] : memref<49x4x8xbf16, #tpu.memory_space<vmem>>, vector<1x4x8xbf16>
      %432 = vector.shape_cast %431 : vector<1x4x8xbf16> to vector<4x8xbf16>
      %cst_333 = arith.constant dense<0.000000e+00> : vector<16x8xf32>
      %433 = tpu.matmul %430, %432, %cst_333 {dimension_numbers = #tpu.dot_dimension_numbers<[1], [0], [0], [1], [0, 0, 1, 1], [], []>} : vector<16x4xbf16>, vector<4x8xbf16>, vector<16x8xf32> -> vector<16x8xf32>
      %434 = arith.addf %425, %433 : vector<16x8xf32>
      %435 = arith.addi %0, %arg6 : i32
      %c6_i32_334 = arith.constant 6 : i32
      %436 = arith.addi %435, %c6_i32_334 : i32
      %c0_335 = arith.constant 0 : index
      %437 = arith.index_cast %436 : i32 to index
      %c5_336 = arith.constant 5 : index
      %c0_337 = arith.constant 0 : index
      %438 = vector.load %arg2[%c0_335, %437, %c5_336, %c0_337] : memref<1x22x22x4xbf16, #tpu.memory_space<vmem>>, vector<1x1x16x4xbf16>
      %439 = vector.shape_cast %438 : vector<1x1x16x4xbf16> to vector<16x4xbf16>
      %c47 = arith.constant 47 : index
      %c0_338 = arith.constant 0 : index
      %c0_339 = arith.constant 0 : index
      %440 = vector.load %arg3[%c47, %c0_338, %c0_339] : memref<49x4x8xbf16, #tpu.memory_space<vmem>>, vector<1x4x8xbf16>
      %441 = vector.shape_cast %440 : vector<1x4x8xbf16> to vector<4x8xbf16>
      %cst_340 = arith.constant dense<0.000000e+00> : vector<16x8xf32>
      %442 = tpu.matmul %439, %441, %cst_340 {dimension_numbers = #tpu.dot_dimension_numbers<[1], [0], [0], [1], [0, 0, 1, 1], [], []>} : vector<16x4xbf16>, vector<4x8xbf16>, vector<16x8xf32> -> vector<16x8xf32>
      %443 = arith.addf %434, %442 : vector<16x8xf32>
      %444 = arith.addi %0, %arg6 : i32
      %c6_i32_341 = arith.constant 6 : i32
      %445 = arith.addi %444, %c6_i32_341 : i32
      %c0_342 = arith.constant 0 : index
      %446 = arith.index_cast %445 : i32 to index
      %c6_343 = arith.constant 6 : index
      %c0_344 = arith.constant 0 : index
      %447 = vector.load %arg2[%c0_342, %446, %c6_343, %c0_344] : memref<1x22x22x4xbf16, #tpu.memory_space<vmem>>, vector<1x1x16x4xbf16>
      %448 = vector.shape_cast %447 : vector<1x1x16x4xbf16> to vector<16x4xbf16>
      %c48 = arith.constant 48 : index
      %c0_345 = arith.constant 0 : index
      %c0_346 = arith.constant 0 : index
      %449 = vector.load %arg3[%c48, %c0_345, %c0_346] : memref<49x4x8xbf16, #tpu.memory_space<vmem>>, vector<1x4x8xbf16>
      %450 = vector.shape_cast %449 : vector<1x4x8xbf16> to vector<4x8xbf16>
      %cst_347 = arith.constant dense<0.000000e+00> : vector<16x8xf32>
      %451 = tpu.matmul %448, %450, %cst_347 {dimension_numbers = #tpu.dot_dimension_numbers<[1], [0], [0], [1], [0, 0, 1, 1], [], []>} : vector<16x4xbf16>, vector<4x8xbf16>, vector<16x8xf32> -> vector<16x8xf32>
      %452 = arith.addf %443, %451 : vector<16x8xf32>
      %453 = arith.truncf %452 : vector<16x8xf32> to vector<16x8xbf16>
      %c0_348 = arith.constant 0 : index
      %454 = arith.index_cast %arg6 : i32 to index
      %c0_349 = arith.constant 0 : index
      %c0_350 = arith.constant 0 : index
      %455 = vector.load %arg4[%c0_348, %454, %c0_349, %c0_350] : memref<1x16x16x8xbf16, #tpu.memory_space<vmem>>, vector<1x1x16x8xbf16>
      %456 = vector.shape_cast %455 : vector<1x1x16x8xbf16> to vector<16x8xbf16>
      %457 = vector.shape_cast %453 : vector<16x8xbf16> to vector<1x1x16x8xbf16>
      tpu.vector_store %arg4[%c0_348, %454, %c0_349, %c0_350], %457 {strides = array<i32>} : memref<1x16x16x8xbf16, #tpu.memory_space<vmem>>, vector<1x1x16x8xbf16>,
      %cst_351 = arith.constant dense<0.000000e+00> : vector<8xf32>
      %458 = vector.multi_reduction <add>, %452, %cst_351 [0] : vector<16x8xf32> to vector<8xf32>
      %459 = vector.shape_cast %458 : vector<8xf32> to vector<1x8xf32>
      %460 = arith.addf %arg7, %459 : vector<1x8xf32>
      %461 = arith.mulf %452, %452 : vector<16x8xf32>
      %cst_352 = arith.constant dense<0.000000e+00> : vector<8xf32>
      %462 = vector.multi_reduction <add>, %461, %cst_352 [0] : vector<16x8xf32> to vector<8xf32>
      %463 = vector.shape_cast %462 : vector<8xf32> to vector<1x8xf32>
      %464 = arith.addf %arg8, %463 : vector<1x8xf32>
      scf.yield %460, %464 : vector<1x8xf32>, vector<1x8xf32>
    }
    %c16_i32_2 = arith.constant 16 : i32
    %c0 = arith.constant 0 : index
    %c0_3 = arith.constant 0 : index
    %c0_4 = arith.constant 0 : index
    %5 = vector.load %arg5[%c0, %c0_3, %c0_4] : memref<1x2x8xf32, #tpu.memory_space<vmem>>, vector<1x1x8xf32>
    %6 = vector.shape_cast %5 : vector<1x1x8xf32> to vector<1x8xf32>
    %7 = vector.shape_cast %4#0 : vector<1x8xf32> to vector<1x1x8xf32>
    tpu.vector_store %arg5[%c0, %c0_3, %c0_4], %7 {strides = array<i32>} : memref<1x2x8xf32, #tpu.memory_space<vmem>>, vector<1x1x8xf32>,
    %c0_5 = arith.constant 0 : index
    %c1 = arith.constant 1 : index
    %c0_6 = arith.constant 0 : index
    %8 = vector.load %arg5[%c0_5, %c1, %c0_6] : memref<1x2x8xf32, #tpu.memory_space<vmem>>, vector<1x1x8xf32>
    %9 = vector.shape_cast %8 : vector<1x1x8xf32> to vector<1x8xf32>
    %10 = vector.shape_cast %4#1 : vector<1x8xf32> to vector<1x1x8xf32>
    tpu.vector_store %arg5[%c0_5, %c1, %c0_6], %10 {strides = array<i32>} : memref<1x2x8xf32, #tpu.memory_space<vmem>>, vector<1x1x8xf32>,
    return
  }
  func.func @transform_0(%arg0: i32, %arg1: i32) -> (i32, i32, i32, i32) {
    %c0_i32 = arith.constant 0 : i32
    %c0_i32_0 = arith.constant 0 : i32
    %c0_i32_1 = arith.constant 0 : i32
    %c0_i32_2 = arith.constant 0 : i32
    return %arg0, %c0_i32, %c0_i32_0, %c0_i32_1 : i32, i32, i32, i32
  }
  func.func @transform_1(%arg0: i32, %arg1: i32) -> (i32, i32, i32) {
    %c0_i32 = arith.constant 0 : i32
    %c0_i32_0 = arith.constant 0 : i32
    %c0_i32_1 = arith.constant 0 : i32
    %c0_i32_2 = arith.constant 0 : i32
    return %c0_i32, %c0_i32_0, %c0_i32_1 : i32, i32, i32
  }
  func.func @transform_2(%arg0: i32, %arg1: i32) -> (i32, i32, i32, i32) {
    %c0_i32 = arith.constant 0 : i32
    %c0_i32_0 = arith.constant 0 : i32
    %c0_i32_1 = arith.constant 0 : i32
    return %arg0, %arg1, %c0_i32, %c0_i32_0 : i32, i32, i32, i32
  }
  func.func @transform_3(%arg0: i32, %arg1: i32) -> (i32, i32, i32) {
    %c1_i32 = arith.constant 1 : i32
    %0 = arith.muli %arg0, %c1_i32 : i32
    %1 = arith.addi %0, %arg1 : i32
    %c0_i32 = arith.constant 0 : i32
    %c0_i32_0 = arith.constant 0 : i32
    %c0_i32_1 = arith.constant 0 : i32
    return %1, %c0_i32, %c0_i32_0 : i32, i32, i32
  }
}

module attributes {stable_mosaic.version = 11 : i64} {
  func.func @_matmul_stats_kernel(%arg0: i32, %arg1: memref<128x72xbf16, #tpu.memory_space<vmem>>, %arg2: memref<72x16xbf16, #tpu.memory_space<vmem>>, %arg3: memref<128x16xbf16, #tpu.memory_space<vmem>>, %arg4: memref<1x2x16xf32, #tpu.memory_space<vmem>>) attributes {dimension_semantics = [#tpu.dimension_semantics<parallel>], iteration_bounds = array<i64: 1>, scalar_prefetch = 0 : i64, scratch_operands = 0 : i64, tpu.core_type = #tpu.core_type<tc>, window_params = [{transform_indices = @transform_0, window_bounds = array<i64: 128, 72>}, {pipeline_mode = #tpu.pipeline_mode<synchronous>, transform_indices = @transform_1, window_bounds = array<i64: 72, 16>}, {transform_indices = @transform_2, window_bounds = array<i64: 128, 16>}, {transform_indices = @transform_3, window_bounds = array<i64: 1, 2, 16>}]} {
    %c0 = arith.constant 0 : index
    %c0_0 = arith.constant 0 : index
    %0 = vector.load %arg1[%c0, %c0_0] : memref<128x72xbf16, #tpu.memory_space<vmem>>, vector<128x72xbf16>
    %c0_1 = arith.constant 0 : index
    %c0_2 = arith.constant 0 : index
    %1 = vector.load %arg2[%c0_1, %c0_2] : memref<72x16xbf16, #tpu.memory_space<vmem>>, vector<72x16xbf16>
    %cst = arith.constant dense<0.000000e+00> : vector<128x16xf32>
    %2 = tpu.matmul %0, %1, %cst {dimension_numbers = #tpu.dot_dimension_numbers<[1], [0], [0], [1], [0, 0, 1, 1], [], []>} : vector<128x72xbf16>, vector<72x16xbf16>, vector<128x16xf32> -> vector<128x16xf32>
    %3 = arith.truncf %2 : vector<128x16xf32> to vector<128x16xbf16>
    %c0_3 = arith.constant 0 : index
    %c0_4 = arith.constant 0 : index
    %4 = vector.load %arg3[%c0_3, %c0_4] : memref<128x16xbf16, #tpu.memory_space<vmem>>, vector<128x16xbf16>
    tpu.vector_store %arg3[%c0_3, %c0_4], %3 {strides = array<i32>} : memref<128x16xbf16, #tpu.memory_space<vmem>>, vector<128x16xbf16>,
    %cst_5 = arith.constant dense<0.000000e+00> : vector<16xf32>
    %5 = vector.multi_reduction <add>, %2, %cst_5 [0] : vector<128x16xf32> to vector<16xf32>
    %6 = vector.shape_cast %5 : vector<16xf32> to vector<1x16xf32>
    %c0_6 = arith.constant 0 : index
    %c0_7 = arith.constant 0 : index
    %c0_8 = arith.constant 0 : index
    %7 = vector.load %arg4[%c0_6, %c0_7, %c0_8] : memref<1x2x16xf32, #tpu.memory_space<vmem>>, vector<1x1x16xf32>
    %8 = vector.shape_cast %7 : vector<1x1x16xf32> to vector<1x16xf32>
    %9 = vector.shape_cast %6 : vector<1x16xf32> to vector<1x1x16xf32>
    tpu.vector_store %arg4[%c0_6, %c0_7, %c0_8], %9 {strides = array<i32>} : memref<1x2x16xf32, #tpu.memory_space<vmem>>, vector<1x1x16xf32>,
    %10 = arith.mulf %2, %2 : vector<128x16xf32>
    %cst_9 = arith.constant dense<0.000000e+00> : vector<16xf32>
    %11 = vector.multi_reduction <add>, %10, %cst_9 [0] : vector<128x16xf32> to vector<16xf32>
    %12 = vector.shape_cast %11 : vector<16xf32> to vector<1x16xf32>
    %c0_10 = arith.constant 0 : index
    %c1 = arith.constant 1 : index
    %c0_11 = arith.constant 0 : index
    %13 = vector.load %arg4[%c0_10, %c1, %c0_11] : memref<1x2x16xf32, #tpu.memory_space<vmem>>, vector<1x1x16xf32>
    %14 = vector.shape_cast %13 : vector<1x1x16xf32> to vector<1x16xf32>
    %15 = vector.shape_cast %12 : vector<1x16xf32> to vector<1x1x16xf32>
    tpu.vector_store %arg4[%c0_10, %c1, %c0_11], %15 {strides = array<i32>} : memref<1x2x16xf32, #tpu.memory_space<vmem>>, vector<1x1x16xf32>,
    return
  }
  func.func @transform_0(%arg0: i32) -> (i32, i32) {
    %c0_i32 = arith.constant 0 : i32
    %c0_i32_0 = arith.constant 0 : i32
    return %arg0, %c0_i32 : i32, i32
  }
  func.func @transform_1(%arg0: i32) -> (i32, i32) {
    %c0_i32 = arith.constant 0 : i32
    %c0_i32_0 = arith.constant 0 : i32
    %c0_i32_1 = arith.constant 0 : i32
    return %c0_i32, %c0_i32_0 : i32, i32
  }
  func.func @transform_2(%arg0: i32) -> (i32, i32) {
    %c0_i32 = arith.constant 0 : i32
    %c0_i32_0 = arith.constant 0 : i32
    return %arg0, %c0_i32 : i32, i32
  }
  func.func @transform_3(%arg0: i32) -> (i32, i32, i32) {
    %c0_i32 = arith.constant 0 : i32
    %c0_i32_0 = arith.constant 0 : i32
    %c0_i32_1 = arith.constant 0 : i32
    return %arg0, %c0_i32, %c0_i32_0 : i32, i32, i32
  }
}

module attributes {stable_mosaic.version = 11 : i64} {
  func.func @_matmul_stats_kernel(%arg0: i32, %arg1: memref<32x144xbf16, #tpu.memory_space<vmem>>, %arg2: memref<144x32xbf16, #tpu.memory_space<vmem>>, %arg3: memref<32x32xbf16, #tpu.memory_space<vmem>>, %arg4: memref<1x2x32xf32, #tpu.memory_space<vmem>>) attributes {dimension_semantics = [#tpu.dimension_semantics<parallel>], iteration_bounds = array<i64: 1>, scalar_prefetch = 0 : i64, scratch_operands = 0 : i64, tpu.core_type = #tpu.core_type<tc>, window_params = [{transform_indices = @transform_0, window_bounds = array<i64: 32, 144>}, {pipeline_mode = #tpu.pipeline_mode<synchronous>, transform_indices = @transform_1, window_bounds = array<i64: 144, 32>}, {transform_indices = @transform_2, window_bounds = array<i64: 32, 32>}, {transform_indices = @transform_3, window_bounds = array<i64: 1, 2, 32>}]} {
    %c0 = arith.constant 0 : index
    %c0_0 = arith.constant 0 : index
    %0 = vector.load %arg1[%c0, %c0_0] : memref<32x144xbf16, #tpu.memory_space<vmem>>, vector<32x144xbf16>
    %c0_1 = arith.constant 0 : index
    %c0_2 = arith.constant 0 : index
    %1 = vector.load %arg2[%c0_1, %c0_2] : memref<144x32xbf16, #tpu.memory_space<vmem>>, vector<144x32xbf16>
    %cst = arith.constant dense<0.000000e+00> : vector<32x32xf32>
    %2 = tpu.matmul %0, %1, %cst {dimension_numbers = #tpu.dot_dimension_numbers<[1], [0], [0], [1], [0, 0, 1, 1], [], []>} : vector<32x144xbf16>, vector<144x32xbf16>, vector<32x32xf32> -> vector<32x32xf32>
    %3 = arith.truncf %2 : vector<32x32xf32> to vector<32x32xbf16>
    %c0_3 = arith.constant 0 : index
    %c0_4 = arith.constant 0 : index
    %4 = vector.load %arg3[%c0_3, %c0_4] : memref<32x32xbf16, #tpu.memory_space<vmem>>, vector<32x32xbf16>
    tpu.vector_store %arg3[%c0_3, %c0_4], %3 {strides = array<i32>} : memref<32x32xbf16, #tpu.memory_space<vmem>>, vector<32x32xbf16>,
    %cst_5 = arith.constant dense<0.000000e+00> : vector<32xf32>
    %5 = vector.multi_reduction <add>, %2, %cst_5 [0] : vector<32x32xf32> to vector<32xf32>
    %6 = vector.shape_cast %5 : vector<32xf32> to vector<1x32xf32>
    %c0_6 = arith.constant 0 : index
    %c0_7 = arith.constant 0 : index
    %c0_8 = arith.constant 0 : index
    %7 = vector.load %arg4[%c0_6, %c0_7, %c0_8] : memref<1x2x32xf32, #tpu.memory_space<vmem>>, vector<1x1x32xf32>
    %8 = vector.shape_cast %7 : vector<1x1x32xf32> to vector<1x32xf32>
    %9 = vector.shape_cast %6 : vector<1x32xf32> to vector<1x1x32xf32>
    tpu.vector_store %arg4[%c0_6, %c0_7, %c0_8], %9 {strides = array<i32>} : memref<1x2x32xf32, #tpu.memory_space<vmem>>, vector<1x1x32xf32>,
    %10 = arith.mulf %2, %2 : vector<32x32xf32>
    %cst_9 = arith.constant dense<0.000000e+00> : vector<32xf32>
    %11 = vector.multi_reduction <add>, %10, %cst_9 [0] : vector<32x32xf32> to vector<32xf32>
    %12 = vector.shape_cast %11 : vector<32xf32> to vector<1x32xf32>
    %c0_10 = arith.constant 0 : index
    %c1 = arith.constant 1 : index
    %c0_11 = arith.constant 0 : index
    %13 = vector.load %arg4[%c0_10, %c1, %c0_11] : memref<1x2x32xf32, #tpu.memory_space<vmem>>, vector<1x1x32xf32>
    %14 = vector.shape_cast %13 : vector<1x1x32xf32> to vector<1x32xf32>
    %15 = vector.shape_cast %12 : vector<1x32xf32> to vector<1x1x32xf32>
    tpu.vector_store %arg4[%c0_10, %c1, %c0_11], %15 {strides = array<i32>} : memref<1x2x32xf32, #tpu.memory_space<vmem>>, vector<1x1x32xf32>,
    return
  }
  func.func @transform_0(%arg0: i32) -> (i32, i32) {
    %c0_i32 = arith.constant 0 : i32
    %c0_i32_0 = arith.constant 0 : i32
    return %arg0, %c0_i32 : i32, i32
  }
  func.func @transform_1(%arg0: i32) -> (i32, i32) {
    %c0_i32 = arith.constant 0 : i32
    %c0_i32_0 = arith.constant 0 : i32
    %c0_i32_1 = arith.constant 0 : i32
    return %c0_i32, %c0_i32_0 : i32, i32
  }
  func.func @transform_2(%arg0: i32) -> (i32, i32) {
    %c0_i32 = arith.constant 0 : i32
    %c0_i32_0 = arith.constant 0 : i32
    return %arg0, %c0_i32 : i32, i32
  }
  func.func @transform_3(%arg0: i32) -> (i32, i32, i32) {
    %c0_i32 = arith.constant 0 : i32
    %c0_i32_0 = arith.constant 0 : i32
    %c0_i32_1 = arith.constant 0 : i32
    return %arg0, %c0_i32, %c0_i32_0 : i32, i32, i32
  }
}

module attributes {stable_mosaic.version = 11 : i64} {
  func.func @_residual_kernel(%arg0: i32, %arg1: memref<32x32xbf16, #tpu.memory_space<vmem>>, %arg2: memref<32x32xbf16, #tpu.memory_space<vmem>>, %arg3: memref<1x32xf32, #tpu.memory_space<vmem>>, %arg4: memref<1x32xf32, #tpu.memory_space<vmem>>, %arg5: memref<1x32xf32, #tpu.memory_space<vmem>>, %arg6: memref<1x32xf32, #tpu.memory_space<vmem>>, %arg7: memref<32x32xbf16, #tpu.memory_space<vmem>>) attributes {dimension_semantics = [#tpu.dimension_semantics<parallel>], iteration_bounds = array<i64: 1>, scalar_prefetch = 0 : i64, scratch_operands = 0 : i64, tpu.core_type = #tpu.core_type<tc>, window_params = [{transform_indices = @transform_0, window_bounds = array<i64: 32, 32>}, {transform_indices = @transform_1, window_bounds = array<i64: 32, 32>}, {pipeline_mode = #tpu.pipeline_mode<synchronous>, transform_indices = @transform_2, window_bounds = array<i64: 1, 32>}, {pipeline_mode = #tpu.pipeline_mode<synchronous>, transform_indices = @transform_3, window_bounds = array<i64: 1, 32>}, {pipeline_mode = #tpu.pipeline_mode<synchronous>, transform_indices = @transform_4, window_bounds = array<i64: 1, 32>}, {pipeline_mode = #tpu.pipeline_mode<synchronous>, transform_indices = @transform_5, window_bounds = array<i64: 1, 32>}, {transform_indices = @transform_6, window_bounds = array<i64: 32, 32>}]} {
    %c0 = arith.constant 0 : index
    %c0_0 = arith.constant 0 : index
    %0 = vector.load %arg1[%c0, %c0_0] : memref<32x32xbf16, #tpu.memory_space<vmem>>, vector<32x32xbf16>
    %1 = arith.extf %0 : vector<32x32xbf16> to vector<32x32xf32>
    %c0_1 = arith.constant 0 : index
    %c0_2 = arith.constant 0 : index
    %2 = vector.load %arg3[%c0_1, %c0_2] : memref<1x32xf32, #tpu.memory_space<vmem>>, vector<1x32xf32>
    %3 = vector.broadcast %2 : vector<1x32xf32> to vector<32x32xf32>
    %4 = arith.mulf %1, %3 : vector<32x32xf32>
    %c0_3 = arith.constant 0 : index
    %c0_4 = arith.constant 0 : index
    %5 = vector.load %arg4[%c0_3, %c0_4] : memref<1x32xf32, #tpu.memory_space<vmem>>, vector<1x32xf32>
    %6 = vector.broadcast %5 : vector<1x32xf32> to vector<32x32xf32>
    %7 = arith.addf %4, %6 : vector<32x32xf32>
    %c0_5 = arith.constant 0 : index
    %c0_6 = arith.constant 0 : index
    %8 = vector.load %arg2[%c0_5, %c0_6] : memref<32x32xbf16, #tpu.memory_space<vmem>>, vector<32x32xbf16>
    %9 = arith.extf %8 : vector<32x32xbf16> to vector<32x32xf32>
    %c0_7 = arith.constant 0 : index
    %c0_8 = arith.constant 0 : index
    %10 = vector.load %arg5[%c0_7, %c0_8] : memref<1x32xf32, #tpu.memory_space<vmem>>, vector<1x32xf32>
    %11 = vector.broadcast %10 : vector<1x32xf32> to vector<32x32xf32>
    %12 = arith.mulf %9, %11 : vector<32x32xf32>
    %c0_9 = arith.constant 0 : index
    %c0_10 = arith.constant 0 : index
    %13 = vector.load %arg6[%c0_9, %c0_10] : memref<1x32xf32, #tpu.memory_space<vmem>>, vector<1x32xf32>
    %14 = vector.broadcast %13 : vector<1x32xf32> to vector<32x32xf32>
    %15 = arith.addf %12, %14 : vector<32x32xf32>
    %cst = arith.constant 0.000000e+00 : f32
    %16 = vector.broadcast %cst : f32 to vector<32x32xf32>
    %17 = arith.maximumf %15, %16 : vector<32x32xf32>
    %18 = arith.addf %7, %17 : vector<32x32xf32>
    %19 = arith.truncf %18 : vector<32x32xf32> to vector<32x32xbf16>
    %c0_11 = arith.constant 0 : index
    %c0_12 = arith.constant 0 : index
    %20 = vector.load %arg7[%c0_11, %c0_12] : memref<32x32xbf16, #tpu.memory_space<vmem>>, vector<32x32xbf16>
    tpu.vector_store %arg7[%c0_11, %c0_12], %19 {strides = array<i32>} : memref<32x32xbf16, #tpu.memory_space<vmem>>, vector<32x32xbf16>,
    return
  }
  func.func @transform_0(%arg0: i32) -> (i32, i32) {
    %c0_i32 = arith.constant 0 : i32
    %c0_i32_0 = arith.constant 0 : i32
    return %arg0, %c0_i32 : i32, i32
  }
  func.func @transform_1(%arg0: i32) -> (i32, i32) {
    %c0_i32 = arith.constant 0 : i32
    %c0_i32_0 = arith.constant 0 : i32
    return %arg0, %c0_i32 : i32, i32
  }
  func.func @transform_2(%arg0: i32) -> (i32, i32) {
    %c0_i32 = arith.constant 0 : i32
    %c0_i32_0 = arith.constant 0 : i32
    %c0_i32_1 = arith.constant 0 : i32
    return %c0_i32, %c0_i32_0 : i32, i32
  }
  func.func @transform_3(%arg0: i32) -> (i32, i32) {
    %c0_i32 = arith.constant 0 : i32
    %c0_i32_0 = arith.constant 0 : i32
    %c0_i32_1 = arith.constant 0 : i32
    return %c0_i32, %c0_i32_0 : i32, i32
  }
  func.func @transform_4(%arg0: i32) -> (i32, i32) {
    %c0_i32 = arith.constant 0 : i32
    %c0_i32_0 = arith.constant 0 : i32
    %c0_i32_1 = arith.constant 0 : i32
    return %c0_i32, %c0_i32_0 : i32, i32
  }
  func.func @transform_5(%arg0: i32) -> (i32, i32) {
    %c0_i32 = arith.constant 0 : i32
    %c0_i32_0 = arith.constant 0 : i32
    %c0_i32_1 = arith.constant 0 : i32
    return %c0_i32, %c0_i32_0 : i32, i32
  }
  func.func @transform_6(%arg0: i32) -> (i32, i32) {
    %c0_i32 = arith.constant 0 : i32
    %c0_i32_0 = arith.constant 0 : i32
    return %arg0, %c0_i32 : i32, i32
  }
}

module attributes {stable_mosaic.version = 11 : i64} {
  func.func @_direct_conv_kernel(%arg0: i32, %arg1: i32, %arg2: memref<1x6x6x32xbf16, #tpu.memory_space<vmem>>, %arg3: memref<9x32x32xbf16, #tpu.memory_space<vmem>>, %arg4: memref<1x32xf32, #tpu.memory_space<vmem>>, %arg5: memref<1x32xf32, #tpu.memory_space<vmem>>, %arg6: memref<1x4x4x32xbf16, #tpu.memory_space<vmem>>, %arg7: memref<1x2x32xf32, #tpu.memory_space<vmem>>) attributes {dimension_semantics = [#tpu.dimension_semantics<parallel>, #tpu.dimension_semantics<parallel>], iteration_bounds = array<i64: 2, 1>, scalar_prefetch = 0 : i64, scratch_operands = 0 : i64, tpu.core_type = #tpu.core_type<tc>, window_params = [{transform_indices = @transform_0, window_bounds = array<i64: 1, 6, 6, 32>}, {pipeline_mode = #tpu.pipeline_mode<synchronous>, transform_indices = @transform_1, window_bounds = array<i64: 9, 32, 32>}, {pipeline_mode = #tpu.pipeline_mode<synchronous>, transform_indices = @transform_2, window_bounds = array<i64: 1, 32>}, {pipeline_mode = #tpu.pipeline_mode<synchronous>, transform_indices = @transform_3, window_bounds = array<i64: 1, 32>}, {transform_indices = @transform_4, window_bounds = array<i64: 1, 4, 4, 32>}, {transform_indices = @transform_5, window_bounds = array<i64: 1, 2, 32>}]} {
    %c4_i32 = arith.constant 4 : i32
    %0 = arith.muli %arg1, %c4_i32 : i32
    %c0 = arith.constant 0 : index
    %c0_0 = arith.constant 0 : index
    %1 = vector.load %arg4[%c0, %c0_0] : memref<1x32xf32, #tpu.memory_space<vmem>>, vector<1x32xf32>
    %2 = vector.shape_cast %1 : vector<1x32xf32> to vector<1x32xf32>
    %3 = vector.broadcast %2 : vector<1x32xf32> to vector<4x32xf32>
    %c0_1 = arith.constant 0 : index
    %c0_2 = arith.constant 0 : index
    %4 = vector.load %arg5[%c0_1, %c0_2] : memref<1x32xf32, #tpu.memory_space<vmem>>, vector<1x32xf32>
    %5 = vector.shape_cast %4 : vector<1x32xf32> to vector<1x32xf32>
    %6 = vector.broadcast %5 : vector<1x32xf32> to vector<4x32xf32>
    %cst = arith.constant 0.000000e+00 : f32
    %7 = vector.broadcast %cst : f32 to vector<1x32xf32>
    %cst_3 = arith.constant 0.000000e+00 : f32
    %8 = vector.broadcast %cst_3 : f32 to vector<1x32xf32>
    %c0_i32 = arith.constant 0 : i32
    %c4_i32_4 = arith.constant 4 : i32
    %9 = arith.addi %c0_i32, %c4_i32_4 : i32
    %c1_i32 = arith.constant 1 : i32
    %10:2 = scf.for %arg8 = %c0_i32 to %9 step %c1_i32 iter_args(%arg9 = %7, %arg10 = %8) -> (vector<1x32xf32>, vector<1x32xf32>)  : i32 {
      %cst_11 = arith.constant 0.000000e+00 : f32
      %17 = vector.broadcast %cst_11 : f32 to vector<4x32xf32>
      %18 = arith.addi %0, %arg8 : i32
      %c0_i32_12 = arith.constant 0 : i32
      %19 = arith.addi %18, %c0_i32_12 : i32
      %c0_13 = arith.constant 0 : index
      %20 = arith.index_cast %19 : i32 to index
      %c0_14 = arith.constant 0 : index
      %c0_15 = arith.constant 0 : index
      %21 = vector.load %arg2[%c0_13, %20, %c0_14, %c0_15] : memref<1x6x6x32xbf16, #tpu.memory_space<vmem>>, vector<1x1x4x32xbf16>
      %22 = vector.shape_cast %21 : vector<1x1x4x32xbf16> to vector<4x32xbf16>
      %23 = arith.extf %22 : vector<4x32xbf16> to vector<4x32xf32>
      %24 = arith.mulf %23, %3 : vector<4x32xf32>
      %25 = arith.addf %24, %6 : vector<4x32xf32>
      %cst_16 = arith.constant 0.000000e+00 : f32
      %26 = vector.broadcast %cst_16 : f32 to vector<4x32xf32>
      %27 = arith.maximumf %25, %26 : vector<4x32xf32>
      %28 = arith.truncf %27 : vector<4x32xf32> to vector<4x32xbf16>
      %c0_17 = arith.constant 0 : index
      %c0_18 = arith.constant 0 : index
      %c0_19 = arith.constant 0 : index
      %29 = vector.load %arg3[%c0_17, %c0_18, %c0_19] : memref<9x32x32xbf16, #tpu.memory_space<vmem>>, vector<1x32x32xbf16>
      %30 = vector.shape_cast %29 : vector<1x32x32xbf16> to vector<32x32xbf16>
      %cst_20 = arith.constant dense<0.000000e+00> : vector<4x32xf32>
      %31 = tpu.matmul %28, %30, %cst_20 {dimension_numbers = #tpu.dot_dimension_numbers<[1], [0], [0], [1], [0, 0, 1, 1], [], []>} : vector<4x32xbf16>, vector<32x32xbf16>, vector<4x32xf32> -> vector<4x32xf32>
      %32 = arith.addf %17, %31 : vector<4x32xf32>
      %33 = arith.addi %0, %arg8 : i32
      %c0_i32_21 = arith.constant 0 : i32
      %34 = arith.addi %33, %c0_i32_21 : i32
      %c0_22 = arith.constant 0 : index
      %35 = arith.index_cast %34 : i32 to index
      %c1_23 = arith.constant 1 : index
      %c0_24 = arith.constant 0 : index
      %36 = vector.load %arg2[%c0_22, %35, %c1_23, %c0_24] : memref<1x6x6x32xbf16, #tpu.memory_space<vmem>>, vector<1x1x4x32xbf16>
      %37 = vector.shape_cast %36 : vector<1x1x4x32xbf16> to vector<4x32xbf16>
      %38 = arith.extf %37 : vector<4x32xbf16> to vector<4x32xf32>
      %39 = arith.mulf %38, %3 : vector<4x32xf32>
      %40 = arith.addf %39, %6 : vector<4x32xf32>
      %cst_25 = arith.constant 0.000000e+00 : f32
      %41 = vector.broadcast %cst_25 : f32 to vector<4x32xf32>
      %42 = arith.maximumf %40, %41 : vector<4x32xf32>
      %43 = arith.truncf %42 : vector<4x32xf32> to vector<4x32xbf16>
      %c1_26 = arith.constant 1 : index
      %c0_27 = arith.constant 0 : index
      %c0_28 = arith.constant 0 : index
      %44 = vector.load %arg3[%c1_26, %c0_27, %c0_28] : memref<9x32x32xbf16, #tpu.memory_space<vmem>>, vector<1x32x32xbf16>
      %45 = vector.shape_cast %44 : vector<1x32x32xbf16> to vector<32x32xbf16>
      %cst_29 = arith.constant dense<0.000000e+00> : vector<4x32xf32>
      %46 = tpu.matmul %43, %45, %cst_29 {dimension_numbers = #tpu.dot_dimension_numbers<[1], [0], [0], [1], [0, 0, 1, 1], [], []>} : vector<4x32xbf16>, vector<32x32xbf16>, vector<4x32xf32> -> vector<4x32xf32>
      %47 = arith.addf %32, %46 : vector<4x32xf32>
      %48 = arith.addi %0, %arg8 : i32
      %c0_i32_30 = arith.constant 0 : i32
      %49 = arith.addi %48, %c0_i32_30 : i32
      %c0_31 = arith.constant 0 : index
      %50 = arith.index_cast %49 : i32 to index
      %c2 = arith.constant 2 : index
      %c0_32 = arith.constant 0 : index
      %51 = vector.load %arg2[%c0_31, %50, %c2, %c0_32] : memref<1x6x6x32xbf16, #tpu.memory_space<vmem>>, vector<1x1x4x32xbf16>
      %52 = vector.shape_cast %51 : vector<1x1x4x32xbf16> to vector<4x32xbf16>
      %53 = arith.extf %52 : vector<4x32xbf16> to vector<4x32xf32>
      %54 = arith.mulf %53, %3 : vector<4x32xf32>
      %55 = arith.addf %54, %6 : vector<4x32xf32>
      %cst_33 = arith.constant 0.000000e+00 : f32
      %56 = vector.broadcast %cst_33 : f32 to vector<4x32xf32>
      %57 = arith.maximumf %55, %56 : vector<4x32xf32>
      %58 = arith.truncf %57 : vector<4x32xf32> to vector<4x32xbf16>
      %c2_34 = arith.constant 2 : index
      %c0_35 = arith.constant 0 : index
      %c0_36 = arith.constant 0 : index
      %59 = vector.load %arg3[%c2_34, %c0_35, %c0_36] : memref<9x32x32xbf16, #tpu.memory_space<vmem>>, vector<1x32x32xbf16>
      %60 = vector.shape_cast %59 : vector<1x32x32xbf16> to vector<32x32xbf16>
      %cst_37 = arith.constant dense<0.000000e+00> : vector<4x32xf32>
      %61 = tpu.matmul %58, %60, %cst_37 {dimension_numbers = #tpu.dot_dimension_numbers<[1], [0], [0], [1], [0, 0, 1, 1], [], []>} : vector<4x32xbf16>, vector<32x32xbf16>, vector<4x32xf32> -> vector<4x32xf32>
      %62 = arith.addf %47, %61 : vector<4x32xf32>
      %63 = arith.addi %0, %arg8 : i32
      %c1_i32_38 = arith.constant 1 : i32
      %64 = arith.addi %63, %c1_i32_38 : i32
      %c0_39 = arith.constant 0 : index
      %65 = arith.index_cast %64 : i32 to index
      %c0_40 = arith.constant 0 : index
      %c0_41 = arith.constant 0 : index
      %66 = vector.load %arg2[%c0_39, %65, %c0_40, %c0_41] : memref<1x6x6x32xbf16, #tpu.memory_space<vmem>>, vector<1x1x4x32xbf16>
      %67 = vector.shape_cast %66 : vector<1x1x4x32xbf16> to vector<4x32xbf16>
      %68 = arith.extf %67 : vector<4x32xbf16> to vector<4x32xf32>
      %69 = arith.mulf %68, %3 : vector<4x32xf32>
      %70 = arith.addf %69, %6 : vector<4x32xf32>
      %cst_42 = arith.constant 0.000000e+00 : f32
      %71 = vector.broadcast %cst_42 : f32 to vector<4x32xf32>
      %72 = arith.maximumf %70, %71 : vector<4x32xf32>
      %73 = arith.truncf %72 : vector<4x32xf32> to vector<4x32xbf16>
      %c3 = arith.constant 3 : index
      %c0_43 = arith.constant 0 : index
      %c0_44 = arith.constant 0 : index
      %74 = vector.load %arg3[%c3, %c0_43, %c0_44] : memref<9x32x32xbf16, #tpu.memory_space<vmem>>, vector<1x32x32xbf16>
      %75 = vector.shape_cast %74 : vector<1x32x32xbf16> to vector<32x32xbf16>
      %cst_45 = arith.constant dense<0.000000e+00> : vector<4x32xf32>
      %76 = tpu.matmul %73, %75, %cst_45 {dimension_numbers = #tpu.dot_dimension_numbers<[1], [0], [0], [1], [0, 0, 1, 1], [], []>} : vector<4x32xbf16>, vector<32x32xbf16>, vector<4x32xf32> -> vector<4x32xf32>
      %77 = arith.addf %62, %76 : vector<4x32xf32>
      %78 = arith.addi %0, %arg8 : i32
      %c1_i32_46 = arith.constant 1 : i32
      %79 = arith.addi %78, %c1_i32_46 : i32
      %c0_47 = arith.constant 0 : index
      %80 = arith.index_cast %79 : i32 to index
      %c1_48 = arith.constant 1 : index
      %c0_49 = arith.constant 0 : index
      %81 = vector.load %arg2[%c0_47, %80, %c1_48, %c0_49] : memref<1x6x6x32xbf16, #tpu.memory_space<vmem>>, vector<1x1x4x32xbf16>
      %82 = vector.shape_cast %81 : vector<1x1x4x32xbf16> to vector<4x32xbf16>
      %83 = arith.extf %82 : vector<4x32xbf16> to vector<4x32xf32>
      %84 = arith.mulf %83, %3 : vector<4x32xf32>
      %85 = arith.addf %84, %6 : vector<4x32xf32>
      %cst_50 = arith.constant 0.000000e+00 : f32
      %86 = vector.broadcast %cst_50 : f32 to vector<4x32xf32>
      %87 = arith.maximumf %85, %86 : vector<4x32xf32>
      %88 = arith.truncf %87 : vector<4x32xf32> to vector<4x32xbf16>
      %c4 = arith.constant 4 : index
      %c0_51 = arith.constant 0 : index
      %c0_52 = arith.constant 0 : index
      %89 = vector.load %arg3[%c4, %c0_51, %c0_52] : memref<9x32x32xbf16, #tpu.memory_space<vmem>>, vector<1x32x32xbf16>
      %90 = vector.shape_cast %89 : vector<1x32x32xbf16> to vector<32x32xbf16>
      %cst_53 = arith.constant dense<0.000000e+00> : vector<4x32xf32>
      %91 = tpu.matmul %88, %90, %cst_53 {dimension_numbers = #tpu.dot_dimension_numbers<[1], [0], [0], [1], [0, 0, 1, 1], [], []>} : vector<4x32xbf16>, vector<32x32xbf16>, vector<4x32xf32> -> vector<4x32xf32>
      %92 = arith.addf %77, %91 : vector<4x32xf32>
      %93 = arith.addi %0, %arg8 : i32
      %c1_i32_54 = arith.constant 1 : i32
      %94 = arith.addi %93, %c1_i32_54 : i32
      %c0_55 = arith.constant 0 : index
      %95 = arith.index_cast %94 : i32 to index
      %c2_56 = arith.constant 2 : index
      %c0_57 = arith.constant 0 : index
      %96 = vector.load %arg2[%c0_55, %95, %c2_56, %c0_57] : memref<1x6x6x32xbf16, #tpu.memory_space<vmem>>, vector<1x1x4x32xbf16>
      %97 = vector.shape_cast %96 : vector<1x1x4x32xbf16> to vector<4x32xbf16>
      %98 = arith.extf %97 : vector<4x32xbf16> to vector<4x32xf32>
      %99 = arith.mulf %98, %3 : vector<4x32xf32>
      %100 = arith.addf %99, %6 : vector<4x32xf32>
      %cst_58 = arith.constant 0.000000e+00 : f32
      %101 = vector.broadcast %cst_58 : f32 to vector<4x32xf32>
      %102 = arith.maximumf %100, %101 : vector<4x32xf32>
      %103 = arith.truncf %102 : vector<4x32xf32> to vector<4x32xbf16>
      %c5 = arith.constant 5 : index
      %c0_59 = arith.constant 0 : index
      %c0_60 = arith.constant 0 : index
      %104 = vector.load %arg3[%c5, %c0_59, %c0_60] : memref<9x32x32xbf16, #tpu.memory_space<vmem>>, vector<1x32x32xbf16>
      %105 = vector.shape_cast %104 : vector<1x32x32xbf16> to vector<32x32xbf16>
      %cst_61 = arith.constant dense<0.000000e+00> : vector<4x32xf32>
      %106 = tpu.matmul %103, %105, %cst_61 {dimension_numbers = #tpu.dot_dimension_numbers<[1], [0], [0], [1], [0, 0, 1, 1], [], []>} : vector<4x32xbf16>, vector<32x32xbf16>, vector<4x32xf32> -> vector<4x32xf32>
      %107 = arith.addf %92, %106 : vector<4x32xf32>
      %108 = arith.addi %0, %arg8 : i32
      %c2_i32 = arith.constant 2 : i32
      %109 = arith.addi %108, %c2_i32 : i32
      %c0_62 = arith.constant 0 : index
      %110 = arith.index_cast %109 : i32 to index
      %c0_63 = arith.constant 0 : index
      %c0_64 = arith.constant 0 : index
      %111 = vector.load %arg2[%c0_62, %110, %c0_63, %c0_64] : memref<1x6x6x32xbf16, #tpu.memory_space<vmem>>, vector<1x1x4x32xbf16>
      %112 = vector.shape_cast %111 : vector<1x1x4x32xbf16> to vector<4x32xbf16>
      %113 = arith.extf %112 : vector<4x32xbf16> to vector<4x32xf32>
      %114 = arith.mulf %113, %3 : vector<4x32xf32>
      %115 = arith.addf %114, %6 : vector<4x32xf32>
      %cst_65 = arith.constant 0.000000e+00 : f32
      %116 = vector.broadcast %cst_65 : f32 to vector<4x32xf32>
      %117 = arith.maximumf %115, %116 : vector<4x32xf32>
      %118 = arith.truncf %117 : vector<4x32xf32> to vector<4x32xbf16>
      %c6 = arith.constant 6 : index
      %c0_66 = arith.constant 0 : index
      %c0_67 = arith.constant 0 : index
      %119 = vector.load %arg3[%c6, %c0_66, %c0_67] : memref<9x32x32xbf16, #tpu.memory_space<vmem>>, vector<1x32x32xbf16>
      %120 = vector.shape_cast %119 : vector<1x32x32xbf16> to vector<32x32xbf16>
      %cst_68 = arith.constant dense<0.000000e+00> : vector<4x32xf32>
      %121 = tpu.matmul %118, %120, %cst_68 {dimension_numbers = #tpu.dot_dimension_numbers<[1], [0], [0], [1], [0, 0, 1, 1], [], []>} : vector<4x32xbf16>, vector<32x32xbf16>, vector<4x32xf32> -> vector<4x32xf32>
      %122 = arith.addf %107, %121 : vector<4x32xf32>
      %123 = arith.addi %0, %arg8 : i32
      %c2_i32_69 = arith.constant 2 : i32
      %124 = arith.addi %123, %c2_i32_69 : i32
      %c0_70 = arith.constant 0 : index
      %125 = arith.index_cast %124 : i32 to index
      %c1_71 = arith.constant 1 : index
      %c0_72 = arith.constant 0 : index
      %126 = vector.load %arg2[%c0_70, %125, %c1_71, %c0_72] : memref<1x6x6x32xbf16, #tpu.memory_space<vmem>>, vector<1x1x4x32xbf16>
      %127 = vector.shape_cast %126 : vector<1x1x4x32xbf16> to vector<4x32xbf16>
      %128 = arith.extf %127 : vector<4x32xbf16> to vector<4x32xf32>
      %129 = arith.mulf %128, %3 : vector<4x32xf32>
      %130 = arith.addf %129, %6 : vector<4x32xf32>
      %cst_73 = arith.constant 0.000000e+00 : f32
      %131 = vector.broadcast %cst_73 : f32 to vector<4x32xf32>
      %132 = arith.maximumf %130, %131 : vector<4x32xf32>
      %133 = arith.truncf %132 : vector<4x32xf32> to vector<4x32xbf16>
      %c7 = arith.constant 7 : index
      %c0_74 = arith.constant 0 : index
      %c0_75 = arith.constant 0 : index
      %134 = vector.load %arg3[%c7, %c0_74, %c0_75] : memref<9x32x32xbf16, #tpu.memory_space<vmem>>, vector<1x32x32xbf16>
      %135 = vector.shape_cast %134 : vector<1x32x32xbf16> to vector<32x32xbf16>
      %cst_76 = arith.constant dense<0.000000e+00> : vector<4x32xf32>
      %136 = tpu.matmul %133, %135, %cst_76 {dimension_numbers = #tpu.dot_dimension_numbers<[1], [0], [0], [1], [0, 0, 1, 1], [], []>} : vector<4x32xbf16>, vector<32x32xbf16>, vector<4x32xf32> -> vector<4x32xf32>
      %137 = arith.addf %122, %136 : vector<4x32xf32>
      %138 = arith.addi %0, %arg8 : i32
      %c2_i32_77 = arith.constant 2 : i32
      %139 = arith.addi %138, %c2_i32_77 : i32
      %c0_78 = arith.constant 0 : index
      %140 = arith.index_cast %139 : i32 to index
      %c2_79 = arith.constant 2 : index
      %c0_80 = arith.constant 0 : index
      %141 = vector.load %arg2[%c0_78, %140, %c2_79, %c0_80] : memref<1x6x6x32xbf16, #tpu.memory_space<vmem>>, vector<1x1x4x32xbf16>
      %142 = vector.shape_cast %141 : vector<1x1x4x32xbf16> to vector<4x32xbf16>
      %143 = arith.extf %142 : vector<4x32xbf16> to vector<4x32xf32>
      %144 = arith.mulf %143, %3 : vector<4x32xf32>
      %145 = arith.addf %144, %6 : vector<4x32xf32>
      %cst_81 = arith.constant 0.000000e+00 : f32
      %146 = vector.broadcast %cst_81 : f32 to vector<4x32xf32>
      %147 = arith.maximumf %145, %146 : vector<4x32xf32>
      %148 = arith.truncf %147 : vector<4x32xf32> to vector<4x32xbf16>
      %c8 = arith.constant 8 : index
      %c0_82 = arith.constant 0 : index
      %c0_83 = arith.constant 0 : index
      %149 = vector.load %arg3[%c8, %c0_82, %c0_83] : memref<9x32x32xbf16, #tpu.memory_space<vmem>>, vector<1x32x32xbf16>
      %150 = vector.shape_cast %149 : vector<1x32x32xbf16> to vector<32x32xbf16>
      %cst_84 = arith.constant dense<0.000000e+00> : vector<4x32xf32>
      %151 = tpu.matmul %148, %150, %cst_84 {dimension_numbers = #tpu.dot_dimension_numbers<[1], [0], [0], [1], [0, 0, 1, 1], [], []>} : vector<4x32xbf16>, vector<32x32xbf16>, vector<4x32xf32> -> vector<4x32xf32>
      %152 = arith.addf %137, %151 : vector<4x32xf32>
      %153 = arith.truncf %152 : vector<4x32xf32> to vector<4x32xbf16>
      %c0_85 = arith.constant 0 : index
      %154 = arith.index_cast %arg8 : i32 to index
      %c0_86 = arith.constant 0 : index
      %c0_87 = arith.constant 0 : index
      %155 = vector.load %arg6[%c0_85, %154, %c0_86, %c0_87] : memref<1x4x4x32xbf16, #tpu.memory_space<vmem>>, vector<1x1x4x32xbf16>
      %156 = vector.shape_cast %155 : vector<1x1x4x32xbf16> to vector<4x32xbf16>
      %157 = vector.shape_cast %153 : vector<4x32xbf16> to vector<1x1x4x32xbf16>
      tpu.vector_store %arg6[%c0_85, %154, %c0_86, %c0_87], %157 {strides = array<i32>} : memref<1x4x4x32xbf16, #tpu.memory_space<vmem>>, vector<1x1x4x32xbf16>,
      %cst_88 = arith.constant dense<0.000000e+00> : vector<32xf32>
      %158 = vector.multi_reduction <add>, %152, %cst_88 [0] : vector<4x32xf32> to vector<32xf32>
      %159 = vector.shape_cast %158 : vector<32xf32> to vector<1x32xf32>
      %160 = arith.addf %arg9, %159 : vector<1x32xf32>
      %161 = arith.mulf %152, %152 : vector<4x32xf32>
      %cst_89 = arith.constant dense<0.000000e+00> : vector<32xf32>
      %162 = vector.multi_reduction <add>, %161, %cst_89 [0] : vector<4x32xf32> to vector<32xf32>
      %163 = vector.shape_cast %162 : vector<32xf32> to vector<1x32xf32>
      %164 = arith.addf %arg10, %163 : vector<1x32xf32>
      scf.yield %160, %164 : vector<1x32xf32>, vector<1x32xf32>
    }
    %c4_i32_5 = arith.constant 4 : i32
    %c0_6 = arith.constant 0 : index
    %c0_7 = arith.constant 0 : index
    %c0_8 = arith.constant 0 : index
    %11 = vector.load %arg7[%c0_6, %c0_7, %c0_8] : memref<1x2x32xf32, #tpu.memory_space<vmem>>, vector<1x1x32xf32>
    %12 = vector.shape_cast %11 : vector<1x1x32xf32> to vector<1x32xf32>
    %13 = vector.shape_cast %10#0 : vector<1x32xf32> to vector<1x1x32xf32>
    tpu.vector_store %arg7[%c0_6, %c0_7, %c0_8], %13 {strides = array<i32>} : memref<1x2x32xf32, #tpu.memory_space<vmem>>, vector<1x1x32xf32>,
    %c0_9 = arith.constant 0 : index
    %c1 = arith.constant 1 : index
    %c0_10 = arith.constant 0 : index
    %14 = vector.load %arg7[%c0_9, %c1, %c0_10] : memref<1x2x32xf32, #tpu.memory_space<vmem>>, vector<1x1x32xf32>
    %15 = vector.shape_cast %14 : vector<1x1x32xf32> to vector<1x32xf32>
    %16 = vector.shape_cast %10#1 : vector<1x32xf32> to vector<1x1x32xf32>
    tpu.vector_store %arg7[%c0_9, %c1, %c0_10], %16 {strides = array<i32>} : memref<1x2x32xf32, #tpu.memory_space<vmem>>, vector<1x1x32xf32>,
    return
  }
  func.func @transform_0(%arg0: i32, %arg1: i32) -> (i32, i32, i32, i32) {
    %c0_i32 = arith.constant 0 : i32
    %c0_i32_0 = arith.constant 0 : i32
    %c0_i32_1 = arith.constant 0 : i32
    %c0_i32_2 = arith.constant 0 : i32
    return %arg0, %c0_i32, %c0_i32_0, %c0_i32_1 : i32, i32, i32, i32
  }
  func.func @transform_1(%arg0: i32, %arg1: i32) -> (i32, i32, i32) {
    %c0_i32 = arith.constant 0 : i32
    %c0_i32_0 = arith.constant 0 : i32
    %c0_i32_1 = arith.constant 0 : i32
    %c0_i32_2 = arith.constant 0 : i32
    return %c0_i32, %c0_i32_0, %c0_i32_1 : i32, i32, i32
  }
  func.func @transform_2(%arg0: i32, %arg1: i32) -> (i32, i32) {
    %c0_i32 = arith.constant 0 : i32
    %c0_i32_0 = arith.constant 0 : i32
    %c0_i32_1 = arith.constant 0 : i32
    return %c0_i32, %c0_i32_0 : i32, i32
  }
  func.func @transform_3(%arg0: i32, %arg1: i32) -> (i32, i32) {
    %c0_i32 = arith.constant 0 : i32
    %c0_i32_0 = arith.constant 0 : i32
    %c0_i32_1 = arith.constant 0 : i32
    return %c0_i32, %c0_i32_0 : i32, i32
  }
  func.func @transform_4(%arg0: i32, %arg1: i32) -> (i32, i32, i32, i32) {
    %c0_i32 = arith.constant 0 : i32
    %c0_i32_0 = arith.constant 0 : i32
    %c0_i32_1 = arith.constant 0 : i32
    return %arg0, %arg1, %c0_i32, %c0_i32_0 : i32, i32, i32, i32
  }
  func.func @transform_5(%arg0: i32, %arg1: i32) -> (i32, i32, i32) {
    %c1_i32 = arith.constant 1 : i32
    %0 = arith.muli %arg0, %c1_i32 : i32
    %1 = arith.addi %0, %arg1 : i32
    %c0_i32 = arith.constant 0 : i32
    %c0_i32_0 = arith.constant 0 : i32
    %c0_i32_1 = arith.constant 0 : i32
    return %1, %c0_i32, %c0_i32_0 : i32, i32, i32
  }
}

module attributes {stable_mosaic.version = 11 : i64} {
  func.func @_residual_kernel(%arg0: i32, %arg1: memref<32x32xbf16, #tpu.memory_space<vmem>>, %arg2: memref<32x32xbf16, #tpu.memory_space<vmem>>, %arg3: memref<1x32xf32, #tpu.memory_space<vmem>>, %arg4: memref<1x32xf32, #tpu.memory_space<vmem>>, %arg5: memref<32x32xbf16, #tpu.memory_space<vmem>>) attributes {dimension_semantics = [#tpu.dimension_semantics<parallel>], iteration_bounds = array<i64: 1>, scalar_prefetch = 0 : i64, scratch_operands = 0 : i64, tpu.core_type = #tpu.core_type<tc>, window_params = [{transform_indices = @transform_0, window_bounds = array<i64: 32, 32>}, {transform_indices = @transform_1, window_bounds = array<i64: 32, 32>}, {pipeline_mode = #tpu.pipeline_mode<synchronous>, transform_indices = @transform_2, window_bounds = array<i64: 1, 32>}, {pipeline_mode = #tpu.pipeline_mode<synchronous>, transform_indices = @transform_3, window_bounds = array<i64: 1, 32>}, {transform_indices = @transform_4, window_bounds = array<i64: 32, 32>}]} {
    %c0 = arith.constant 0 : index
    %c0_0 = arith.constant 0 : index
    %0 = vector.load %arg1[%c0, %c0_0] : memref<32x32xbf16, #tpu.memory_space<vmem>>, vector<32x32xbf16>
    %1 = arith.extf %0 : vector<32x32xbf16> to vector<32x32xf32>
    %c0_1 = arith.constant 0 : index
    %c0_2 = arith.constant 0 : index
    %2 = vector.load %arg3[%c0_1, %c0_2] : memref<1x32xf32, #tpu.memory_space<vmem>>, vector<1x32xf32>
    %3 = vector.broadcast %2 : vector<1x32xf32> to vector<32x32xf32>
    %4 = arith.mulf %1, %3 : vector<32x32xf32>
    %c0_3 = arith.constant 0 : index
    %c0_4 = arith.constant 0 : index
    %5 = vector.load %arg4[%c0_3, %c0_4] : memref<1x32xf32, #tpu.memory_space<vmem>>, vector<1x32xf32>
    %6 = vector.broadcast %5 : vector<1x32xf32> to vector<32x32xf32>
    %7 = arith.addf %4, %6 : vector<32x32xf32>
    %c0_5 = arith.constant 0 : index
    %c0_6 = arith.constant 0 : index
    %8 = vector.load %arg2[%c0_5, %c0_6] : memref<32x32xbf16, #tpu.memory_space<vmem>>, vector<32x32xbf16>
    %9 = arith.extf %8 : vector<32x32xbf16> to vector<32x32xf32>
    %10 = arith.addf %7, %9 : vector<32x32xf32>
    %11 = arith.truncf %10 : vector<32x32xf32> to vector<32x32xbf16>
    %c0_7 = arith.constant 0 : index
    %c0_8 = arith.constant 0 : index
    %12 = vector.load %arg5[%c0_7, %c0_8] : memref<32x32xbf16, #tpu.memory_space<vmem>>, vector<32x32xbf16>
    tpu.vector_store %arg5[%c0_7, %c0_8], %11 {strides = array<i32>} : memref<32x32xbf16, #tpu.memory_space<vmem>>, vector<32x32xbf16>,
    return
  }
  func.func @transform_0(%arg0: i32) -> (i32, i32) {
    %c0_i32 = arith.constant 0 : i32
    %c0_i32_0 = arith.constant 0 : i32
    return %arg0, %c0_i32 : i32, i32
  }
  func.func @transform_1(%arg0: i32) -> (i32, i32) {
    %c0_i32 = arith.constant 0 : i32
    %c0_i32_0 = arith.constant 0 : i32
    return %arg0, %c0_i32 : i32, i32
  }
  func.func @transform_2(%arg0: i32) -> (i32, i32) {
    %c0_i32 = arith.constant 0 : i32
    %c0_i32_0 = arith.constant 0 : i32
    %c0_i32_1 = arith.constant 0 : i32
    return %c0_i32, %c0_i32_0 : i32, i32
  }
  func.func @transform_3(%arg0: i32) -> (i32, i32) {
    %c0_i32 = arith.constant 0 : i32
    %c0_i32_0 = arith.constant 0 : i32
    %c0_i32_1 = arith.constant 0 : i32
    return %c0_i32, %c0_i32_0 : i32, i32
  }
  func.func @transform_4(%arg0: i32) -> (i32, i32) {
    %c0_i32 = arith.constant 0 : i32
    %c0_i32_0 = arith.constant 0 : i32
    return %arg0, %c0_i32 : i32, i32
  }
}

module attributes {stable_mosaic.version = 11 : i64} {
  func.func @_direct_conv_kernel(%arg0: i32, %arg1: i32, %arg2: memref<1x6x6x32xbf16, #tpu.memory_space<vmem>>, %arg3: memref<9x32x32xbf16, #tpu.memory_space<vmem>>, %arg4: memref<1x4x4x32xbf16, #tpu.memory_space<vmem>>, %arg5: memref<1x2x32xf32, #tpu.memory_space<vmem>>) attributes {dimension_semantics = [#tpu.dimension_semantics<parallel>, #tpu.dimension_semantics<parallel>], iteration_bounds = array<i64: 2, 1>, scalar_prefetch = 0 : i64, scratch_operands = 0 : i64, tpu.core_type = #tpu.core_type<tc>, window_params = [{transform_indices = @transform_0, window_bounds = array<i64: 1, 6, 6, 32>}, {pipeline_mode = #tpu.pipeline_mode<synchronous>, transform_indices = @transform_1, window_bounds = array<i64: 9, 32, 32>}, {transform_indices = @transform_2, window_bounds = array<i64: 1, 4, 4, 32>}, {transform_indices = @transform_3, window_bounds = array<i64: 1, 2, 32>}]} {
    %c4_i32 = arith.constant 4 : i32
    %0 = arith.muli %arg1, %c4_i32 : i32
    %cst = arith.constant 0.000000e+00 : f32
    %1 = vector.broadcast %cst : f32 to vector<1x32xf32>
    %cst_0 = arith.constant 0.000000e+00 : f32
    %2 = vector.broadcast %cst_0 : f32 to vector<1x32xf32>
    %c0_i32 = arith.constant 0 : i32
    %c4_i32_1 = arith.constant 4 : i32
    %3 = arith.addi %c0_i32, %c4_i32_1 : i32
    %c1_i32 = arith.constant 1 : i32
    %4:2 = scf.for %arg6 = %c0_i32 to %3 step %c1_i32 iter_args(%arg7 = %1, %arg8 = %2) -> (vector<1x32xf32>, vector<1x32xf32>)  : i32 {
      %cst_7 = arith.constant 0.000000e+00 : f32
      %11 = vector.broadcast %cst_7 : f32 to vector<4x32xf32>
      %12 = arith.addi %0, %arg6 : i32
      %c0_i32_8 = arith.constant 0 : i32
      %13 = arith.addi %12, %c0_i32_8 : i32
      %c0_9 = arith.constant 0 : index
      %14 = arith.index_cast %13 : i32 to index
      %c0_10 = arith.constant 0 : index
      %c0_11 = arith.constant 0 : index
      %15 = vector.load %arg2[%c0_9, %14, %c0_10, %c0_11] : memref<1x6x6x32xbf16, #tpu.memory_space<vmem>>, vector<1x1x4x32xbf16>
      %16 = vector.shape_cast %15 : vector<1x1x4x32xbf16> to vector<4x32xbf16>
      %c0_12 = arith.constant 0 : index
      %c0_13 = arith.constant 0 : index
      %c0_14 = arith.constant 0 : index
      %17 = vector.load %arg3[%c0_12, %c0_13, %c0_14] : memref<9x32x32xbf16, #tpu.memory_space<vmem>>, vector<1x32x32xbf16>
      %18 = vector.shape_cast %17 : vector<1x32x32xbf16> to vector<32x32xbf16>
      %cst_15 = arith.constant dense<0.000000e+00> : vector<4x32xf32>
      %19 = tpu.matmul %16, %18, %cst_15 {dimension_numbers = #tpu.dot_dimension_numbers<[1], [0], [0], [1], [0, 0, 1, 1], [], []>} : vector<4x32xbf16>, vector<32x32xbf16>, vector<4x32xf32> -> vector<4x32xf32>
      %20 = arith.addf %11, %19 : vector<4x32xf32>
      %21 = arith.addi %0, %arg6 : i32
      %c0_i32_16 = arith.constant 0 : i32
      %22 = arith.addi %21, %c0_i32_16 : i32
      %c0_17 = arith.constant 0 : index
      %23 = arith.index_cast %22 : i32 to index
      %c1_18 = arith.constant 1 : index
      %c0_19 = arith.constant 0 : index
      %24 = vector.load %arg2[%c0_17, %23, %c1_18, %c0_19] : memref<1x6x6x32xbf16, #tpu.memory_space<vmem>>, vector<1x1x4x32xbf16>
      %25 = vector.shape_cast %24 : vector<1x1x4x32xbf16> to vector<4x32xbf16>
      %c1_20 = arith.constant 1 : index
      %c0_21 = arith.constant 0 : index
      %c0_22 = arith.constant 0 : index
      %26 = vector.load %arg3[%c1_20, %c0_21, %c0_22] : memref<9x32x32xbf16, #tpu.memory_space<vmem>>, vector<1x32x32xbf16>
      %27 = vector.shape_cast %26 : vector<1x32x32xbf16> to vector<32x32xbf16>
      %cst_23 = arith.constant dense<0.000000e+00> : vector<4x32xf32>
      %28 = tpu.matmul %25, %27, %cst_23 {dimension_numbers = #tpu.dot_dimension_numbers<[1], [0], [0], [1], [0, 0, 1, 1], [], []>} : vector<4x32xbf16>, vector<32x32xbf16>, vector<4x32xf32> -> vector<4x32xf32>
      %29 = arith.addf %20, %28 : vector<4x32xf32>
      %30 = arith.addi %0, %arg6 : i32
      %c0_i32_24 = arith.constant 0 : i32
      %31 = arith.addi %30, %c0_i32_24 : i32
      %c0_25 = arith.constant 0 : index
      %32 = arith.index_cast %31 : i32 to index
      %c2 = arith.constant 2 : index
      %c0_26 = arith.constant 0 : index
      %33 = vector.load %arg2[%c0_25, %32, %c2, %c0_26] : memref<1x6x6x32xbf16, #tpu.memory_space<vmem>>, vector<1x1x4x32xbf16>
      %34 = vector.shape_cast %33 : vector<1x1x4x32xbf16> to vector<4x32xbf16>
      %c2_27 = arith.constant 2 : index
      %c0_28 = arith.constant 0 : index
      %c0_29 = arith.constant 0 : index
      %35 = vector.load %arg3[%c2_27, %c0_28, %c0_29] : memref<9x32x32xbf16, #tpu.memory_space<vmem>>, vector<1x32x32xbf16>
      %36 = vector.shape_cast %35 : vector<1x32x32xbf16> to vector<32x32xbf16>
      %cst_30 = arith.constant dense<0.000000e+00> : vector<4x32xf32>
      %37 = tpu.matmul %34, %36, %cst_30 {dimension_numbers = #tpu.dot_dimension_numbers<[1], [0], [0], [1], [0, 0, 1, 1], [], []>} : vector<4x32xbf16>, vector<32x32xbf16>, vector<4x32xf32> -> vector<4x32xf32>
      %38 = arith.addf %29, %37 : vector<4x32xf32>
      %39 = arith.addi %0, %arg6 : i32
      %c1_i32_31 = arith.constant 1 : i32
      %40 = arith.addi %39, %c1_i32_31 : i32
      %c0_32 = arith.constant 0 : index
      %41 = arith.index_cast %40 : i32 to index
      %c0_33 = arith.constant 0 : index
      %c0_34 = arith.constant 0 : index
      %42 = vector.load %arg2[%c0_32, %41, %c0_33, %c0_34] : memref<1x6x6x32xbf16, #tpu.memory_space<vmem>>, vector<1x1x4x32xbf16>
      %43 = vector.shape_cast %42 : vector<1x1x4x32xbf16> to vector<4x32xbf16>
      %c3 = arith.constant 3 : index
      %c0_35 = arith.constant 0 : index
      %c0_36 = arith.constant 0 : index
      %44 = vector.load %arg3[%c3, %c0_35, %c0_36] : memref<9x32x32xbf16, #tpu.memory_space<vmem>>, vector<1x32x32xbf16>
      %45 = vector.shape_cast %44 : vector<1x32x32xbf16> to vector<32x32xbf16>
      %cst_37 = arith.constant dense<0.000000e+00> : vector<4x32xf32>
      %46 = tpu.matmul %43, %45, %cst_37 {dimension_numbers = #tpu.dot_dimension_numbers<[1], [0], [0], [1], [0, 0, 1, 1], [], []>} : vector<4x32xbf16>, vector<32x32xbf16>, vector<4x32xf32> -> vector<4x32xf32>
      %47 = arith.addf %38, %46 : vector<4x32xf32>
      %48 = arith.addi %0, %arg6 : i32
      %c1_i32_38 = arith.constant 1 : i32
      %49 = arith.addi %48, %c1_i32_38 : i32
      %c0_39 = arith.constant 0 : index
      %50 = arith.index_cast %49 : i32 to index
      %c1_40 = arith.constant 1 : index
      %c0_41 = arith.constant 0 : index
      %51 = vector.load %arg2[%c0_39, %50, %c1_40, %c0_41] : memref<1x6x6x32xbf16, #tpu.memory_space<vmem>>, vector<1x1x4x32xbf16>
      %52 = vector.shape_cast %51 : vector<1x1x4x32xbf16> to vector<4x32xbf16>
      %c4 = arith.constant 4 : index
      %c0_42 = arith.constant 0 : index
      %c0_43 = arith.constant 0 : index
      %53 = vector.load %arg3[%c4, %c0_42, %c0_43] : memref<9x32x32xbf16, #tpu.memory_space<vmem>>, vector<1x32x32xbf16>
      %54 = vector.shape_cast %53 : vector<1x32x32xbf16> to vector<32x32xbf16>
      %cst_44 = arith.constant dense<0.000000e+00> : vector<4x32xf32>
      %55 = tpu.matmul %52, %54, %cst_44 {dimension_numbers = #tpu.dot_dimension_numbers<[1], [0], [0], [1], [0, 0, 1, 1], [], []>} : vector<4x32xbf16>, vector<32x32xbf16>, vector<4x32xf32> -> vector<4x32xf32>
      %56 = arith.addf %47, %55 : vector<4x32xf32>
      %57 = arith.addi %0, %arg6 : i32
      %c1_i32_45 = arith.constant 1 : i32
      %58 = arith.addi %57, %c1_i32_45 : i32
      %c0_46 = arith.constant 0 : index
      %59 = arith.index_cast %58 : i32 to index
      %c2_47 = arith.constant 2 : index
      %c0_48 = arith.constant 0 : index
      %60 = vector.load %arg2[%c0_46, %59, %c2_47, %c0_48] : memref<1x6x6x32xbf16, #tpu.memory_space<vmem>>, vector<1x1x4x32xbf16>
      %61 = vector.shape_cast %60 : vector<1x1x4x32xbf16> to vector<4x32xbf16>
      %c5 = arith.constant 5 : index
      %c0_49 = arith.constant 0 : index
      %c0_50 = arith.constant 0 : index
      %62 = vector.load %arg3[%c5, %c0_49, %c0_50] : memref<9x32x32xbf16, #tpu.memory_space<vmem>>, vector<1x32x32xbf16>
      %63 = vector.shape_cast %62 : vector<1x32x32xbf16> to vector<32x32xbf16>
      %cst_51 = arith.constant dense<0.000000e+00> : vector<4x32xf32>
      %64 = tpu.matmul %61, %63, %cst_51 {dimension_numbers = #tpu.dot_dimension_numbers<[1], [0], [0], [1], [0, 0, 1, 1], [], []>} : vector<4x32xbf16>, vector<32x32xbf16>, vector<4x32xf32> -> vector<4x32xf32>
      %65 = arith.addf %56, %64 : vector<4x32xf32>
      %66 = arith.addi %0, %arg6 : i32
      %c2_i32 = arith.constant 2 : i32
      %67 = arith.addi %66, %c2_i32 : i32
      %c0_52 = arith.constant 0 : index
      %68 = arith.index_cast %67 : i32 to index
      %c0_53 = arith.constant 0 : index
      %c0_54 = arith.constant 0 : index
      %69 = vector.load %arg2[%c0_52, %68, %c0_53, %c0_54] : memref<1x6x6x32xbf16, #tpu.memory_space<vmem>>, vector<1x1x4x32xbf16>
      %70 = vector.shape_cast %69 : vector<1x1x4x32xbf16> to vector<4x32xbf16>
      %c6 = arith.constant 6 : index
      %c0_55 = arith.constant 0 : index
      %c0_56 = arith.constant 0 : index
      %71 = vector.load %arg3[%c6, %c0_55, %c0_56] : memref<9x32x32xbf16, #tpu.memory_space<vmem>>, vector<1x32x32xbf16>
      %72 = vector.shape_cast %71 : vector<1x32x32xbf16> to vector<32x32xbf16>
      %cst_57 = arith.constant dense<0.000000e+00> : vector<4x32xf32>
      %73 = tpu.matmul %70, %72, %cst_57 {dimension_numbers = #tpu.dot_dimension_numbers<[1], [0], [0], [1], [0, 0, 1, 1], [], []>} : vector<4x32xbf16>, vector<32x32xbf16>, vector<4x32xf32> -> vector<4x32xf32>
      %74 = arith.addf %65, %73 : vector<4x32xf32>
      %75 = arith.addi %0, %arg6 : i32
      %c2_i32_58 = arith.constant 2 : i32
      %76 = arith.addi %75, %c2_i32_58 : i32
      %c0_59 = arith.constant 0 : index
      %77 = arith.index_cast %76 : i32 to index
      %c1_60 = arith.constant 1 : index
      %c0_61 = arith.constant 0 : index
      %78 = vector.load %arg2[%c0_59, %77, %c1_60, %c0_61] : memref<1x6x6x32xbf16, #tpu.memory_space<vmem>>, vector<1x1x4x32xbf16>
      %79 = vector.shape_cast %78 : vector<1x1x4x32xbf16> to vector<4x32xbf16>
      %c7 = arith.constant 7 : index
      %c0_62 = arith.constant 0 : index
      %c0_63 = arith.constant 0 : index
      %80 = vector.load %arg3[%c7, %c0_62, %c0_63] : memref<9x32x32xbf16, #tpu.memory_space<vmem>>, vector<1x32x32xbf16>
      %81 = vector.shape_cast %80 : vector<1x32x32xbf16> to vector<32x32xbf16>
      %cst_64 = arith.constant dense<0.000000e+00> : vector<4x32xf32>
      %82 = tpu.matmul %79, %81, %cst_64 {dimension_numbers = #tpu.dot_dimension_numbers<[1], [0], [0], [1], [0, 0, 1, 1], [], []>} : vector<4x32xbf16>, vector<32x32xbf16>, vector<4x32xf32> -> vector<4x32xf32>
      %83 = arith.addf %74, %82 : vector<4x32xf32>
      %84 = arith.addi %0, %arg6 : i32
      %c2_i32_65 = arith.constant 2 : i32
      %85 = arith.addi %84, %c2_i32_65 : i32
      %c0_66 = arith.constant 0 : index
      %86 = arith.index_cast %85 : i32 to index
      %c2_67 = arith.constant 2 : index
      %c0_68 = arith.constant 0 : index
      %87 = vector.load %arg2[%c0_66, %86, %c2_67, %c0_68] : memref<1x6x6x32xbf16, #tpu.memory_space<vmem>>, vector<1x1x4x32xbf16>
      %88 = vector.shape_cast %87 : vector<1x1x4x32xbf16> to vector<4x32xbf16>
      %c8 = arith.constant 8 : index
      %c0_69 = arith.constant 0 : index
      %c0_70 = arith.constant 0 : index
      %89 = vector.load %arg3[%c8, %c0_69, %c0_70] : memref<9x32x32xbf16, #tpu.memory_space<vmem>>, vector<1x32x32xbf16>
      %90 = vector.shape_cast %89 : vector<1x32x32xbf16> to vector<32x32xbf16>
      %cst_71 = arith.constant dense<0.000000e+00> : vector<4x32xf32>
      %91 = tpu.matmul %88, %90, %cst_71 {dimension_numbers = #tpu.dot_dimension_numbers<[1], [0], [0], [1], [0, 0, 1, 1], [], []>} : vector<4x32xbf16>, vector<32x32xbf16>, vector<4x32xf32> -> vector<4x32xf32>
      %92 = arith.addf %83, %91 : vector<4x32xf32>
      %93 = arith.truncf %92 : vector<4x32xf32> to vector<4x32xbf16>
      %c0_72 = arith.constant 0 : index
      %94 = arith.index_cast %arg6 : i32 to index
      %c0_73 = arith.constant 0 : index
      %c0_74 = arith.constant 0 : index
      %95 = vector.load %arg4[%c0_72, %94, %c0_73, %c0_74] : memref<1x4x4x32xbf16, #tpu.memory_space<vmem>>, vector<1x1x4x32xbf16>
      %96 = vector.shape_cast %95 : vector<1x1x4x32xbf16> to vector<4x32xbf16>
      %97 = vector.shape_cast %93 : vector<4x32xbf16> to vector<1x1x4x32xbf16>
      tpu.vector_store %arg4[%c0_72, %94, %c0_73, %c0_74], %97 {strides = array<i32>} : memref<1x4x4x32xbf16, #tpu.memory_space<vmem>>, vector<1x1x4x32xbf16>,
      %cst_75 = arith.constant dense<0.000000e+00> : vector<32xf32>
      %98 = vector.multi_reduction <add>, %92, %cst_75 [0] : vector<4x32xf32> to vector<32xf32>
      %99 = vector.shape_cast %98 : vector<32xf32> to vector<1x32xf32>
      %100 = arith.addf %arg7, %99 : vector<1x32xf32>
      %101 = arith.mulf %92, %92 : vector<4x32xf32>
      %cst_76 = arith.constant dense<0.000000e+00> : vector<32xf32>
      %102 = vector.multi_reduction <add>, %101, %cst_76 [0] : vector<4x32xf32> to vector<32xf32>
      %103 = vector.shape_cast %102 : vector<32xf32> to vector<1x32xf32>
      %104 = arith.addf %arg8, %103 : vector<1x32xf32>
      scf.yield %100, %104 : vector<1x32xf32>, vector<1x32xf32>
    }
    %c4_i32_2 = arith.constant 4 : i32
    %c0 = arith.constant 0 : index
    %c0_3 = arith.constant 0 : index
    %c0_4 = arith.constant 0 : index
    %5 = vector.load %arg5[%c0, %c0_3, %c0_4] : memref<1x2x32xf32, #tpu.memory_space<vmem>>, vector<1x1x32xf32>
    %6 = vector.shape_cast %5 : vector<1x1x32xf32> to vector<1x32xf32>
    %7 = vector.shape_cast %4#0 : vector<1x32xf32> to vector<1x1x32xf32>
    tpu.vector_store %arg5[%c0, %c0_3, %c0_4], %7 {strides = array<i32>} : memref<1x2x32xf32, #tpu.memory_space<vmem>>, vector<1x1x32xf32>,
    %c0_5 = arith.constant 0 : index
    %c1 = arith.constant 1 : index
    %c0_6 = arith.constant 0 : index
    %8 = vector.load %arg5[%c0_5, %c1, %c0_6] : memref<1x2x32xf32, #tpu.memory_space<vmem>>, vector<1x1x32xf32>
    %9 = vector.shape_cast %8 : vector<1x1x32xf32> to vector<1x32xf32>
    %10 = vector.shape_cast %4#1 : vector<1x32xf32> to vector<1x1x32xf32>
    tpu.vector_store %arg5[%c0_5, %c1, %c0_6], %10 {strides = array<i32>} : memref<1x2x32xf32, #tpu.memory_space<vmem>>, vector<1x1x32xf32>,
    return
  }
  func.func @transform_0(%arg0: i32, %arg1: i32) -> (i32, i32, i32, i32) {
    %c0_i32 = arith.constant 0 : i32
    %c0_i32_0 = arith.constant 0 : i32
    %c0_i32_1 = arith.constant 0 : i32
    %c0_i32_2 = arith.constant 0 : i32
    return %arg0, %c0_i32, %c0_i32_0, %c0_i32_1 : i32, i32, i32, i32
  }
  func.func @transform_1(%arg0: i32, %arg1: i32) -> (i32, i32, i32) {
    %c0_i32 = arith.constant 0 : i32
    %c0_i32_0 = arith.constant 0 : i32
    %c0_i32_1 = arith.constant 0 : i32
    %c0_i32_2 = arith.constant 0 : i32
    return %c0_i32, %c0_i32_0, %c0_i32_1 : i32, i32, i32
  }
  func.func @transform_2(%arg0: i32, %arg1: i32) -> (i32, i32, i32, i32) {
    %c0_i32 = arith.constant 0 : i32
    %c0_i32_0 = arith.constant 0 : i32
    %c0_i32_1 = arith.constant 0 : i32
    return %arg0, %arg1, %c0_i32, %c0_i32_0 : i32, i32, i32, i32
  }
  func.func @transform_3(%arg0: i32, %arg1: i32) -> (i32, i32, i32) {
    %c1_i32 = arith.constant 1 : i32
    %0 = arith.muli %arg0, %c1_i32 : i32
    %1 = arith.addi %0, %arg1 : i32
    %c0_i32 = arith.constant 0 : i32
    %c0_i32_0 = arith.constant 0 : i32
    %c0_i32_1 = arith.constant 0 : i32
    return %1, %c0_i32, %c0_i32_0 : i32, i32, i32
  }
}

module attributes {stable_mosaic.version = 11 : i64} {
  func.func @_direct_conv_kernel(%arg0: i32, %arg1: i32, %arg2: memref<1x5x5x32xbf16, #tpu.memory_space<vmem>>, %arg3: memref<4x32x64xbf16, #tpu.memory_space<vmem>>, %arg4: memref<1x4x4x64xbf16, #tpu.memory_space<vmem>>, %arg5: memref<1x2x64xf32, #tpu.memory_space<vmem>>) attributes {dimension_semantics = [#tpu.dimension_semantics<parallel>, #tpu.dimension_semantics<parallel>], iteration_bounds = array<i64: 2, 1>, scalar_prefetch = 0 : i64, scratch_operands = 0 : i64, tpu.core_type = #tpu.core_type<tc>, window_params = [{transform_indices = @transform_0, window_bounds = array<i64: 1, 5, 5, 32>}, {pipeline_mode = #tpu.pipeline_mode<synchronous>, transform_indices = @transform_1, window_bounds = array<i64: 4, 32, 64>}, {transform_indices = @transform_2, window_bounds = array<i64: 1, 4, 4, 64>}, {transform_indices = @transform_3, window_bounds = array<i64: 1, 2, 64>}]} {
    %c4_i32 = arith.constant 4 : i32
    %0 = arith.muli %arg1, %c4_i32 : i32
    %cst = arith.constant 0.000000e+00 : f32
    %1 = vector.broadcast %cst : f32 to vector<1x64xf32>
    %cst_0 = arith.constant 0.000000e+00 : f32
    %2 = vector.broadcast %cst_0 : f32 to vector<1x64xf32>
    %c0_i32 = arith.constant 0 : i32
    %c4_i32_1 = arith.constant 4 : i32
    %3 = arith.addi %c0_i32, %c4_i32_1 : i32
    %c1_i32 = arith.constant 1 : i32
    %4:2 = scf.for %arg6 = %c0_i32 to %3 step %c1_i32 iter_args(%arg7 = %1, %arg8 = %2) -> (vector<1x64xf32>, vector<1x64xf32>)  : i32 {
      %cst_7 = arith.constant 0.000000e+00 : f32
      %11 = vector.broadcast %cst_7 : f32 to vector<4x64xf32>
      %12 = arith.addi %0, %arg6 : i32
      %c0_i32_8 = arith.constant 0 : i32
      %13 = arith.addi %12, %c0_i32_8 : i32
      %c0_9 = arith.constant 0 : index
      %14 = arith.index_cast %13 : i32 to index
      %c0_10 = arith.constant 0 : index
      %c0_11 = arith.constant 0 : index
      %15 = vector.load %arg2[%c0_9, %14, %c0_10, %c0_11] : memref<1x5x5x32xbf16, #tpu.memory_space<vmem>>, vector<1x1x4x32xbf16>
      %16 = vector.shape_cast %15 : vector<1x1x4x32xbf16> to vector<4x32xbf16>
      %c0_12 = arith.constant 0 : index
      %c0_13 = arith.constant 0 : index
      %c0_14 = arith.constant 0 : index
      %17 = vector.load %arg3[%c0_12, %c0_13, %c0_14] : memref<4x32x64xbf16, #tpu.memory_space<vmem>>, vector<1x32x64xbf16>
      %18 = vector.shape_cast %17 : vector<1x32x64xbf16> to vector<32x64xbf16>
      %cst_15 = arith.constant dense<0.000000e+00> : vector<4x64xf32>
      %19 = tpu.matmul %16, %18, %cst_15 {dimension_numbers = #tpu.dot_dimension_numbers<[1], [0], [0], [1], [0, 0, 1, 1], [], []>} : vector<4x32xbf16>, vector<32x64xbf16>, vector<4x64xf32> -> vector<4x64xf32>
      %20 = arith.addf %11, %19 : vector<4x64xf32>
      %21 = arith.addi %0, %arg6 : i32
      %c0_i32_16 = arith.constant 0 : i32
      %22 = arith.addi %21, %c0_i32_16 : i32
      %c0_17 = arith.constant 0 : index
      %23 = arith.index_cast %22 : i32 to index
      %c1_18 = arith.constant 1 : index
      %c0_19 = arith.constant 0 : index
      %24 = vector.load %arg2[%c0_17, %23, %c1_18, %c0_19] : memref<1x5x5x32xbf16, #tpu.memory_space<vmem>>, vector<1x1x4x32xbf16>
      %25 = vector.shape_cast %24 : vector<1x1x4x32xbf16> to vector<4x32xbf16>
      %c1_20 = arith.constant 1 : index
      %c0_21 = arith.constant 0 : index
      %c0_22 = arith.constant 0 : index
      %26 = vector.load %arg3[%c1_20, %c0_21, %c0_22] : memref<4x32x64xbf16, #tpu.memory_space<vmem>>, vector<1x32x64xbf16>
      %27 = vector.shape_cast %26 : vector<1x32x64xbf16> to vector<32x64xbf16>
      %cst_23 = arith.constant dense<0.000000e+00> : vector<4x64xf32>
      %28 = tpu.matmul %25, %27, %cst_23 {dimension_numbers = #tpu.dot_dimension_numbers<[1], [0], [0], [1], [0, 0, 1, 1], [], []>} : vector<4x32xbf16>, vector<32x64xbf16>, vector<4x64xf32> -> vector<4x64xf32>
      %29 = arith.addf %20, %28 : vector<4x64xf32>
      %30 = arith.addi %0, %arg6 : i32
      %c1_i32_24 = arith.constant 1 : i32
      %31 = arith.addi %30, %c1_i32_24 : i32
      %c0_25 = arith.constant 0 : index
      %32 = arith.index_cast %31 : i32 to index
      %c0_26 = arith.constant 0 : index
      %c0_27 = arith.constant 0 : index
      %33 = vector.load %arg2[%c0_25, %32, %c0_26, %c0_27] : memref<1x5x5x32xbf16, #tpu.memory_space<vmem>>, vector<1x1x4x32xbf16>
      %34 = vector.shape_cast %33 : vector<1x1x4x32xbf16> to vector<4x32xbf16>
      %c2 = arith.constant 2 : index
      %c0_28 = arith.constant 0 : index
      %c0_29 = arith.constant 0 : index
      %35 = vector.load %arg3[%c2, %c0_28, %c0_29] : memref<4x32x64xbf16, #tpu.memory_space<vmem>>, vector<1x32x64xbf16>
      %36 = vector.shape_cast %35 : vector<1x32x64xbf16> to vector<32x64xbf16>
      %cst_30 = arith.constant dense<0.000000e+00> : vector<4x64xf32>
      %37 = tpu.matmul %34, %36, %cst_30 {dimension_numbers = #tpu.dot_dimension_numbers<[1], [0], [0], [1], [0, 0, 1, 1], [], []>} : vector<4x32xbf16>, vector<32x64xbf16>, vector<4x64xf32> -> vector<4x64xf32>
      %38 = arith.addf %29, %37 : vector<4x64xf32>
      %39 = arith.addi %0, %arg6 : i32
      %c1_i32_31 = arith.constant 1 : i32
      %40 = arith.addi %39, %c1_i32_31 : i32
      %c0_32 = arith.constant 0 : index
      %41 = arith.index_cast %40 : i32 to index
      %c1_33 = arith.constant 1 : index
      %c0_34 = arith.constant 0 : index
      %42 = vector.load %arg2[%c0_32, %41, %c1_33, %c0_34] : memref<1x5x5x32xbf16, #tpu.memory_space<vmem>>, vector<1x1x4x32xbf16>
      %43 = vector.shape_cast %42 : vector<1x1x4x32xbf16> to vector<4x32xbf16>
      %c3 = arith.constant 3 : index
      %c0_35 = arith.constant 0 : index
      %c0_36 = arith.constant 0 : index
      %44 = vector.load %arg3[%c3, %c0_35, %c0_36] : memref<4x32x64xbf16, #tpu.memory_space<vmem>>, vector<1x32x64xbf16>
      %45 = vector.shape_cast %44 : vector<1x32x64xbf16> to vector<32x64xbf16>
      %cst_37 = arith.constant dense<0.000000e+00> : vector<4x64xf32>
      %46 = tpu.matmul %43, %45, %cst_37 {dimension_numbers = #tpu.dot_dimension_numbers<[1], [0], [0], [1], [0, 0, 1, 1], [], []>} : vector<4x32xbf16>, vector<32x64xbf16>, vector<4x64xf32> -> vector<4x64xf32>
      %47 = arith.addf %38, %46 : vector<4x64xf32>
      %48 = arith.truncf %47 : vector<4x64xf32> to vector<4x64xbf16>
      %c0_38 = arith.constant 0 : index
      %49 = arith.index_cast %arg6 : i32 to index
      %c0_39 = arith.constant 0 : index
      %c0_40 = arith.constant 0 : index
      %50 = vector.load %arg4[%c0_38, %49, %c0_39, %c0_40] : memref<1x4x4x64xbf16, #tpu.memory_space<vmem>>, vector<1x1x4x64xbf16>
      %51 = vector.shape_cast %50 : vector<1x1x4x64xbf16> to vector<4x64xbf16>
      %52 = vector.shape_cast %48 : vector<4x64xbf16> to vector<1x1x4x64xbf16>
      tpu.vector_store %arg4[%c0_38, %49, %c0_39, %c0_40], %52 {strides = array<i32>} : memref<1x4x4x64xbf16, #tpu.memory_space<vmem>>, vector<1x1x4x64xbf16>,
      %cst_41 = arith.constant dense<0.000000e+00> : vector<64xf32>
      %53 = vector.multi_reduction <add>, %47, %cst_41 [0] : vector<4x64xf32> to vector<64xf32>
      %54 = vector.shape_cast %53 : vector<64xf32> to vector<1x64xf32>
      %55 = arith.addf %arg7, %54 : vector<1x64xf32>
      %56 = arith.mulf %47, %47 : vector<4x64xf32>
      %cst_42 = arith.constant dense<0.000000e+00> : vector<64xf32>
      %57 = vector.multi_reduction <add>, %56, %cst_42 [0] : vector<4x64xf32> to vector<64xf32>
      %58 = vector.shape_cast %57 : vector<64xf32> to vector<1x64xf32>
      %59 = arith.addf %arg8, %58 : vector<1x64xf32>
      scf.yield %55, %59 : vector<1x64xf32>, vector<1x64xf32>
    }
    %c4_i32_2 = arith.constant 4 : i32
    %c0 = arith.constant 0 : index
    %c0_3 = arith.constant 0 : index
    %c0_4 = arith.constant 0 : index
    %5 = vector.load %arg5[%c0, %c0_3, %c0_4] : memref<1x2x64xf32, #tpu.memory_space<vmem>>, vector<1x1x64xf32>
    %6 = vector.shape_cast %5 : vector<1x1x64xf32> to vector<1x64xf32>
    %7 = vector.shape_cast %4#0 : vector<1x64xf32> to vector<1x1x64xf32>
    tpu.vector_store %arg5[%c0, %c0_3, %c0_4], %7 {strides = array<i32>} : memref<1x2x64xf32, #tpu.memory_space<vmem>>, vector<1x1x64xf32>,
    %c0_5 = arith.constant 0 : index
    %c1 = arith.constant 1 : index
    %c0_6 = arith.constant 0 : index
    %8 = vector.load %arg5[%c0_5, %c1, %c0_6] : memref<1x2x64xf32, #tpu.memory_space<vmem>>, vector<1x1x64xf32>
    %9 = vector.shape_cast %8 : vector<1x1x64xf32> to vector<1x64xf32>
    %10 = vector.shape_cast %4#1 : vector<1x64xf32> to vector<1x1x64xf32>
    tpu.vector_store %arg5[%c0_5, %c1, %c0_6], %10 {strides = array<i32>} : memref<1x2x64xf32, #tpu.memory_space<vmem>>, vector<1x1x64xf32>,
    return
  }
  func.func @transform_0(%arg0: i32, %arg1: i32) -> (i32, i32, i32, i32) {
    %c0_i32 = arith.constant 0 : i32
    %c0_i32_0 = arith.constant 0 : i32
    %c0_i32_1 = arith.constant 0 : i32
    %c0_i32_2 = arith.constant 0 : i32
    return %arg0, %c0_i32, %c0_i32_0, %c0_i32_1 : i32, i32, i32, i32
  }
  func.func @transform_1(%arg0: i32, %arg1: i32) -> (i32, i32, i32) {
    %c0_i32 = arith.constant 0 : i32
    %c0_i32_0 = arith.constant 0 : i32
    %c0_i32_1 = arith.constant 0 : i32
    %c0_i32_2 = arith.constant 0 : i32
    return %c0_i32, %c0_i32_0, %c0_i32_1 : i32, i32, i32
  }
  func.func @transform_2(%arg0: i32, %arg1: i32) -> (i32, i32, i32, i32) {
    %c0_i32 = arith.constant 0 : i32
    %c0_i32_0 = arith.constant 0 : i32
    %c0_i32_1 = arith.constant 0 : i32
    return %arg0, %arg1, %c0_i32, %c0_i32_0 : i32, i32, i32, i32
  }
  func.func @transform_3(%arg0: i32, %arg1: i32) -> (i32, i32, i32) {
    %c1_i32 = arith.constant 1 : i32
    %0 = arith.muli %arg0, %c1_i32 : i32
    %1 = arith.addi %0, %arg1 : i32
    %c0_i32 = arith.constant 0 : i32
    %c0_i32_0 = arith.constant 0 : i32
    %c0_i32_1 = arith.constant 0 : i32
    return %1, %c0_i32, %c0_i32_0 : i32, i32, i32
  }
}

module attributes {stable_mosaic.version = 11 : i64} {
  func.func @_direct_conv_kernel(%arg0: i32, %arg1: i32, %arg2: memref<1x9x9x16xbf16, #tpu.memory_space<vmem>>, %arg3: memref<4x16x32xbf16, #tpu.memory_space<vmem>>, %arg4: memref<1x8x8x32xbf16, #tpu.memory_space<vmem>>, %arg5: memref<1x2x32xf32, #tpu.memory_space<vmem>>) attributes {dimension_semantics = [#tpu.dimension_semantics<parallel>, #tpu.dimension_semantics<parallel>], iteration_bounds = array<i64: 2, 1>, scalar_prefetch = 0 : i64, scratch_operands = 0 : i64, tpu.core_type = #tpu.core_type<tc>, window_params = [{transform_indices = @transform_0, window_bounds = array<i64: 1, 9, 9, 16>}, {pipeline_mode = #tpu.pipeline_mode<synchronous>, transform_indices = @transform_1, window_bounds = array<i64: 4, 16, 32>}, {transform_indices = @transform_2, window_bounds = array<i64: 1, 8, 8, 32>}, {transform_indices = @transform_3, window_bounds = array<i64: 1, 2, 32>}]} {
    %c8_i32 = arith.constant 8 : i32
    %0 = arith.muli %arg1, %c8_i32 : i32
    %cst = arith.constant 0.000000e+00 : f32
    %1 = vector.broadcast %cst : f32 to vector<1x32xf32>
    %cst_0 = arith.constant 0.000000e+00 : f32
    %2 = vector.broadcast %cst_0 : f32 to vector<1x32xf32>
    %c0_i32 = arith.constant 0 : i32
    %c8_i32_1 = arith.constant 8 : i32
    %3 = arith.addi %c0_i32, %c8_i32_1 : i32
    %c1_i32 = arith.constant 1 : i32
    %4:2 = scf.for %arg6 = %c0_i32 to %3 step %c1_i32 iter_args(%arg7 = %1, %arg8 = %2) -> (vector<1x32xf32>, vector<1x32xf32>)  : i32 {
      %cst_7 = arith.constant 0.000000e+00 : f32
      %11 = vector.broadcast %cst_7 : f32 to vector<8x32xf32>
      %12 = arith.addi %0, %arg6 : i32
      %c0_i32_8 = arith.constant 0 : i32
      %13 = arith.addi %12, %c0_i32_8 : i32
      %c0_9 = arith.constant 0 : index
      %14 = arith.index_cast %13 : i32 to index
      %c0_10 = arith.constant 0 : index
      %c0_11 = arith.constant 0 : index
      %15 = vector.load %arg2[%c0_9, %14, %c0_10, %c0_11] : memref<1x9x9x16xbf16, #tpu.memory_space<vmem>>, vector<1x1x8x16xbf16>
      %16 = vector.shape_cast %15 : vector<1x1x8x16xbf16> to vector<8x16xbf16>
      %c0_12 = arith.constant 0 : index
      %c0_13 = arith.constant 0 : index
      %c0_14 = arith.constant 0 : index
      %17 = vector.load %arg3[%c0_12, %c0_13, %c0_14] : memref<4x16x32xbf16, #tpu.memory_space<vmem>>, vector<1x16x32xbf16>
      %18 = vector.shape_cast %17 : vector<1x16x32xbf16> to vector<16x32xbf16>
      %cst_15 = arith.constant dense<0.000000e+00> : vector<8x32xf32>
      %19 = tpu.matmul %16, %18, %cst_15 {dimension_numbers = #tpu.dot_dimension_numbers<[1], [0], [0], [1], [0, 0, 1, 1], [], []>} : vector<8x16xbf16>, vector<16x32xbf16>, vector<8x32xf32> -> vector<8x32xf32>
      %20 = arith.addf %11, %19 : vector<8x32xf32>
      %21 = arith.addi %0, %arg6 : i32
      %c0_i32_16 = arith.constant 0 : i32
      %22 = arith.addi %21, %c0_i32_16 : i32
      %c0_17 = arith.constant 0 : index
      %23 = arith.index_cast %22 : i32 to index
      %c1_18 = arith.constant 1 : index
      %c0_19 = arith.constant 0 : index
      %24 = vector.load %arg2[%c0_17, %23, %c1_18, %c0_19] : memref<1x9x9x16xbf16, #tpu.memory_space<vmem>>, vector<1x1x8x16xbf16>
      %25 = vector.shape_cast %24 : vector<1x1x8x16xbf16> to vector<8x16xbf16>
      %c1_20 = arith.constant 1 : index
      %c0_21 = arith.constant 0 : index
      %c0_22 = arith.constant 0 : index
      %26 = vector.load %arg3[%c1_20, %c0_21, %c0_22] : memref<4x16x32xbf16, #tpu.memory_space<vmem>>, vector<1x16x32xbf16>
      %27 = vector.shape_cast %26 : vector<1x16x32xbf16> to vector<16x32xbf16>
      %cst_23 = arith.constant dense<0.000000e+00> : vector<8x32xf32>
      %28 = tpu.matmul %25, %27, %cst_23 {dimension_numbers = #tpu.dot_dimension_numbers<[1], [0], [0], [1], [0, 0, 1, 1], [], []>} : vector<8x16xbf16>, vector<16x32xbf16>, vector<8x32xf32> -> vector<8x32xf32>
      %29 = arith.addf %20, %28 : vector<8x32xf32>
      %30 = arith.addi %0, %arg6 : i32
      %c1_i32_24 = arith.constant 1 : i32
      %31 = arith.addi %30, %c1_i32_24 : i32
      %c0_25 = arith.constant 0 : index
      %32 = arith.index_cast %31 : i32 to index
      %c0_26 = arith.constant 0 : index
      %c0_27 = arith.constant 0 : index
      %33 = vector.load %arg2[%c0_25, %32, %c0_26, %c0_27] : memref<1x9x9x16xbf16, #tpu.memory_space<vmem>>, vector<1x1x8x16xbf16>
      %34 = vector.shape_cast %33 : vector<1x1x8x16xbf16> to vector<8x16xbf16>
      %c2 = arith.constant 2 : index
      %c0_28 = arith.constant 0 : index
      %c0_29 = arith.constant 0 : index
      %35 = vector.load %arg3[%c2, %c0_28, %c0_29] : memref<4x16x32xbf16, #tpu.memory_space<vmem>>, vector<1x16x32xbf16>
      %36 = vector.shape_cast %35 : vector<1x16x32xbf16> to vector<16x32xbf16>
      %cst_30 = arith.constant dense<0.000000e+00> : vector<8x32xf32>
      %37 = tpu.matmul %34, %36, %cst_30 {dimension_numbers = #tpu.dot_dimension_numbers<[1], [0], [0], [1], [0, 0, 1, 1], [], []>} : vector<8x16xbf16>, vector<16x32xbf16>, vector<8x32xf32> -> vector<8x32xf32>
      %38 = arith.addf %29, %37 : vector<8x32xf32>
      %39 = arith.addi %0, %arg6 : i32
      %c1_i32_31 = arith.constant 1 : i32
      %40 = arith.addi %39, %c1_i32_31 : i32
      %c0_32 = arith.constant 0 : index
      %41 = arith.index_cast %40 : i32 to index
      %c1_33 = arith.constant 1 : index
      %c0_34 = arith.constant 0 : index
      %42 = vector.load %arg2[%c0_32, %41, %c1_33, %c0_34] : memref<1x9x9x16xbf16, #tpu.memory_space<vmem>>, vector<1x1x8x16xbf16>
      %43 = vector.shape_cast %42 : vector<1x1x8x16xbf16> to vector<8x16xbf16>
      %c3 = arith.constant 3 : index
      %c0_35 = arith.constant 0 : index
      %c0_36 = arith.constant 0 : index
      %44 = vector.load %arg3[%c3, %c0_35, %c0_36] : memref<4x16x32xbf16, #tpu.memory_space<vmem>>, vector<1x16x32xbf16>
      %45 = vector.shape_cast %44 : vector<1x16x32xbf16> to vector<16x32xbf16>
      %cst_37 = arith.constant dense<0.000000e+00> : vector<8x32xf32>
      %46 = tpu.matmul %43, %45, %cst_37 {dimension_numbers = #tpu.dot_dimension_numbers<[1], [0], [0], [1], [0, 0, 1, 1], [], []>} : vector<8x16xbf16>, vector<16x32xbf16>, vector<8x32xf32> -> vector<8x32xf32>
      %47 = arith.addf %38, %46 : vector<8x32xf32>
      %48 = arith.truncf %47 : vector<8x32xf32> to vector<8x32xbf16>
      %c0_38 = arith.constant 0 : index
      %49 = arith.index_cast %arg6 : i32 to index
      %c0_39 = arith.constant 0 : index
      %c0_40 = arith.constant 0 : index
      %50 = vector.load %arg4[%c0_38, %49, %c0_39, %c0_40] : memref<1x8x8x32xbf16, #tpu.memory_space<vmem>>, vector<1x1x8x32xbf16>
      %51 = vector.shape_cast %50 : vector<1x1x8x32xbf16> to vector<8x32xbf16>
      %52 = vector.shape_cast %48 : vector<8x32xbf16> to vector<1x1x8x32xbf16>
      tpu.vector_store %arg4[%c0_38, %49, %c0_39, %c0_40], %52 {strides = array<i32>} : memref<1x8x8x32xbf16, #tpu.memory_space<vmem>>, vector<1x1x8x32xbf16>,
      %cst_41 = arith.constant dense<0.000000e+00> : vector<32xf32>
      %53 = vector.multi_reduction <add>, %47, %cst_41 [0] : vector<8x32xf32> to vector<32xf32>
      %54 = vector.shape_cast %53 : vector<32xf32> to vector<1x32xf32>
      %55 = arith.addf %arg7, %54 : vector<1x32xf32>
      %56 = arith.mulf %47, %47 : vector<8x32xf32>
      %cst_42 = arith.constant dense<0.000000e+00> : vector<32xf32>
      %57 = vector.multi_reduction <add>, %56, %cst_42 [0] : vector<8x32xf32> to vector<32xf32>
      %58 = vector.shape_cast %57 : vector<32xf32> to vector<1x32xf32>
      %59 = arith.addf %arg8, %58 : vector<1x32xf32>
      scf.yield %55, %59 : vector<1x32xf32>, vector<1x32xf32>
    }
    %c8_i32_2 = arith.constant 8 : i32
    %c0 = arith.constant 0 : index
    %c0_3 = arith.constant 0 : index
    %c0_4 = arith.constant 0 : index
    %5 = vector.load %arg5[%c0, %c0_3, %c0_4] : memref<1x2x32xf32, #tpu.memory_space<vmem>>, vector<1x1x32xf32>
    %6 = vector.shape_cast %5 : vector<1x1x32xf32> to vector<1x32xf32>
    %7 = vector.shape_cast %4#0 : vector<1x32xf32> to vector<1x1x32xf32>
    tpu.vector_store %arg5[%c0, %c0_3, %c0_4], %7 {strides = array<i32>} : memref<1x2x32xf32, #tpu.memory_space<vmem>>, vector<1x1x32xf32>,
    %c0_5 = arith.constant 0 : index
    %c1 = arith.constant 1 : index
    %c0_6 = arith.constant 0 : index
    %8 = vector.load %arg5[%c0_5, %c1, %c0_6] : memref<1x2x32xf32, #tpu.memory_space<vmem>>, vector<1x1x32xf32>
    %9 = vector.shape_cast %8 : vector<1x1x32xf32> to vector<1x32xf32>
    %10 = vector.shape_cast %4#1 : vector<1x32xf32> to vector<1x1x32xf32>
    tpu.vector_store %arg5[%c0_5, %c1, %c0_6], %10 {strides = array<i32>} : memref<1x2x32xf32, #tpu.memory_space<vmem>>, vector<1x1x32xf32>,
    return
  }
  func.func @transform_0(%arg0: i32, %arg1: i32) -> (i32, i32, i32, i32) {
    %c0_i32 = arith.constant 0 : i32
    %c0_i32_0 = arith.constant 0 : i32
    %c0_i32_1 = arith.constant 0 : i32
    %c0_i32_2 = arith.constant 0 : i32
    return %arg0, %c0_i32, %c0_i32_0, %c0_i32_1 : i32, i32, i32, i32
  }
  func.func @transform_1(%arg0: i32, %arg1: i32) -> (i32, i32, i32) {
    %c0_i32 = arith.constant 0 : i32
    %c0_i32_0 = arith.constant 0 : i32
    %c0_i32_1 = arith.constant 0 : i32
    %c0_i32_2 = arith.constant 0 : i32
    return %c0_i32, %c0_i32_0, %c0_i32_1 : i32, i32, i32
  }
  func.func @transform_2(%arg0: i32, %arg1: i32) -> (i32, i32, i32, i32) {
    %c0_i32 = arith.constant 0 : i32
    %c0_i32_0 = arith.constant 0 : i32
    %c0_i32_1 = arith.constant 0 : i32
    return %arg0, %arg1, %c0_i32, %c0_i32_0 : i32, i32, i32, i32
  }
  func.func @transform_3(%arg0: i32, %arg1: i32) -> (i32, i32, i32) {
    %c1_i32 = arith.constant 1 : i32
    %0 = arith.muli %arg0, %c1_i32 : i32
    %1 = arith.addi %0, %arg1 : i32
    %c0_i32 = arith.constant 0 : i32
    %c0_i32_0 = arith.constant 0 : i32
    %c0_i32_1 = arith.constant 0 : i32
    return %1, %c0_i32, %c0_i32_0 : i32, i32, i32
  }
}

module attributes {stable_mosaic.version = 11 : i64} {
  func.func @_direct_conv_kernel(%arg0: i32, %arg1: i32, %arg2: memref<1x22x22x8xbf16, #tpu.memory_space<vmem>>, %arg3: memref<49x8x3xbf16, #tpu.memory_space<vmem>>, %arg4: memref<1x8xf32, #tpu.memory_space<vmem>>, %arg5: memref<1x8xf32, #tpu.memory_space<vmem>>, %arg6: memref<1x3xf32, #tpu.memory_space<vmem>>, %arg7: memref<1x16x16x3xf32, #tpu.memory_space<vmem>>) attributes {dimension_semantics = [#tpu.dimension_semantics<parallel>, #tpu.dimension_semantics<parallel>], iteration_bounds = array<i64: 2, 1>, scalar_prefetch = 0 : i64, scratch_operands = 0 : i64, tpu.core_type = #tpu.core_type<tc>, window_params = [{transform_indices = @transform_0, window_bounds = array<i64: 1, 22, 22, 8>}, {pipeline_mode = #tpu.pipeline_mode<synchronous>, transform_indices = @transform_1, window_bounds = array<i64: 49, 8, 3>}, {pipeline_mode = #tpu.pipeline_mode<synchronous>, transform_indices = @transform_2, window_bounds = array<i64: 1, 8>}, {pipeline_mode = #tpu.pipeline_mode<synchronous>, transform_indices = @transform_3, window_bounds = array<i64: 1, 8>}, {pipeline_mode = #tpu.pipeline_mode<synchronous>, transform_indices = @transform_4, window_bounds = array<i64: 1, 3>}, {transform_indices = @transform_5, window_bounds = array<i64: 1, 16, 16, 3>}]} {
    %c16_i32 = arith.constant 16 : i32
    %0 = arith.muli %arg1, %c16_i32 : i32
    %c0 = arith.constant 0 : index
    %c0_0 = arith.constant 0 : index
    %1 = vector.load %arg4[%c0, %c0_0] : memref<1x8xf32, #tpu.memory_space<vmem>>, vector<1x8xf32>
    %2 = vector.shape_cast %1 : vector<1x8xf32> to vector<1x8xf32>
    %3 = vector.broadcast %2 : vector<1x8xf32> to vector<16x8xf32>
    %c0_1 = arith.constant 0 : index
    %c0_2 = arith.constant 0 : index
    %4 = vector.load %arg5[%c0_1, %c0_2] : memref<1x8xf32, #tpu.memory_space<vmem>>, vector<1x8xf32>
    %5 = vector.shape_cast %4 : vector<1x8xf32> to vector<1x8xf32>
    %6 = vector.broadcast %5 : vector<1x8xf32> to vector<16x8xf32>
    %c0_i32 = arith.constant 0 : i32
    %c16_i32_3 = arith.constant 16 : i32
    %7 = arith.addi %c0_i32, %c16_i32_3 : i32
    %c1_i32 = arith.constant 1 : i32
    scf.for %arg8 = %c0_i32 to %7 step %c1_i32  : i32 {
      %cst = arith.constant 0.000000e+00 : f32
      %8 = vector.broadcast %cst : f32 to vector<16x3xf32>
      %9 = arith.addi %0, %arg8 : i32
      %c0_i32_5 = arith.constant 0 : i32
      %10 = arith.addi %9, %c0_i32_5 : i32
      %c0_6 = arith.constant 0 : index
      %11 = arith.index_cast %10 : i32 to index
      %c0_7 = arith.constant 0 : index
      %c0_8 = arith.constant 0 : index
      %12 = vector.load %arg2[%c0_6, %11, %c0_7, %c0_8] : memref<1x22x22x8xbf16, #tpu.memory_space<vmem>>, vector<1x1x16x8xbf16>
      %13 = vector.shape_cast %12 : vector<1x1x16x8xbf16> to vector<16x8xbf16>
      %14 = arith.extf %13 : vector<16x8xbf16> to vector<16x8xf32>
      %15 = arith.mulf %14, %3 : vector<16x8xf32>
      %16 = arith.addf %15, %6 : vector<16x8xf32>
      %cst_9 = arith.constant 0.000000e+00 : f32
      %17 = vector.broadcast %cst_9 : f32 to vector<16x8xf32>
      %18 = arith.maximumf %16, %17 : vector<16x8xf32>
      %19 = arith.truncf %18 : vector<16x8xf32> to vector<16x8xbf16>
      %c0_10 = arith.constant 0 : index
      %c0_11 = arith.constant 0 : index
      %c0_12 = arith.constant 0 : index
      %20 = vector.load %arg3[%c0_10, %c0_11, %c0_12] : memref<49x8x3xbf16, #tpu.memory_space<vmem>>, vector<1x8x3xbf16>
      %21 = vector.shape_cast %20 : vector<1x8x3xbf16> to vector<8x3xbf16>
      %cst_13 = arith.constant dense<0.000000e+00> : vector<16x3xf32>
      %22 = tpu.matmul %19, %21, %cst_13 {dimension_numbers = #tpu.dot_dimension_numbers<[1], [0], [0], [1], [0, 0, 1, 1], [], []>} : vector<16x8xbf16>, vector<8x3xbf16>, vector<16x3xf32> -> vector<16x3xf32>
      %23 = arith.addf %8, %22 : vector<16x3xf32>
      %24 = arith.addi %0, %arg8 : i32
      %c0_i32_14 = arith.constant 0 : i32
      %25 = arith.addi %24, %c0_i32_14 : i32
      %c0_15 = arith.constant 0 : index
      %26 = arith.index_cast %25 : i32 to index
      %c1 = arith.constant 1 : index
      %c0_16 = arith.constant 0 : index
      %27 = vector.load %arg2[%c0_15, %26, %c1, %c0_16] : memref<1x22x22x8xbf16, #tpu.memory_space<vmem>>, vector<1x1x16x8xbf16>
      %28 = vector.shape_cast %27 : vector<1x1x16x8xbf16> to vector<16x8xbf16>
      %29 = arith.extf %28 : vector<16x8xbf16> to vector<16x8xf32>
      %30 = arith.mulf %29, %3 : vector<16x8xf32>
      %31 = arith.addf %30, %6 : vector<16x8xf32>
      %cst_17 = arith.constant 0.000000e+00 : f32
      %32 = vector.broadcast %cst_17 : f32 to vector<16x8xf32>
      %33 = arith.maximumf %31, %32 : vector<16x8xf32>
      %34 = arith.truncf %33 : vector<16x8xf32> to vector<16x8xbf16>
      %c1_18 = arith.constant 1 : index
      %c0_19 = arith.constant 0 : index
      %c0_20 = arith.constant 0 : index
      %35 = vector.load %arg3[%c1_18, %c0_19, %c0_20] : memref<49x8x3xbf16, #tpu.memory_space<vmem>>, vector<1x8x3xbf16>
      %36 = vector.shape_cast %35 : vector<1x8x3xbf16> to vector<8x3xbf16>
      %cst_21 = arith.constant dense<0.000000e+00> : vector<16x3xf32>
      %37 = tpu.matmul %34, %36, %cst_21 {dimension_numbers = #tpu.dot_dimension_numbers<[1], [0], [0], [1], [0, 0, 1, 1], [], []>} : vector<16x8xbf16>, vector<8x3xbf16>, vector<16x3xf32> -> vector<16x3xf32>
      %38 = arith.addf %23, %37 : vector<16x3xf32>
      %39 = arith.addi %0, %arg8 : i32
      %c0_i32_22 = arith.constant 0 : i32
      %40 = arith.addi %39, %c0_i32_22 : i32
      %c0_23 = arith.constant 0 : index
      %41 = arith.index_cast %40 : i32 to index
      %c2 = arith.constant 2 : index
      %c0_24 = arith.constant 0 : index
      %42 = vector.load %arg2[%c0_23, %41, %c2, %c0_24] : memref<1x22x22x8xbf16, #tpu.memory_space<vmem>>, vector<1x1x16x8xbf16>
      %43 = vector.shape_cast %42 : vector<1x1x16x8xbf16> to vector<16x8xbf16>
      %44 = arith.extf %43 : vector<16x8xbf16> to vector<16x8xf32>
      %45 = arith.mulf %44, %3 : vector<16x8xf32>
      %46 = arith.addf %45, %6 : vector<16x8xf32>
      %cst_25 = arith.constant 0.000000e+00 : f32
      %47 = vector.broadcast %cst_25 : f32 to vector<16x8xf32>
      %48 = arith.maximumf %46, %47 : vector<16x8xf32>
      %49 = arith.truncf %48 : vector<16x8xf32> to vector<16x8xbf16>
      %c2_26 = arith.constant 2 : index
      %c0_27 = arith.constant 0 : index
      %c0_28 = arith.constant 0 : index
      %50 = vector.load %arg3[%c2_26, %c0_27, %c0_28] : memref<49x8x3xbf16, #tpu.memory_space<vmem>>, vector<1x8x3xbf16>
      %51 = vector.shape_cast %50 : vector<1x8x3xbf16> to vector<8x3xbf16>
      %cst_29 = arith.constant dense<0.000000e+00> : vector<16x3xf32>
      %52 = tpu.matmul %49, %51, %cst_29 {dimension_numbers = #tpu.dot_dimension_numbers<[1], [0], [0], [1], [0, 0, 1, 1], [], []>} : vector<16x8xbf16>, vector<8x3xbf16>, vector<16x3xf32> -> vector<16x3xf32>
      %53 = arith.addf %38, %52 : vector<16x3xf32>
      %54 = arith.addi %0, %arg8 : i32
      %c0_i32_30 = arith.constant 0 : i32
      %55 = arith.addi %54, %c0_i32_30 : i32
      %c0_31 = arith.constant 0 : index
      %56 = arith.index_cast %55 : i32 to index
      %c3 = arith.constant 3 : index
      %c0_32 = arith.constant 0 : index
      %57 = vector.load %arg2[%c0_31, %56, %c3, %c0_32] : memref<1x22x22x8xbf16, #tpu.memory_space<vmem>>, vector<1x1x16x8xbf16>
      %58 = vector.shape_cast %57 : vector<1x1x16x8xbf16> to vector<16x8xbf16>
      %59 = arith.extf %58 : vector<16x8xbf16> to vector<16x8xf32>
      %60 = arith.mulf %59, %3 : vector<16x8xf32>
      %61 = arith.addf %60, %6 : vector<16x8xf32>
      %cst_33 = arith.constant 0.000000e+00 : f32
      %62 = vector.broadcast %cst_33 : f32 to vector<16x8xf32>
      %63 = arith.maximumf %61, %62 : vector<16x8xf32>
      %64 = arith.truncf %63 : vector<16x8xf32> to vector<16x8xbf16>
      %c3_34 = arith.constant 3 : index
      %c0_35 = arith.constant 0 : index
      %c0_36 = arith.constant 0 : index
      %65 = vector.load %arg3[%c3_34, %c0_35, %c0_36] : memref<49x8x3xbf16, #tpu.memory_space<vmem>>, vector<1x8x3xbf16>
      %66 = vector.shape_cast %65 : vector<1x8x3xbf16> to vector<8x3xbf16>
      %cst_37 = arith.constant dense<0.000000e+00> : vector<16x3xf32>
      %67 = tpu.matmul %64, %66, %cst_37 {dimension_numbers = #tpu.dot_dimension_numbers<[1], [0], [0], [1], [0, 0, 1, 1], [], []>} : vector<16x8xbf16>, vector<8x3xbf16>, vector<16x3xf32> -> vector<16x3xf32>
      %68 = arith.addf %53, %67 : vector<16x3xf32>
      %69 = arith.addi %0, %arg8 : i32
      %c0_i32_38 = arith.constant 0 : i32
      %70 = arith.addi %69, %c0_i32_38 : i32
      %c0_39 = arith.constant 0 : index
      %71 = arith.index_cast %70 : i32 to index
      %c4 = arith.constant 4 : index
      %c0_40 = arith.constant 0 : index
      %72 = vector.load %arg2[%c0_39, %71, %c4, %c0_40] : memref<1x22x22x8xbf16, #tpu.memory_space<vmem>>, vector<1x1x16x8xbf16>
      %73 = vector.shape_cast %72 : vector<1x1x16x8xbf16> to vector<16x8xbf16>
      %74 = arith.extf %73 : vector<16x8xbf16> to vector<16x8xf32>
      %75 = arith.mulf %74, %3 : vector<16x8xf32>
      %76 = arith.addf %75, %6 : vector<16x8xf32>
      %cst_41 = arith.constant 0.000000e+00 : f32
      %77 = vector.broadcast %cst_41 : f32 to vector<16x8xf32>
      %78 = arith.maximumf %76, %77 : vector<16x8xf32>
      %79 = arith.truncf %78 : vector<16x8xf32> to vector<16x8xbf16>
      %c4_42 = arith.constant 4 : index
      %c0_43 = arith.constant 0 : index
      %c0_44 = arith.constant 0 : index
      %80 = vector.load %arg3[%c4_42, %c0_43, %c0_44] : memref<49x8x3xbf16, #tpu.memory_space<vmem>>, vector<1x8x3xbf16>
      %81 = vector.shape_cast %80 : vector<1x8x3xbf16> to vector<8x3xbf16>
      %cst_45 = arith.constant dense<0.000000e+00> : vector<16x3xf32>
      %82 = tpu.matmul %79, %81, %cst_45 {dimension_numbers = #tpu.dot_dimension_numbers<[1], [0], [0], [1], [0, 0, 1, 1], [], []>} : vector<16x8xbf16>, vector<8x3xbf16>, vector<16x3xf32> -> vector<16x3xf32>
      %83 = arith.addf %68, %82 : vector<16x3xf32>
      %84 = arith.addi %0, %arg8 : i32
      %c0_i32_46 = arith.constant 0 : i32
      %85 = arith.addi %84, %c0_i32_46 : i32
      %c0_47 = arith.constant 0 : index
      %86 = arith.index_cast %85 : i32 to index
      %c5 = arith.constant 5 : index
      %c0_48 = arith.constant 0 : index
      %87 = vector.load %arg2[%c0_47, %86, %c5, %c0_48] : memref<1x22x22x8xbf16, #tpu.memory_space<vmem>>, vector<1x1x16x8xbf16>
      %88 = vector.shape_cast %87 : vector<1x1x16x8xbf16> to vector<16x8xbf16>
      %89 = arith.extf %88 : vector<16x8xbf16> to vector<16x8xf32>
      %90 = arith.mulf %89, %3 : vector<16x8xf32>
      %91 = arith.addf %90, %6 : vector<16x8xf32>
      %cst_49 = arith.constant 0.000000e+00 : f32
      %92 = vector.broadcast %cst_49 : f32 to vector<16x8xf32>
      %93 = arith.maximumf %91, %92 : vector<16x8xf32>
      %94 = arith.truncf %93 : vector<16x8xf32> to vector<16x8xbf16>
      %c5_50 = arith.constant 5 : index
      %c0_51 = arith.constant 0 : index
      %c0_52 = arith.constant 0 : index
      %95 = vector.load %arg3[%c5_50, %c0_51, %c0_52] : memref<49x8x3xbf16, #tpu.memory_space<vmem>>, vector<1x8x3xbf16>
      %96 = vector.shape_cast %95 : vector<1x8x3xbf16> to vector<8x3xbf16>
      %cst_53 = arith.constant dense<0.000000e+00> : vector<16x3xf32>
      %97 = tpu.matmul %94, %96, %cst_53 {dimension_numbers = #tpu.dot_dimension_numbers<[1], [0], [0], [1], [0, 0, 1, 1], [], []>} : vector<16x8xbf16>, vector<8x3xbf16>, vector<16x3xf32> -> vector<16x3xf32>
      %98 = arith.addf %83, %97 : vector<16x3xf32>
      %99 = arith.addi %0, %arg8 : i32
      %c0_i32_54 = arith.constant 0 : i32
      %100 = arith.addi %99, %c0_i32_54 : i32
      %c0_55 = arith.constant 0 : index
      %101 = arith.index_cast %100 : i32 to index
      %c6 = arith.constant 6 : index
      %c0_56 = arith.constant 0 : index
      %102 = vector.load %arg2[%c0_55, %101, %c6, %c0_56] : memref<1x22x22x8xbf16, #tpu.memory_space<vmem>>, vector<1x1x16x8xbf16>
      %103 = vector.shape_cast %102 : vector<1x1x16x8xbf16> to vector<16x8xbf16>
      %104 = arith.extf %103 : vector<16x8xbf16> to vector<16x8xf32>
      %105 = arith.mulf %104, %3 : vector<16x8xf32>
      %106 = arith.addf %105, %6 : vector<16x8xf32>
      %cst_57 = arith.constant 0.000000e+00 : f32
      %107 = vector.broadcast %cst_57 : f32 to vector<16x8xf32>
      %108 = arith.maximumf %106, %107 : vector<16x8xf32>
      %109 = arith.truncf %108 : vector<16x8xf32> to vector<16x8xbf16>
      %c6_58 = arith.constant 6 : index
      %c0_59 = arith.constant 0 : index
      %c0_60 = arith.constant 0 : index
      %110 = vector.load %arg3[%c6_58, %c0_59, %c0_60] : memref<49x8x3xbf16, #tpu.memory_space<vmem>>, vector<1x8x3xbf16>
      %111 = vector.shape_cast %110 : vector<1x8x3xbf16> to vector<8x3xbf16>
      %cst_61 = arith.constant dense<0.000000e+00> : vector<16x3xf32>
      %112 = tpu.matmul %109, %111, %cst_61 {dimension_numbers = #tpu.dot_dimension_numbers<[1], [0], [0], [1], [0, 0, 1, 1], [], []>} : vector<16x8xbf16>, vector<8x3xbf16>, vector<16x3xf32> -> vector<16x3xf32>
      %113 = arith.addf %98, %112 : vector<16x3xf32>
      %114 = arith.addi %0, %arg8 : i32
      %c1_i32_62 = arith.constant 1 : i32
      %115 = arith.addi %114, %c1_i32_62 : i32
      %c0_63 = arith.constant 0 : index
      %116 = arith.index_cast %115 : i32 to index
      %c0_64 = arith.constant 0 : index
      %c0_65 = arith.constant 0 : index
      %117 = vector.load %arg2[%c0_63, %116, %c0_64, %c0_65] : memref<1x22x22x8xbf16, #tpu.memory_space<vmem>>, vector<1x1x16x8xbf16>
      %118 = vector.shape_cast %117 : vector<1x1x16x8xbf16> to vector<16x8xbf16>
      %119 = arith.extf %118 : vector<16x8xbf16> to vector<16x8xf32>
      %120 = arith.mulf %119, %3 : vector<16x8xf32>
      %121 = arith.addf %120, %6 : vector<16x8xf32>
      %cst_66 = arith.constant 0.000000e+00 : f32
      %122 = vector.broadcast %cst_66 : f32 to vector<16x8xf32>
      %123 = arith.maximumf %121, %122 : vector<16x8xf32>
      %124 = arith.truncf %123 : vector<16x8xf32> to vector<16x8xbf16>
      %c7 = arith.constant 7 : index
      %c0_67 = arith.constant 0 : index
      %c0_68 = arith.constant 0 : index
      %125 = vector.load %arg3[%c7, %c0_67, %c0_68] : memref<49x8x3xbf16, #tpu.memory_space<vmem>>, vector<1x8x3xbf16>
      %126 = vector.shape_cast %125 : vector<1x8x3xbf16> to vector<8x3xbf16>
      %cst_69 = arith.constant dense<0.000000e+00> : vector<16x3xf32>
      %127 = tpu.matmul %124, %126, %cst_69 {dimension_numbers = #tpu.dot_dimension_numbers<[1], [0], [0], [1], [0, 0, 1, 1], [], []>} : vector<16x8xbf16>, vector<8x3xbf16>, vector<16x3xf32> -> vector<16x3xf32>
      %128 = arith.addf %113, %127 : vector<16x3xf32>
      %129 = arith.addi %0, %arg8 : i32
      %c1_i32_70 = arith.constant 1 : i32
      %130 = arith.addi %129, %c1_i32_70 : i32
      %c0_71 = arith.constant 0 : index
      %131 = arith.index_cast %130 : i32 to index
      %c1_72 = arith.constant 1 : index
      %c0_73 = arith.constant 0 : index
      %132 = vector.load %arg2[%c0_71, %131, %c1_72, %c0_73] : memref<1x22x22x8xbf16, #tpu.memory_space<vmem>>, vector<1x1x16x8xbf16>
      %133 = vector.shape_cast %132 : vector<1x1x16x8xbf16> to vector<16x8xbf16>
      %134 = arith.extf %133 : vector<16x8xbf16> to vector<16x8xf32>
      %135 = arith.mulf %134, %3 : vector<16x8xf32>
      %136 = arith.addf %135, %6 : vector<16x8xf32>
      %cst_74 = arith.constant 0.000000e+00 : f32
      %137 = vector.broadcast %cst_74 : f32 to vector<16x8xf32>
      %138 = arith.maximumf %136, %137 : vector<16x8xf32>
      %139 = arith.truncf %138 : vector<16x8xf32> to vector<16x8xbf16>
      %c8 = arith.constant 8 : index
      %c0_75 = arith.constant 0 : index
      %c0_76 = arith.constant 0 : index
      %140 = vector.load %arg3[%c8, %c0_75, %c0_76] : memref<49x8x3xbf16, #tpu.memory_space<vmem>>, vector<1x8x3xbf16>
      %141 = vector.shape_cast %140 : vector<1x8x3xbf16> to vector<8x3xbf16>
      %cst_77 = arith.constant dense<0.000000e+00> : vector<16x3xf32>
      %142 = tpu.matmul %139, %141, %cst_77 {dimension_numbers = #tpu.dot_dimension_numbers<[1], [0], [0], [1], [0, 0, 1, 1], [], []>} : vector<16x8xbf16>, vector<8x3xbf16>, vector<16x3xf32> -> vector<16x3xf32>
      %143 = arith.addf %128, %142 : vector<16x3xf32>
      %144 = arith.addi %0, %arg8 : i32
      %c1_i32_78 = arith.constant 1 : i32
      %145 = arith.addi %144, %c1_i32_78 : i32
      %c0_79 = arith.constant 0 : index
      %146 = arith.index_cast %145 : i32 to index
      %c2_80 = arith.constant 2 : index
      %c0_81 = arith.constant 0 : index
      %147 = vector.load %arg2[%c0_79, %146, %c2_80, %c0_81] : memref<1x22x22x8xbf16, #tpu.memory_space<vmem>>, vector<1x1x16x8xbf16>
      %148 = vector.shape_cast %147 : vector<1x1x16x8xbf16> to vector<16x8xbf16>
      %149 = arith.extf %148 : vector<16x8xbf16> to vector<16x8xf32>
      %150 = arith.mulf %149, %3 : vector<16x8xf32>
      %151 = arith.addf %150, %6 : vector<16x8xf32>
      %cst_82 = arith.constant 0.000000e+00 : f32
      %152 = vector.broadcast %cst_82 : f32 to vector<16x8xf32>
      %153 = arith.maximumf %151, %152 : vector<16x8xf32>
      %154 = arith.truncf %153 : vector<16x8xf32> to vector<16x8xbf16>
      %c9 = arith.constant 9 : index
      %c0_83 = arith.constant 0 : index
      %c0_84 = arith.constant 0 : index
      %155 = vector.load %arg3[%c9, %c0_83, %c0_84] : memref<49x8x3xbf16, #tpu.memory_space<vmem>>, vector<1x8x3xbf16>
      %156 = vector.shape_cast %155 : vector<1x8x3xbf16> to vector<8x3xbf16>
      %cst_85 = arith.constant dense<0.000000e+00> : vector<16x3xf32>
      %157 = tpu.matmul %154, %156, %cst_85 {dimension_numbers = #tpu.dot_dimension_numbers<[1], [0], [0], [1], [0, 0, 1, 1], [], []>} : vector<16x8xbf16>, vector<8x3xbf16>, vector<16x3xf32> -> vector<16x3xf32>
      %158 = arith.addf %143, %157 : vector<16x3xf32>
      %159 = arith.addi %0, %arg8 : i32
      %c1_i32_86 = arith.constant 1 : i32
      %160 = arith.addi %159, %c1_i32_86 : i32
      %c0_87 = arith.constant 0 : index
      %161 = arith.index_cast %160 : i32 to index
      %c3_88 = arith.constant 3 : index
      %c0_89 = arith.constant 0 : index
      %162 = vector.load %arg2[%c0_87, %161, %c3_88, %c0_89] : memref<1x22x22x8xbf16, #tpu.memory_space<vmem>>, vector<1x1x16x8xbf16>
      %163 = vector.shape_cast %162 : vector<1x1x16x8xbf16> to vector<16x8xbf16>
      %164 = arith.extf %163 : vector<16x8xbf16> to vector<16x8xf32>
      %165 = arith.mulf %164, %3 : vector<16x8xf32>
      %166 = arith.addf %165, %6 : vector<16x8xf32>
      %cst_90 = arith.constant 0.000000e+00 : f32
      %167 = vector.broadcast %cst_90 : f32 to vector<16x8xf32>
      %168 = arith.maximumf %166, %167 : vector<16x8xf32>
      %169 = arith.truncf %168 : vector<16x8xf32> to vector<16x8xbf16>
      %c10 = arith.constant 10 : index
      %c0_91 = arith.constant 0 : index
      %c0_92 = arith.constant 0 : index
      %170 = vector.load %arg3[%c10, %c0_91, %c0_92] : memref<49x8x3xbf16, #tpu.memory_space<vmem>>, vector<1x8x3xbf16>
      %171 = vector.shape_cast %170 : vector<1x8x3xbf16> to vector<8x3xbf16>
      %cst_93 = arith.constant dense<0.000000e+00> : vector<16x3xf32>
      %172 = tpu.matmul %169, %171, %cst_93 {dimension_numbers = #tpu.dot_dimension_numbers<[1], [0], [0], [1], [0, 0, 1, 1], [], []>} : vector<16x8xbf16>, vector<8x3xbf16>, vector<16x3xf32> -> vector<16x3xf32>
      %173 = arith.addf %158, %172 : vector<16x3xf32>
      %174 = arith.addi %0, %arg8 : i32
      %c1_i32_94 = arith.constant 1 : i32
      %175 = arith.addi %174, %c1_i32_94 : i32
      %c0_95 = arith.constant 0 : index
      %176 = arith.index_cast %175 : i32 to index
      %c4_96 = arith.constant 4 : index
      %c0_97 = arith.constant 0 : index
      %177 = vector.load %arg2[%c0_95, %176, %c4_96, %c0_97] : memref<1x22x22x8xbf16, #tpu.memory_space<vmem>>, vector<1x1x16x8xbf16>
      %178 = vector.shape_cast %177 : vector<1x1x16x8xbf16> to vector<16x8xbf16>
      %179 = arith.extf %178 : vector<16x8xbf16> to vector<16x8xf32>
      %180 = arith.mulf %179, %3 : vector<16x8xf32>
      %181 = arith.addf %180, %6 : vector<16x8xf32>
      %cst_98 = arith.constant 0.000000e+00 : f32
      %182 = vector.broadcast %cst_98 : f32 to vector<16x8xf32>
      %183 = arith.maximumf %181, %182 : vector<16x8xf32>
      %184 = arith.truncf %183 : vector<16x8xf32> to vector<16x8xbf16>
      %c11 = arith.constant 11 : index
      %c0_99 = arith.constant 0 : index
      %c0_100 = arith.constant 0 : index
      %185 = vector.load %arg3[%c11, %c0_99, %c0_100] : memref<49x8x3xbf16, #tpu.memory_space<vmem>>, vector<1x8x3xbf16>
      %186 = vector.shape_cast %185 : vector<1x8x3xbf16> to vector<8x3xbf16>
      %cst_101 = arith.constant dense<0.000000e+00> : vector<16x3xf32>
      %187 = tpu.matmul %184, %186, %cst_101 {dimension_numbers = #tpu.dot_dimension_numbers<[1], [0], [0], [1], [0, 0, 1, 1], [], []>} : vector<16x8xbf16>, vector<8x3xbf16>, vector<16x3xf32> -> vector<16x3xf32>
      %188 = arith.addf %173, %187 : vector<16x3xf32>
      %189 = arith.addi %0, %arg8 : i32
      %c1_i32_102 = arith.constant 1 : i32
      %190 = arith.addi %189, %c1_i32_102 : i32
      %c0_103 = arith.constant 0 : index
      %191 = arith.index_cast %190 : i32 to index
      %c5_104 = arith.constant 5 : index
      %c0_105 = arith.constant 0 : index
      %192 = vector.load %arg2[%c0_103, %191, %c5_104, %c0_105] : memref<1x22x22x8xbf16, #tpu.memory_space<vmem>>, vector<1x1x16x8xbf16>
      %193 = vector.shape_cast %192 : vector<1x1x16x8xbf16> to vector<16x8xbf16>
      %194 = arith.extf %193 : vector<16x8xbf16> to vector<16x8xf32>
      %195 = arith.mulf %194, %3 : vector<16x8xf32>
      %196 = arith.addf %195, %6 : vector<16x8xf32>
      %cst_106 = arith.constant 0.000000e+00 : f32
      %197 = vector.broadcast %cst_106 : f32 to vector<16x8xf32>
      %198 = arith.maximumf %196, %197 : vector<16x8xf32>
      %199 = arith.truncf %198 : vector<16x8xf32> to vector<16x8xbf16>
      %c12 = arith.constant 12 : index
      %c0_107 = arith.constant 0 : index
      %c0_108 = arith.constant 0 : index
      %200 = vector.load %arg3[%c12, %c0_107, %c0_108] : memref<49x8x3xbf16, #tpu.memory_space<vmem>>, vector<1x8x3xbf16>
      %201 = vector.shape_cast %200 : vector<1x8x3xbf16> to vector<8x3xbf16>
      %cst_109 = arith.constant dense<0.000000e+00> : vector<16x3xf32>
      %202 = tpu.matmul %199, %201, %cst_109 {dimension_numbers = #tpu.dot_dimension_numbers<[1], [0], [0], [1], [0, 0, 1, 1], [], []>} : vector<16x8xbf16>, vector<8x3xbf16>, vector<16x3xf32> -> vector<16x3xf32>
      %203 = arith.addf %188, %202 : vector<16x3xf32>
      %204 = arith.addi %0, %arg8 : i32
      %c1_i32_110 = arith.constant 1 : i32
      %205 = arith.addi %204, %c1_i32_110 : i32
      %c0_111 = arith.constant 0 : index
      %206 = arith.index_cast %205 : i32 to index
      %c6_112 = arith.constant 6 : index
      %c0_113 = arith.constant 0 : index
      %207 = vector.load %arg2[%c0_111, %206, %c6_112, %c0_113] : memref<1x22x22x8xbf16, #tpu.memory_space<vmem>>, vector<1x1x16x8xbf16>
      %208 = vector.shape_cast %207 : vector<1x1x16x8xbf16> to vector<16x8xbf16>
      %209 = arith.extf %208 : vector<16x8xbf16> to vector<16x8xf32>
      %210 = arith.mulf %209, %3 : vector<16x8xf32>
      %211 = arith.addf %210, %6 : vector<16x8xf32>
      %cst_114 = arith.constant 0.000000e+00 : f32
      %212 = vector.broadcast %cst_114 : f32 to vector<16x8xf32>
      %213 = arith.maximumf %211, %212 : vector<16x8xf32>
      %214 = arith.truncf %213 : vector<16x8xf32> to vector<16x8xbf16>
      %c13 = arith.constant 13 : index
      %c0_115 = arith.constant 0 : index
      %c0_116 = arith.constant 0 : index
      %215 = vector.load %arg3[%c13, %c0_115, %c0_116] : memref<49x8x3xbf16, #tpu.memory_space<vmem>>, vector<1x8x3xbf16>
      %216 = vector.shape_cast %215 : vector<1x8x3xbf16> to vector<8x3xbf16>
      %cst_117 = arith.constant dense<0.000000e+00> : vector<16x3xf32>
      %217 = tpu.matmul %214, %216, %cst_117 {dimension_numbers = #tpu.dot_dimension_numbers<[1], [0], [0], [1], [0, 0, 1, 1], [], []>} : vector<16x8xbf16>, vector<8x3xbf16>, vector<16x3xf32> -> vector<16x3xf32>
      %218 = arith.addf %203, %217 : vector<16x3xf32>
      %219 = arith.addi %0, %arg8 : i32
      %c2_i32 = arith.constant 2 : i32
      %220 = arith.addi %219, %c2_i32 : i32
      %c0_118 = arith.constant 0 : index
      %221 = arith.index_cast %220 : i32 to index
      %c0_119 = arith.constant 0 : index
      %c0_120 = arith.constant 0 : index
      %222 = vector.load %arg2[%c0_118, %221, %c0_119, %c0_120] : memref<1x22x22x8xbf16, #tpu.memory_space<vmem>>, vector<1x1x16x8xbf16>
      %223 = vector.shape_cast %222 : vector<1x1x16x8xbf16> to vector<16x8xbf16>
      %224 = arith.extf %223 : vector<16x8xbf16> to vector<16x8xf32>
      %225 = arith.mulf %224, %3 : vector<16x8xf32>
      %226 = arith.addf %225, %6 : vector<16x8xf32>
      %cst_121 = arith.constant 0.000000e+00 : f32
      %227 = vector.broadcast %cst_121 : f32 to vector<16x8xf32>
      %228 = arith.maximumf %226, %227 : vector<16x8xf32>
      %229 = arith.truncf %228 : vector<16x8xf32> to vector<16x8xbf16>
      %c14 = arith.constant 14 : index
      %c0_122 = arith.constant 0 : index
      %c0_123 = arith.constant 0 : index
      %230 = vector.load %arg3[%c14, %c0_122, %c0_123] : memref<49x8x3xbf16, #tpu.memory_space<vmem>>, vector<1x8x3xbf16>
      %231 = vector.shape_cast %230 : vector<1x8x3xbf16> to vector<8x3xbf16>
      %cst_124 = arith.constant dense<0.000000e+00> : vector<16x3xf32>
      %232 = tpu.matmul %229, %231, %cst_124 {dimension_numbers = #tpu.dot_dimension_numbers<[1], [0], [0], [1], [0, 0, 1, 1], [], []>} : vector<16x8xbf16>, vector<8x3xbf16>, vector<16x3xf32> -> vector<16x3xf32>
      %233 = arith.addf %218, %232 : vector<16x3xf32>
      %234 = arith.addi %0, %arg8 : i32
      %c2_i32_125 = arith.constant 2 : i32
      %235 = arith.addi %234, %c2_i32_125 : i32
      %c0_126 = arith.constant 0 : index
      %236 = arith.index_cast %235 : i32 to index
      %c1_127 = arith.constant 1 : index
      %c0_128 = arith.constant 0 : index
      %237 = vector.load %arg2[%c0_126, %236, %c1_127, %c0_128] : memref<1x22x22x8xbf16, #tpu.memory_space<vmem>>, vector<1x1x16x8xbf16>
      %238 = vector.shape_cast %237 : vector<1x1x16x8xbf16> to vector<16x8xbf16>
      %239 = arith.extf %238 : vector<16x8xbf16> to vector<16x8xf32>
      %240 = arith.mulf %239, %3 : vector<16x8xf32>
      %241 = arith.addf %240, %6 : vector<16x8xf32>
      %cst_129 = arith.constant 0.000000e+00 : f32
      %242 = vector.broadcast %cst_129 : f32 to vector<16x8xf32>
      %243 = arith.maximumf %241, %242 : vector<16x8xf32>
      %244 = arith.truncf %243 : vector<16x8xf32> to vector<16x8xbf16>
      %c15 = arith.constant 15 : index
      %c0_130 = arith.constant 0 : index
      %c0_131 = arith.constant 0 : index
      %245 = vector.load %arg3[%c15, %c0_130, %c0_131] : memref<49x8x3xbf16, #tpu.memory_space<vmem>>, vector<1x8x3xbf16>
      %246 = vector.shape_cast %245 : vector<1x8x3xbf16> to vector<8x3xbf16>
      %cst_132 = arith.constant dense<0.000000e+00> : vector<16x3xf32>
      %247 = tpu.matmul %244, %246, %cst_132 {dimension_numbers = #tpu.dot_dimension_numbers<[1], [0], [0], [1], [0, 0, 1, 1], [], []>} : vector<16x8xbf16>, vector<8x3xbf16>, vector<16x3xf32> -> vector<16x3xf32>
      %248 = arith.addf %233, %247 : vector<16x3xf32>
      %249 = arith.addi %0, %arg8 : i32
      %c2_i32_133 = arith.constant 2 : i32
      %250 = arith.addi %249, %c2_i32_133 : i32
      %c0_134 = arith.constant 0 : index
      %251 = arith.index_cast %250 : i32 to index
      %c2_135 = arith.constant 2 : index
      %c0_136 = arith.constant 0 : index
      %252 = vector.load %arg2[%c0_134, %251, %c2_135, %c0_136] : memref<1x22x22x8xbf16, #tpu.memory_space<vmem>>, vector<1x1x16x8xbf16>
      %253 = vector.shape_cast %252 : vector<1x1x16x8xbf16> to vector<16x8xbf16>
      %254 = arith.extf %253 : vector<16x8xbf16> to vector<16x8xf32>
      %255 = arith.mulf %254, %3 : vector<16x8xf32>
      %256 = arith.addf %255, %6 : vector<16x8xf32>
      %cst_137 = arith.constant 0.000000e+00 : f32
      %257 = vector.broadcast %cst_137 : f32 to vector<16x8xf32>
      %258 = arith.maximumf %256, %257 : vector<16x8xf32>
      %259 = arith.truncf %258 : vector<16x8xf32> to vector<16x8xbf16>
      %c16 = arith.constant 16 : index
      %c0_138 = arith.constant 0 : index
      %c0_139 = arith.constant 0 : index
      %260 = vector.load %arg3[%c16, %c0_138, %c0_139] : memref<49x8x3xbf16, #tpu.memory_space<vmem>>, vector<1x8x3xbf16>
      %261 = vector.shape_cast %260 : vector<1x8x3xbf16> to vector<8x3xbf16>
      %cst_140 = arith.constant dense<0.000000e+00> : vector<16x3xf32>
      %262 = tpu.matmul %259, %261, %cst_140 {dimension_numbers = #tpu.dot_dimension_numbers<[1], [0], [0], [1], [0, 0, 1, 1], [], []>} : vector<16x8xbf16>, vector<8x3xbf16>, vector<16x3xf32> -> vector<16x3xf32>
      %263 = arith.addf %248, %262 : vector<16x3xf32>
      %264 = arith.addi %0, %arg8 : i32
      %c2_i32_141 = arith.constant 2 : i32
      %265 = arith.addi %264, %c2_i32_141 : i32
      %c0_142 = arith.constant 0 : index
      %266 = arith.index_cast %265 : i32 to index
      %c3_143 = arith.constant 3 : index
      %c0_144 = arith.constant 0 : index
      %267 = vector.load %arg2[%c0_142, %266, %c3_143, %c0_144] : memref<1x22x22x8xbf16, #tpu.memory_space<vmem>>, vector<1x1x16x8xbf16>
      %268 = vector.shape_cast %267 : vector<1x1x16x8xbf16> to vector<16x8xbf16>
      %269 = arith.extf %268 : vector<16x8xbf16> to vector<16x8xf32>
      %270 = arith.mulf %269, %3 : vector<16x8xf32>
      %271 = arith.addf %270, %6 : vector<16x8xf32>
      %cst_145 = arith.constant 0.000000e+00 : f32
      %272 = vector.broadcast %cst_145 : f32 to vector<16x8xf32>
      %273 = arith.maximumf %271, %272 : vector<16x8xf32>
      %274 = arith.truncf %273 : vector<16x8xf32> to vector<16x8xbf16>
      %c17 = arith.constant 17 : index
      %c0_146 = arith.constant 0 : index
      %c0_147 = arith.constant 0 : index
      %275 = vector.load %arg3[%c17, %c0_146, %c0_147] : memref<49x8x3xbf16, #tpu.memory_space<vmem>>, vector<1x8x3xbf16>
      %276 = vector.shape_cast %275 : vector<1x8x3xbf16> to vector<8x3xbf16>
      %cst_148 = arith.constant dense<0.000000e+00> : vector<16x3xf32>
      %277 = tpu.matmul %274, %276, %cst_148 {dimension_numbers = #tpu.dot_dimension_numbers<[1], [0], [0], [1], [0, 0, 1, 1], [], []>} : vector<16x8xbf16>, vector<8x3xbf16>, vector<16x3xf32> -> vector<16x3xf32>
      %278 = arith.addf %263, %277 : vector<16x3xf32>
      %279 = arith.addi %0, %arg8 : i32
      %c2_i32_149 = arith.constant 2 : i32
      %280 = arith.addi %279, %c2_i32_149 : i32
      %c0_150 = arith.constant 0 : index
      %281 = arith.index_cast %280 : i32 to index
      %c4_151 = arith.constant 4 : index
      %c0_152 = arith.constant 0 : index
      %282 = vector.load %arg2[%c0_150, %281, %c4_151, %c0_152] : memref<1x22x22x8xbf16, #tpu.memory_space<vmem>>, vector<1x1x16x8xbf16>
      %283 = vector.shape_cast %282 : vector<1x1x16x8xbf16> to vector<16x8xbf16>
      %284 = arith.extf %283 : vector<16x8xbf16> to vector<16x8xf32>
      %285 = arith.mulf %284, %3 : vector<16x8xf32>
      %286 = arith.addf %285, %6 : vector<16x8xf32>
      %cst_153 = arith.constant 0.000000e+00 : f32
      %287 = vector.broadcast %cst_153 : f32 to vector<16x8xf32>
      %288 = arith.maximumf %286, %287 : vector<16x8xf32>
      %289 = arith.truncf %288 : vector<16x8xf32> to vector<16x8xbf16>
      %c18 = arith.constant 18 : index
      %c0_154 = arith.constant 0 : index
      %c0_155 = arith.constant 0 : index
      %290 = vector.load %arg3[%c18, %c0_154, %c0_155] : memref<49x8x3xbf16, #tpu.memory_space<vmem>>, vector<1x8x3xbf16>
      %291 = vector.shape_cast %290 : vector<1x8x3xbf16> to vector<8x3xbf16>
      %cst_156 = arith.constant dense<0.000000e+00> : vector<16x3xf32>
      %292 = tpu.matmul %289, %291, %cst_156 {dimension_numbers = #tpu.dot_dimension_numbers<[1], [0], [0], [1], [0, 0, 1, 1], [], []>} : vector<16x8xbf16>, vector<8x3xbf16>, vector<16x3xf32> -> vector<16x3xf32>
      %293 = arith.addf %278, %292 : vector<16x3xf32>
      %294 = arith.addi %0, %arg8 : i32
      %c2_i32_157 = arith.constant 2 : i32
      %295 = arith.addi %294, %c2_i32_157 : i32
      %c0_158 = arith.constant 0 : index
      %296 = arith.index_cast %295 : i32 to index
      %c5_159 = arith.constant 5 : index
      %c0_160 = arith.constant 0 : index
      %297 = vector.load %arg2[%c0_158, %296, %c5_159, %c0_160] : memref<1x22x22x8xbf16, #tpu.memory_space<vmem>>, vector<1x1x16x8xbf16>
      %298 = vector.shape_cast %297 : vector<1x1x16x8xbf16> to vector<16x8xbf16>
      %299 = arith.extf %298 : vector<16x8xbf16> to vector<16x8xf32>
      %300 = arith.mulf %299, %3 : vector<16x8xf32>
      %301 = arith.addf %300, %6 : vector<16x8xf32>
      %cst_161 = arith.constant 0.000000e+00 : f32
      %302 = vector.broadcast %cst_161 : f32 to vector<16x8xf32>
      %303 = arith.maximumf %301, %302 : vector<16x8xf32>
      %304 = arith.truncf %303 : vector<16x8xf32> to vector<16x8xbf16>
      %c19 = arith.constant 19 : index
      %c0_162 = arith.constant 0 : index
      %c0_163 = arith.constant 0 : index
      %305 = vector.load %arg3[%c19, %c0_162, %c0_163] : memref<49x8x3xbf16, #tpu.memory_space<vmem>>, vector<1x8x3xbf16>
      %306 = vector.shape_cast %305 : vector<1x8x3xbf16> to vector<8x3xbf16>
      %cst_164 = arith.constant dense<0.000000e+00> : vector<16x3xf32>
      %307 = tpu.matmul %304, %306, %cst_164 {dimension_numbers = #tpu.dot_dimension_numbers<[1], [0], [0], [1], [0, 0, 1, 1], [], []>} : vector<16x8xbf16>, vector<8x3xbf16>, vector<16x3xf32> -> vector<16x3xf32>
      %308 = arith.addf %293, %307 : vector<16x3xf32>
      %309 = arith.addi %0, %arg8 : i32
      %c2_i32_165 = arith.constant 2 : i32
      %310 = arith.addi %309, %c2_i32_165 : i32
      %c0_166 = arith.constant 0 : index
      %311 = arith.index_cast %310 : i32 to index
      %c6_167 = arith.constant 6 : index
      %c0_168 = arith.constant 0 : index
      %312 = vector.load %arg2[%c0_166, %311, %c6_167, %c0_168] : memref<1x22x22x8xbf16, #tpu.memory_space<vmem>>, vector<1x1x16x8xbf16>
      %313 = vector.shape_cast %312 : vector<1x1x16x8xbf16> to vector<16x8xbf16>
      %314 = arith.extf %313 : vector<16x8xbf16> to vector<16x8xf32>
      %315 = arith.mulf %314, %3 : vector<16x8xf32>
      %316 = arith.addf %315, %6 : vector<16x8xf32>
      %cst_169 = arith.constant 0.000000e+00 : f32
      %317 = vector.broadcast %cst_169 : f32 to vector<16x8xf32>
      %318 = arith.maximumf %316, %317 : vector<16x8xf32>
      %319 = arith.truncf %318 : vector<16x8xf32> to vector<16x8xbf16>
      %c20 = arith.constant 20 : index
      %c0_170 = arith.constant 0 : index
      %c0_171 = arith.constant 0 : index
      %320 = vector.load %arg3[%c20, %c0_170, %c0_171] : memref<49x8x3xbf16, #tpu.memory_space<vmem>>, vector<1x8x3xbf16>
      %321 = vector.shape_cast %320 : vector<1x8x3xbf16> to vector<8x3xbf16>
      %cst_172 = arith.constant dense<0.000000e+00> : vector<16x3xf32>
      %322 = tpu.matmul %319, %321, %cst_172 {dimension_numbers = #tpu.dot_dimension_numbers<[1], [0], [0], [1], [0, 0, 1, 1], [], []>} : vector<16x8xbf16>, vector<8x3xbf16>, vector<16x3xf32> -> vector<16x3xf32>
      %323 = arith.addf %308, %322 : vector<16x3xf32>
      %324 = arith.addi %0, %arg8 : i32
      %c3_i32 = arith.constant 3 : i32
      %325 = arith.addi %324, %c3_i32 : i32
      %c0_173 = arith.constant 0 : index
      %326 = arith.index_cast %325 : i32 to index
      %c0_174 = arith.constant 0 : index
      %c0_175 = arith.constant 0 : index
      %327 = vector.load %arg2[%c0_173, %326, %c0_174, %c0_175] : memref<1x22x22x8xbf16, #tpu.memory_space<vmem>>, vector<1x1x16x8xbf16>
      %328 = vector.shape_cast %327 : vector<1x1x16x8xbf16> to vector<16x8xbf16>
      %329 = arith.extf %328 : vector<16x8xbf16> to vector<16x8xf32>
      %330 = arith.mulf %329, %3 : vector<16x8xf32>
      %331 = arith.addf %330, %6 : vector<16x8xf32>
      %cst_176 = arith.constant 0.000000e+00 : f32
      %332 = vector.broadcast %cst_176 : f32 to vector<16x8xf32>
      %333 = arith.maximumf %331, %332 : vector<16x8xf32>
      %334 = arith.truncf %333 : vector<16x8xf32> to vector<16x8xbf16>
      %c21 = arith.constant 21 : index
      %c0_177 = arith.constant 0 : index
      %c0_178 = arith.constant 0 : index
      %335 = vector.load %arg3[%c21, %c0_177, %c0_178] : memref<49x8x3xbf16, #tpu.memory_space<vmem>>, vector<1x8x3xbf16>
      %336 = vector.shape_cast %335 : vector<1x8x3xbf16> to vector<8x3xbf16>
      %cst_179 = arith.constant dense<0.000000e+00> : vector<16x3xf32>
      %337 = tpu.matmul %334, %336, %cst_179 {dimension_numbers = #tpu.dot_dimension_numbers<[1], [0], [0], [1], [0, 0, 1, 1], [], []>} : vector<16x8xbf16>, vector<8x3xbf16>, vector<16x3xf32> -> vector<16x3xf32>
      %338 = arith.addf %323, %337 : vector<16x3xf32>
      %339 = arith.addi %0, %arg8 : i32
      %c3_i32_180 = arith.constant 3 : i32
      %340 = arith.addi %339, %c3_i32_180 : i32
      %c0_181 = arith.constant 0 : index
      %341 = arith.index_cast %340 : i32 to index
      %c1_182 = arith.constant 1 : index
      %c0_183 = arith.constant 0 : index
      %342 = vector.load %arg2[%c0_181, %341, %c1_182, %c0_183] : memref<1x22x22x8xbf16, #tpu.memory_space<vmem>>, vector<1x1x16x8xbf16>
      %343 = vector.shape_cast %342 : vector<1x1x16x8xbf16> to vector<16x8xbf16>
      %344 = arith.extf %343 : vector<16x8xbf16> to vector<16x8xf32>
      %345 = arith.mulf %344, %3 : vector<16x8xf32>
      %346 = arith.addf %345, %6 : vector<16x8xf32>
      %cst_184 = arith.constant 0.000000e+00 : f32
      %347 = vector.broadcast %cst_184 : f32 to vector<16x8xf32>
      %348 = arith.maximumf %346, %347 : vector<16x8xf32>
      %349 = arith.truncf %348 : vector<16x8xf32> to vector<16x8xbf16>
      %c22 = arith.constant 22 : index
      %c0_185 = arith.constant 0 : index
      %c0_186 = arith.constant 0 : index
      %350 = vector.load %arg3[%c22, %c0_185, %c0_186] : memref<49x8x3xbf16, #tpu.memory_space<vmem>>, vector<1x8x3xbf16>
      %351 = vector.shape_cast %350 : vector<1x8x3xbf16> to vector<8x3xbf16>
      %cst_187 = arith.constant dense<0.000000e+00> : vector<16x3xf32>
      %352 = tpu.matmul %349, %351, %cst_187 {dimension_numbers = #tpu.dot_dimension_numbers<[1], [0], [0], [1], [0, 0, 1, 1], [], []>} : vector<16x8xbf16>, vector<8x3xbf16>, vector<16x3xf32> -> vector<16x3xf32>
      %353 = arith.addf %338, %352 : vector<16x3xf32>
      %354 = arith.addi %0, %arg8 : i32
      %c3_i32_188 = arith.constant 3 : i32
      %355 = arith.addi %354, %c3_i32_188 : i32
      %c0_189 = arith.constant 0 : index
      %356 = arith.index_cast %355 : i32 to index
      %c2_190 = arith.constant 2 : index
      %c0_191 = arith.constant 0 : index
      %357 = vector.load %arg2[%c0_189, %356, %c2_190, %c0_191] : memref<1x22x22x8xbf16, #tpu.memory_space<vmem>>, vector<1x1x16x8xbf16>
      %358 = vector.shape_cast %357 : vector<1x1x16x8xbf16> to vector<16x8xbf16>
      %359 = arith.extf %358 : vector<16x8xbf16> to vector<16x8xf32>
      %360 = arith.mulf %359, %3 : vector<16x8xf32>
      %361 = arith.addf %360, %6 : vector<16x8xf32>
      %cst_192 = arith.constant 0.000000e+00 : f32
      %362 = vector.broadcast %cst_192 : f32 to vector<16x8xf32>
      %363 = arith.maximumf %361, %362 : vector<16x8xf32>
      %364 = arith.truncf %363 : vector<16x8xf32> to vector<16x8xbf16>
      %c23 = arith.constant 23 : index
      %c0_193 = arith.constant 0 : index
      %c0_194 = arith.constant 0 : index
      %365 = vector.load %arg3[%c23, %c0_193, %c0_194] : memref<49x8x3xbf16, #tpu.memory_space<vmem>>, vector<1x8x3xbf16>
      %366 = vector.shape_cast %365 : vector<1x8x3xbf16> to vector<8x3xbf16>
      %cst_195 = arith.constant dense<0.000000e+00> : vector<16x3xf32>
      %367 = tpu.matmul %364, %366, %cst_195 {dimension_numbers = #tpu.dot_dimension_numbers<[1], [0], [0], [1], [0, 0, 1, 1], [], []>} : vector<16x8xbf16>, vector<8x3xbf16>, vector<16x3xf32> -> vector<16x3xf32>
      %368 = arith.addf %353, %367 : vector<16x3xf32>
      %369 = arith.addi %0, %arg8 : i32
      %c3_i32_196 = arith.constant 3 : i32
      %370 = arith.addi %369, %c3_i32_196 : i32
      %c0_197 = arith.constant 0 : index
      %371 = arith.index_cast %370 : i32 to index
      %c3_198 = arith.constant 3 : index
      %c0_199 = arith.constant 0 : index
      %372 = vector.load %arg2[%c0_197, %371, %c3_198, %c0_199] : memref<1x22x22x8xbf16, #tpu.memory_space<vmem>>, vector<1x1x16x8xbf16>
      %373 = vector.shape_cast %372 : vector<1x1x16x8xbf16> to vector<16x8xbf16>
      %374 = arith.extf %373 : vector<16x8xbf16> to vector<16x8xf32>
      %375 = arith.mulf %374, %3 : vector<16x8xf32>
      %376 = arith.addf %375, %6 : vector<16x8xf32>
      %cst_200 = arith.constant 0.000000e+00 : f32
      %377 = vector.broadcast %cst_200 : f32 to vector<16x8xf32>
      %378 = arith.maximumf %376, %377 : vector<16x8xf32>
      %379 = arith.truncf %378 : vector<16x8xf32> to vector<16x8xbf16>
      %c24 = arith.constant 24 : index
      %c0_201 = arith.constant 0 : index
      %c0_202 = arith.constant 0 : index
      %380 = vector.load %arg3[%c24, %c0_201, %c0_202] : memref<49x8x3xbf16, #tpu.memory_space<vmem>>, vector<1x8x3xbf16>
      %381 = vector.shape_cast %380 : vector<1x8x3xbf16> to vector<8x3xbf16>
      %cst_203 = arith.constant dense<0.000000e+00> : vector<16x3xf32>
      %382 = tpu.matmul %379, %381, %cst_203 {dimension_numbers = #tpu.dot_dimension_numbers<[1], [0], [0], [1], [0, 0, 1, 1], [], []>} : vector<16x8xbf16>, vector<8x3xbf16>, vector<16x3xf32> -> vector<16x3xf32>
      %383 = arith.addf %368, %382 : vector<16x3xf32>
      %384 = arith.addi %0, %arg8 : i32
      %c3_i32_204 = arith.constant 3 : i32
      %385 = arith.addi %384, %c3_i32_204 : i32
      %c0_205 = arith.constant 0 : index
      %386 = arith.index_cast %385 : i32 to index
      %c4_206 = arith.constant 4 : index
      %c0_207 = arith.constant 0 : index
      %387 = vector.load %arg2[%c0_205, %386, %c4_206, %c0_207] : memref<1x22x22x8xbf16, #tpu.memory_space<vmem>>, vector<1x1x16x8xbf16>
      %388 = vector.shape_cast %387 : vector<1x1x16x8xbf16> to vector<16x8xbf16>
      %389 = arith.extf %388 : vector<16x8xbf16> to vector<16x8xf32>
      %390 = arith.mulf %389, %3 : vector<16x8xf32>
      %391 = arith.addf %390, %6 : vector<16x8xf32>
      %cst_208 = arith.constant 0.000000e+00 : f32
      %392 = vector.broadcast %cst_208 : f32 to vector<16x8xf32>
      %393 = arith.maximumf %391, %392 : vector<16x8xf32>
      %394 = arith.truncf %393 : vector<16x8xf32> to vector<16x8xbf16>
      %c25 = arith.constant 25 : index
      %c0_209 = arith.constant 0 : index
      %c0_210 = arith.constant 0 : index
      %395 = vector.load %arg3[%c25, %c0_209, %c0_210] : memref<49x8x3xbf16, #tpu.memory_space<vmem>>, vector<1x8x3xbf16>
      %396 = vector.shape_cast %395 : vector<1x8x3xbf16> to vector<8x3xbf16>
      %cst_211 = arith.constant dense<0.000000e+00> : vector<16x3xf32>
      %397 = tpu.matmul %394, %396, %cst_211 {dimension_numbers = #tpu.dot_dimension_numbers<[1], [0], [0], [1], [0, 0, 1, 1], [], []>} : vector<16x8xbf16>, vector<8x3xbf16>, vector<16x3xf32> -> vector<16x3xf32>
      %398 = arith.addf %383, %397 : vector<16x3xf32>
      %399 = arith.addi %0, %arg8 : i32
      %c3_i32_212 = arith.constant 3 : i32
      %400 = arith.addi %399, %c3_i32_212 : i32
      %c0_213 = arith.constant 0 : index
      %401 = arith.index_cast %400 : i32 to index
      %c5_214 = arith.constant 5 : index
      %c0_215 = arith.constant 0 : index
      %402 = vector.load %arg2[%c0_213, %401, %c5_214, %c0_215] : memref<1x22x22x8xbf16, #tpu.memory_space<vmem>>, vector<1x1x16x8xbf16>
      %403 = vector.shape_cast %402 : vector<1x1x16x8xbf16> to vector<16x8xbf16>
      %404 = arith.extf %403 : vector<16x8xbf16> to vector<16x8xf32>
      %405 = arith.mulf %404, %3 : vector<16x8xf32>
      %406 = arith.addf %405, %6 : vector<16x8xf32>
      %cst_216 = arith.constant 0.000000e+00 : f32
      %407 = vector.broadcast %cst_216 : f32 to vector<16x8xf32>
      %408 = arith.maximumf %406, %407 : vector<16x8xf32>
      %409 = arith.truncf %408 : vector<16x8xf32> to vector<16x8xbf16>
      %c26 = arith.constant 26 : index
      %c0_217 = arith.constant 0 : index
      %c0_218 = arith.constant 0 : index
      %410 = vector.load %arg3[%c26, %c0_217, %c0_218] : memref<49x8x3xbf16, #tpu.memory_space<vmem>>, vector<1x8x3xbf16>
      %411 = vector.shape_cast %410 : vector<1x8x3xbf16> to vector<8x3xbf16>
      %cst_219 = arith.constant dense<0.000000e+00> : vector<16x3xf32>
      %412 = tpu.matmul %409, %411, %cst_219 {dimension_numbers = #tpu.dot_dimension_numbers<[1], [0], [0], [1], [0, 0, 1, 1], [], []>} : vector<16x8xbf16>, vector<8x3xbf16>, vector<16x3xf32> -> vector<16x3xf32>
      %413 = arith.addf %398, %412 : vector<16x3xf32>
      %414 = arith.addi %0, %arg8 : i32
      %c3_i32_220 = arith.constant 3 : i32
      %415 = arith.addi %414, %c3_i32_220 : i32
      %c0_221 = arith.constant 0 : index
      %416 = arith.index_cast %415 : i32 to index
      %c6_222 = arith.constant 6 : index
      %c0_223 = arith.constant 0 : index
      %417 = vector.load %arg2[%c0_221, %416, %c6_222, %c0_223] : memref<1x22x22x8xbf16, #tpu.memory_space<vmem>>, vector<1x1x16x8xbf16>
      %418 = vector.shape_cast %417 : vector<1x1x16x8xbf16> to vector<16x8xbf16>
      %419 = arith.extf %418 : vector<16x8xbf16> to vector<16x8xf32>
      %420 = arith.mulf %419, %3 : vector<16x8xf32>
      %421 = arith.addf %420, %6 : vector<16x8xf32>
      %cst_224 = arith.constant 0.000000e+00 : f32
      %422 = vector.broadcast %cst_224 : f32 to vector<16x8xf32>
      %423 = arith.maximumf %421, %422 : vector<16x8xf32>
      %424 = arith.truncf %423 : vector<16x8xf32> to vector<16x8xbf16>
      %c27 = arith.constant 27 : index
      %c0_225 = arith.constant 0 : index
      %c0_226 = arith.constant 0 : index
      %425 = vector.load %arg3[%c27, %c0_225, %c0_226] : memref<49x8x3xbf16, #tpu.memory_space<vmem>>, vector<1x8x3xbf16>
      %426 = vector.shape_cast %425 : vector<1x8x3xbf16> to vector<8x3xbf16>
      %cst_227 = arith.constant dense<0.000000e+00> : vector<16x3xf32>
      %427 = tpu.matmul %424, %426, %cst_227 {dimension_numbers = #tpu.dot_dimension_numbers<[1], [0], [0], [1], [0, 0, 1, 1], [], []>} : vector<16x8xbf16>, vector<8x3xbf16>, vector<16x3xf32> -> vector<16x3xf32>
      %428 = arith.addf %413, %427 : vector<16x3xf32>
      %429 = arith.addi %0, %arg8 : i32
      %c4_i32 = arith.constant 4 : i32
      %430 = arith.addi %429, %c4_i32 : i32
      %c0_228 = arith.constant 0 : index
      %431 = arith.index_cast %430 : i32 to index
      %c0_229 = arith.constant 0 : index
      %c0_230 = arith.constant 0 : index
      %432 = vector.load %arg2[%c0_228, %431, %c0_229, %c0_230] : memref<1x22x22x8xbf16, #tpu.memory_space<vmem>>, vector<1x1x16x8xbf16>
      %433 = vector.shape_cast %432 : vector<1x1x16x8xbf16> to vector<16x8xbf16>
      %434 = arith.extf %433 : vector<16x8xbf16> to vector<16x8xf32>
      %435 = arith.mulf %434, %3 : vector<16x8xf32>
      %436 = arith.addf %435, %6 : vector<16x8xf32>
      %cst_231 = arith.constant 0.000000e+00 : f32
      %437 = vector.broadcast %cst_231 : f32 to vector<16x8xf32>
      %438 = arith.maximumf %436, %437 : vector<16x8xf32>
      %439 = arith.truncf %438 : vector<16x8xf32> to vector<16x8xbf16>
      %c28 = arith.constant 28 : index
      %c0_232 = arith.constant 0 : index
      %c0_233 = arith.constant 0 : index
      %440 = vector.load %arg3[%c28, %c0_232, %c0_233] : memref<49x8x3xbf16, #tpu.memory_space<vmem>>, vector<1x8x3xbf16>
      %441 = vector.shape_cast %440 : vector<1x8x3xbf16> to vector<8x3xbf16>
      %cst_234 = arith.constant dense<0.000000e+00> : vector<16x3xf32>
      %442 = tpu.matmul %439, %441, %cst_234 {dimension_numbers = #tpu.dot_dimension_numbers<[1], [0], [0], [1], [0, 0, 1, 1], [], []>} : vector<16x8xbf16>, vector<8x3xbf16>, vector<16x3xf32> -> vector<16x3xf32>
      %443 = arith.addf %428, %442 : vector<16x3xf32>
      %444 = arith.addi %0, %arg8 : i32
      %c4_i32_235 = arith.constant 4 : i32
      %445 = arith.addi %444, %c4_i32_235 : i32
      %c0_236 = arith.constant 0 : index
      %446 = arith.index_cast %445 : i32 to index
      %c1_237 = arith.constant 1 : index
      %c0_238 = arith.constant 0 : index
      %447 = vector.load %arg2[%c0_236, %446, %c1_237, %c0_238] : memref<1x22x22x8xbf16, #tpu.memory_space<vmem>>, vector<1x1x16x8xbf16>
      %448 = vector.shape_cast %447 : vector<1x1x16x8xbf16> to vector<16x8xbf16>
      %449 = arith.extf %448 : vector<16x8xbf16> to vector<16x8xf32>
      %450 = arith.mulf %449, %3 : vector<16x8xf32>
      %451 = arith.addf %450, %6 : vector<16x8xf32>
      %cst_239 = arith.constant 0.000000e+00 : f32
      %452 = vector.broadcast %cst_239 : f32 to vector<16x8xf32>
      %453 = arith.maximumf %451, %452 : vector<16x8xf32>
      %454 = arith.truncf %453 : vector<16x8xf32> to vector<16x8xbf16>
      %c29 = arith.constant 29 : index
      %c0_240 = arith.constant 0 : index
      %c0_241 = arith.constant 0 : index
      %455 = vector.load %arg3[%c29, %c0_240, %c0_241] : memref<49x8x3xbf16, #tpu.memory_space<vmem>>, vector<1x8x3xbf16>
      %456 = vector.shape_cast %455 : vector<1x8x3xbf16> to vector<8x3xbf16>
      %cst_242 = arith.constant dense<0.000000e+00> : vector<16x3xf32>
      %457 = tpu.matmul %454, %456, %cst_242 {dimension_numbers = #tpu.dot_dimension_numbers<[1], [0], [0], [1], [0, 0, 1, 1], [], []>} : vector<16x8xbf16>, vector<8x3xbf16>, vector<16x3xf32> -> vector<16x3xf32>
      %458 = arith.addf %443, %457 : vector<16x3xf32>
      %459 = arith.addi %0, %arg8 : i32
      %c4_i32_243 = arith.constant 4 : i32
      %460 = arith.addi %459, %c4_i32_243 : i32
      %c0_244 = arith.constant 0 : index
      %461 = arith.index_cast %460 : i32 to index
      %c2_245 = arith.constant 2 : index
      %c0_246 = arith.constant 0 : index
      %462 = vector.load %arg2[%c0_244, %461, %c2_245, %c0_246] : memref<1x22x22x8xbf16, #tpu.memory_space<vmem>>, vector<1x1x16x8xbf16>
      %463 = vector.shape_cast %462 : vector<1x1x16x8xbf16> to vector<16x8xbf16>
      %464 = arith.extf %463 : vector<16x8xbf16> to vector<16x8xf32>
      %465 = arith.mulf %464, %3 : vector<16x8xf32>
      %466 = arith.addf %465, %6 : vector<16x8xf32>
      %cst_247 = arith.constant 0.000000e+00 : f32
      %467 = vector.broadcast %cst_247 : f32 to vector<16x8xf32>
      %468 = arith.maximumf %466, %467 : vector<16x8xf32>
      %469 = arith.truncf %468 : vector<16x8xf32> to vector<16x8xbf16>
      %c30 = arith.constant 30 : index
      %c0_248 = arith.constant 0 : index
      %c0_249 = arith.constant 0 : index
      %470 = vector.load %arg3[%c30, %c0_248, %c0_249] : memref<49x8x3xbf16, #tpu.memory_space<vmem>>, vector<1x8x3xbf16>
      %471 = vector.shape_cast %470 : vector<1x8x3xbf16> to vector<8x3xbf16>
      %cst_250 = arith.constant dense<0.000000e+00> : vector<16x3xf32>
      %472 = tpu.matmul %469, %471, %cst_250 {dimension_numbers = #tpu.dot_dimension_numbers<[1], [0], [0], [1], [0, 0, 1, 1], [], []>} : vector<16x8xbf16>, vector<8x3xbf16>, vector<16x3xf32> -> vector<16x3xf32>
      %473 = arith.addf %458, %472 : vector<16x3xf32>
      %474 = arith.addi %0, %arg8 : i32
      %c4_i32_251 = arith.constant 4 : i32
      %475 = arith.addi %474, %c4_i32_251 : i32
      %c0_252 = arith.constant 0 : index
      %476 = arith.index_cast %475 : i32 to index
      %c3_253 = arith.constant 3 : index
      %c0_254 = arith.constant 0 : index
      %477 = vector.load %arg2[%c0_252, %476, %c3_253, %c0_254] : memref<1x22x22x8xbf16, #tpu.memory_space<vmem>>, vector<1x1x16x8xbf16>
      %478 = vector.shape_cast %477 : vector<1x1x16x8xbf16> to vector<16x8xbf16>
      %479 = arith.extf %478 : vector<16x8xbf16> to vector<16x8xf32>
      %480 = arith.mulf %479, %3 : vector<16x8xf32>
      %481 = arith.addf %480, %6 : vector<16x8xf32>
      %cst_255 = arith.constant 0.000000e+00 : f32
      %482 = vector.broadcast %cst_255 : f32 to vector<16x8xf32>
      %483 = arith.maximumf %481, %482 : vector<16x8xf32>
      %484 = arith.truncf %483 : vector<16x8xf32> to vector<16x8xbf16>
      %c31 = arith.constant 31 : index
      %c0_256 = arith.constant 0 : index
      %c0_257 = arith.constant 0 : index
      %485 = vector.load %arg3[%c31, %c0_256, %c0_257] : memref<49x8x3xbf16, #tpu.memory_space<vmem>>, vector<1x8x3xbf16>
      %486 = vector.shape_cast %485 : vector<1x8x3xbf16> to vector<8x3xbf16>
      %cst_258 = arith.constant dense<0.000000e+00> : vector<16x3xf32>
      %487 = tpu.matmul %484, %486, %cst_258 {dimension_numbers = #tpu.dot_dimension_numbers<[1], [0], [0], [1], [0, 0, 1, 1], [], []>} : vector<16x8xbf16>, vector<8x3xbf16>, vector<16x3xf32> -> vector<16x3xf32>
      %488 = arith.addf %473, %487 : vector<16x3xf32>
      %489 = arith.addi %0, %arg8 : i32
      %c4_i32_259 = arith.constant 4 : i32
      %490 = arith.addi %489, %c4_i32_259 : i32
      %c0_260 = arith.constant 0 : index
      %491 = arith.index_cast %490 : i32 to index
      %c4_261 = arith.constant 4 : index
      %c0_262 = arith.constant 0 : index
      %492 = vector.load %arg2[%c0_260, %491, %c4_261, %c0_262] : memref<1x22x22x8xbf16, #tpu.memory_space<vmem>>, vector<1x1x16x8xbf16>
      %493 = vector.shape_cast %492 : vector<1x1x16x8xbf16> to vector<16x8xbf16>
      %494 = arith.extf %493 : vector<16x8xbf16> to vector<16x8xf32>
      %495 = arith.mulf %494, %3 : vector<16x8xf32>
      %496 = arith.addf %495, %6 : vector<16x8xf32>
      %cst_263 = arith.constant 0.000000e+00 : f32
      %497 = vector.broadcast %cst_263 : f32 to vector<16x8xf32>
      %498 = arith.maximumf %496, %497 : vector<16x8xf32>
      %499 = arith.truncf %498 : vector<16x8xf32> to vector<16x8xbf16>
      %c32 = arith.constant 32 : index
      %c0_264 = arith.constant 0 : index
      %c0_265 = arith.constant 0 : index
      %500 = vector.load %arg3[%c32, %c0_264, %c0_265] : memref<49x8x3xbf16, #tpu.memory_space<vmem>>, vector<1x8x3xbf16>
      %501 = vector.shape_cast %500 : vector<1x8x3xbf16> to vector<8x3xbf16>
      %cst_266 = arith.constant dense<0.000000e+00> : vector<16x3xf32>
      %502 = tpu.matmul %499, %501, %cst_266 {dimension_numbers = #tpu.dot_dimension_numbers<[1], [0], [0], [1], [0, 0, 1, 1], [], []>} : vector<16x8xbf16>, vector<8x3xbf16>, vector<16x3xf32> -> vector<16x3xf32>
      %503 = arith.addf %488, %502 : vector<16x3xf32>
      %504 = arith.addi %0, %arg8 : i32
      %c4_i32_267 = arith.constant 4 : i32
      %505 = arith.addi %504, %c4_i32_267 : i32
      %c0_268 = arith.constant 0 : index
      %506 = arith.index_cast %505 : i32 to index
      %c5_269 = arith.constant 5 : index
      %c0_270 = arith.constant 0 : index
      %507 = vector.load %arg2[%c0_268, %506, %c5_269, %c0_270] : memref<1x22x22x8xbf16, #tpu.memory_space<vmem>>, vector<1x1x16x8xbf16>
      %508 = vector.shape_cast %507 : vector<1x1x16x8xbf16> to vector<16x8xbf16>
      %509 = arith.extf %508 : vector<16x8xbf16> to vector<16x8xf32>
      %510 = arith.mulf %509, %3 : vector<16x8xf32>
      %511 = arith.addf %510, %6 : vector<16x8xf32>
      %cst_271 = arith.constant 0.000000e+00 : f32
      %512 = vector.broadcast %cst_271 : f32 to vector<16x8xf32>
      %513 = arith.maximumf %511, %512 : vector<16x8xf32>
      %514 = arith.truncf %513 : vector<16x8xf32> to vector<16x8xbf16>
      %c33 = arith.constant 33 : index
      %c0_272 = arith.constant 0 : index
      %c0_273 = arith.constant 0 : index
      %515 = vector.load %arg3[%c33, %c0_272, %c0_273] : memref<49x8x3xbf16, #tpu.memory_space<vmem>>, vector<1x8x3xbf16>
      %516 = vector.shape_cast %515 : vector<1x8x3xbf16> to vector<8x3xbf16>
      %cst_274 = arith.constant dense<0.000000e+00> : vector<16x3xf32>
      %517 = tpu.matmul %514, %516, %cst_274 {dimension_numbers = #tpu.dot_dimension_numbers<[1], [0], [0], [1], [0, 0, 1, 1], [], []>} : vector<16x8xbf16>, vector<8x3xbf16>, vector<16x3xf32> -> vector<16x3xf32>
      %518 = arith.addf %503, %517 : vector<16x3xf32>
      %519 = arith.addi %0, %arg8 : i32
      %c4_i32_275 = arith.constant 4 : i32
      %520 = arith.addi %519, %c4_i32_275 : i32
      %c0_276 = arith.constant 0 : index
      %521 = arith.index_cast %520 : i32 to index
      %c6_277 = arith.constant 6 : index
      %c0_278 = arith.constant 0 : index
      %522 = vector.load %arg2[%c0_276, %521, %c6_277, %c0_278] : memref<1x22x22x8xbf16, #tpu.memory_space<vmem>>, vector<1x1x16x8xbf16>
      %523 = vector.shape_cast %522 : vector<1x1x16x8xbf16> to vector<16x8xbf16>
      %524 = arith.extf %523 : vector<16x8xbf16> to vector<16x8xf32>
      %525 = arith.mulf %524, %3 : vector<16x8xf32>
      %526 = arith.addf %525, %6 : vector<16x8xf32>
      %cst_279 = arith.constant 0.000000e+00 : f32
      %527 = vector.broadcast %cst_279 : f32 to vector<16x8xf32>
      %528 = arith.maximumf %526, %527 : vector<16x8xf32>
      %529 = arith.truncf %528 : vector<16x8xf32> to vector<16x8xbf16>
      %c34 = arith.constant 34 : index
      %c0_280 = arith.constant 0 : index
      %c0_281 = arith.constant 0 : index
      %530 = vector.load %arg3[%c34, %c0_280, %c0_281] : memref<49x8x3xbf16, #tpu.memory_space<vmem>>, vector<1x8x3xbf16>
      %531 = vector.shape_cast %530 : vector<1x8x3xbf16> to vector<8x3xbf16>
      %cst_282 = arith.constant dense<0.000000e+00> : vector<16x3xf32>
      %532 = tpu.matmul %529, %531, %cst_282 {dimension_numbers = #tpu.dot_dimension_numbers<[1], [0], [0], [1], [0, 0, 1, 1], [], []>} : vector<16x8xbf16>, vector<8x3xbf16>, vector<16x3xf32> -> vector<16x3xf32>
      %533 = arith.addf %518, %532 : vector<16x3xf32>
      %534 = arith.addi %0, %arg8 : i32
      %c5_i32 = arith.constant 5 : i32
      %535 = arith.addi %534, %c5_i32 : i32
      %c0_283 = arith.constant 0 : index
      %536 = arith.index_cast %535 : i32 to index
      %c0_284 = arith.constant 0 : index
      %c0_285 = arith.constant 0 : index
      %537 = vector.load %arg2[%c0_283, %536, %c0_284, %c0_285] : memref<1x22x22x8xbf16, #tpu.memory_space<vmem>>, vector<1x1x16x8xbf16>
      %538 = vector.shape_cast %537 : vector<1x1x16x8xbf16> to vector<16x8xbf16>
      %539 = arith.extf %538 : vector<16x8xbf16> to vector<16x8xf32>
      %540 = arith.mulf %539, %3 : vector<16x8xf32>
      %541 = arith.addf %540, %6 : vector<16x8xf32>
      %cst_286 = arith.constant 0.000000e+00 : f32
      %542 = vector.broadcast %cst_286 : f32 to vector<16x8xf32>
      %543 = arith.maximumf %541, %542 : vector<16x8xf32>
      %544 = arith.truncf %543 : vector<16x8xf32> to vector<16x8xbf16>
      %c35 = arith.constant 35 : index
      %c0_287 = arith.constant 0 : index
      %c0_288 = arith.constant 0 : index
      %545 = vector.load %arg3[%c35, %c0_287, %c0_288] : memref<49x8x3xbf16, #tpu.memory_space<vmem>>, vector<1x8x3xbf16>
      %546 = vector.shape_cast %545 : vector<1x8x3xbf16> to vector<8x3xbf16>
      %cst_289 = arith.constant dense<0.000000e+00> : vector<16x3xf32>
      %547 = tpu.matmul %544, %546, %cst_289 {dimension_numbers = #tpu.dot_dimension_numbers<[1], [0], [0], [1], [0, 0, 1, 1], [], []>} : vector<16x8xbf16>, vector<8x3xbf16>, vector<16x3xf32> -> vector<16x3xf32>
      %548 = arith.addf %533, %547 : vector<16x3xf32>
      %549 = arith.addi %0, %arg8 : i32
      %c5_i32_290 = arith.constant 5 : i32
      %550 = arith.addi %549, %c5_i32_290 : i32
      %c0_291 = arith.constant 0 : index
      %551 = arith.index_cast %550 : i32 to index
      %c1_292 = arith.constant 1 : index
      %c0_293 = arith.constant 0 : index
      %552 = vector.load %arg2[%c0_291, %551, %c1_292, %c0_293] : memref<1x22x22x8xbf16, #tpu.memory_space<vmem>>, vector<1x1x16x8xbf16>
      %553 = vector.shape_cast %552 : vector<1x1x16x8xbf16> to vector<16x8xbf16>
      %554 = arith.extf %553 : vector<16x8xbf16> to vector<16x8xf32>
      %555 = arith.mulf %554, %3 : vector<16x8xf32>
      %556 = arith.addf %555, %6 : vector<16x8xf32>
      %cst_294 = arith.constant 0.000000e+00 : f32
      %557 = vector.broadcast %cst_294 : f32 to vector<16x8xf32>
      %558 = arith.maximumf %556, %557 : vector<16x8xf32>
      %559 = arith.truncf %558 : vector<16x8xf32> to vector<16x8xbf16>
      %c36 = arith.constant 36 : index
      %c0_295 = arith.constant 0 : index
      %c0_296 = arith.constant 0 : index
      %560 = vector.load %arg3[%c36, %c0_295, %c0_296] : memref<49x8x3xbf16, #tpu.memory_space<vmem>>, vector<1x8x3xbf16>
      %561 = vector.shape_cast %560 : vector<1x8x3xbf16> to vector<8x3xbf16>
      %cst_297 = arith.constant dense<0.000000e+00> : vector<16x3xf32>
      %562 = tpu.matmul %559, %561, %cst_297 {dimension_numbers = #tpu.dot_dimension_numbers<[1], [0], [0], [1], [0, 0, 1, 1], [], []>} : vector<16x8xbf16>, vector<8x3xbf16>, vector<16x3xf32> -> vector<16x3xf32>
      %563 = arith.addf %548, %562 : vector<16x3xf32>
      %564 = arith.addi %0, %arg8 : i32
      %c5_i32_298 = arith.constant 5 : i32
      %565 = arith.addi %564, %c5_i32_298 : i32
      %c0_299 = arith.constant 0 : index
      %566 = arith.index_cast %565 : i32 to index
      %c2_300 = arith.constant 2 : index
      %c0_301 = arith.constant 0 : index
      %567 = vector.load %arg2[%c0_299, %566, %c2_300, %c0_301] : memref<1x22x22x8xbf16, #tpu.memory_space<vmem>>, vector<1x1x16x8xbf16>
      %568 = vector.shape_cast %567 : vector<1x1x16x8xbf16> to vector<16x8xbf16>
      %569 = arith.extf %568 : vector<16x8xbf16> to vector<16x8xf32>
      %570 = arith.mulf %569, %3 : vector<16x8xf32>
      %571 = arith.addf %570, %6 : vector<16x8xf32>
      %cst_302 = arith.constant 0.000000e+00 : f32
      %572 = vector.broadcast %cst_302 : f32 to vector<16x8xf32>
      %573 = arith.maximumf %571, %572 : vector<16x8xf32>
      %574 = arith.truncf %573 : vector<16x8xf32> to vector<16x8xbf16>
      %c37 = arith.constant 37 : index
      %c0_303 = arith.constant 0 : index
      %c0_304 = arith.constant 0 : index
      %575 = vector.load %arg3[%c37, %c0_303, %c0_304] : memref<49x8x3xbf16, #tpu.memory_space<vmem>>, vector<1x8x3xbf16>
      %576 = vector.shape_cast %575 : vector<1x8x3xbf16> to vector<8x3xbf16>
      %cst_305 = arith.constant dense<0.000000e+00> : vector<16x3xf32>
      %577 = tpu.matmul %574, %576, %cst_305 {dimension_numbers = #tpu.dot_dimension_numbers<[1], [0], [0], [1], [0, 0, 1, 1], [], []>} : vector<16x8xbf16>, vector<8x3xbf16>, vector<16x3xf32> -> vector<16x3xf32>
      %578 = arith.addf %563, %577 : vector<16x3xf32>
      %579 = arith.addi %0, %arg8 : i32
      %c5_i32_306 = arith.constant 5 : i32
      %580 = arith.addi %579, %c5_i32_306 : i32
      %c0_307 = arith.constant 0 : index
      %581 = arith.index_cast %580 : i32 to index
      %c3_308 = arith.constant 3 : index
      %c0_309 = arith.constant 0 : index
      %582 = vector.load %arg2[%c0_307, %581, %c3_308, %c0_309] : memref<1x22x22x8xbf16, #tpu.memory_space<vmem>>, vector<1x1x16x8xbf16>
      %583 = vector.shape_cast %582 : vector<1x1x16x8xbf16> to vector<16x8xbf16>
      %584 = arith.extf %583 : vector<16x8xbf16> to vector<16x8xf32>
      %585 = arith.mulf %584, %3 : vector<16x8xf32>
      %586 = arith.addf %585, %6 : vector<16x8xf32>
      %cst_310 = arith.constant 0.000000e+00 : f32
      %587 = vector.broadcast %cst_310 : f32 to vector<16x8xf32>
      %588 = arith.maximumf %586, %587 : vector<16x8xf32>
      %589 = arith.truncf %588 : vector<16x8xf32> to vector<16x8xbf16>
      %c38 = arith.constant 38 : index
      %c0_311 = arith.constant 0 : index
      %c0_312 = arith.constant 0 : index
      %590 = vector.load %arg3[%c38, %c0_311, %c0_312] : memref<49x8x3xbf16, #tpu.memory_space<vmem>>, vector<1x8x3xbf16>
      %591 = vector.shape_cast %590 : vector<1x8x3xbf16> to vector<8x3xbf16>
      %cst_313 = arith.constant dense<0.000000e+00> : vector<16x3xf32>
      %592 = tpu.matmul %589, %591, %cst_313 {dimension_numbers = #tpu.dot_dimension_numbers<[1], [0], [0], [1], [0, 0, 1, 1], [], []>} : vector<16x8xbf16>, vector<8x3xbf16>, vector<16x3xf32> -> vector<16x3xf32>
      %593 = arith.addf %578, %592 : vector<16x3xf32>
      %594 = arith.addi %0, %arg8 : i32
      %c5_i32_314 = arith.constant 5 : i32
      %595 = arith.addi %594, %c5_i32_314 : i32
      %c0_315 = arith.constant 0 : index
      %596 = arith.index_cast %595 : i32 to index
      %c4_316 = arith.constant 4 : index
      %c0_317 = arith.constant 0 : index
      %597 = vector.load %arg2[%c0_315, %596, %c4_316, %c0_317] : memref<1x22x22x8xbf16, #tpu.memory_space<vmem>>, vector<1x1x16x8xbf16>
      %598 = vector.shape_cast %597 : vector<1x1x16x8xbf16> to vector<16x8xbf16>
      %599 = arith.extf %598 : vector<16x8xbf16> to vector<16x8xf32>
      %600 = arith.mulf %599, %3 : vector<16x8xf32>
      %601 = arith.addf %600, %6 : vector<16x8xf32>
      %cst_318 = arith.constant 0.000000e+00 : f32
      %602 = vector.broadcast %cst_318 : f32 to vector<16x8xf32>
      %603 = arith.maximumf %601, %602 : vector<16x8xf32>
      %604 = arith.truncf %603 : vector<16x8xf32> to vector<16x8xbf16>
      %c39 = arith.constant 39 : index
      %c0_319 = arith.constant 0 : index
      %c0_320 = arith.constant 0 : index
      %605 = vector.load %arg3[%c39, %c0_319, %c0_320] : memref<49x8x3xbf16, #tpu.memory_space<vmem>>, vector<1x8x3xbf16>
      %606 = vector.shape_cast %605 : vector<1x8x3xbf16> to vector<8x3xbf16>
      %cst_321 = arith.constant dense<0.000000e+00> : vector<16x3xf32>
      %607 = tpu.matmul %604, %606, %cst_321 {dimension_numbers = #tpu.dot_dimension_numbers<[1], [0], [0], [1], [0, 0, 1, 1], [], []>} : vector<16x8xbf16>, vector<8x3xbf16>, vector<16x3xf32> -> vector<16x3xf32>
      %608 = arith.addf %593, %607 : vector<16x3xf32>
      %609 = arith.addi %0, %arg8 : i32
      %c5_i32_322 = arith.constant 5 : i32
      %610 = arith.addi %609, %c5_i32_322 : i32
      %c0_323 = arith.constant 0 : index
      %611 = arith.index_cast %610 : i32 to index
      %c5_324 = arith.constant 5 : index
      %c0_325 = arith.constant 0 : index
      %612 = vector.load %arg2[%c0_323, %611, %c5_324, %c0_325] : memref<1x22x22x8xbf16, #tpu.memory_space<vmem>>, vector<1x1x16x8xbf16>
      %613 = vector.shape_cast %612 : vector<1x1x16x8xbf16> to vector<16x8xbf16>
      %614 = arith.extf %613 : vector<16x8xbf16> to vector<16x8xf32>
      %615 = arith.mulf %614, %3 : vector<16x8xf32>
      %616 = arith.addf %615, %6 : vector<16x8xf32>
      %cst_326 = arith.constant 0.000000e+00 : f32
      %617 = vector.broadcast %cst_326 : f32 to vector<16x8xf32>
      %618 = arith.maximumf %616, %617 : vector<16x8xf32>
      %619 = arith.truncf %618 : vector<16x8xf32> to vector<16x8xbf16>
      %c40 = arith.constant 40 : index
      %c0_327 = arith.constant 0 : index
      %c0_328 = arith.constant 0 : index
      %620 = vector.load %arg3[%c40, %c0_327, %c0_328] : memref<49x8x3xbf16, #tpu.memory_space<vmem>>, vector<1x8x3xbf16>
      %621 = vector.shape_cast %620 : vector<1x8x3xbf16> to vector<8x3xbf16>
      %cst_329 = arith.constant dense<0.000000e+00> : vector<16x3xf32>
      %622 = tpu.matmul %619, %621, %cst_329 {dimension_numbers = #tpu.dot_dimension_numbers<[1], [0], [0], [1], [0, 0, 1, 1], [], []>} : vector<16x8xbf16>, vector<8x3xbf16>, vector<16x3xf32> -> vector<16x3xf32>
      %623 = arith.addf %608, %622 : vector<16x3xf32>
      %624 = arith.addi %0, %arg8 : i32
      %c5_i32_330 = arith.constant 5 : i32
      %625 = arith.addi %624, %c5_i32_330 : i32
      %c0_331 = arith.constant 0 : index
      %626 = arith.index_cast %625 : i32 to index
      %c6_332 = arith.constant 6 : index
      %c0_333 = arith.constant 0 : index
      %627 = vector.load %arg2[%c0_331, %626, %c6_332, %c0_333] : memref<1x22x22x8xbf16, #tpu.memory_space<vmem>>, vector<1x1x16x8xbf16>
      %628 = vector.shape_cast %627 : vector<1x1x16x8xbf16> to vector<16x8xbf16>
      %629 = arith.extf %628 : vector<16x8xbf16> to vector<16x8xf32>
      %630 = arith.mulf %629, %3 : vector<16x8xf32>
      %631 = arith.addf %630, %6 : vector<16x8xf32>
      %cst_334 = arith.constant 0.000000e+00 : f32
      %632 = vector.broadcast %cst_334 : f32 to vector<16x8xf32>
      %633 = arith.maximumf %631, %632 : vector<16x8xf32>
      %634 = arith.truncf %633 : vector<16x8xf32> to vector<16x8xbf16>
      %c41 = arith.constant 41 : index
      %c0_335 = arith.constant 0 : index
      %c0_336 = arith.constant 0 : index
      %635 = vector.load %arg3[%c41, %c0_335, %c0_336] : memref<49x8x3xbf16, #tpu.memory_space<vmem>>, vector<1x8x3xbf16>
      %636 = vector.shape_cast %635 : vector<1x8x3xbf16> to vector<8x3xbf16>
      %cst_337 = arith.constant dense<0.000000e+00> : vector<16x3xf32>
      %637 = tpu.matmul %634, %636, %cst_337 {dimension_numbers = #tpu.dot_dimension_numbers<[1], [0], [0], [1], [0, 0, 1, 1], [], []>} : vector<16x8xbf16>, vector<8x3xbf16>, vector<16x3xf32> -> vector<16x3xf32>
      %638 = arith.addf %623, %637 : vector<16x3xf32>
      %639 = arith.addi %0, %arg8 : i32
      %c6_i32 = arith.constant 6 : i32
      %640 = arith.addi %639, %c6_i32 : i32
      %c0_338 = arith.constant 0 : index
      %641 = arith.index_cast %640 : i32 to index
      %c0_339 = arith.constant 0 : index
      %c0_340 = arith.constant 0 : index
      %642 = vector.load %arg2[%c0_338, %641, %c0_339, %c0_340] : memref<1x22x22x8xbf16, #tpu.memory_space<vmem>>, vector<1x1x16x8xbf16>
      %643 = vector.shape_cast %642 : vector<1x1x16x8xbf16> to vector<16x8xbf16>
      %644 = arith.extf %643 : vector<16x8xbf16> to vector<16x8xf32>
      %645 = arith.mulf %644, %3 : vector<16x8xf32>
      %646 = arith.addf %645, %6 : vector<16x8xf32>
      %cst_341 = arith.constant 0.000000e+00 : f32
      %647 = vector.broadcast %cst_341 : f32 to vector<16x8xf32>
      %648 = arith.maximumf %646, %647 : vector<16x8xf32>
      %649 = arith.truncf %648 : vector<16x8xf32> to vector<16x8xbf16>
      %c42 = arith.constant 42 : index
      %c0_342 = arith.constant 0 : index
      %c0_343 = arith.constant 0 : index
      %650 = vector.load %arg3[%c42, %c0_342, %c0_343] : memref<49x8x3xbf16, #tpu.memory_space<vmem>>, vector<1x8x3xbf16>
      %651 = vector.shape_cast %650 : vector<1x8x3xbf16> to vector<8x3xbf16>
      %cst_344 = arith.constant dense<0.000000e+00> : vector<16x3xf32>
      %652 = tpu.matmul %649, %651, %cst_344 {dimension_numbers = #tpu.dot_dimension_numbers<[1], [0], [0], [1], [0, 0, 1, 1], [], []>} : vector<16x8xbf16>, vector<8x3xbf16>, vector<16x3xf32> -> vector<16x3xf32>
      %653 = arith.addf %638, %652 : vector<16x3xf32>
      %654 = arith.addi %0, %arg8 : i32
      %c6_i32_345 = arith.constant 6 : i32
      %655 = arith.addi %654, %c6_i32_345 : i32
      %c0_346 = arith.constant 0 : index
      %656 = arith.index_cast %655 : i32 to index
      %c1_347 = arith.constant 1 : index
      %c0_348 = arith.constant 0 : index
      %657 = vector.load %arg2[%c0_346, %656, %c1_347, %c0_348] : memref<1x22x22x8xbf16, #tpu.memory_space<vmem>>, vector<1x1x16x8xbf16>
      %658 = vector.shape_cast %657 : vector<1x1x16x8xbf16> to vector<16x8xbf16>
      %659 = arith.extf %658 : vector<16x8xbf16> to vector<16x8xf32>
      %660 = arith.mulf %659, %3 : vector<16x8xf32>
      %661 = arith.addf %660, %6 : vector<16x8xf32>
      %cst_349 = arith.constant 0.000000e+00 : f32
      %662 = vector.broadcast %cst_349 : f32 to vector<16x8xf32>
      %663 = arith.maximumf %661, %662 : vector<16x8xf32>
      %664 = arith.truncf %663 : vector<16x8xf32> to vector<16x8xbf16>
      %c43 = arith.constant 43 : index
      %c0_350 = arith.constant 0 : index
      %c0_351 = arith.constant 0 : index
      %665 = vector.load %arg3[%c43, %c0_350, %c0_351] : memref<49x8x3xbf16, #tpu.memory_space<vmem>>, vector<1x8x3xbf16>
      %666 = vector.shape_cast %665 : vector<1x8x3xbf16> to vector<8x3xbf16>
      %cst_352 = arith.constant dense<0.000000e+00> : vector<16x3xf32>
      %667 = tpu.matmul %664, %666, %cst_352 {dimension_numbers = #tpu.dot_dimension_numbers<[1], [0], [0], [1], [0, 0, 1, 1], [], []>} : vector<16x8xbf16>, vector<8x3xbf16>, vector<16x3xf32> -> vector<16x3xf32>
      %668 = arith.addf %653, %667 : vector<16x3xf32>
      %669 = arith.addi %0, %arg8 : i32
      %c6_i32_353 = arith.constant 6 : i32
      %670 = arith.addi %669, %c6_i32_353 : i32
      %c0_354 = arith.constant 0 : index
      %671 = arith.index_cast %670 : i32 to index
      %c2_355 = arith.constant 2 : index
      %c0_356 = arith.constant 0 : index
      %672 = vector.load %arg2[%c0_354, %671, %c2_355, %c0_356] : memref<1x22x22x8xbf16, #tpu.memory_space<vmem>>, vector<1x1x16x8xbf16>
      %673 = vector.shape_cast %672 : vector<1x1x16x8xbf16> to vector<16x8xbf16>
      %674 = arith.extf %673 : vector<16x8xbf16> to vector<16x8xf32>
      %675 = arith.mulf %674, %3 : vector<16x8xf32>
      %676 = arith.addf %675, %6 : vector<16x8xf32>
      %cst_357 = arith.constant 0.000000e+00 : f32
      %677 = vector.broadcast %cst_357 : f32 to vector<16x8xf32>
      %678 = arith.maximumf %676, %677 : vector<16x8xf32>
      %679 = arith.truncf %678 : vector<16x8xf32> to vector<16x8xbf16>
      %c44 = arith.constant 44 : index
      %c0_358 = arith.constant 0 : index
      %c0_359 = arith.constant 0 : index
      %680 = vector.load %arg3[%c44, %c0_358, %c0_359] : memref<49x8x3xbf16, #tpu.memory_space<vmem>>, vector<1x8x3xbf16>
      %681 = vector.shape_cast %680 : vector<1x8x3xbf16> to vector<8x3xbf16>
      %cst_360 = arith.constant dense<0.000000e+00> : vector<16x3xf32>
      %682 = tpu.matmul %679, %681, %cst_360 {dimension_numbers = #tpu.dot_dimension_numbers<[1], [0], [0], [1], [0, 0, 1, 1], [], []>} : vector<16x8xbf16>, vector<8x3xbf16>, vector<16x3xf32> -> vector<16x3xf32>
      %683 = arith.addf %668, %682 : vector<16x3xf32>
      %684 = arith.addi %0, %arg8 : i32
      %c6_i32_361 = arith.constant 6 : i32
      %685 = arith.addi %684, %c6_i32_361 : i32
      %c0_362 = arith.constant 0 : index
      %686 = arith.index_cast %685 : i32 to index
      %c3_363 = arith.constant 3 : index
      %c0_364 = arith.constant 0 : index
      %687 = vector.load %arg2[%c0_362, %686, %c3_363, %c0_364] : memref<1x22x22x8xbf16, #tpu.memory_space<vmem>>, vector<1x1x16x8xbf16>
      %688 = vector.shape_cast %687 : vector<1x1x16x8xbf16> to vector<16x8xbf16>
      %689 = arith.extf %688 : vector<16x8xbf16> to vector<16x8xf32>
      %690 = arith.mulf %689, %3 : vector<16x8xf32>
      %691 = arith.addf %690, %6 : vector<16x8xf32>
      %cst_365 = arith.constant 0.000000e+00 : f32
      %692 = vector.broadcast %cst_365 : f32 to vector<16x8xf32>
      %693 = arith.maximumf %691, %692 : vector<16x8xf32>
      %694 = arith.truncf %693 : vector<16x8xf32> to vector<16x8xbf16>
      %c45 = arith.constant 45 : index
      %c0_366 = arith.constant 0 : index
      %c0_367 = arith.constant 0 : index
      %695 = vector.load %arg3[%c45, %c0_366, %c0_367] : memref<49x8x3xbf16, #tpu.memory_space<vmem>>, vector<1x8x3xbf16>
      %696 = vector.shape_cast %695 : vector<1x8x3xbf16> to vector<8x3xbf16>
      %cst_368 = arith.constant dense<0.000000e+00> : vector<16x3xf32>
      %697 = tpu.matmul %694, %696, %cst_368 {dimension_numbers = #tpu.dot_dimension_numbers<[1], [0], [0], [1], [0, 0, 1, 1], [], []>} : vector<16x8xbf16>, vector<8x3xbf16>, vector<16x3xf32> -> vector<16x3xf32>
      %698 = arith.addf %683, %697 : vector<16x3xf32>
      %699 = arith.addi %0, %arg8 : i32
      %c6_i32_369 = arith.constant 6 : i32
      %700 = arith.addi %699, %c6_i32_369 : i32
      %c0_370 = arith.constant 0 : index
      %701 = arith.index_cast %700 : i32 to index
      %c4_371 = arith.constant 4 : index
      %c0_372 = arith.constant 0 : index
      %702 = vector.load %arg2[%c0_370, %701, %c4_371, %c0_372] : memref<1x22x22x8xbf16, #tpu.memory_space<vmem>>, vector<1x1x16x8xbf16>
      %703 = vector.shape_cast %702 : vector<1x1x16x8xbf16> to vector<16x8xbf16>
      %704 = arith.extf %703 : vector<16x8xbf16> to vector<16x8xf32>
      %705 = arith.mulf %704, %3 : vector<16x8xf32>
      %706 = arith.addf %705, %6 : vector<16x8xf32>
      %cst_373 = arith.constant 0.000000e+00 : f32
      %707 = vector.broadcast %cst_373 : f32 to vector<16x8xf32>
      %708 = arith.maximumf %706, %707 : vector<16x8xf32>
      %709 = arith.truncf %708 : vector<16x8xf32> to vector<16x8xbf16>
      %c46 = arith.constant 46 : index
      %c0_374 = arith.constant 0 : index
      %c0_375 = arith.constant 0 : index
      %710 = vector.load %arg3[%c46, %c0_374, %c0_375] : memref<49x8x3xbf16, #tpu.memory_space<vmem>>, vector<1x8x3xbf16>
      %711 = vector.shape_cast %710 : vector<1x8x3xbf16> to vector<8x3xbf16>
      %cst_376 = arith.constant dense<0.000000e+00> : vector<16x3xf32>
      %712 = tpu.matmul %709, %711, %cst_376 {dimension_numbers = #tpu.dot_dimension_numbers<[1], [0], [0], [1], [0, 0, 1, 1], [], []>} : vector<16x8xbf16>, vector<8x3xbf16>, vector<16x3xf32> -> vector<16x3xf32>
      %713 = arith.addf %698, %712 : vector<16x3xf32>
      %714 = arith.addi %0, %arg8 : i32
      %c6_i32_377 = arith.constant 6 : i32
      %715 = arith.addi %714, %c6_i32_377 : i32
      %c0_378 = arith.constant 0 : index
      %716 = arith.index_cast %715 : i32 to index
      %c5_379 = arith.constant 5 : index
      %c0_380 = arith.constant 0 : index
      %717 = vector.load %arg2[%c0_378, %716, %c5_379, %c0_380] : memref<1x22x22x8xbf16, #tpu.memory_space<vmem>>, vector<1x1x16x8xbf16>
      %718 = vector.shape_cast %717 : vector<1x1x16x8xbf16> to vector<16x8xbf16>
      %719 = arith.extf %718 : vector<16x8xbf16> to vector<16x8xf32>
      %720 = arith.mulf %719, %3 : vector<16x8xf32>
      %721 = arith.addf %720, %6 : vector<16x8xf32>
      %cst_381 = arith.constant 0.000000e+00 : f32
      %722 = vector.broadcast %cst_381 : f32 to vector<16x8xf32>
      %723 = arith.maximumf %721, %722 : vector<16x8xf32>
      %724 = arith.truncf %723 : vector<16x8xf32> to vector<16x8xbf16>
      %c47 = arith.constant 47 : index
      %c0_382 = arith.constant 0 : index
      %c0_383 = arith.constant 0 : index
      %725 = vector.load %arg3[%c47, %c0_382, %c0_383] : memref<49x8x3xbf16, #tpu.memory_space<vmem>>, vector<1x8x3xbf16>
      %726 = vector.shape_cast %725 : vector<1x8x3xbf16> to vector<8x3xbf16>
      %cst_384 = arith.constant dense<0.000000e+00> : vector<16x3xf32>
      %727 = tpu.matmul %724, %726, %cst_384 {dimension_numbers = #tpu.dot_dimension_numbers<[1], [0], [0], [1], [0, 0, 1, 1], [], []>} : vector<16x8xbf16>, vector<8x3xbf16>, vector<16x3xf32> -> vector<16x3xf32>
      %728 = arith.addf %713, %727 : vector<16x3xf32>
      %729 = arith.addi %0, %arg8 : i32
      %c6_i32_385 = arith.constant 6 : i32
      %730 = arith.addi %729, %c6_i32_385 : i32
      %c0_386 = arith.constant 0 : index
      %731 = arith.index_cast %730 : i32 to index
      %c6_387 = arith.constant 6 : index
      %c0_388 = arith.constant 0 : index
      %732 = vector.load %arg2[%c0_386, %731, %c6_387, %c0_388] : memref<1x22x22x8xbf16, #tpu.memory_space<vmem>>, vector<1x1x16x8xbf16>
      %733 = vector.shape_cast %732 : vector<1x1x16x8xbf16> to vector<16x8xbf16>
      %734 = arith.extf %733 : vector<16x8xbf16> to vector<16x8xf32>
      %735 = arith.mulf %734, %3 : vector<16x8xf32>
      %736 = arith.addf %735, %6 : vector<16x8xf32>
      %cst_389 = arith.constant 0.000000e+00 : f32
      %737 = vector.broadcast %cst_389 : f32 to vector<16x8xf32>
      %738 = arith.maximumf %736, %737 : vector<16x8xf32>
      %739 = arith.truncf %738 : vector<16x8xf32> to vector<16x8xbf16>
      %c48 = arith.constant 48 : index
      %c0_390 = arith.constant 0 : index
      %c0_391 = arith.constant 0 : index
      %740 = vector.load %arg3[%c48, %c0_390, %c0_391] : memref<49x8x3xbf16, #tpu.memory_space<vmem>>, vector<1x8x3xbf16>
      %741 = vector.shape_cast %740 : vector<1x8x3xbf16> to vector<8x3xbf16>
      %cst_392 = arith.constant dense<0.000000e+00> : vector<16x3xf32>
      %742 = tpu.matmul %739, %741, %cst_392 {dimension_numbers = #tpu.dot_dimension_numbers<[1], [0], [0], [1], [0, 0, 1, 1], [], []>} : vector<16x8xbf16>, vector<8x3xbf16>, vector<16x3xf32> -> vector<16x3xf32>
      %743 = arith.addf %728, %742 : vector<16x3xf32>
      %c0_393 = arith.constant 0 : index
      %c0_394 = arith.constant 0 : index
      %744 = vector.load %arg6[%c0_393, %c0_394] : memref<1x3xf32, #tpu.memory_space<vmem>>, vector<1x3xf32>
      %745 = vector.broadcast %744 : vector<1x3xf32> to vector<16x3xf32>
      %746 = arith.addf %743, %745 : vector<16x3xf32>
      %747 = math.tanh %746 : vector<16x3xf32>
      %c0_395 = arith.constant 0 : index
      %748 = arith.index_cast %arg8 : i32 to index
      %c0_396 = arith.constant 0 : index
      %c0_397 = arith.constant 0 : index
      %749 = vector.load %arg7[%c0_395, %748, %c0_396, %c0_397] : memref<1x16x16x3xf32, #tpu.memory_space<vmem>>, vector<1x1x16x3xf32>
      %750 = vector.shape_cast %749 : vector<1x1x16x3xf32> to vector<16x3xf32>
      %751 = vector.shape_cast %747 : vector<16x3xf32> to vector<1x1x16x3xf32>
      tpu.vector_store %arg7[%c0_395, %748, %c0_396, %c0_397], %751 {strides = array<i32>} : memref<1x16x16x3xf32, #tpu.memory_space<vmem>>, vector<1x1x16x3xf32>,
    }
    %c16_i32_4 = arith.constant 16 : i32
    return
  }
  func.func @transform_0(%arg0: i32, %arg1: i32) -> (i32, i32, i32, i32) {
    %c0_i32 = arith.constant 0 : i32
    %c0_i32_0 = arith.constant 0 : i32
    %c0_i32_1 = arith.constant 0 : i32
    %c0_i32_2 = arith.constant 0 : i32
    return %arg0, %c0_i32, %c0_i32_0, %c0_i32_1 : i32, i32, i32, i32
  }
  func.func @transform_1(%arg0: i32, %arg1: i32) -> (i32, i32, i32) {
    %c0_i32 = arith.constant 0 : i32
    %c0_i32_0 = arith.constant 0 : i32
    %c0_i32_1 = arith.constant 0 : i32
    %c0_i32_2 = arith.constant 0 : i32
    return %c0_i32, %c0_i32_0, %c0_i32_1 : i32, i32, i32
  }
  func.func @transform_2(%arg0: i32, %arg1: i32) -> (i32, i32) {
    %c0_i32 = arith.constant 0 : i32
    %c0_i32_0 = arith.constant 0 : i32
    %c0_i32_1 = arith.constant 0 : i32
    return %c0_i32, %c0_i32_0 : i32, i32
  }
  func.func @transform_3(%arg0: i32, %arg1: i32) -> (i32, i32) {
    %c0_i32 = arith.constant 0 : i32
    %c0_i32_0 = arith.constant 0 : i32
    %c0_i32_1 = arith.constant 0 : i32
    return %c0_i32, %c0_i32_0 : i32, i32
  }
  func.func @transform_4(%arg0: i32, %arg1: i32) -> (i32, i32) {
    %c0_i32 = arith.constant 0 : i32
    %c0_i32_0 = arith.constant 0 : i32
    %c0_i32_1 = arith.constant 0 : i32
    return %c0_i32, %c0_i32_0 : i32, i32
  }
  func.func @transform_5(%arg0: i32, %arg1: i32) -> (i32, i32, i32, i32) {
    %c0_i32 = arith.constant 0 : i32
    %c0_i32_0 = arith.constant 0 : i32
    %c0_i32_1 = arith.constant 0 : i32
    return %arg0, %arg1, %c0_i32, %c0_i32_0 : i32, i32, i32, i32
  }
}

</mosaic_0001>

<bundles_post_ra>
// kernel: resnet_generator_forward.13
= control target key start
LH: loop header
LB: loop body
LE: loop exit
PB: predicated region body
PF: predicated region fallthrough
CT: control target
= control target key end

     0   :  { %vm106_vm0 = vcmask 588800   ;;  %vm131_vm1 = vcmask 1043456   ;;  %vm296_vm2 = vcmask 125952   ;;  %vm313_vm3 = vcmask 130048   ;;  %s743_s1 = inlined_call_operand.vmem [shape: bf16[72,16], index: 1, kind: input, shape index: {}]   ;;  %s744_s0 = inlined_call_operand.vmem [shape: bf16[128,72], index: 0, kind: input, shape index: {}]   ;;  %s745_s2 = inlined_call_operand.vmem [shape: bf16[128,16], index: 2, kind: output, shape index: {0}]   ;;  %s746_s3 = inlined_call_operand.vmem [shape: f32[1,2,16], index: 3, kind: output, shape index: {1}]  }
   0x1   :  { %v519_v0 = vld [vmem:[%s743_s1] sm:$0xff]   ;;  %v520_v1 = vld [vmem:[%s743_s1 + $0x8] sm:$0xff]   ;;  %v521_v2 = vld [vmem:[%s743_s1 + $0x10] sm:$0xff]   ;;  %vm351_vm4 = vcmask 122880  }
   0x2   :  { %481 = vmatprep.subr.bf16.mxu0 %v519_v0  ;;  %507 = vmatprep.subr.bf16.mxu1 %v519_v0  ;;  %v524_v3 = vld [vmem:[%s744_s0] sm:$0xff]   ;;  %v522_v4 = vld [vmem:[%s743_s1 + $0x18] sm:$0xff]   ;;  %v525_v8 = vld [vmem:[%s744_s0 + $0x8] sm:$0xff]  }
   0x3   :  { %482 = vmatpush3.bf16.msra.mxu0 %v519_v0  ;;  %512 = vmatpush3.bf16.msra.mxu1 %v519_v0  ;;  %v528_v5 = vld [vmem:[%s744_s0 + $0x20] sm:$0xff]   ;;  %v529_v9 = vld [vmem:[%s744_s0 + $0x28] sm:$0xff]   ;;  %v526_v10 = vld [vmem:[%s744_s0 + $0x10] sm:$0xff]  }
   0x4   :  { %483 = vmatprep.subr.bf16.mxu0 %v520_v1  ;;  %508 = vmatprep.subr.bf16.mxu1 %v520_v1  ;;  %v523_v6 = vld [vmem:[%s743_s1 + $0x20] ss:$0 sps:$4 sm:$0xff]   ;;  %v530_v11 = vld [vmem:[%s744_s0 + $0x30] sm:$0xff]   ;;  %v527_v12 = vld [vmem:[%s744_s0 + $0x18] sm:$0xff]  }
   0x5   :  { %491 = vmatprep.mubr.msk.bf16.mxu0 %vm106_vm0, %v524_v3  ;;  %499 = vmatprep.mubr.msk.bf16.mxu1 %vm106_vm0, %v528_v5  ;;  %v133_v7 = vsel %vm131_vm1, %v523_v6, 0  ;;  %v531_v13 = vld [vmem:[%s744_s0 + $0x38] sm:$0xff]  }
   0x7   :  { %484 = vmatpush3.bf16.msra.mxu0 %v520_v1  ;;  %513 = vmatpush3.bf16.msra.mxu1 %v520_v1 }
   0x8   :  { %485 = vmatprep.subr.bf16.mxu0 %v521_v2  ;;  %509 = vmatprep.subr.bf16.mxu1 %v521_v2 }
   0xb   :  { %486 = vmatpush3.bf16.msra.mxu0 %v521_v2  ;;  %514 = vmatpush3.bf16.msra.mxu1 %v521_v2 }
   0xc   :  { %487 = vmatprep.subr.bf16.mxu0 %v522_v4  ;;  %510 = vmatprep.subr.bf16.mxu1 %v522_v4 }
   0xf   :  { %488 = vmatpush3.bf16.msra.mxu0 %v522_v4  ;;  %515 = vmatpush3.bf16.msra.mxu1 %v522_v4 }
  0x10   :  { %517 = vmatprep.subr.msk.bf16.mxu0 %vm131_vm1, %v523_v6  ;;  %518 = vmatprep.subr.msk.bf16.mxu1 %vm131_vm1, %v523_v6 }
  0x13   :  { %490 = vmatpush3.bf16.msra.mxu0 %v133_v7  ;;  %516 = vmatpush3.bf16.msra.mxu1 %v133_v7 }
  0x16   :  { %492 = vmatmul.mubr.msk.bf16.vlgmr.msra.gmra.mrb[0].mxu0 %vm106_vm0, %v525_v8  ;;  %500 = vmatmul.mubr.msk.bf16.vlgmr.msra.gmra.mrb[0].mxu1 %vm106_vm0, %v529_v9 }
  0x17   :  { %495 = vmatprep.mubr.msk.bf16.mxu0 %vm106_vm0, %v526_v10  ;;  %503 = vmatprep.mubr.msk.bf16.mxu1 %vm106_vm0, %v530_v11 }
  0x1e   :  { %496 = vmatmul.mubr.msk.bf16.gmra.mrb[4].mxu0 %vm106_vm0, %v527_v12  ;;  %504 = vmatmul.mubr.msk.bf16.gmra.mrb[4].mxu1 %vm106_vm0, %v531_v13 }
  0xe9   :  { %v493_v14 = vpop.f32.mrb[0].mxu0  ;;  %v599_v15 = vpop.f32.mrb[0].mxu1 }
  0xea   :  { %v454_v16 = vpack.c.bf16 %v493_v14, %v493_v14  ;;  %v169_v17 = vpop.f32.mrb[1].mxu0  ;;  %v462_v18 = vpack.c.bf16 %v599_v15, %v599_v15  ;;  %v603_v19 = vpop.f32.mrb[1].mxu1  ;;  %v355_v24 = vmul.f32 %v493_v14, %v493_v14  ;;  %v317_v35 = vsel %vm313_vm3, %v493_v14, 0.0 }
  0xeb   :  { %v452_v20 = vpack.c.bf16 %v169_v17, %v169_v17  ;;  %v353_v21 = vmul.f32 %v169_v17, %v169_v17  ;;  %v494_v22 = vpop.f32.mrb[2].mxu0  ;;  %v605_v23 = vpop.f32.mrb[2].mxu1  ;;  %v314_v28 = vsel %vm313_vm3, %v169_v17, 0.0  ;;  %v460_v34 = vpack.c.bf16 %v603_v19, %v603_v19 }
  0xec   :  { %299 = vst.msk [vmem:[%s745_s2 + $0x8] sm:$0xf] %vm296_vm2, %v454_v16  ;;  %v455_v25 = vpack.c.bf16 %v494_v22, %v494_v22  ;;  %v172_v26 = vpop.f32.mrb[3].mxu0  ;;  %307 = vst.msk [vmem:[%s745_s2 + $0x28] sm:$0xf] %vm296_vm2, %v462_v18  ;;  %v615_v27 = vpop.f32.mrb[3].mxu1  ;;  %v356_v32 = vmul.f32 %v494_v22, %v494_v22  ;;  %v463_v38 = vpack.c.bf16 %v605_v23, %v605_v23 }
  0xed   :  { %297 = vst.msk [vmem:[%s745_s2] sm:$0xf] %vm296_vm2, %v452_v20  ;;  %v453_v29 = vpack.c.bf16 %v172_v26, %v172_v26  ;;  %v315_v30 = vsel %vm313_vm3, %v172_v26, 0.0  ;;  %v354_v31 = vmul.f32 %v172_v26, %v172_v26  ;;  %v369_v36 = vsel %vm313_vm3, %v353_v21, 0.0  ;;  %305 = vst.msk [vmem:[%s745_s2 + $0x20] sm:$0xf] %vm296_vm2, %v460_v34 }
  0xee   :  { %300 = vst.msk [vmem:[%s745_s2 + $0xc] sm:$0xf] %vm296_vm2, %v455_v25  ;;  %v316_v33 = vadd.f32 %v315_v30, %v314_v28  ;;  %v372_v41 = vsel %vm313_vm3, %v355_v24, 0.0  ;;  %308 = vst.msk [vmem:[%s745_s2 + $0x2c] sm:$0xf] %vm296_vm2, %v463_v38  ;;  %v461_v43 = vpack.c.bf16 %v615_v27, %v615_v27  ;;  %v319_v45 = vsel %vm313_vm3, %v494_v22, 0.0 }
  0xef   :  { %298 = vst.msk [vmem:[%s745_s2 + $0x4] sm:$0xf] %vm296_vm2, %v453_v29  ;;  %v370_v37 = vsel %vm313_vm3, %v354_v31, 0.0  ;;  %v374_v46 = vsel %vm313_vm3, %v356_v32, 0.0  ;;  %v361_v5 = vmul.f32 %v603_v19, %v603_v19  ;;  %v329_v16 = vsel %vm313_vm3, %v603_v19, 0.0 }
  0xf0   :  { %v318_v39 = vadd.f32 %v317_v35, %v316_v33  ;;  %v371_v40 = vadd.f32 %v370_v37, %v369_v36  ;;  %306 = vst.msk [vmem:[%s745_s2 + $0x24] sm:$0xf] %vm296_vm2, %v461_v43  ;;  %v362_v25 = vmul.f32 %v615_v27, %v615_v27  ;;  %v363_v28 = vmul.f32 %v599_v15, %v599_v15 }
  0xf1   :  { %v497_v42 = vpop.f32.mrb[4].mxu0  ;;  %v649_v44 = vpop.f32.mrb[4].mxu1  ;;  %v384_v24 = vsel %vm313_vm3, %v361_v5, 0.0  ;;  %v331_v29 = vsel %vm313_vm3, %v615_v27, 0.0  ;;  %v333_v32 = vsel %vm313_vm3, %v599_v15, 0.0  ;;  %v364_v33 = vmul.f32 %v605_v23, %v605_v23 }
  0xf2   :  { %v373_v47 = vadd.f32 %v372_v41, %v371_v40  ;;  %v458_v48 = vpack.c.bf16 %v497_v42, %v497_v42  ;;  %v185_v49 = vpop.f32.mrb[5].mxu0  ;;  %v217_v50 = vpop.f32.mrb[5].mxu1  ;;  %v320_v52 = vadd.f32 %v319_v45, %v318_v39  ;;  %v359_v0 = vmul.f32 %v497_v42, %v497_v42 }
  0xf3   :  { %v456_v51 = vpack.c.bf16 %v185_v49, %v185_v49  ;;  %v321_v53 = vsel %vm313_vm3, %v185_v49, 0.0  ;;  %v357_v54 = vmul.f32 %v185_v49, %v185_v49  ;;  %v498_v55 = vpop.f32.mrb[6].mxu0  ;;  %v658_v56 = vpop.f32.mrb[6].mxu1  ;;  %v466_v6 = vpack.c.bf16 %v649_v44, %v649_v44 }
  0xf4   :  { %303 = vst.msk [vmem:[%s745_s2 + $0x18] sm:$0xf] %vm296_vm2, %v458_v48  ;;  %v375_v57 = vadd.f32 %v374_v46, %v373_v47  ;;  %v459_v58 = vpack.c.bf16 %v498_v55, %v498_v55  ;;  %v188_v59 = vpop.f32.mrb[7].mxu0  ;;  %v220_v60 = vpop.f32.mrb[7].mxu1  ;;  %v322_v61 = vadd.f32 %v321_v53, %v320_v52  ;;  %v325_v7 = vsel %vm313_vm3, %v497_v42, 0.0 }
  0xf5   :  { %301 = vst.msk [vmem:[%s745_s2 + $0x10] sm:$0xf] %vm296_vm2, %v456_v51  ;;  %v376_v62 = vsel %vm313_vm3, %v357_v54, 0.0  ;;  %v457_v63 = vpack.c.bf16 %v188_v59, %v188_v59  ;;  %v323_v2 = vsel %vm313_vm3, %v188_v59, 0.0  ;;  %v358_v3 = vmul.f32 %v188_v59, %v188_v59  ;;  %311 = vst.msk [vmem:[%s745_s2 + $0x38] sm:$0xf] %vm296_vm2, %v466_v6 }
  0xf6   :  { %v377_v1 = vadd.f32 %v376_v62, %v375_v57  ;;  %304 = vst.msk [vmem:[%s745_s2 + $0x1c] sm:$0xf] %vm296_vm2, %v459_v58  ;;  %v324_v4 = vadd.f32 %v323_v2, %v322_v61  ;;  %v360_v8 = vmul.f32 %v498_v55, %v498_v55  ;;  %v464_v10 = vpack.c.bf16 %v217_v50, %v217_v50 }
  0xf7   :  { %302 = vst.msk [vmem:[%s745_s2 + $0x14] sm:$0xf] %vm296_vm2, %v457_v63  ;;  %v378_v9 = vsel %vm313_vm3, %v358_v3, 0.0  ;;  %v380_v13 = vsel %vm313_vm3, %v359_v0, 0.0  ;;  %v327_v14 = vsel %vm313_vm3, %v498_v55, 0.0  ;;  %v467_v17 = vpack.c.bf16 %v658_v56, %v658_v56 }
  0xf8   :  { %v326_v11 = vadd.f32 %v325_v7, %v324_v4  ;;  %v379_v12 = vadd.f32 %v378_v9, %v377_v1  ;;  %309 = vst.msk [vmem:[%s745_s2 + $0x30] sm:$0xf] %vm296_vm2, %v464_v10  ;;  %v465_v21 = vpack.c.bf16 %v220_v60, %v220_v60  ;;  %v382_v22 = vsel %vm313_vm3, %v360_v8, 0.0 }
  0xf9   :  { %312 = vst.msk [vmem:[%s745_s2 + $0x3c] sm:$0xf] %vm296_vm2, %v467_v17  ;;  %v386_v34 = vsel %vm313_vm3, %v362_v25, 0.0  ;;  %v365_v35 = vmul.f32 %v217_v50, %v217_v50  ;;  %v388_v38 = vsel %vm313_vm3, %v363_v28, 0.0  ;;  %v335_v39 = vsel %vm313_vm3, %v605_v23, 0.0 }
  0xfa   :  { %v381_v18 = vadd.f32 %v380_v13, %v379_v12  ;;  %v328_v20 = vadd.f32 %v327_v14, %v326_v11  ;;  %310 = vst.msk [vmem:[%s745_s2 + $0x34] sm:$0xf] %vm296_vm2, %v465_v21  ;;  %v337_v27 = vsel %vm313_vm3, %v217_v50, 0.0  ;;  %v390_v42 = vsel %vm313_vm3, %v364_v33, 0.0 }
  0xfb   :  { %v392_v15 = vsel %vm313_vm3, %v365_v35, 0.0  ;;  %v366_v43 = vmul.f32 %v220_v60, %v220_v60  ;;  %v367_v47 = vmul.f32 %v649_v44, %v649_v44  ;;  %v339_v48 = vsel %vm313_vm3, %v220_v60, 0.0 }
  0xfc   :  { %v330_v19 = vadd.f32 %v329_v16, %v328_v20  ;;  %v383_v26 = vadd.f32 %v382_v22, %v381_v18  ;;  %v341_v23 = vsel %vm313_vm3, %v649_v44, 0.0  ;;  %v368_v50 = vmul.f32 %v658_v56, %v658_v56 }
  0xfd   :  { %v394_v52 = vsel %vm313_vm3, %v366_v43, 0.0  ;;  %v396_v55 = vsel %vm313_vm3, %v367_v47, 0.0  ;;  %v343_v57 = vsel %vm313_vm3, %v658_v56, 0.0 }
  0xfe   :  { %v385_v30 = vadd.f32 %v384_v24, %v383_v26  ;;  %v332_v31 = vadd.f32 %v331_v29, %v330_v19  ;;  %v398_v60 = vsel %vm313_vm3, %v368_v50, 0.0 }
 0x100   :  { %v334_v36 = vadd.f32 %v333_v32, %v332_v31  ;;  %v387_v37 = vadd.f32 %v386_v34, %v385_v30 }
 0x102   :  { %v389_v40 = vadd.f32 %v388_v38, %v387_v37  ;;  %v336_v41 = vadd.f32 %v335_v39, %v334_v36 }
 0x104   :  { %v338_v45 = vadd.f32 %v337_v27, %v336_v41  ;;  %v391_v46 = vadd.f32 %v390_v42, %v389_v40 }
 0x106   :  { %v393_v49 = vadd.f32 %v392_v15, %v391_v46  ;;  %v340_v51 = vadd.f32 %v339_v48, %v338_v45 }
 0x108   :  { %v342_v53 = vadd.f32 %v341_v23, %v340_v51  ;;  %v395_v54 = vadd.f32 %v394_v52, %v393_v49 }
 0x10a   :  { %v344_v58 = vadd.f32 %v343_v57, %v342_v53  ;;  %v397_v59 = vadd.f32 %v396_v55, %v395_v54 }
 0x10c   :  { %v345_v61 = vrot.slane %v344_v58, 4  ;;  %v399_v62 = vadd.f32 %v398_v60, %v397_v59 }
 0x10e   :  { %v346_v63 = vadd.f32 %v345_v61, %v344_v58  ;;  %v400_v44 = vrot.slane %v399_v62, 4 }
 0x110   :  { %v347_v0 = vrot.slane %v346_v63, 2  ;;  %v401_v1 = vadd.f32 %v400_v44, %v399_v62 }
 0x112   :  { %v348_v2 = vadd.f32 %v347_v0, %v346_v63  ;;  %v402_v3 = vrot.slane %v401_v1, 2 }
 0x114   :  { %v349_v4 = vrot.slane %v348_v2, 1  ;;  %v403_v5 = vadd.f32 %v402_v3, %v401_v1 }
 0x116   :  { %v350_v6 = vadd.f32 %v349_v4, %v348_v2  ;;  %v404_v7 = vrot.slane %v403_v5, 1 }
 0x118   :  { %352 = vst.msk [vmem:[%s746_s3] sm:$0x1] %vm351_vm4, %v350_v6  ;;  %v405_v56 = vadd.f32 %v404_v7, %v403_v5 }
 0x11a   :  { %406 = vst.msk [vmem:[%s746_s3 + $0x1] sm:$0x1] %vm351_vm4, %v405_v56 }

// kernel: resnet_generator_forward.12
= control target key start
LH: loop header
LB: loop body
LE: loop exit
PB: predicated region body
PF: predicated region fallthrough
CT: control target
= control target key end

     0   :  { %s4595_s12 = smov 0   ;;  %s4597_s13 = smov 0   ;;  %s5246_s0 = inlined_call_operand.vmem [shape: bf16[2,22,22,4], index: 0, kind: input, shape index: {}]   ;;  %s5247_s1 = inlined_call_operand.vmem [shape: bf16[49,4,8], index: 1, kind: input, shape index: {}]   ;;  %s5248_s2 = inlined_call_operand.vmem [shape: bf16[2,16,16,8], index: 2, kind: output, shape index: {0}]   ;;  %s5249_s3 = inlined_call_operand.vmem [shape: f32[2,2,8], index: 3, kind: output, shape index: {1}]  }
   0x1   :  { %s4599_s14 = smov 0  }
   0x2 LB: > { %s26_s15 = sadd.s32 1, %s4555_s13  ;;  %p3607_p0 = scmp.ge.s32.totalorder %s4559_s14, 1  ;;  %s4559_s14 = sphi %s4599_s14, %s14_s14   ;;  %s4555_s13 = sphi %s4597_s13, %s5253_s13   ;;  %s4551_s12 = sphi %s4595_s12, %s5252_s12  }
   0x3   : > { %p28_p1 = scmp.ge.s32.totalorder %s26_s15, 2  ;;  %p156_p2 = scmp.lt.s32.totalorder %s4559_s14, 3 }
   0x5   : > { %s5255_s15 = smov (%p28_p1, %s26_s15), 0  ;;  %p157_p3 = pnand %p3607_p0, %p156_p2 }
   0x6   : > { %p190_p4 = scmp.lt.s32.totalorder (!%p157_p3), %s4551_s12, 1  ;;  %v4628_v0 = vmov (!%p157_p3), 0.0   ;;  %v4630_v1 = vmov (!%p157_p3), 0.0   ;;  %s4632_s28 = smov (!%p157_p3), 0  }
   0x7   : > { %160 = sbr.rel (%p157_p3) target bundleno = 558 (0x22e), region = 28 }
   0xe   : > { %s5257_s12 = smov (!%p190_p4, %s4551_s12), 1 }
   0xf   : > { %s4418_s16 = smul.u32 264, %s5257_s12  ;;  %s3831_s17 = sshll.u32 %s5257_s12, 7 }
  0x10   : > { %s4616_s20 = scalar_lea.vmem %s5248_s2, %s3831_s17  ;;  %s3611_s21 = sshll.u32 %s5257_s12, 1 }
  0x11   : > { %s4621_s24 = scalar_lea.vmem %s5246_s0, %s4418_s16  ;;  %s4626_s27 = scalar_lea.vmem %s5249_s3, %s3611_s21 }
  0x12 LB: >> { %vm257_vm0 = vcmask 1041408   ;;  %v3714_v2 = vld [vmem:[%s5247_s1 + $0x30] sm:$0x3]  ;;  %v3613_v3 = vld [vmem:[%s5247_s1 + $0x2] sm:$0x3]  ;;  %v4573_v4 = vmov 0.0   ;;  %s4571_s28 = sphi %s4632_s28, %s219_s28   ;;  %v4567_v1 = vphi %v4630_v1, %v5251_v1   ;;  %v4563_v0 = vphi %v4628_v0, %v5250_v0  }
  0x13   : >> { %4078 = vmatprep.subr.bf16.mxu0 %v4573_v4  ;;  %3934 = vmatprep.subr.bf16.mxu1 %v4573_v4  ;;  %v1800_v5 = vsel %vm257_vm0, %v3714_v2, 0  ;;  %v259_v6 = vsel %vm257_vm0, %v3613_v3, 0  ;;  %s3832_s6 = smul.u32 12, %s4571_s28  ;;  %vm4574_vm1 = vmmov 0   ;;  %v228_v18 = vld [vmem:[%s5247_s1] sm:$0x3] }
  0x14   : >> { %4079 = vmatpush3.bf16.msra.mxu0 %v1800_v5  ;;  %3935 = vmatpush3.bf16.msra.mxu1 %v259_v6  ;;  %vm240_vm2 = vsmask.f32 7424  ;;  %vm253_vm3 = vcmask 31744   ;;  %v3718_v30 = vld [vmem:[%s5247_s1 + $0x32] sm:$0x3]  ;;  %v305_v31 = vsel %vm257_vm0, %v228_v18, 0 }
  0x15   : >> { %3936 = vmatprep.mubr.msk.bf16.mxu1 %vm4574_vm1, %v4573_v4  ;;  %4080 = vmatprep.mubr.msk.bf16.mxu0 %vm4574_vm1, %v4573_v4  ;;  %s4660_s7 = scalar_lea.vmem %s4621_s24, %s3832_s6  ;;  %vm413_vm4 = vsmask.f32 6400  ;;  %v1858_v36 = vsel %vm257_vm0, %v3718_v30, 0  ;;  %v3618_v41 = vld [vmem:[%s5247_s1 + $0x4] sm:$0x3]  ;;  %vm486_vm5 = vcmask 1045504  }
  0x16   : >> { %4084 = vmatprep.subr.bf16.mxu0 %v4573_v4  ;;  %3940 = vmatprep.subr.bf16.mxu1 %v4573_v4  ;;  %v226_v7 = vld [vmem:[%s4660_s7] sm:$0xf]  ;;  %v4665_v8 = vld [vmem:[%s4660_s7 + $0x4] sm:$0xf]  ;;  %v4672_v11 = vld [vmem:[%s4660_s7 + $0x28] sm:$0xf] }
  0x17   : >> { %v3614_v9 = vcombine.low %v226_v7, %v4665_v8  ;;  %v4669_v10 = vld [vmem:[%s4660_s7 + $0x8] ss:$0 sps:$4 sm:$0x11]   ;;  %v3709_v12 = vld [vmem:[%s4660_s7 + $0x24] sm:$0xe]  ;;  %v362_v45 = vsel %vm257_vm0, %v3618_v41, 0 }
  0x18   : >> { %v249_v15 = vshll.u32 %v4669_v10, 16  ;;  %v4677_v16 = vcombine.low %v3709_v12, %v4672_v11  ;;  %v4472_v17 = vld [vmem:[%s4660_s7 + $0x2c] ss:$0 sps:$4 sm:$0x33]   ;;  %v3717_v35 = vld [vmem:[%s4660_s7 + $0x24] sm:$0xc] }
  0x19   : >> { %v242_v13 = vshrl.u32 %v3614_v9, 16  ;;  %v244_v14 = vshll.u32 %v3614_v9, 16  ;;  %v1788_v23 = vshrl.u32 %v4472_v17, 16  ;;  %v1791_v24 = vshll.u32 %v4472_v17, 16  ;;  %v348_v42 = vld [vmem:[%s4660_s7] sm:$0xe] }
  0x1a   : >> { %v251_v20 = vrot.slane %v249_v15, 1  ;;  %v1780_v21 = vshrl.u32 %v4677_v16, 16  ;;  %v1783_v22 = vshll.u32 %v4677_v16, 16  ;;  %v3719_v38 = vcombine.low %v3717_v35, %v4672_v11  ;;  %v4707_v43 = vld [vmem:[%s4660_s7 + $0x2c] ss:$0 sps:$4 sm:$0x77]  }
  0x1b   : >> { %v246_v19 = vrot.slane %v244_v14, 1  ;;  %v1790_v28 = vrot.slane %v1788_v23, 1  ;;  %v1793_v29 = vrot.slane %v1791_v24, 2  ;;  %v1852_v40 = vrot.slane %v4472_v17, 2  ;;  %v3722_v44 = vld [vmem:[%s5247_s1 + $0x34] sm:$0x3] }
  0x1c   : >> { %v1782_v26 = vrot.slane %v1780_v21, 1  ;;  %v1785_v27 = vrot.slane %v1783_v22, 2  ;;  %v1851_v39 = vrot.slane %v3719_v38, 2  ;;  %v3619_v47 = vcombine.low %v348_v42, %v4665_v8  ;;  %v4476_v59 = vld [vmem:[%s4660_s7 + $0x8] ss:$0 sps:$4 sm:$0x33]  }
  0x1d   : >> { %v247_v25 = vor.u32 %v246_v19, %v242_v13  ;;  %v1794_v34 = vor.u32 %v1793_v29, %v1790_v28  ;;  %v1910_v48 = vshrl.u32 %v3719_v38, 16  ;;  %v1913_v49 = vshll.u32 %v3719_v38, 16  ;;  %v3621_v60 = vld [vmem:[%s5247_s1 + $0x6] sm:$0x3]  ;;  %v3726_v2 = vld [vmem:[%s5247_s1 + $0x36] sm:$0x3] }
  0x1e   : >> { %v1786_v33 = vor.u32 %v1785_v27, %v1782_v26  ;;  %v1853_v46 = vsel %vm486_vm5, %v1851_v39, %v1852_v40  ;;  %v1918_v50 = vshrl.u32 %v4707_v43, 16  ;;  %v1921_v51 = vshll.u32 %v4707_v43, 16  ;;  %v3725_v18 = vld [vmem:[%s4660_s7 + $0x24] sm:$0x8]  ;;  %v3624_v22 = vld [vmem:[%s5247_s1 + $0x8] sm:$0x3] }
  0x1f   : >> { %v252_v32 = vsel %vm240_vm2, %v247_v25, %v251_v20  ;;  %v1930_v52 = vsel %vm257_vm0, %v3722_v44, 0  ;;  %v355_v53 = vrot.slane %v3619_v47, 1  ;;  %v356_v54 = vrot.slane %v4669_v10, 1  ;;  %v3731_v26 = vld [vmem:[%s5247_s1 + $0x38] sm:$0x3] }
  0x20   : >> { %3937 = vmatmul.mubr.msk.bf16.vlgmr.msra.gmra.mrb[0].mxu1 %vm253_vm3, %v252_v32  ;;  %v1795_v37 = vsel %vm413_vm4, %v1786_v33, %v1794_v34  ;;  %v1912_v55 = vrot.slane %v1910_v48, 2  ;;  %v1915_v56 = vrot.slane %v1913_v49, 3  ;;  %v1920_v57 = vrot.slane %v1918_v50, 2  ;;  %v480_v27 = vld [vmem:[%s4660_s7] sm:$0xc] }
  0x21   : >> { %3941 = vmatpush3.bf16.msra.mxu1 %v305_v31  ;;  %3942 = vmatprep.mubr.msk.bf16.mxu1 %vm4574_vm1, %v4573_v4  ;;  %v1923_v58 = vrot.slane %v1921_v51, 3  ;;  %vm354_vm6 = vcmask 1046528   ;;  %vm545_vm7 = vsmask.f32 5376  ;;  %v415_v3 = vshrl.u32 %v3619_v47, 16 }
  0x22   : >> { %3946 = vmatprep.subr.bf16.mxu1 %v4573_v4  ;;  %4081 = vmatmul.mubr.msk.bf16.vlgmr.msra.gmra.mrb[0].mxu0 %vm253_vm3, %v1795_v37  ;;  %v357_v61 = vsel %vm354_vm6, %v355_v53, %v356_v54  ;;  %v1916_v62 = vor.u32 %v1915_v56, %v1912_v55  ;;  %v418_v5 = vshll.u32 %v3619_v47, 16  ;;  %v423_v6 = vshrl.u32 %v4476_v59, 16  ;;  %v4769_v31 = vld [vmem:[%s4660_s7 + $0x8] ss:$0 sps:$4 sm:$0x77]  }
  0x23   : >> { %4085 = vmatpush3.bf16.msra.mxu0 %v1858_v36  ;;  %4086 = vmatprep.mubr.msk.bf16.mxu0 %vm4574_vm1, %v4573_v4  ;;  %v1924_v63 = vor.u32 %v1923_v58, %v1920_v57  ;;  %v426_v7 = vshll.u32 %v4476_v59, 16  ;;  %v1988_v12 = vsel %vm257_vm0, %v3726_v2, 0  ;;  %v417_v13 = vrot.slane %v415_v3, 1  ;;  %v3734_v34 = vld [vmem:[%s4660_s7 + $0x30] sm:$0xf] }
  0x24   : >> { %4090 = vmatprep.subr.bf16.mxu0 %v4573_v4  ;;  %v420_v14 = vrot.slane %v418_v5, 2  ;;  %v425_v15 = vrot.slane %v423_v6, 1  ;;  %v3727_v19 = vcombine.low %v3725_v18, %v4672_v11  ;;  %v1982_v24 = vrot.slane %v4707_v43, 3  ;;  %v4774_v35 = vld [vmem:[%s4660_s7 + $0x34] sm:$0xf] }
  0x25   : >> { %v1925_v10 = vsel %vm545_vm7, %v1916_v62, %v1924_v63  ;;  %v428_v17 = vrot.slane %v426_v7, 2  ;;  %vm618_vm8 = vcmask 1044480   ;;  %v494_v11 = vsel %vm257_vm0, %v3624_v22, 0  ;;  %v3627_v36 = vld [vmem:[%s5247_s1 + $0xa] sm:$0x3] }
  0x26   : >> { %v421_v20 = vor.u32 %v420_v14, %v417_v13  ;;  %v1981_v23 = vrot.slane %v3727_v19, 3  ;;  %v2050_v29 = vsel %vm257_vm0, %v3731_v26, 0  ;;  %v3625_v30 = vcombine.low %v480_v27, %v4665_v8  ;;  %v3737_v37 = vld [vmem:[%s5247_s1 + $0x3a] sm:$0x3]  ;;  %v3630_v58 = vld [vmem:[%s5247_s1 + $0xc] sm:$0x3] }
  0x27   : >> { %v429_v21 = vor.u32 %v428_v17, %v425_v15  ;;  %v488_v33 = vrot.slane %v4476_v59, 2  ;;  %v3738_v40 = vcombine.low %v3734_v34, %v4774_v35  ;;  %v555_v42 = vshrl.u32 %v4769_v31, 16  ;;  %v4482_v49 = vld [vmem:[%s4660_s7 + $0x38] ss:$0 sps:$4 sm:$0x11]  }
  0x28   : >> { %v1983_v28 = vsel %vm618_vm8, %v1981_v23, %v1982_v24  ;;  %v487_v32 = vrot.slane %v3625_v30, 2  ;;  %v547_v38 = vshrl.u32 %v3625_v30, 16  ;;  %v550_v39 = vshll.u32 %v3625_v30, 16  ;;  %v3742_v62 = vld [vmem:[%s5247_s1 + $0x3c] sm:$0x3] }
  0x29   : >> { %v430_v25 = vsel %vm413_vm4, %v421_v20, %v429_v21  ;;  %v558_v43 = vshll.u32 %v4769_v31, 16  ;;  %v567_v44 = vsel %vm257_vm0, %v3627_v36, 0  ;;  %v2111_v50 = vshll.u32 %v3738_v40, 16  ;;  %v612_v2 = vld [vmem:[%s4660_s7] sm:$0x8] }
  0x2a   : >> { %v489_v41 = vsel %vm486_vm5, %v487_v32, %v488_v33  ;;  %v549_v47 = vrot.slane %v547_v38, 2  ;;  %v552_v48 = vrot.slane %v550_v39, 3  ;;  %v557_v51 = vrot.slane %v555_v42, 2  ;;  %v3741_v7 = vld [vmem:[%s4660_s7 + $0x30] sm:$0xe] }
  0x2b   : >> { %v2109_v53 = vshrl.u32 %v3738_v40, 16  ;;  %v2113_v54 = vrot.slane %v2111_v50, 1  ;;  %v2116_v55 = vshll.u32 %v4482_v49, 16  ;;  %v626_v63 = vsel %vm257_vm0, %v3630_v58, 0  ;;  %v3746_v18 = vld [vmem:[%s5247_s1 + $0x3e] sm:$0x3] }
  0x2c   : >> { %3943 = vmatmul.mubr.msk.bf16.vlgmr.msra.gmra.mrb[0].mxu1 %vm253_vm3, %v3614_v9  ;;  %v435_v9 = vsel %vm257_vm0, %v3621_v60, 0  ;;  %v553_v56 = vor.u32 %v552_v48, %v549_v47  ;;  %v2182_v5 = vsel %vm257_vm0, %v3742_v62, 0  ;;  %v3631_v6 = vcombine.low %v612_v2, %v4665_v8  ;;  %v3635_v8 = vld [vmem:[%s5247_s1 + $0xe] sm:$0x3]  ;;  %v3641_v32 = vld [vmem:[%s5247_s1 + $0x10] sm:$0x3] }
  0x2d   : >> { %3947 = vmatpush3.bf16.msra.mxu1 %v362_v45  ;;  %3948 = vmatprep.mubr.msk.bf16.mxu1 %vm4574_vm1, %v4573_v4  ;;  %v4479_v45 = vld [vmem:[%s4660_s7 + $0x30] sm:$0xff]   ;;  %v2114_v59 = vor.u32 %v2113_v54, %v2109_v53  ;;  %v2118_v60 = vrot.slane %v2116_v55, 1  ;;  %v2176_v14 = vrot.slane %v4482_v49, 1  ;;  %v4825_v15 = vld [vmem:[%s4660_s7 + $0x38] ss:$0 sps:$4 sm:$0x33]  }
  0x2e   : >> { %3952 = vmatprep.subr.bf16.mxu1 %v4573_v4  ;;  %4087 = vmatmul.mubr.msk.bf16.vlgmr.msra.gmra.mrb[0].mxu0 %vm253_vm3, %v1853_v46  ;;  %v2124_v46 = vsel %vm257_vm0, %v3737_v37, 0  ;;  %v688_v19 = vsel %vm257_vm0, %v3635_v8, 0  ;;  %v2242_v23 = vshrl.u32 %v4825_v15, 16  ;;  %v2245_v24 = vshll.u32 %v4825_v15, 16  ;;  %v3638_v26 = vld [vmem:[%s4660_s7 + $0xc] sm:$0xf] }
  0x2f   : >> { %4091 = vmatpush3.bf16.msra.mxu0 %v1930_v52  ;;  %4092 = vmatprep.mubr.msk.bf16.mxu0 %vm4574_vm1, %v4573_v4  ;;  %v560_v52 = vrot.slane %v558_v43, 3  ;;  %v2119_v3 = vsel %vm240_vm2, %v2114_v59, %v2118_v60  ;;  %v4485_v33 = vld [vmem:[%s4660_s7 + $0xc] sm:$0xff]   ;;  %v4488_v37 = vld [vmem:[%s4660_s7 + $0x14] ss:$0 sps:$4 sm:$0x11]   ;;  %v762_v40 = vsel %vm257_vm0, %v3641_v32, 0 }
  0x30   : >> { %4096 = vmatprep.subr.bf16.mxu0 %v4573_v4  ;;  %v2247_v30 = vrot.slane %v2245_v24, 2  ;;  %v3750_v39 = vld [vmem:[%s5247_s1 + $0x40] sm:$0x3]  ;;  %v2306_v50 = vrot.slane %v4825_v15, 2  ;;  %v3645_v53 = vld [vmem:[%s4660_s7 + $0xc] sm:$0xe] }
  0x31   : >> { %v561_v57 = vor.u32 %v560_v52, %v557_v51  ;;  %v2312_v42 = vsel %vm257_vm0, %v3750_v39, 0  ;;  %v3646_v51 = vld [vmem:[%s5247_s1 + $0x12] sm:$0x3]  ;;  %v4876_v54 = vld [vmem:[%s4660_s7 + $0x38] ss:$0 sps:$4 sm:$0x77]  }
  0x32   : >> { %v2372_v62 = vshrl.u32 %v4876_v54, 16  ;;  %v3650_v8 = vld [vmem:[%s5247_s1 + $0x14] sm:$0x3]  ;;  %v3653_v39 = vld [vmem:[%s4660_s7 + $0xc] sm:$0xc]  ;;  %vm3406_vm9 = vcmask 60416  }
  0x33   : >> { %vm3409_vm10 = vcmask 64512  }
  0x38   : >> { %3949 = vmatmul.mubr.msk.bf16.vlgmr.msra.gmra.mrb[0].mxu1 %vm253_vm3, %v357_v61  ;;  %v562_v61 = vsel %vm545_vm7, %v553_v56, %v561_v57  ;;  %v3754_v56 = vld [vmem:[%s5247_s1 + $0x42] sm:$0x3]  ;;  %v820_v57 = vsel %vm257_vm0, %v3646_v51, 0 }
  0x39   : >> { %3953 = vmatpush3.bf16.msra.mxu1 %v435_v9  ;;  %3954 = vmatprep.mubr.msk.bf16.mxu1 %vm4574_vm1, %v4573_v4  ;;  %v3743_v9 = vcombine.low %v3741_v7, %v4774_v35  ;;  %v2384_v2 = vsel %vm257_vm0, %v3754_v56, 0 }
  0x3a   : >> { %3958 = vmatprep.subr.bf16.mxu1 %v4573_v4  ;;  %4093 = vmatmul.mubr.msk.bf16.vlgmr.msra.gmra.mrb[0].mxu0 %vm253_vm3, %v1925_v10  ;;  %v619_v10 = vrot.slane %v3631_v6, 3 }
  0x3b   : >> { %4097 = vmatpush3.bf16.msra.mxu0 %v1988_v12  ;;  %4098 = vmatprep.mubr.msk.bf16.mxu0 %vm4574_vm1, %v4573_v4  ;;  %v620_v12 = vrot.slane %v4769_v31, 3  ;;  %v2175_v13 = vrot.slane %v3743_v9, 1  ;;  %v2234_v20 = vshrl.u32 %v3743_v9, 16  ;;  %v2237_v22 = vshll.u32 %v3743_v9, 16 }
  0x3c   : >> { %4102 = vmatprep.subr.bf16.mxu0 %v4573_v4  ;;  %v2374_v9 = vrot.slane %v2372_v62, 2 }
  0x3d   : >> { %v621_v17 = vsel %vm618_vm8, %v619_v10, %v620_v12  ;;  %v2177_v21 = vsel %vm354_vm6, %v2175_v13, %v2176_v14  ;;  %v2236_v27 = vrot.slane %v2234_v20, 1  ;;  %v4492_v12 = vld [vmem:[%s4660_s7 + $0x14] ss:$0 sps:$4 sm:$0x33]  }
  0x3e   : >> { %v880_v20 = vshrl.u32 %v4492_v12, 16 }
  0x44   : >> { %3955 = vmatmul.mubr.msk.bf16.vlgmr.msra.gmra.mrb[0].mxu1 %vm253_vm3, %v430_v25  ;;  %v2254_v25 = vsel %vm257_vm0, %v3746_v18, 0 }
  0x45   : >> { %3959 = vmatpush3.bf16.msra.mxu1 %v494_v11  ;;  %3960 = vmatprep.mubr.msk.bf16.mxu1 %vm4574_vm1, %v4573_v4  ;;  %v4842_v11 = vld [vmem:[%s4660_s7 + $0x10] sm:$0xf] }
  0x46   : >> { %3964 = vmatprep.subr.bf16.mxu1 %v4573_v4  ;;  %4099 = vmatmul.mubr.msk.bf16.vlgmr.msra.gmra.mrb[0].mxu0 %vm253_vm3, %v1983_v28  ;;  %v2239_v28 = vrot.slane %v2237_v22, 2  ;;  %v3642_v31 = vcombine.low %v3638_v26, %v4842_v11  ;;  %v3647_v58 = vcombine.low %v3645_v53, %v4842_v11  ;;  %v892_v22 = vsel %vm257_vm0, %v3650_v8, 0 }
  0x47   : >> { %4103 = vmatpush3.bf16.msra.mxu0 %v2050_v29  ;;  %4104 = vmatprep.mubr.msk.bf16.mxu0 %vm4574_vm1, %v4573_v4  ;;  %v2244_v29 = vrot.slane %v2242_v23, 1 }
  0x48   : >> { %4108 = vmatprep.subr.bf16.mxu0 %v4573_v4  ;;  %v2240_v34 = vor.u32 %v2239_v28, %v2236_v27  ;;  %v749_v38 = vshll.u32 %v3642_v31, 16  ;;  %v747_v43 = vshrl.u32 %v3642_v31, 16  ;;  %v872_v18 = vshrl.u32 %v3647_v58, 16 }
  0x49   : >> { %v2248_v36 = vor.u32 %v2247_v30, %v2244_v29  ;;  %v882_v27 = vrot.slane %v880_v20, 1  ;;  %v3757_v29 = vld [vmem:[%s4660_s7 + $0x30] sm:$0x8] }
  0x4a   : >> { %v3759_v30 = vcombine.low %v3757_v29, %v4774_v35  ;;  %v3778_v29 = vld [vmem:[%s5247_s1 + $0x4c] sm:$0x3] }
  0x50   : >> { %3961 = vmatmul.mubr.msk.bf16.vlgmr.msra.gmra.mrb[0].mxu1 %vm253_vm3, %v489_v41  ;;  %v2249_v41 = vsel %vm413_vm4, %v2240_v34, %v2248_v36  ;;  %v2435_v34 = vrot.slane %v3759_v30, 3  ;;  %v2436_v36 = vrot.slane %v4876_v54, 3 }
  0x51   : >> { %3965 = vmatpush3.bf16.msra.mxu1 %v567_v44  ;;  %3966 = vmatprep.mubr.msk.bf16.mxu1 %vm4574_vm1, %v4573_v4  ;;  %v751_v44 = vrot.slane %v749_v38, 1  ;;  %v3763_v38 = vld [vmem:[%s5247_s1 + $0x46] sm:$0x3] }
  0x52   : >> { %3970 = vmatprep.subr.bf16.mxu1 %v4573_v4  ;;  %4105 = vmatmul.mubr.msk.bf16.vlgmr.msra.gmra.mrb[0].mxu0 %vm253_vm3, %v4479_v45  ;;  %v754_v45 = vshll.u32 %v4488_v37, 16 }
  0x53   : >> { %4109 = vmatpush3.bf16.msra.mxu0 %v2124_v46  ;;  %4110 = vmatprep.mubr.msk.bf16.mxu0 %vm4574_vm1, %v4573_v4  ;;  %v3749_v46 = vld [vmem:[%s4660_s7 + $0x30] sm:$0xc]  ;;  %v752_v48 = vor.u32 %v751_v44, %v747_v43  ;;  %v4938_v43 = vld [vmem:[%s4660_s7 + $0x14] ss:$0 sps:$4 sm:$0x77]  }
  0x54   : >> { %4114 = vmatprep.subr.bf16.mxu0 %v4573_v4  ;;  %v3751_v47 = vcombine.low %v3749_v46, %v4774_v35  ;;  %v756_v49 = vrot.slane %v754_v45, 1  ;;  %v944_v45 = vrot.slane %v4492_v12, 2  ;;  %v3766_v46 = vld [vmem:[%s4660_s7 + $0x3c] sm:$0xf] }
  0x56   : >> { %v2305_v52 = vrot.slane %v3751_v47, 2  ;;  %v757_v55 = vsel %vm240_vm2, %v752_v48, %v756_v49  ;;  %v2364_v59 = vshrl.u32 %v3751_v47, 16  ;;  %v3658_v48 = vld [vmem:[%s5247_s1 + $0x18] sm:$0x3] }
  0x57   : >> { %v1022_v56 = vsel %vm257_vm0, %v3658_v48, 0 }
  0x58   : >> { %v2307_v60 = vsel %vm486_vm5, %v2305_v52, %v2306_v50  ;;  %v2366_v6 = vrot.slane %v2364_v59, 2  ;;  %v3769_v52 = vld [vmem:[%s5247_s1 + $0x48] sm:$0x3]  ;;  %v4498_v59 = vld [vmem:[%s4660_s7 + $0x44] ss:$0 sps:$4 sm:$0x11]  }
  0x5c   : >> { %3967 = vmatmul.mubr.msk.bf16.vlgmr.msra.gmra.mrb[0].mxu1 %vm253_vm3, %v562_v61  ;;  %v2367_v61 = vshll.u32 %v3751_v47, 16  ;;  %v4943_v47 = vld [vmem:[%s4660_s7 + $0x40] sm:$0xf] }
  0x5d   : >> { %3971 = vmatpush3.bf16.msra.mxu1 %v626_v63  ;;  %3972 = vmatprep.mubr.msk.bf16.mxu1 %vm4574_vm1, %v4573_v4  ;;  %v2375_v63 = vshll.u32 %v4876_v54, 16  ;;  %v3770_v50 = vcombine.low %v3766_v46, %v4943_v47  ;;  %v1010_v54 = vshrl.u32 %v4938_v43, 16 }
  0x5e   : >> { %3976 = vmatprep.subr.bf16.mxu1 %v4573_v4  ;;  %4111 = vmatmul.mubr.msk.bf16.vlgmr.msra.gmra.mrb[0].mxu0 %vm253_vm3, %v2119_v3  ;;  %v813_v3 = vrot.slane %v3647_v58, 1  ;;  %v2369_v7 = vrot.slane %v2367_v61, 3 }
  0x5f   : >> { %4115 = vmatpush3.bf16.msra.mxu0 %v2182_v5  ;;  %4116 = vmatprep.mubr.msk.bf16.mxu0 %vm4574_vm1, %v4573_v4  ;;  %v814_v5 = vrot.slane %v4488_v37, 1  ;;  %v2377_v10 = vrot.slane %v2375_v63, 3  ;;  %v1012_v63 = vrot.slane %v1010_v54, 2  ;;  %v3781_v54 = vld [vmem:[%s4660_s7 + $0x3c] sm:$0xc] }
  0x60   : >> { %4120 = vmatprep.subr.bf16.mxu0 %v4573_v4  ;;  %v2370_v14 = vor.u32 %v2369_v7, %v2366_v6  ;;  %v2570_v6 = vshll.u32 %v4498_v59, 16 }
  0x61   : >> { %v815_v13 = vsel %vm354_vm6, %v813_v3, %v814_v5  ;;  %v2378_v15 = vor.u32 %v2377_v10, %v2374_v9  ;;  %v2563_v3 = vshrl.u32 %v3770_v50, 16  ;;  %v3662_v10 = vld [vmem:[%s5247_s1 + $0x1a] sm:$0x3] }
  0x62   : >> { %v2572_v8 = vrot.slane %v2570_v6, 1 }
  0x63   : >> { %v2379_v23 = vsel %vm545_vm7, %v2370_v14, %v2378_v15  ;;  %v3774_v14 = vld [vmem:[%s5247_s1 + $0x4a] sm:$0x3]  ;;  %v1080_v15 = vsel %vm257_vm0, %v3662_v10, 0 }
  0x68   : >> { %3973 = vmatmul.mubr.msk.bf16.vlgmr.msra.gmra.mrb[0].mxu1 %vm253_vm3, %v621_v17  ;;  %v3758_v17 = vld [vmem:[%s5247_s1 + $0x44] sm:$0x3] }
  0x69   : >> { %3977 = vmatpush3.bf16.msra.mxu1 %v688_v19  ;;  %3978 = vmatprep.mubr.msk.bf16.mxu1 %vm4574_vm1, %v4573_v4  ;;  %v875_v19 = vshll.u32 %v3647_v58, 16  ;;  %v2442_v24 = vsel %vm257_vm0, %v3758_v17, 0  ;;  %v2578_v58 = vsel %vm257_vm0, %v3769_v52, 0  ;;  %v3661_v17 = vld [vmem:[%s4660_s7 + $0xc] sm:$0x8] }
  0x6a   : >> { %3982 = vmatprep.subr.bf16.mxu1 %v4573_v4  ;;  %4117 = vmatmul.mubr.msk.bf16.vlgmr.msra.gmra.mrb[0].mxu0 %vm253_vm3, %v2177_v21  ;;  %v883_v21 = vshll.u32 %v4492_v12, 16  ;;  %v3663_v20 = vcombine.low %v3661_v17, %v4842_v11 }
  0x6b   : >> { %4121 = vmatpush3.bf16.msra.mxu0 %v2254_v25  ;;  %4122 = vmatprep.mubr.msk.bf16.mxu0 %vm4574_vm1, %v4573_v4  ;;  %v874_v25 = vrot.slane %v872_v18, 1  ;;  %v877_v26 = vrot.slane %v875_v19, 2  ;;  %v2636_v19 = vsel %vm257_vm0, %v3774_v14, 0 }
  0x6c   : >> { %4126 = vmatprep.subr.bf16.mxu0 %v4573_v4  ;;  %v885_v28 = vrot.slane %v883_v21, 2  ;;  %v3773_v21 = vld [vmem:[%s4660_s7 + $0x3c] sm:$0xe] }
  0x6d   : >> { %v878_v31 = vor.u32 %v877_v26, %v874_v25  ;;  %v2630_v26 = vrot.slane %v4498_v59, 1  ;;  %v3783_v59 = vcombine.low %v3781_v54, %v4943_v47 }
  0x6e   : >> { %v886_v32 = vor.u32 %v885_v28, %v882_v27  ;;  %v4502_v27 = vld [vmem:[%s4660_s7 + $0x44] ss:$0 sps:$4 sm:$0x33]  }
  0x70   : >> { %v887_v37 = vsel %vm413_vm4, %v878_v31, %v886_v32 }
  0x74   : >> { %3979 = vmatmul.mubr.msk.bf16.vlgmr.msra.gmra.mrb[0].mxu1 %vm253_vm3, %v4485_v33  ;;  %v3654_v33 = vld [vmem:[%s5247_s1 + $0x16] sm:$0x3] }
  0x75   : >> { %3983 = vmatpush3.bf16.msra.mxu1 %v762_v40  ;;  %3984 = vmatprep.mubr.msk.bf16.mxu1 %vm4574_vm1, %v4573_v4  ;;  %v950_v35 = vsel %vm257_vm0, %v3654_v33, 0  ;;  %v2437_v40 = vsel %vm618_vm8, %v2435_v34, %v2436_v36  ;;  %v2696_v34 = vshrl.u32 %v4502_v27, 16  ;;  %v2699_v36 = vshll.u32 %v4502_v27, 16 }
  0x76   : >> { %3988 = vmatprep.subr.bf16.mxu1 %v4573_v4  ;;  %4123 = vmatmul.mubr.msk.bf16.vlgmr.msra.gmra.mrb[0].mxu0 %vm253_vm3, %v2249_v41  ;;  %v2504_v41 = vsel %vm257_vm0, %v3763_v38, 0  ;;  %v3670_v38 = vld [vmem:[%s4660_s7 + $0x18] sm:$0xf] }
  0x77   : >> { %4127 = vmatpush3.bf16.msra.mxu0 %v2312_v42  ;;  %4128 = vmatprep.mubr.msk.bf16.mxu0 %vm4574_vm1, %v4573_v4  ;;  %v3655_v42 = vcombine.low %v3653_v39, %v4842_v11  ;;  %v3667_v11 = vld [vmem:[%s5247_s1 + $0x1c] sm:$0x3] }
  0x78   : >> { %4132 = vmatprep.subr.bf16.mxu0 %v4573_v4  ;;  %v1142_v30 = vsel %vm257_vm0, %v3667_v11, 0  ;;  %v3682_v11 = vld [vmem:[%s5247_s1 + $0x22] sm:$0x3] }
  0x79   : >> { %v943_v44 = vrot.slane %v3655_v42, 2  ;;  %v1002_v49 = vshrl.u32 %v3655_v42, 16  ;;  %v1005_v53 = vshll.u32 %v3655_v42, 16  ;;  %v2701_v42 = vrot.slane %v2699_v36, 2 }
  0x7b   : >> { %v945_v51 = vsel %vm486_vm5, %v943_v44, %v944_v45  ;;  %v1004_v61 = vrot.slane %v1002_v49, 2  ;;  %v1007_v62 = vrot.slane %v1005_v53, 3  ;;  %v3673_v44 = vld [vmem:[%s5247_s1 + $0x1e] sm:$0x3] }
  0x7c   : >> { %v4501_v45 = vld [vmem:[%s4660_s7 + $0x18] sm:$0xff]   ;;  %v4504_v49 = vld [vmem:[%s4660_s7 + $0x20] ss:$0 sps:$4 sm:$0x11]   ;;  %v1216_v52 = vsel %vm257_vm0, %v3673_v44, 0 }
  0x7d   : >> { %v1008_v7 = vor.u32 %v1007_v62, %v1004_v61  ;;  %v2759_v62 = vrot.slane %v3783_v59, 2 }
  0x80   : >> { %3985 = vmatmul.mubr.msk.bf16.vlgmr.msra.gmra.mrb[0].mxu1 %vm253_vm3, %v757_v55  ;;  %v1013_v55 = vshll.u32 %v4938_v43, 16 }
  0x81   : >> { %3989 = vmatpush3.bf16.msra.mxu1 %v820_v57  ;;  %3990 = vmatprep.mubr.msk.bf16.mxu1 %vm4574_vm1, %v4573_v4  ;;  %v4495_v57 = vld [vmem:[%s4660_s7 + $0x3c] sm:$0xff]  }
  0x82   : >> { %3994 = vmatprep.subr.bf16.mxu1 %v4573_v4  ;;  %4129 = vmatmul.mubr.msk.bf16.vlgmr.msra.gmra.mrb[0].mxu0 %vm253_vm3, %v2307_v60  ;;  %v2565_v60 = vshll.u32 %v3770_v50, 16 }
  0x83   : >> { %4133 = vmatpush3.bf16.msra.mxu0 %v2384_v2  ;;  %4134 = vmatprep.mubr.msk.bf16.mxu0 %vm4574_vm1, %v4573_v4  ;;  %v1015_v2 = vrot.slane %v1013_v55, 3 }
  0x84   : >> { %4138 = vmatprep.subr.bf16.mxu0 %v4573_v4  ;;  %v2567_v5 = vrot.slane %v2565_v60, 1 }
  0x85   : >> { %v1016_v9 = vor.u32 %v1015_v2, %v1012_v63  ;;  %v2760_v63 = vrot.slane %v4502_v27, 2  ;;  %v3678_v2 = vld [vmem:[%s5247_s1 + $0x20] sm:$0x3] }
  0x86   : >> { %v2568_v12 = vor.u32 %v2567_v5, %v2563_v3  ;;  %v3677_v3 = vld [vmem:[%s4660_s7 + $0x18] sm:$0xe]  ;;  %v5040_v5 = vld [vmem:[%s4660_s7 + $0x44] ss:$0 sps:$4 sm:$0x77]  }
  0x87   : >> { %v2761_v10 = vsel %vm486_vm5, %v2759_v62, %v2760_v63  ;;  %v2826_v14 = vshrl.u32 %v5040_v5, 16  ;;  %v3801_v63 = vld [vmem:[%s5247_s1 + $0x56] sm:$0x3] }
  0x88   : >> { %v2573_v18 = vsel %vm240_vm2, %v2568_v12, %v2572_v8  ;;  %v2818_v8 = vshrl.u32 %v3783_v59, 16 }
  0x8c   : >> { %3991 = vmatmul.mubr.msk.bf16.vlgmr.msra.gmra.mrb[0].mxu1 %vm253_vm3, %v815_v13  ;;  %v1017_v13 = vsel %vm545_vm7, %v1008_v7, %v1016_v9  ;;  %v3786_v7 = vld [vmem:[%s5247_s1 + $0x50] sm:$0x3]  ;;  %v1274_v9 = vsel %vm257_vm0, %v3678_v2, 0 }
  0x8d   : >> { %3995 = vmatpush3.bf16.msra.mxu1 %v892_v22  ;;  %3996 = vmatprep.mubr.msk.bf16.mxu1 %vm4574_vm1, %v4573_v4  ;;  %v3775_v22 = vcombine.low %v3773_v21, %v4943_v47  ;;  %v2838_v17 = vsel %vm257_vm0, %v3786_v7, 0 }
  0x8e   : >> { %4000 = vmatprep.subr.bf16.mxu1 %v4573_v4  ;;  %4135 = vmatmul.mubr.msk.bf16.vlgmr.msra.gmra.mrb[0].mxu0 %vm253_vm3, %v2379_v23  ;;  %v1073_v23 = vrot.slane %v3663_v20, 3  ;;  %v2820_v20 = vrot.slane %v2818_v8, 2 }
  0x8f   : >> { %4139 = vmatpush3.bf16.msra.mxu0 %v2442_v24  ;;  %4140 = vmatprep.mubr.msk.bf16.mxu0 %vm4574_vm1, %v4573_v4  ;;  %v1074_v24 = vrot.slane %v4938_v43, 3  ;;  %v2629_v25 = vrot.slane %v3775_v22, 1  ;;  %v2688_v31 = vshrl.u32 %v3775_v22, 16  ;;  %v2691_v33 = vshll.u32 %v3775_v22, 16 }
  0x90   : >> { %4144 = vmatprep.subr.bf16.mxu0 %v4573_v4  ;;  %v2828_v22 = vrot.slane %v2826_v14, 2 }
  0x91   : >> { %v1075_v28 = vsel %vm618_vm8, %v1073_v23, %v1074_v24  ;;  %v2631_v32 = vsel %vm354_vm6, %v2629_v25, %v2630_v26  ;;  %v2690_v39 = vrot.slane %v2688_v31, 1  ;;  %v4508_v24 = vld [vmem:[%s4660_s7 + $0x20] ss:$0 sps:$4 sm:$0x33]  }
  0x92   : >> { %v1334_v31 = vshrl.u32 %v4508_v24, 16 }
  0x98   : >> { %3997 = vmatmul.mubr.msk.bf16.vlgmr.msra.gmra.mrb[0].mxu1 %vm253_vm3, %v887_v37  ;;  %v2708_v37 = vsel %vm257_vm0, %v3778_v29, 0 }
  0x99   : >> { %4001 = vmatpush3.bf16.msra.mxu1 %v950_v35  ;;  %4002 = vmatprep.mubr.msk.bf16.mxu1 %vm4574_vm1, %v4573_v4  ;;  %v5007_v35 = vld [vmem:[%s4660_s7 + $0x1c] sm:$0xf] }
  0x9a   : >> { %4006 = vmatprep.subr.bf16.mxu1 %v4573_v4  ;;  %4141 = vmatmul.mubr.msk.bf16.vlgmr.msra.gmra.mrb[0].mxu0 %vm253_vm3, %v2437_v40  ;;  %v2693_v40 = vrot.slane %v2691_v33, 2  ;;  %v3674_v43 = vcombine.low %v3670_v38, %v5007_v35  ;;  %v3679_v12 = vcombine.low %v3677_v3, %v5007_v35  ;;  %v1346_v33 = vsel %vm257_vm0, %v3682_v11, 0 }
  0x9b   : >> { %4145 = vmatpush3.bf16.msra.mxu0 %v2504_v41  ;;  %4146 = vmatprep.mubr.msk.bf16.mxu0 %vm4574_vm1, %v4573_v4  ;;  %v2698_v41 = vrot.slane %v2696_v34, 1 }
  0x9c   : >> { %4150 = vmatprep.subr.bf16.mxu0 %v4573_v4  ;;  %v2694_v46 = vor.u32 %v2693_v40, %v2690_v39  ;;  %v1203_v50 = vshll.u32 %v3674_v43, 16  ;;  %v1326_v29 = vshrl.u32 %v3679_v12, 16  ;;  %v1336_v39 = vrot.slane %v1334_v31, 1 }
  0x9d   : >> { %v2702_v48 = vor.u32 %v2701_v42, %v2698_v41  ;;  %v3789_v41 = vld [vmem:[%s4660_s7 + $0x3c] sm:$0x8] }
  0x9e   : >> { %v3791_v42 = vcombine.low %v3789_v41, %v4943_v47  ;;  %v3810_v41 = vld [vmem:[%s5247_s1 + $0x5a] sm:$0x3] }
  0x9f   : >> { %v2703_v53 = vsel %vm413_vm4, %v2694_v46, %v2702_v48  ;;  %v2890_v48 = vrot.slane %v5040_v5, 3 }
  0xa0   : >> { %v2889_v46 = vrot.slane %v3791_v42, 3 }
  0xa4   : >> { %4003 = vmatmul.mubr.msk.bf16.vlgmr.msra.gmra.mrb[0].mxu1 %vm253_vm3, %v945_v51  ;;  %v3782_v51 = vld [vmem:[%s5247_s1 + $0x4e] sm:$0x3] }
  0xa5   : >> { %4007 = vmatpush3.bf16.msra.mxu1 %v1022_v56  ;;  %4008 = vmatprep.mubr.msk.bf16.mxu1 %vm4574_vm1, %v4573_v4  ;;  %v2766_v55 = vsel %vm257_vm0, %v3782_v51, 0  ;;  %v1201_v56 = vshrl.u32 %v3674_v43, 16  ;;  %v3795_v51 = vld [vmem:[%s5247_s1 + $0x54] sm:$0x3] }
  0xa6   : >> { %4012 = vmatprep.subr.bf16.mxu1 %v4573_v4  ;;  %4147 = vmatmul.mubr.msk.bf16.vlgmr.msra.gmra.mrb[0].mxu0 %vm253_vm3, %v4495_v57  ;;  %v1205_v57 = vrot.slane %v1203_v50, 1  ;;  %v3685_v50 = vld [vmem:[%s4660_s7 + $0x18] sm:$0xc]  ;;  %v2958_v54 = vsel %vm257_vm0, %v3795_v51, 0 }
  0xa7   : >> { %4151 = vmatpush3.bf16.msra.mxu0 %v2578_v58  ;;  %4152 = vmatprep.mubr.msk.bf16.mxu0 %vm4574_vm1, %v4573_v4  ;;  %v1208_v58 = vshll.u32 %v4504_v49, 16 }
  0xa8   : >> { %4156 = vmatprep.subr.bf16.mxu0 %v4573_v4  ;;  %v1206_v60 = vor.u32 %v1205_v57, %v1201_v56  ;;  %v1398_v56 = vrot.slane %v4508_v24, 2  ;;  %v4512_v57 = vld [vmem:[%s4660_s7 + $0x20] ss:$0 sps:$4 sm:$0x77]  }
  0xa9   : >> { %v1210_v61 = vrot.slane %v1208_v58, 1  ;;  %v3798_v58 = vld [vmem:[%s4660_s7 + $0x48] sm:$0xf] }
  0xab   : >> { %v1211_v6 = vsel %vm240_vm2, %v1206_v60, %v1210_v61  ;;  %v3690_v60 = vld [vmem:[%s5247_s1 + $0x26] sm:$0x3] }
  0xac   : >> { %v1476_v7 = vsel %vm257_vm0, %v3690_v60, 0 }
  0xb0   : >> { %4009 = vmatmul.mubr.msk.bf16.vlgmr.msra.gmra.mrb[0].mxu1 %vm253_vm3, %v1017_v13  ;;  %v2821_v13 = vshll.u32 %v3783_v59, 16  ;;  %v5105_v59 = vld [vmem:[%s4660_s7 + $0x4c] sm:$0xf] }
  0xb1   : >> { %4013 = vmatpush3.bf16.msra.mxu1 %v1080_v15  ;;  %4014 = vmatprep.mubr.msk.bf16.mxu1 %vm4574_vm1, %v4573_v4  ;;  %v2829_v15 = vshll.u32 %v5040_v5, 16  ;;  %v3802_v62 = vcombine.low %v3798_v58, %v5105_v59  ;;  %v1464_v5 = vshrl.u32 %v4512_v57, 16 }
  0xb2   : >> { %4018 = vmatprep.subr.bf16.mxu1 %v4573_v4  ;;  %4153 = vmatmul.mubr.msk.bf16.vlgmr.msra.gmra.mrb[0].mxu0 %vm253_vm3, %v2573_v18  ;;  %v1267_v18 = vrot.slane %v3679_v12, 1  ;;  %v2823_v21 = vrot.slane %v2821_v13, 3 }
  0xb3   : >> { %4157 = vmatpush3.bf16.msra.mxu0 %v2636_v19  ;;  %4158 = vmatprep.mubr.msk.bf16.mxu0 %vm4574_vm1, %v4573_v4  ;;  %v1268_v19 = vrot.slane %v4504_v49, 1  ;;  %v2831_v23 = vrot.slane %v2829_v15, 3  ;;  %v3019_v8 = vshll.u32 %v3802_v62, 16  ;;  %v1466_v15 = vrot.slane %v1464_v5, 2  ;;  %v3813_v5 = vld [vmem:[%s4660_s7 + $0x48] sm:$0xc] }
  0xb4   : >> { %4162 = vmatprep.subr.bf16.mxu0 %v4573_v4  ;;  %v2824_v26 = vor.u32 %v2823_v21, %v2820_v20 }
  0xb5   : >> { %v1269_v25 = vsel %vm354_vm6, %v1267_v18, %v1268_v19  ;;  %v2832_v27 = vor.u32 %v2831_v23, %v2828_v22  ;;  %v3017_v18 = vshrl.u32 %v3802_v62, 16  ;;  %v3021_v19 = vrot.slane %v3019_v8, 1  ;;  %v3694_v23 = vld [vmem:[%s5247_s1 + $0x28] sm:$0x3] }
  0xb7   : >> { %v2833_v34 = vsel %vm545_vm7, %v2824_v26, %v2832_v27  ;;  %v3806_v26 = vld [vmem:[%s5247_s1 + $0x58] sm:$0x3]  ;;  %v1534_v27 = vsel %vm257_vm0, %v3694_v23, 0 }
  0xb8   : >> { %v3090_v31 = vsel %vm257_vm0, %v3806_v26, 0 }
  0xbc   : >> { %4015 = vmatmul.mubr.msk.bf16.vlgmr.msra.gmra.mrb[0].mxu1 %vm253_vm3, %v1075_v28  ;;  %v3790_v28 = vld [vmem:[%s5247_s1 + $0x52] sm:$0x3] }
  0xbd   : >> { %4019 = vmatpush3.bf16.msra.mxu1 %v1142_v30  ;;  %4020 = vmatprep.mubr.msk.bf16.mxu1 %vm4574_vm1, %v4573_v4  ;;  %v1329_v30 = vshll.u32 %v3679_v12, 16  ;;  %v2896_v36 = vsel %vm257_vm0, %v3790_v28, 0  ;;  %v4514_v12 = vld [vmem:[%s4660_s7 + $0x50] ss:$0 sps:$4 sm:$0x11]  }
  0xbe   : >> { %4024 = vmatprep.subr.bf16.mxu1 %v4573_v4  ;;  %4159 = vmatmul.mubr.msk.bf16.vlgmr.msra.gmra.mrb[0].mxu0 %vm253_vm3, %v2631_v32  ;;  %v1337_v32 = vshll.u32 %v4508_v24, 16  ;;  %v3024_v20 = vshll.u32 %v4514_v12, 16  ;;  %v3022_v24 = vor.u32 %v3021_v19, %v3017_v18  ;;  %v3693_v28 = vld [vmem:[%s4660_s7 + $0x18] sm:$0x8] }
  0xbf   : >> { %4163 = vmatpush3.bf16.msra.mxu0 %v2708_v37  ;;  %4164 = vmatprep.mubr.msk.bf16.mxu0 %vm4574_vm1, %v4573_v4  ;;  %v1328_v37 = vrot.slane %v1326_v29, 1  ;;  %v1331_v38 = vrot.slane %v1329_v30, 2  ;;  %v3805_v30 = vld [vmem:[%s4660_s7 + $0x48] sm:$0xe] }
  0xc0   : >> { %4168 = vmatprep.subr.bf16.mxu0 %v4573_v4  ;;  %v1339_v40 = vrot.slane %v1337_v32, 2  ;;  %v3026_v11 = vrot.slane %v3024_v20, 1  ;;  %v3695_v32 = vcombine.low %v3693_v28, %v5007_v35  ;;  %v4522_v18 = vld [vmem:[%s4660_s7 + $0x50] ss:$0 sps:$4 sm:$0x77]  }
  0xc1   : >> { %v1332_v43 = vor.u32 %v1331_v38, %v1328_v37  ;;  %v3084_v38 = vrot.slane %v4514_v12, 1  ;;  %v3815_v12 = vcombine.low %v3813_v5, %v5105_v59  ;;  %v3818_v20 = vld [vmem:[%s5247_s1 + $0x5e] sm:$0x3] }
  0xc2   : >> { %v1340_v44 = vor.u32 %v1339_v40, %v1336_v39  ;;  %v3027_v29 = vsel %vm240_vm2, %v3022_v24, %v3026_v11  ;;  %v4518_v39 = vld [vmem:[%s4660_s7 + $0x50] ss:$0 sps:$4 sm:$0x33]   ;;  %v3280_v11 = vshrl.u32 %v4522_v18, 16  ;;  %v3292_v26 = vsel %vm257_vm0, %v3818_v20, 0 }
  0xc3   : >> { %v3272_v23 = vshrl.u32 %v3815_v12, 16  ;;  %v3275_v24 = vshll.u32 %v3815_v12, 16 }
  0xc4   : >> { %v1341_v49 = vsel %vm413_vm4, %v1332_v43, %v1340_v44 }
  0xc5   : >> { %v3277_v28 = vrot.slane %v3275_v24, 3 }
  0xc8   : >> { %4021 = vmatmul.mubr.msk.bf16.vlgmr.msra.gmra.mrb[0].mxu1 %vm253_vm3, %v4501_v45  ;;  %v3686_v45 = vld [vmem:[%s5247_s1 + $0x24] sm:$0x3] }
  0xc9   : >> { %4025 = vmatpush3.bf16.msra.mxu1 %v1216_v52  ;;  %4026 = vmatprep.mubr.msk.bf16.mxu1 %vm4574_vm1, %v4573_v4  ;;  %v1404_v47 = vsel %vm257_vm0, %v3686_v45, 0  ;;  %v2891_v52 = vsel %vm618_vm8, %v2889_v46, %v2890_v48  ;;  %v3150_v46 = vshrl.u32 %v4518_v39, 16  ;;  %v3153_v48 = vshll.u32 %v4518_v39, 16 }
  0xca   : >> { %4030 = vmatprep.subr.bf16.mxu1 %v4573_v4  ;;  %4165 = vmatmul.mubr.msk.bf16.vlgmr.msra.gmra.mrb[0].mxu0 %vm253_vm3, %v2703_v53  ;;  %v3687_v53 = vcombine.low %v3685_v50, %v5007_v35  ;;  %v3699_v35 = vld [vmem:[%s5247_s1 + $0x2a] sm:$0x3]  ;;  %v3702_v50 = vld [vmem:[%s4660_s7 + $0x24] sm:$0xf] }
  0xcb   : >> { %4169 = vmatpush3.bf16.msra.mxu0 %v2766_v55  ;;  %4170 = vmatprep.mubr.msk.bf16.mxu0 %vm4574_vm1, %v4573_v4  ;;  %v1596_v42 = vsel %vm257_vm0, %v3699_v35, 0 }
  0xcc   : >> { %4174 = vmatprep.subr.bf16.mxu0 %v4573_v4  ;;  %v1397_v55 = vrot.slane %v3687_v53, 2  ;;  %v1456_v2 = vshrl.u32 %v3687_v53, 16  ;;  %v1459_v3 = vshll.u32 %v3687_v53, 16  ;;  %v3155_v53 = vrot.slane %v3153_v48, 2 }
  0xce   : >> { %v1399_v61 = vsel %vm486_vm5, %v1397_v55, %v1398_v56  ;;  %v1458_v13 = vrot.slane %v1456_v2, 2  ;;  %v1461_v14 = vrot.slane %v1459_v3, 3  ;;  %v3705_v56 = vld [vmem:[%s5247_s1 + $0x2c] sm:$0x3] }
  0xcf   : >> { %v1670_v2 = vsel %vm257_vm0, %v3705_v56, 0 }
  0xd0   : >> { %v1462_v21 = vor.u32 %v1461_v14, %v1458_v13  ;;  %v3213_v14 = vrot.slane %v3815_v12, 2 }
  0xd4   : >> { %4027 = vmatmul.mubr.msk.bf16.vlgmr.msra.gmra.mrb[0].mxu1 %vm253_vm3, %v1211_v6  ;;  %v1467_v6 = vshll.u32 %v4512_v57, 16 }
  0xd5   : >> { %4031 = vmatpush3.bf16.msra.mxu1 %v1274_v9  ;;  %4032 = vmatprep.mubr.msk.bf16.mxu1 %vm4574_vm1, %v4573_v4  ;;  %v4511_v9 = vld [vmem:[%s4660_s7 + $0x48] sm:$0xff]  }
  0xd6   : >> { %4036 = vmatprep.subr.bf16.mxu1 %v4573_v4  ;;  %4171 = vmatmul.mubr.msk.bf16.vlgmr.msra.gmra.mrb[0].mxu0 %vm253_vm3, %v2761_v10  ;;  %v3032_v10 = vsel %vm257_vm0, %v3801_v63, 0  ;;  %v3814_v63 = vld [vmem:[%s5247_s1 + $0x5c] sm:$0x3] }
  0xd7   : >> { %4175 = vmatpush3.bf16.msra.mxu0 %v2838_v17  ;;  %4176 = vmatprep.mubr.msk.bf16.mxu0 %vm4574_vm1, %v4573_v4  ;;  %v1469_v17 = vrot.slane %v1467_v6, 3  ;;  %v3220_v6 = vsel %vm257_vm0, %v3814_v63, 0 }
  0xd8   : >> { %4180 = vmatprep.subr.bf16.mxu0 %v4573_v4 }
  0xd9   : >> { %v1470_v22 = vor.u32 %v1469_v17, %v1466_v15  ;;  %v3214_v15 = vrot.slane %v4518_v39, 2  ;;  %v3710_v17 = vld [vmem:[%s5247_s1 + $0x2e] sm:$0x3]  ;;  %v3821_v39 = vld [vmem:[%s4660_s7 + $0x48] sm:$0x8] }
  0xe0   : >> { %4033 = vmatmul.mubr.msk.bf16.vlgmr.msra.gmra.mrb[0].mxu1 %vm253_vm3, %v1269_v25  ;;  %v1471_v25 = vsel %vm545_vm7, %v1462_v21, %v1470_v22  ;;  %v1728_v21 = vsel %vm257_vm0, %v3710_v17, 0  ;;  %v3215_v22 = vsel %vm486_vm5, %v3213_v14, %v3214_v15 }
  0xe1   : >> { %4037 = vmatpush3.bf16.msra.mxu1 %v1346_v33  ;;  %4038 = vmatprep.mubr.msk.bf16.mxu1 %vm4574_vm1, %v4573_v4  ;;  %v3807_v33 = vcombine.low %v3805_v30, %v5105_v59 }
  0xe2   : >> { %4042 = vmatprep.subr.bf16.mxu1 %v4573_v4  ;;  %4177 = vmatmul.mubr.msk.bf16.vlgmr.msra.gmra.mrb[0].mxu0 %vm253_vm3, %v2833_v34  ;;  %v1527_v34 = vrot.slane %v3695_v32, 3 }
  0xe3   : >> { %4181 = vmatpush3.bf16.msra.mxu0 %v2896_v36  ;;  %4182 = vmatprep.mubr.msk.bf16.mxu0 %vm4574_vm1, %v4573_v4  ;;  %v1528_v36 = vrot.slane %v4512_v57, 3  ;;  %v3083_v37 = vrot.slane %v3807_v33, 1  ;;  %v3142_v44 = vshrl.u32 %v3807_v33, 16  ;;  %v3145_v45 = vshll.u32 %v3807_v33, 16  ;;  %v4517_v57 = vld [vmem:[%s4660_s7 + $0x24] sm:$0xff]  }
  0xe4   : >> { %4186 = vmatprep.subr.bf16.mxu0 %v4573_v4 }
  0xe5   : >> { %v1529_v40 = vsel %vm618_vm8, %v1527_v34, %v1528_v36  ;;  %v3085_v43 = vsel %vm354_vm6, %v3083_v37, %v3084_v38  ;;  %v3144_v51 = vrot.slane %v3142_v44, 1  ;;  %v3822_v37 = vld [vmem:[%s5247_s1 + $0x60] sm:$0x3] }
  0xe6   : >> { %v3350_v35 = vsel %vm257_vm0, %v3822_v37, 0 }
  0xec   : >> { %4039 = vmatmul.mubr.msk.bf16.vlgmr.msra.gmra.mrb[0].mxu1 %vm253_vm3, %v1341_v49  ;;  %v3162_v49 = vsel %vm257_vm0, %v3810_v41, 0  ;;  %v3344_v41 = vrot.slane %v4522_v18, 3 }
  0xed   : >> { %4043 = vmatpush3.bf16.msra.mxu1 %v1404_v47  ;;  %4044 = vmatprep.mubr.msk.bf16.mxu1 %vm4574_vm1, %v4573_v4  ;;  %v3147_v47 = vrot.slane %v3145_v45, 2 }
  0xee   : >> { %4048 = vmatprep.subr.bf16.mxu1 %v4573_v4  ;;  %4183 = vmatmul.mubr.msk.bf16.vlgmr.msra.gmra.mrb[0].mxu0 %vm253_vm3, %v2891_v52  ;;  %v3152_v52 = vrot.slane %v3150_v46, 1 }
  0xef   : >> { %4187 = vmatpush3.bf16.msra.mxu0 %v2958_v54  ;;  %4188 = vmatprep.mubr.msk.bf16.mxu0 %vm4574_vm1, %v4573_v4  ;;  %v4524_v54 = vld [vmem:[%s4660_s7 + $0x28] sm:$0xf]  ;;  %v3148_v58 = vor.u32 %v3147_v47, %v3144_v51 }
  0xf0   : >> { %4192 = vmatprep.subr.bf16.mxu0 %v4573_v4  ;;  %v3706_v55 = vcombine.low %v3702_v50, %v4524_v54  ;;  %v3156_v60 = vor.u32 %v3155_v53, %v3152_v52 }
  0xf2   : >> { %v1657_v62 = vshll.u32 %v3706_v55, 16  ;;  %v3157_v3 = vsel %vm413_vm4, %v3148_v58, %v3156_v60 }
  0xf8   : >> { %4045 = vmatmul.mubr.msk.bf16.vlgmr.msra.gmra.mrb[0].mxu1 %vm253_vm3, %v1399_v61  ;;  %v4520_v61 = vld [vmem:[%s4660_s7 + $0x2c] ss:$0 sps:$4 sm:$0x11]   ;;  %s3835_s7 = sshll.u32 %s4571_s28, 3  ;;  %s219_s28 = sadd.s32 1, %s4571_s28  }
  0xf9   : >> { %4049 = vmatpush3.bf16.msra.mxu1 %v1476_v7  ;;  %4050 = vmatprep.mubr.msk.bf16.mxu1 %vm4574_vm1, %v4573_v4  ;;  %v1655_v7 = vshrl.u32 %v3706_v55, 16  ;;  %v1722_v32 = vrot.slane %v4520_v61, 1  ;;  %s3405_s6 = scalar_lea.vmem %s4616_s20, %s3835_s7  ;;  %p216_p5 = scmp.ge.s32.totalorder %s219_s28, 16  }
  0xfa   : >> { %4054 = vmatprep.subr.bf16.mxu1 %v4573_v4  ;;  %4189 = vmatmul.mubr.msk.bf16.vlgmr.msra.gmra.mrb[0].mxu0 %vm253_vm3, %v4511_v9  ;;  %v1659_v9 = vrot.slane %v1657_v62, 1  ;;  %vm3432_vm11 = vcmask (%p216_p5), 57344  }
  0xfb   : >> { %4193 = vmatpush3.bf16.msra.mxu0 %v3032_v10  ;;  %4194 = vmatprep.mubr.msk.bf16.mxu0 %vm4574_vm1, %v4573_v4  ;;  %v1662_v10 = vshll.u32 %v4520_v61, 16 }
  0xfc   : >> { %4198 = vmatprep.subr.bf16.mxu0 %v4573_v4  ;;  %v1660_v8 = vor.u32 %v1659_v9, %v1655_v7 }
  0xfd   : >> { %v1664_v13 = vrot.slane %v1662_v10, 1 }
  0xff   : >> { %v1665_v19 = vsel %vm240_vm2, %v1660_v8, %v1664_v13 }
 0x104   : >> { %4051 = vmatmul.mubr.msk.bf16.vlgmr.msra.gmra.mrb[0].mxu1 %vm253_vm3, %v1471_v25  ;;  %v3283_v25 = vshll.u32 %v4522_v18, 16 }
 0x105   : >> { %4055 = vmatpush3.bf16.msra.mxu1 %v1534_v27  ;;  %4056 = vmatprep.mubr.msk.bf16.mxu1 %vm4574_vm1, %v4573_v4  ;;  %v3274_v27 = vrot.slane %v3272_v23, 2 }
 0x106   : >> { %4060 = vmatprep.subr.bf16.mxu1 %v4573_v4  ;;  %4195 = vmatmul.mubr.msk.bf16.vlgmr.msra.gmra.mrb[0].mxu0 %vm253_vm3, %v3027_v29  ;;  %v3282_v29 = vrot.slane %v3280_v11, 2  ;;  %v3285_v30 = vrot.slane %v3283_v25, 3 }
 0x107   : >> { %4199 = vmatpush3.bf16.msra.mxu0 %v3090_v31  ;;  %4200 = vmatprep.mubr.msk.bf16.mxu0 %vm4574_vm1, %v4573_v4  ;;  %v1721_v31 = vrot.slane %v4677_v16, 1  ;;  %v3278_v33 = vor.u32 %v3277_v28, %v3274_v27  ;;  %v3823_v16 = vcombine.low %v3821_v39, %v5105_v59 }
 0x108   : >> { %4204 = vmatprep.subr.bf16.mxu0 %v4573_v4  ;;  %v3286_v34 = vor.u32 %v3285_v30, %v3282_v29 }
 0x109   : >> { %v1723_v36 = vsel %vm354_vm6, %v1721_v31, %v1722_v32 }
 0x10a   : >> { %v3287_v38 = vsel %vm545_vm7, %v3278_v33, %v3286_v34 }
 0x110   : >> { %4057 = vmatmul.mubr.msk.bf16.vlgmr.msra.gmra.mrb[0].mxu1 %vm253_vm3, %v1529_v40  ;;  %v3343_v40 = vrot.slane %v3823_v16, 3 }
 0x111   : >> { %4061 = vmatpush3.bf16.msra.mxu1 %v1596_v42  ;;  %4062 = vmatprep.mubr.msk.bf16.mxu1 %vm4574_vm1, %v4573_v4 }
 0x112   : >> { %4066 = vmatprep.subr.bf16.mxu1 %v4573_v4  ;;  %4201 = vmatmul.mubr.msk.bf16.vlgmr.msra.gmra.mrb[0].mxu0 %vm253_vm3, %v3085_v43  ;;  %v3345_v42 = vsel %vm618_vm8, %v3343_v40, %v3344_v41 }
 0x113   : >> { %4205 = vmatpush3.bf16.msra.mxu0 %v3162_v49  ;;  %4206 = vmatprep.mubr.msk.bf16.mxu0 %vm4574_vm1, %v4573_v4 }
 0x114   : >> { %4210 = vmatprep.subr.bf16.mxu0 %v4573_v4 }
 0x11c   : >> { %4063 = vmatmul.mubr.msk.bf16.vlgmr.msra.gmra.mrb[0].mxu1 %vm253_vm3, %v4517_v57 }
 0x11d   : >> { %4067 = vmatpush3.bf16.msra.mxu1 %v1670_v2  ;;  %4068 = vmatprep.mubr.msk.bf16.mxu1 %vm4574_vm1, %v4573_v4 }
 0x11e   : >> { %4072 = vmatprep.subr.bf16.mxu1 %v4573_v4  ;;  %4207 = vmatmul.mubr.msk.bf16.vlgmr.msra.gmra.mrb[0].mxu0 %vm253_vm3, %v3157_v3 }
 0x11f   : >> { %4211 = vmatpush3.bf16.msra.mxu0 %v3220_v6  ;;  %4212 = vmatprep.mubr.msk.bf16.mxu0 %vm4574_vm1, %v4573_v4 }
 0x120   : >> { %4216 = vmatprep.subr.bf16.mxu0 %v4573_v4 }
 0x128   : >> { %4069 = vmatmul.mubr.msk.bf16.vlgmr.msra.gmra.mrb[0].mxu1 %vm253_vm3, %v1665_v19 }
 0x129   : >> { %4073 = vmatpush3.bf16.msra.mxu1 %v1728_v21  ;;  %4074 = vmatprep.mubr.msk.bf16.mxu1 %vm4574_vm1, %v4573_v4 }
 0x12a   : >> { %4213 = vmatmul.mubr.msk.bf16.vlgmr.msra.gmra.mrb[0].mxu0 %vm253_vm3, %v3215_v22 }
 0x12b   : >> { %4217 = vmatpush3.bf16.msra.mxu0 %v3292_v26  ;;  %4218 = vmatprep.mubr.msk.bf16.mxu0 %vm4574_vm1, %v4573_v4 }
 0x12c   : >> { %4222 = vmatprep.subr.bf16.mxu0 %v4573_v4 }
 0x134   : >> { %4075 = vmatmul.mubr.msk.bf16.vlgmr.msra.gmra.mrb[0].mxu1 %vm253_vm3, %v1723_v36 }
 0x136   : >> { %4219 = vmatmul.mubr.msk.bf16.vlgmr.msra.gmra.mrb[0].mxu0 %vm253_vm3, %v3287_v38 }
 0x137   : >> { %4223 = vmatpush3.bf16.msra.mxu0 %v3350_v35  ;;  %4224 = vmatprep.mubr.msk.bf16.mxu0 %vm4574_vm1, %v4573_v4 }
 0x142   : >> { %4225 = vmatmul.mubr.msk.bf16.vlgmr.msra.gmra.mrb[0].mxu0 %vm253_vm3, %v3345_v42 }
 0x207   : >> { %v1764_v43 = vpop.f32.mrb[0].mxu1 }
 0x208   : >> { %v4076_v44 = vpop.f32.mrb[1].mxu1 }
 0x209   : >> { %v1767_v45 = vpop.f32.mrb[2].mxu1 }
 0x20a   : >> { %v4077_v46 = vpop.f32.mrb[3].mxu1 }
 0x215   : >> { %v3386_v48 = vpop.f32.mrb[0].mxu0 }
 0x216   : >> { %v4228_v49 = vadd.f32 %v3386_v48, %v1764_v43  ;;  %v4226_v50 = vpop.f32.mrb[1].mxu0 }
 0x217   : >> { %v3389_v4 = vpop.f32.mrb[2].mxu0 }
 0x218   : >> { %v3833_v51 = vpack.c.bf16 %v4228_v49, %v4228_v49  ;;  %v3420_v59 = vmul.f32 %v4228_v49, %v4228_v49  ;;  %v4229_v47 = vadd.f32 %v3389_v4, %v1767_v45  ;;  %v4227_v52 = vpop.f32.mrb[3].mxu0  ;;  %v3410_v53 = vsel %vm3409_vm10, %v4228_v49, 0.0 }
 0x21a   : >> { %3407 = vst.msk [vmem:[%s3405_s6] sm:$0xf] %vm3406_vm9, %v3833_v51  ;;  %v3834_v54 = vpack.c.bf16 %v4229_v47, %v4229_v47  ;;  %v3411_v55 = vsel %vm3409_vm10, %v4229_v47, 0.0  ;;  %v3421_v56 = vmul.f32 %v4229_v47, %v4229_v47  ;;  %v3422_v58 = vsel %vm3409_vm10, %v3420_v59, 0.0 }
 0x21b   : >> { %v3412_v57 = vadd.f32 %v3411_v55, %v3410_v53 }
 0x21c   : >> { %3408 = vst.msk [vmem:[%s3405_s6 + $0x4] sm:$0xf] %vm3406_vm9, %v3834_v54  ;;  %v3423_v60 = vsel %vm3409_vm10, %v3421_v56, 0.0 }
 0x21d   : >> { %v3413_v61 = vrot.slane %v3412_v57, 4  ;;  %v3424_v62 = vadd.f32 %v3423_v60, %v3422_v58 }
 0x21f   : >> { %v3414_v63 = vadd.f32 %v3413_v61, %v3412_v57  ;;  %v3425_v2 = vrot.slane %v3424_v62, 4 }
 0x221   : >> { %v3415_v3 = vrot.slane %v3414_v63, 2  ;;  %v3426_v5 = vadd.f32 %v3425_v2, %v3424_v62 }
 0x223   : >> { %v3416_v6 = vadd.f32 %v3415_v3, %v3414_v63  ;;  %v3427_v7 = vrot.slane %v3426_v5, 2 }
 0x225   : >> { %v3417_v9 = vrot.slane %v3416_v6, 1  ;;  %v3428_v10 = vadd.f32 %v3427_v7, %v3426_v5 }
 0x227   : >> { %v3418_v12 = vadd.f32 %v3417_v9, %v3416_v6  ;;  %v3429_v8 = vrot.slane %v3428_v10, 1  ;;  %218 = sbr.rel (!%p216_p5) target bundleno = 18 (0x12), region = 133 }
 0x229   : >> { %v3419_v13 = vadd.f32 %v4567_v1, %v3418_v12   ;;  %v3430_v14 = vadd.f32 %v3429_v8, %v3428_v10 }
 0x22b   : >> { %v3431_v15 = vadd.f32 %v4563_v0, %v3430_v14   ;;  %v5251_v1 = vmov %v3419_v13  ;;  %3433 = vst.msk [vmem:[%s4626_s27] sm:$0x1] (%p216_p5), %vm3432_vm11, %v3419_v13 }
 0x22d   : >> { %v5250_v0 = vmov %v3431_v15  ;;  %3434 = vst.msk [vmem:[%s4626_s27 + $0x1] sm:$0x1] (%p216_p5), %vm3432_vm11, %v3431_v15 }
 0x22e PF: > { %s14_s14 = sadd.s32 1, %s4559_s14   ;;  %s5252_s12 = smov %s4555_s13 }
 0x22f   : > { %p11_p6 = scmp.ge.s32.totalorder %s14_s14, 4   ;;  %s5253_s13 = smov %s5255_s15 }
 0x231   :  { %13 = sbr.rel (!%p11_p6) target bundleno = 2 (0x2), region = 144 }

// kernel: resnet_generator_forward.14
= control target key start
LH: loop header
LB: loop body
LE: loop exit
PB: predicated region body
PF: predicated region fallthrough
CT: control target
= control target key end

     0   :  { %v284_v0 = vmov 0   ;;  %vm108_vm0 = vcmask 130048   ;;  %vm185_vm1 = vcmask 261120   ;;  %vm180_vm2 = vcmask 257024   ;;  %s374_s1 = inlined_call_operand.vmem [shape: bf16[144,32], index: 1, kind: input, shape index: {}]   ;;  %s375_s0 = inlined_call_operand.vmem [shape: bf16[32,144], index: 0, kind: input, shape index: {}]   ;;  %s376_s2 = inlined_call_operand.vmem [shape: bf16[32,32], index: 2, kind: output, shape index: {0}]   ;;  %s377_s3 = inlined_call_operand.vmem [shape: f32[1,2,32], index: 3, kind: output, shape index: {1}]  }
   0x1   :  { %115 = vmatprep.subr.bf16.mxu0 %v284_v0  ;;  %250 = vmatprep.subr.bf16.mxu1 %v284_v0  ;;  %v269_v1 = vld [vmem:[%s374_s1] sm:$0xff]   ;;  %v270_v2 = vld [vmem:[%s374_s1 + $0x8] sm:$0xff]   ;;  %v271_v3 = vld [vmem:[%s374_s1 + $0x10] sm:$0xff]   ;;  %vm199_vm3 = vcmask 253952  }
   0x2   :  { %116 = vmatpush1.bf16.msra.mxu0 %v269_v1  ;;  %259 = vmatpush1.bf16.msra.mxu1 %v269_v1  ;;  %v272_v4 = vld [vmem:[%s374_s1 + $0x18] sm:$0xff]   ;;  %v280_v5 = vld [vmem:[%s375_s0 + $0x4] ss:$8 sps:$4 sm:$0xff]   ;;  %v275_v9 = vld [vmem:[%s374_s1 + $0x30] sm:$0xff]  }
   0x3   :  { %117 = vmatprep.subr.bf16.mxu0 %v284_v0  ;;  %251 = vmatprep.subr.bf16.mxu1 %v284_v0  ;;  %v283_v6 = vld [vmem:[%s375_s0 + $0x14] ss:$8 sps:$4 sm:$0xff]   ;;  %v273_v7 = vld [vmem:[%s374_s1 + $0x20] sm:$0xff]   ;;  %v274_v8 = vld [vmem:[%s374_s1 + $0x28] sm:$0xff]  }
   0x4   :  { %240 = vmatprep.mubr.msk.bf16.mxu0 %vm108_vm0, %v280_v5  ;;  %241 = vmatprep.mubr.msk.bf16.mxu1 %vm108_vm0, %v283_v6  ;;  %v276_v10 = vld [vmem:[%s374_s1 + $0x38] sm:$0xff]   ;;  %v277_v11 = vld [vmem:[%s374_s1 + $0x40] sm:$0xff]  }
   0x5   :  { %v278_v12 = vld [vmem:[%s375_s0] ss:$8 sps:$4 sm:$0xff]   ;;  %v281_v13 = vld [vmem:[%s375_s0 + $0x10] ss:$8 sps:$4 sm:$0xff]  }
   0x6   :  { %118 = vmatpush1.bf16.msra.mxu0 %v270_v2  ;;  %260 = vmatpush1.bf16.msra.mxu1 %v270_v2 }
   0x7   :  { %119 = vmatprep.subr.bf16.mxu0 %v284_v0  ;;  %252 = vmatprep.subr.bf16.mxu1 %v284_v0 }
   0xa   :  { %120 = vmatpush1.bf16.msra.mxu0 %v271_v3  ;;  %261 = vmatpush1.bf16.msra.mxu1 %v271_v3 }
   0xb   :  { %121 = vmatprep.subr.bf16.mxu0 %v284_v0  ;;  %253 = vmatprep.subr.bf16.mxu1 %v284_v0 }
   0xe   :  { %122 = vmatpush1.bf16.msra.mxu0 %v272_v4  ;;  %262 = vmatpush1.bf16.msra.mxu1 %v272_v4 }
   0xf   :  { %123 = vmatprep.subr.bf16.mxu0 %v284_v0  ;;  %254 = vmatprep.subr.bf16.mxu1 %v284_v0 }
  0x12   :  { %124 = vmatpush1.bf16.msra.mxu0 %v273_v7  ;;  %263 = vmatpush1.bf16.msra.mxu1 %v273_v7 }
  0x13   :  { %125 = vmatprep.subr.bf16.mxu0 %v284_v0  ;;  %255 = vmatprep.subr.bf16.mxu1 %v284_v0 }
  0x16   :  { %126 = vmatpush1.bf16.msra.mxu0 %v274_v8  ;;  %264 = vmatpush1.bf16.msra.mxu1 %v274_v8 }
  0x17   :  { %127 = vmatprep.subr.bf16.mxu0 %v284_v0  ;;  %256 = vmatprep.subr.bf16.mxu1 %v284_v0 }
  0x1a   :  { %128 = vmatpush1.bf16.msra.mxu0 %v275_v9  ;;  %265 = vmatpush1.bf16.msra.mxu1 %v275_v9 }
  0x1b   :  { %129 = vmatprep.subr.bf16.mxu0 %v284_v0  ;;  %257 = vmatprep.subr.bf16.mxu1 %v284_v0 }
  0x1e   :  { %130 = vmatpush1.bf16.msra.mxu0 %v276_v10  ;;  %266 = vmatpush1.bf16.msra.mxu1 %v276_v10 }
  0x1f   :  { %131 = vmatprep.subr.bf16.mxu0 %v284_v0  ;;  %258 = vmatprep.subr.bf16.mxu1 %v284_v0 }
  0x22   :  { %132 = vmatpush1.bf16.msra.mxu0 %v277_v11  ;;  %267 = vmatpush1.bf16.msra.mxu1 %v277_v11 }
  0x25   :  { %148 = vmatmul.mubr.bf16.vlgmr.msra.gmra.mrb[0].mxu0 %v278_v12  ;;  %156 = vmatmul.mubr.bf16.vlgmr.msra.gmra.mrb[0].mxu1 %v281_v13 }
  0xf8   :  { %v149_v14 = vpop.f32.mrb[0].mxu0  ;;  %v157_v15 = vpop.f32.mrb[0].mxu1 }
  0xf9   :  { %v246_v16 = vpack.c.bf16 %v149_v14, %v149_v14  ;;  %v201_v17 = vmul.f32 %v149_v14, %v149_v14  ;;  %v151_v18 = vpop.f32.mrb[1].mxu0  ;;  %v248_v19 = vpack.c.bf16 %v157_v15, %v157_v15  ;;  %v159_v20 = vpop.f32.mrb[1].mxu1  ;;  %v186_v21 = vsel %vm185_vm1, %v149_v14, 0.0 }
  0xfa   :  { %v203_v22 = vmul.f32 %v157_v15, %v157_v15  ;;  %v152_v23 = vpop.f32.mrb[2].mxu0  ;;  %v160_v24 = vpop.f32.mrb[2].mxu1  ;;  %v189_v25 = vsel %vm185_vm1, %v157_v15, 0.0 }
  0xfb   :  { %181 = vst.msk [vmem:[%s376_s2] sm:$0xf] %vm180_vm2, %v246_v16  ;;  %183 = vst.msk [vmem:[%s376_s2 + $0x8] sm:$0xf] %vm180_vm2, %v248_v19  ;;  %v247_v26 = vpack.c.bf16 %v152_v23, %v152_v23  ;;  %v187_v27 = vsel %vm185_vm1, %v152_v23, 0.0  ;;  %v202_v28 = vmul.f32 %v152_v23, %v152_v23  ;;  %v154_v29 = vpop.f32.mrb[3].mxu0  ;;  %v249_v32 = vpack.c.bf16 %v160_v24, %v160_v24 }
  0xfc   :  { %v162_v30 = vpop.f32.mrb[3].mxu1  ;;  %v188_v31 = vadd.f32 %v187_v27, %v186_v21  ;;  %v205_v33 = vsel %vm185_vm1, %v201_v17, 0.0  ;;  %v208_v34 = vsel %vm185_vm1, %v203_v22, 0.0  ;;  %v204_v36 = vmul.f32 %v160_v24, %v160_v24 }
  0xfd   :  { %182 = vst.msk [vmem:[%s376_s2 + $0x4] sm:$0xf] %vm180_vm2, %v247_v26  ;;  %v206_v35 = vsel %vm185_vm1, %v202_v28, 0.0  ;;  %184 = vst.msk [vmem:[%s376_s2 + $0xc] sm:$0xf] %vm180_vm2, %v249_v32  ;;  %v191_v39 = vsel %vm185_vm1, %v160_v24, 0.0 }
  0xfe   :  { %v207_v37 = vadd.f32 %v206_v35, %v205_v33  ;;  %v190_v38 = vadd.f32 %v189_v25, %v188_v31  ;;  %v210_v42 = vsel %vm185_vm1, %v204_v36, 0.0 }
 0x100   :  { %v192_v40 = vadd.f32 %v191_v39, %v190_v38  ;;  %v209_v41 = vadd.f32 %v208_v34, %v207_v37 }
 0x102   :  { %v193_v43 = vrot.slane %v192_v40, 4  ;;  %v211_v44 = vadd.f32 %v210_v42, %v209_v41 }
 0x104   :  { %v194_v45 = vadd.f32 %v193_v43, %v192_v40  ;;  %v212_v46 = vrot.slane %v211_v44, 4 }
 0x106   :  { %v195_v47 = vrot.slane %v194_v45, 2  ;;  %v213_v48 = vadd.f32 %v212_v46, %v211_v44 }
 0x108   :  { %v196_v49 = vadd.f32 %v195_v47, %v194_v45  ;;  %v214_v50 = vrot.slane %v213_v48, 2 }
 0x10a   :  { %v197_v51 = vrot.slane %v196_v49, 1  ;;  %v215_v52 = vadd.f32 %v214_v50, %v213_v48 }
 0x10c   :  { %v198_v53 = vadd.f32 %v197_v51, %v196_v49  ;;  %v216_v54 = vrot.slane %v215_v52, 1 }
 0x10e   :  { %200 = vst.msk [vmem:[%s377_s3] sm:$0x1] %vm199_vm3, %v198_v53  ;;  %v217_v55 = vadd.f32 %v216_v54, %v215_v52 }
 0x110   :  { %218 = vst.msk [vmem:[%s377_s3 + $0x1] sm:$0x1] %vm199_vm3, %v217_v55 }

// kernel: resnet_generator_forward.17
= control target key start
LH: loop header
LB: loop body
LE: loop exit
PB: predicated region body
PF: predicated region fallthrough
CT: control target
= control target key end

     0   :  { %vm107_vm0 = vcmask 257024   ;;  %s217_s0 = inlined_call_operand.vmem [shape: bf16[32,32], index: 0, kind: input, shape index: {}]   ;;  %s218_s1 = inlined_call_operand.vmem [shape: bf16[32,32], index: 1, kind: input, shape index: {}]   ;;  %s219_s2 = inlined_call_operand.vmem [shape: f32[1,32], index: 2, kind: input, shape index: {}]   ;;  %s220_s3 = inlined_call_operand.vmem [shape: f32[1,32], index: 3, kind: input, shape index: {}]   ;;  %s221_s4 = inlined_call_operand.vmem [shape: f32[1,32], index: 4, kind: input, shape index: {}]   ;;  %s222_s5 = inlined_call_operand.vmem [shape: f32[1,32], index: 5, kind: input, shape index: {}]   ;;  %s223_s6 = inlined_call_operand.vmem [shape: bf16[32,32], index: 6, kind: output, shape index: {}]  }
   0x1   :  { %v129_v0 = vld [vmem:[%s217_s0] sm:$0xff]   ;;  %v144_v9 = vld [vmem:[%s217_s0 + $0x8] sm:$0xff]  }
   0x2   :  { %v116_v1 = vld [vmem:[%s219_s2] ss:$0 sm:$0xff]  ;;  %v130_v2 = vunpack.c.l.bf16 %v129_v0  ;;  %v131_v5 = vunpack.c.h.bf16 %v129_v0  ;;  %v145_v10 = vld [vmem:[%s218_s1 + $0x8] sm:$0xff]   ;;  %v134_v14 = vunpack.c.l.bf16 %v144_v9  ;;  %v135_v18 = vunpack.c.h.bf16 %v144_v9 }
   0x3   :  { %v137_v3 = vld [vmem:[%s218_s1] sm:$0xff]   ;;  %v142_v15 = vunpack.c.l.bf16 %v145_v10  ;;  %v143_v19 = vunpack.c.h.bf16 %v145_v10 }
   0x4   :  { %v118_v4 = vld [vmem:[%s221_s4] ss:$0 sm:$0xff]  ;;  %v138_v7 = vunpack.c.l.bf16 %v137_v3  ;;  %v139_v8 = vunpack.c.h.bf16 %v137_v3  ;;  %v38_v11 = vmul.f32 %v130_v2, %v116_v1  ;;  %v39_v13 = vmul.f32 %v131_v5, %v116_v1 }
   0x5   :  { %v117_v6 = vld [vmem:[%s220_s3] ss:$0 sm:$0xff]  ;;  %v40_v22 = vmul.f32 %v134_v14, %v116_v1  ;;  %v70_v23 = vmul.f32 %v142_v15, %v118_v4  ;;  %v41_v26 = vmul.f32 %v135_v18, %v116_v1  ;;  %v71_v27 = vmul.f32 %v143_v19, %v118_v4 }
   0x6   :  { %v119_v12 = vld [vmem:[%s222_s5] ss:$0 sm:$0xff]  ;;  %v68_v16 = vmul.f32 %v138_v7, %v118_v4  ;;  %v69_v17 = vmul.f32 %v139_v8, %v118_v4  ;;  %v49_v20 = vadd.f32 %v117_v6, %v38_v11  ;;  %v50_v21 = vadd.f32 %v117_v6, %v39_v13 }
   0x7   :  { %v51_v28 = vadd.f32 %v117_v6, %v40_v22  ;;  %v81_v29 = vadd.f32 %v119_v12, %v70_v23  ;;  %v52_v32 = vadd.f32 %v117_v6, %v41_v26  ;;  %v82_v33 = vadd.f32 %v119_v12, %v71_v27 }
   0x8   :  { %v79_v24 = vadd.f32 %v119_v12, %v68_v16  ;;  %v80_v25 = vadd.f32 %v119_v12, %v69_v17 }
   0x9   :  { %v85_v34 = vmax.f32 %v81_v29, 0.0  ;;  %v86_v37 = vmax.f32 %v82_v33, 0.0 }
   0xa   :  { %v83_v30 = vmax.f32 %v79_v24, 0.0  ;;  %v84_v31 = vmax.f32 %v80_v25, 0.0 }
   0xb   :  { %v89_v38 = vadd.f32 %v85_v34, %v51_v28  ;;  %v90_v41 = vadd.f32 %v86_v37, %v52_v32 }
   0xc   :  { %v87_v35 = vadd.f32 %v83_v30, %v49_v20  ;;  %v88_v36 = vadd.f32 %v84_v31, %v50_v21 }
   0xd   :  { %v126_v42 = vpack.c.bf16 %v89_v38, %v89_v38  ;;  %v127_v43 = vpack.c.bf16 %v90_v41, %v90_v41 }
   0xe   :  { %v124_v39 = vpack.c.bf16 %v87_v35, %v87_v35  ;;  %v125_v40 = vpack.c.bf16 %v88_v36, %v88_v36 }
   0xf   :  { %110 = vst.msk [vmem:[%s223_s6 + $0x8] sm:$0xf] %vm107_vm0, %v126_v42  ;;  %111 = vst.msk [vmem:[%s223_s6 + $0xc] sm:$0xf] %vm107_vm0, %v127_v43 }
  0x10   :  { %108 = vst.msk [vmem:[%s223_s6] sm:$0xf] %vm107_vm0, %v124_v39  ;;  %109 = vst.msk [vmem:[%s223_s6 + $0x4] sm:$0xf] %vm107_vm0, %v125_v40 }

// kernel: resnet_generator_forward.20
= control target key start
LH: loop header
LB: loop body
LE: loop exit
PB: predicated region body
PF: predicated region fallthrough
CT: control target
= control target key end

     0   :  { %vm75_vm0 = vcmask 257024   ;;  %s167_s0 = inlined_call_operand.vmem [shape: bf16[32,32], index: 0, kind: input, shape index: {}]   ;;  %s168_s1 = inlined_call_operand.vmem [shape: bf16[32,32], index: 1, kind: input, shape index: {}]   ;;  %s169_s2 = inlined_call_operand.vmem [shape: f32[1,32], index: 2, kind: input, shape index: {}]   ;;  %s170_s3 = inlined_call_operand.vmem [shape: f32[1,32], index: 3, kind: input, shape index: {}]   ;;  %s171_s4 = inlined_call_operand.vmem [shape: bf16[32,32], index: 4, kind: output, shape index: {}]  }
   0x1   :  { %v95_v0 = vld [vmem:[%s167_s0] sm:$0xff]   ;;  %v110_v5 = vld [vmem:[%s167_s0 + $0x8] sm:$0xff]  }
   0x2   :  { %v84_v1 = vld [vmem:[%s169_s2] ss:$0 sm:$0xff]  ;;  %v96_v2 = vunpack.c.l.bf16 %v95_v0  ;;  %v97_v4 = vunpack.c.h.bf16 %v95_v0  ;;  %v111_v6 = vld [vmem:[%s168_s1 + $0x8] sm:$0xff]   ;;  %v100_v9 = vunpack.c.l.bf16 %v110_v5  ;;  %v101_v13 = vunpack.c.h.bf16 %v110_v5 }
   0x3   :  { %v103_v3 = vld [vmem:[%s168_s1] sm:$0xff]   ;;  %v108_v15 = vunpack.c.l.bf16 %v111_v6  ;;  %v109_v19 = vunpack.c.h.bf16 %v111_v6 }
   0x4   :  { %v85_v7 = vld [vmem:[%s170_s3] ss:$0 sm:$0xff]  ;;  %v104_v8 = vunpack.c.l.bf16 %v103_v3  ;;  %v32_v10 = vmul.f32 %v96_v2, %v84_v1  ;;  %v33_v11 = vmul.f32 %v97_v4, %v84_v1  ;;  %v105_v12 = vunpack.c.h.bf16 %v103_v3 }
   0x5   :  { %v34_v14 = vmul.f32 %v100_v9, %v84_v1  ;;  %v35_v18 = vmul.f32 %v101_v13, %v84_v1 }
   0x6   :  { %v43_v16 = vadd.f32 %v85_v7, %v32_v10  ;;  %v44_v17 = vadd.f32 %v85_v7, %v33_v11 }
   0x7   :  { %v45_v20 = vadd.f32 %v85_v7, %v34_v14  ;;  %v46_v23 = vadd.f32 %v85_v7, %v35_v18 }
   0x8   :  { %v55_v21 = vadd.f32 %v104_v8, %v43_v16  ;;  %v56_v22 = vadd.f32 %v105_v12, %v44_v17 }
   0x9   :  { %v57_v24 = vadd.f32 %v108_v15, %v45_v20  ;;  %v58_v27 = vadd.f32 %v109_v19, %v46_v23 }
   0xa   :  { %v90_v25 = vpack.c.bf16 %v55_v21, %v55_v21  ;;  %v91_v26 = vpack.c.bf16 %v56_v22, %v56_v22 }
   0xb   :  { %v92_v28 = vpack.c.bf16 %v57_v24, %v57_v24  ;;  %v93_v29 = vpack.c.bf16 %v58_v27, %v58_v27 }
   0xc   :  { %76 = vst.msk [vmem:[%s171_s4] sm:$0xf] %vm75_vm0, %v90_v25  ;;  %77 = vst.msk [vmem:[%s171_s4 + $0x4] sm:$0xf] %vm75_vm0, %v91_v26 }
   0xd   :  { %78 = vst.msk [vmem:[%s171_s4 + $0x8] sm:$0xf] %vm75_vm0, %v92_v28  ;;  %79 = vst.msk [vmem:[%s171_s4 + $0xc] sm:$0xf] %vm75_vm0, %v93_v29 }

// kernel: resnet_generator_forward.15
= control target key start
LH: loop header
LB: loop body
LE: loop exit
PB: predicated region body
PF: predicated region fallthrough
CT: control target
= control target key end

     0   :  { %s1453_s18 = smov 0   ;;  %s1455_s19 = smov 0   ;;  %s1663_s0 = inlined_call_operand.vmem [shape: bf16[2,6,6,32], index: 0, kind: input, shape index: {}]   ;;  %s1664_s1 = inlined_call_operand.vmem [shape: bf16[9,32,32], index: 1, kind: input, shape index: {}]   ;;  %s1665_s2 = inlined_call_operand.vmem [shape: f32[1,32], index: 2, kind: input, shape index: {}]   ;;  %s1666_s3 = inlined_call_operand.vmem [shape: f32[1,32], index: 3, kind: input, shape index: {}]   ;;  %s1667_s4 = inlined_call_operand.vmem [shape: bf16[2,4,4,32], index: 4, kind: output, shape index: {0}]   ;;  %s1668_s5 = inlined_call_operand.vmem [shape: f32[2,2,32], index: 5, kind: output, shape index: {1}]  }
   0x1   :  { %s1457_s20 = smov 0  }
   0x2 LB: > { %s28_s21 = sadd.s32 1, %s1403_s19  ;;  %p1097_p0 = scmp.ge.s32.totalorder %s1407_s20, 1  ;;  %s1407_s20 = sphi %s1457_s20, %s16_s20   ;;  %s1403_s19 = sphi %s1455_s19, %s1672_s19   ;;  %s1399_s18 = sphi %s1453_s18, %s1671_s18  }
   0x3   : > { %p30_p1 = scmp.ge.s32.totalorder %s28_s21, 2  ;;  %p206_p2 = scmp.lt.s32.totalorder %s1407_s20, 3 }
   0x5   : > { %s1674_s21 = smov (%p30_p1, %s28_s21), 0  ;;  %p207_p3 = pnand %p1097_p0, %p206_p2 }
   0x6   : > { %p243_p4 = scmp.lt.s32.totalorder (!%p207_p3), %s1399_s18, 1  ;;  %v1474_v0 = vld [vmem:[%s1665_s2] ss:$0 sm:$0xff] (!%p207_p3)  ;;  %v1496_v2 = vmov (!%p207_p3), 0.0   ;;  %v1498_v3 = vmov (!%p207_p3), 0.0   ;;  %s1500_s13 = smov (!%p207_p3), 0  }
   0x7   : > { %210 = sbr.rel (%p207_p3) target bundleno = 317 (0x13d), region = 36  ;;  %v1479_v1 = vld [vmem:[%s1666_s3] ss:$0 sm:$0xff] (!%p207_p3) }
   0xe   : > { %s1676_s18 = smov (!%p243_p4, %s1399_s18), 1 }
   0xf   : > { %s1304_s26 = smul.u32 24, %s1676_s18  ;;  %s1175_s27 = sshll.u32 %s1676_s18, 3 }
  0x10   : > { %s1484_s30 = scalar_lea.vmem %s1667_s4, %s1175_s27  ;;  %s1101_s6 = sshll.u32 %s1676_s18, 1 }
  0x11   : > { %s1489_s9 = scalar_lea.vmem %s1663_s0, %s1304_s26  ;;  %s1494_s12 = scalar_lea.vmem %s1668_s5, %s1101_s6 }
  0x12 LB: >> { %v1355_v4 = vld [vmem:[%s1664_s1 + $0x40] sm:$0xff]   ;;  %v1421_v5 = vmov 0.0   ;;  %v1356_v6 = vld [vmem:[%s1664_s1 + $0x10] sm:$0xff]   ;;  %v1357_v7 = vld [vmem:[%s1664_s1 + $0x48] sm:$0xff]   ;;  %vm1422_vm0 = vmmov 0   ;;  %s1104_s23 = sshll.u32 %s1419_s13, 2  ;;  %s1419_s13 = sphi %s1500_s13, %s285_s13   ;;  %v1415_v3 = vphi %v1498_v3, %v1670_v3   ;;  %v1411_v2 = vphi %v1496_v2, %v1669_v2  }
  0x13   : >> { %1235 = vmatprep.subr.bf16.mxu0 %v1421_v5  ;;  %1203 = vmatprep.subr.bf16.mxu1 %v1421_v5  ;;  %v1358_v8 = vld [vmem:[%s1664_s1 + $0x18] sm:$0xff]   ;;  %s1530_s26 = scalar_lea.vmem %s1489_s9, %s1104_s23  ;;  %vm331_vm1 = vcmask 261120   ;;  %v1359_v30 = vld [vmem:[%s1664_s1 + $0x50] sm:$0xff]   ;;  %v1360_v31 = vld [vmem:[%s1664_s1] sm:$0xff]   ;;  %s1172_s16 = sshll.u32 %s1419_s13, 1  ;;  %vm930_vm2 = vcmask 257024  }
  0x14   : >> { %1236 = vmatpush3.bf16.msra.mxu0 %v1355_v4  ;;  %1207 = vmatprep.mubr.msk.bf16.mxu1 %vm1422_vm0, %v1421_v5  ;;  %v301_v9 = vld [vmem:[%s1530_s26] sm:$0x7]  ;;  %v1131_v10 = vld [vmem:[%s1530_s26 + $0x4] sm:$0x7]  ;;  %v1148_v39 = vld [vmem:[%s1530_s26 + $0x8] sm:$0x3]  ;;  %s927_s17 = scalar_lea.vmem %s1484_s30, %s1172_s16 }
  0x15   : >> { %1204 = vmatpush3.bf16.msra.mxu1 %v1356_v6  ;;  %1237 = vmatprep.subr.bf16.mxu0 %v1421_v5  ;;  %v302_v11 = vunpack.c.l.bf16 %v301_v9  ;;  %v570_v12 = vunpack.c.l.bf16 %v1131_v10  ;;  %v1139_v17 = vld [vmem:[%s1530_s26 + $0x4] sm:$0x6]  ;;  %v291_v18 = vld [vmem:[%s1530_s26] sm:$0x3]  ;;  %v1361_v43 = vld [vmem:[%s1664_s1 + $0x58] sm:$0xff]   ;;  %v716_v46 = vunpack.c.l.bf16 %v1148_v39  ;;  %vm928_vm3 = vcmask 254976  }
  0x16   : >> { %1205 = vmatprep.subr.bf16.mxu1 %v1421_v5  ;;  %1239 = vmatprep.mubr.msk.bf16.mxu0 %vm1422_vm0, %v1421_v5  ;;  %v644_v19 = vunpack.c.l.bf16 %v1139_v17  ;;  %v292_v24 = vunpack.c.l.bf16 %v291_v18  ;;  %v430_v36 = vld [vmem:[%s1530_s26] sm:$0x6]  ;;  %v1362_v44 = vld [vmem:[%s1664_s1 + $0x8] sm:$0xff]   ;;  %v1123_v63 = vld [vmem:[%s1530_s26 + $0x4] sm:$0x3]  ;;  %s285_s13 = sadd.s32 1, %s1419_s13  }
  0x17   : >> { %v303_v13 = vmul.f32 %v1474_v0, %v302_v11  ;;  %v571_v14 = vmul.f32 %v1474_v0, %v570_v12  ;;  %v431_v42 = vunpack.c.l.bf16 %v430_v36  ;;  %v1156_v45 = vld [vmem:[%s1530_s26 + $0x8] sm:$0x7]  ;;  %v717_v51 = vmul.f32 %v1474_v0, %v716_v46  ;;  %v1363_v56 = vld [vmem:[%s1664_s1 + $0x60] sm:$0xff]   ;;  %p282_p5 = scmp.ge.s32.totalorder %s285_s13, 4  }
  0x18   : >> { %1238 = vmatpush3.bf16.msra.mxu0 %v1357_v7  ;;  %v645_v25 = vmul.f32 %v1474_v0, %v644_v19  ;;  %v293_v34 = vmul.f32 %v1474_v0, %v292_v24  ;;  %v783_v50 = vunpack.c.l.bf16 %v1156_v45  ;;  %v1364_v57 = vld [vmem:[%s1664_s1 + $0x20] sm:$0xff]   ;;  %v1365_v61 = vld [vmem:[%s1664_s1 + $0x68] sm:$0xff]   ;;  %v503_v7 = vunpack.c.l.bf16 %v1123_v63  ;;  %v1369_v19 = vld [vmem:[%s1664_s1 + $0x78] sm:$0xff]  }
  0x19   : >> { %1206 = vmatpush3.bf16.msra.mxu1 %v1358_v8  ;;  %1243 = vmatprep.subr.bf16.mxu0 %v1421_v5  ;;  %v304_v15 = vadd.f32 %v1479_v1, %v303_v13  ;;  %v572_v16 = vadd.f32 %v1479_v1, %v571_v14  ;;  %v432_v49 = vmul.f32 %v1474_v0, %v431_v42  ;;  %v1366_v62 = vld [vmem:[%s1664_s1 + $0x28] sm:$0xff]   ;;  %v1367_v13 = vld [vmem:[%s1664_s1 + $0x70] sm:$0xff]   ;;  %vm948_vm4 = vcmask (%p282_p5), 253952  }
  0x1a   : >> { %1211 = vmatprep.subr.bf16.mxu1 %v1421_v5  ;;  %v646_v35 = vadd.f32 %v1479_v1, %v645_v25  ;;  %v294_v40 = vadd.f32 %v1479_v1, %v293_v34  ;;  %v784_v55 = vmul.f32 %v1474_v0, %v783_v50  ;;  %v718_v59 = vadd.f32 %v1479_v1, %v717_v51  ;;  %v1368_v14 = vld [vmem:[%s1664_s1 + $0x30] sm:$0xff]  }
  0x1b   : >> { %v305_v20 = vmax.f32 %v304_v15, 0.0  ;;  %v573_v21 = vmax.f32 %v572_v16, 0.0  ;;  %v433_v54 = vadd.f32 %v1479_v1, %v432_v49  ;;  %v504_v11 = vmul.f32 %v1474_v0, %v503_v7  ;;  %v1164_v15 = vld [vmem:[%s1530_s26 + $0x8] sm:$0x6] }
  0x1c   : >> { %v647_v41 = vmax.f32 %v646_v35, 0.0  ;;  %v295_v47 = vmax.f32 %v294_v40, 0.0  ;;  %v785_v60 = vadd.f32 %v1479_v1, %v784_v55  ;;  %v719_v6 = vmax.f32 %v718_v59, 0.0 }
  0x1d   : >> { %v306_v22 = vpack.c.bf16 %v305_v20, %v305_v20  ;;  %v574_v23 = vpack.c.bf16 %v573_v21, %v573_v21  ;;  %v434_v58 = vmax.f32 %v433_v54, 0.0  ;;  %v505_v16 = vadd.f32 %v1479_v1, %v504_v11  ;;  %v1370_v20 = vld [vmem:[%s1664_s1 + $0x38] sm:$0xff]  }
  0x1e   : >> { %v648_v48 = vpack.c.bf16 %v647_v41, %v647_v41  ;;  %v296_v52 = vpack.c.bf16 %v295_v47, %v295_v47  ;;  %v786_v8 = vmax.f32 %v785_v60, 0.0  ;;  %v720_v10 = vpack.c.bf16 %v719_v6, %v719_v6 }
  0x1f   : >> { %v313_v26 = vshrl.u32 %v306_v22, 16  ;;  %v315_v27 = vshll.u32 %v306_v22, 16  ;;  %v581_v28 = vshrl.u32 %v574_v23, 16  ;;  %v583_v29 = vshll.u32 %v574_v23, 16 }
  0x20   : >> { %v655_v53 = vrot.slane %v648_v48, 1  ;;  %v435_v4 = vpack.c.bf16 %v434_v58, %v434_v58  ;;  %v787_v12 = vpack.c.bf16 %v786_v8, %v786_v8  ;;  %v857_v18 = vunpack.c.l.bf16 %v1164_v15 }
  0x21   : >> { %v317_v32 = vrot.slane %v315_v27, 1  ;;  %v585_v33 = vrot.slane %v583_v29, 1  ;;  %v506_v21 = vmax.f32 %v505_v16, 0.0 }
  0x22   : >> { %v442_v9 = vrot.slane %v435_v4, 1  ;;  %v796_v17 = vshll.u32 %v787_v12, 16  ;;  %v794_v22 = vshrl.u32 %v787_v12, 16  ;;  %v858_v24 = vmul.f32 %v1474_v0, %v857_v18 }
  0x23   : >> { %v318_v37 = vor.u32 %v317_v32, %v313_v26  ;;  %v586_v38 = vor.u32 %v585_v33, %v581_v28  ;;  %v507_v25 = vpack.c.bf16 %v506_v21, %v506_v21  ;;  %v1371_v28 = vld [vmem:[%s1664_s1 + $0x80] sm:$0xff]  }
  0x24   : >> { %v798_v23 = vrot.slane %v796_v17, 1  ;;  %v859_v27 = vadd.f32 %v1479_v1, %v858_v24 }
  0x25   : >> { %1208 = vmatmul.mubr.msk.bf16.vlgmr.msra.gmra.mrb[0].mxu1 %vm331_vm1, %v318_v37  ;;  %1240 = vmatmul.mubr.msk.bf16.vlgmr.msra.gmra.mrb[0].mxu0 %vm331_vm1, %v586_v38 }
  0x26   : >> { %1244 = vmatpush3.bf16.msra.mxu0 %v1359_v30  ;;  %1212 = vmatpush3.bf16.msra.mxu1 %v1360_v31  ;;  %v799_v26 = vor.u32 %v798_v23, %v794_v22  ;;  %v860_v29 = vmax.f32 %v859_v27, 0.0  ;;  %v1372_v30 = vld [vmem:[%s1664_s1 + $0x88] sm:$0xff]  }
  0x27   : >> { %1245 = vmatprep.subr.bf16.mxu0 %v1421_v5  ;;  %1213 = vmatprep.subr.bf16.mxu1 %v1421_v5 }
  0x28   : >> { %1215 = vmatprep.mubr.msk.bf16.mxu1 %vm1422_vm0, %v1421_v5  ;;  %1247 = vmatprep.mubr.msk.bf16.mxu0 %vm1422_vm0, %v1421_v5  ;;  %v861_v31 = vpack.c.bf16 %v860_v29, %v860_v29 }
  0x2a   : >> { %1246 = vmatpush3.bf16.msra.mxu0 %v1361_v43  ;;  %1214 = vmatpush3.bf16.msra.mxu1 %v1362_v44  ;;  %v868_v32 = vrot.slane %v861_v31, 1 }
  0x2b   : >> { %1251 = vmatprep.subr.bf16.mxu0 %v1421_v5  ;;  %1219 = vmatprep.subr.bf16.mxu1 %v1421_v5 }
  0x31   : >> { %1216 = vmatmul.mubr.msk.bf16.vlgmr.msra.gmra.mrb[0].mxu1 %vm331_vm1, %v296_v52  ;;  %1248 = vmatmul.mubr.msk.bf16.vlgmr.msra.gmra.mrb[0].mxu0 %vm331_vm1, %v655_v53 }
  0x32   : >> { %1252 = vmatpush3.bf16.msra.mxu0 %v1363_v56  ;;  %1220 = vmatpush3.bf16.msra.mxu1 %v1364_v57 }
  0x33   : >> { %1253 = vmatprep.subr.bf16.mxu0 %v1421_v5  ;;  %1221 = vmatprep.subr.bf16.mxu1 %v1421_v5 }
  0x34   : >> { %1223 = vmatprep.mubr.msk.bf16.mxu1 %vm1422_vm0, %v1421_v5  ;;  %1255 = vmatprep.mubr.msk.bf16.mxu0 %vm1422_vm0, %v1421_v5 }
  0x36   : >> { %1254 = vmatpush3.bf16.msra.mxu0 %v1365_v61  ;;  %1222 = vmatpush3.bf16.msra.mxu1 %v1366_v62 }
  0x37   : >> { %1259 = vmatprep.subr.bf16.mxu0 %v1421_v5  ;;  %1227 = vmatprep.subr.bf16.mxu1 %v1421_v5 }
  0x3d   : >> { %1224 = vmatmul.mubr.msk.bf16.vlgmr.msra.gmra.mrb[0].mxu1 %vm331_vm1, %v442_v9  ;;  %1256 = vmatmul.mubr.msk.bf16.vlgmr.msra.gmra.mrb[0].mxu0 %vm331_vm1, %v720_v10 }
  0x3e   : >> { %1260 = vmatpush3.bf16.msra.mxu0 %v1367_v13  ;;  %1228 = vmatpush3.bf16.msra.mxu1 %v1368_v14 }
  0x3f   : >> { %1261 = vmatprep.subr.bf16.mxu0 %v1421_v5  ;;  %1229 = vmatprep.subr.bf16.mxu1 %v1421_v5 }
  0x40   : >> { %1231 = vmatprep.mubr.msk.bf16.mxu1 %vm1422_vm0, %v1421_v5  ;;  %1263 = vmatprep.mubr.msk.bf16.mxu0 %vm1422_vm0, %v1421_v5 }
  0x42   : >> { %1262 = vmatpush3.bf16.msra.mxu0 %v1369_v19  ;;  %1230 = vmatpush3.bf16.msra.mxu1 %v1370_v20 }
  0x43   : >> { %1267 = vmatprep.subr.bf16.mxu0 %v1421_v5 }
  0x49   : >> { %1232 = vmatmul.mubr.msk.bf16.vlgmr.msra.gmra.mrb[0].mxu1 %vm331_vm1, %v507_v25  ;;  %1264 = vmatmul.mubr.msk.bf16.vlgmr.msra.gmra.mrb[0].mxu0 %vm331_vm1, %v799_v26 }
  0x4a   : >> { %1268 = vmatpush3.bf16.msra.mxu0 %v1371_v28  ;;  %1271 = vmatprep.mubr.msk.bf16.mxu0 %vm1422_vm0, %v1421_v5 }
  0x4b   : >> { %1269 = vmatprep.subr.bf16.mxu0 %v1421_v5 }
  0x4e   : >> { %1270 = vmatpush3.bf16.msra.mxu0 %v1372_v30 }
  0x55   : >> { %1272 = vmatmul.mubr.msk.bf16.vlgmr.msra.gmra.mrb[0].mxu0 %vm331_vm1, %v868_v32 }
 0x11c   : >> { %v562_v33 = vpop.f32.mrb[0].mxu1 }
 0x11d   : >> { %v1233_v34 = vpop.f32.mrb[1].mxu1 }
 0x11e   : >> { %v565_v35 = vpop.f32.mrb[2].mxu1 }
 0x11f   : >> { %v1234_v36 = vpop.f32.mrb[3].mxu1 }
 0x128   : >> { %v918_v37 = vpop.f32.mrb[0].mxu0 }
 0x129   : >> { %v1275_v38 = vadd.f32 %v918_v37, %v562_v33  ;;  %v1273_v39 = vpop.f32.mrb[1].mxu0 }
 0x12a   : >> { %v921_v40 = vpop.f32.mrb[2].mxu0 }
 0x12b   : >> { %v925_v41 = vpack.c.bf16 %v1275_v38, %v1275_v38  ;;  %v931_v42 = vsel %vm930_vm2, %v1275_v38, 0.0  ;;  %v939_v5 = vmul.f32 %v1275_v38, %v1275_v38  ;;  %v1274_v43 = vpop.f32.mrb[3].mxu0 }
 0x12c   : >> { %v932_v44 = vrot.slane %v931_v42, 4 }
 0x12d   : >> { %929 = vst.msk [vmem:[%s927_s17] sm:$0x3] %vm928_vm3, %v925_v41  ;;  %v940_v45 = vsel %vm930_vm2, %v939_v5, 0.0 }
 0x12e   : >> { %v933_v46 = vadd.f32 %v932_v44, %v931_v42  ;;  %v941_v47 = vrot.slane %v940_v45, 4 }
 0x130   : >> { %v934_v48 = vrot.slane %v933_v46, 2  ;;  %v942_v49 = vadd.f32 %v941_v47, %v940_v45 }
 0x132   : >> { %v935_v50 = vadd.f32 %v934_v48, %v933_v46  ;;  %v943_v51 = vrot.slane %v942_v49, 2 }
 0x134   : >> { %v936_v52 = vrot.slane %v935_v50, 1  ;;  %v944_v53 = vadd.f32 %v943_v51, %v942_v49 }
 0x136   : >> { %v937_v54 = vadd.f32 %v936_v52, %v935_v50  ;;  %v945_v55 = vrot.slane %v944_v53, 1  ;;  %284 = sbr.rel (!%p282_p5) target bundleno = 18 (0x12), region = 97 }
 0x138   : >> { %v938_v56 = vadd.f32 %v1415_v3, %v937_v54   ;;  %v946_v57 = vadd.f32 %v945_v55, %v944_v53 }
 0x13a   : >> { %v947_v58 = vadd.f32 %v1411_v2, %v946_v57   ;;  %v1670_v3 = vmov %v938_v56  ;;  %949 = vst.msk [vmem:[%s1494_s12] sm:$0x1] (%p282_p5), %vm948_vm4, %v938_v56 }
 0x13c   : >> { %v1669_v2 = vmov %v947_v58  ;;  %950 = vst.msk [vmem:[%s1494_s12 + $0x1] sm:$0x1] (%p282_p5), %vm948_vm4, %v947_v58 }
 0x13d PF: > { %s16_s20 = sadd.s32 1, %s1407_s20   ;;  %s1671_s18 = smov %s1403_s19 }
 0x13e   : > { %p13_p6 = scmp.ge.s32.totalorder %s16_s20, 4   ;;  %s1672_s19 = smov %s1674_s21 }
 0x140   :  { %15 = sbr.rel (!%p13_p6) target bundleno = 2 (0x2), region = 108 }

// kernel: resnet_generator_forward.18
= control target key start
LH: loop header
LB: loop body
LE: loop exit
PB: predicated region body
PF: predicated region fallthrough
CT: control target
= control target key end

     0   :  { %s1355_s12 = smov 0   ;;  %s1357_s13 = smov 0   ;;  %s1537_s0 = inlined_call_operand.vmem [shape: bf16[2,6,6,32], index: 0, kind: input, shape index: {}]   ;;  %s1538_s1 = inlined_call_operand.vmem [shape: bf16[9,32,32], index: 1, kind: input, shape index: {}]   ;;  %s1539_s2 = inlined_call_operand.vmem [shape: bf16[2,4,4,32], index: 2, kind: output, shape index: {0}]   ;;  %s1540_s3 = inlined_call_operand.vmem [shape: f32[2,2,32], index: 3, kind: output, shape index: {1}]  }
   0x1   :  { %s1359_s14 = smov 0  }
   0x2 LB: > { %s26_s15 = sadd.s32 1, %s1315_s13  ;;  %p999_p0 = scmp.ge.s32.totalorder %s1319_s14, 1  ;;  %s1319_s14 = sphi %s1359_s14, %s14_s14   ;;  %s1315_s13 = sphi %s1357_s13, %s1544_s13   ;;  %s1311_s12 = sphi %s1355_s12, %s1543_s12  }
   0x3   : > { %p28_p1 = scmp.ge.s32.totalorder %s26_s15, 2  ;;  %p156_p2 = scmp.lt.s32.totalorder %s1319_s14, 3 }
   0x5   : > { %s1546_s15 = smov (%p28_p1, %s26_s15), 0  ;;  %p157_p3 = pnand %p999_p0, %p156_p2 }
   0x6   : > { %p189_p4 = scmp.lt.s32.totalorder (!%p157_p3), %s1311_s12, 1  ;;  %v1388_v0 = vmov (!%p157_p3), 0.0   ;;  %v1390_v1 = vmov (!%p157_p3), 0.0   ;;  %s1392_s28 = smov (!%p157_p3), 0  }
   0x7   : > { %160 = sbr.rel (%p157_p3) target bundleno = 307 (0x133), region = 28 }
   0xe   : > { %s1548_s12 = smov (!%p189_p4, %s1311_s12), 1 }
   0xf   : > { %s1210_s16 = smul.u32 24, %s1548_s12  ;;  %s1081_s17 = sshll.u32 %s1548_s12, 3 }
  0x10   : > { %s1376_s20 = scalar_lea.vmem %s1539_s2, %s1081_s17  ;;  %s1003_s21 = sshll.u32 %s1548_s12, 1 }
  0x11   : > { %s1381_s24 = scalar_lea.vmem %s1537_s0, %s1210_s16  ;;  %s1386_s27 = scalar_lea.vmem %s1540_s3, %s1003_s21 }
  0x12 LB: >> { %v1261_v2 = vld [vmem:[%s1538_s1 + $0x40] sm:$0xff]   ;;  %v1333_v3 = vmov 0.0   ;;  %v1262_v4 = vld [vmem:[%s1538_s1 + $0x10] sm:$0xff]   ;;  %v1263_v5 = vld [vmem:[%s1538_s1 + $0x48] sm:$0xff]   ;;  %vm1334_vm0 = vmmov 0   ;;  %s1004_s8 = sshll.u32 %s1331_s28, 2  ;;  %s1331_s28 = sphi %s1392_s28, %s217_s28   ;;  %v1327_v1 = vphi %v1390_v1, %v1542_v1   ;;  %v1323_v0 = vphi %v1388_v0, %v1541_v0  }
  0x13   : >> { %1141 = vmatprep.subr.bf16.mxu0 %v1333_v3  ;;  %1109 = vmatprep.subr.bf16.mxu1 %v1333_v3  ;;  %v1264_v6 = vld [vmem:[%s1538_s1 + $0x18] sm:$0xff]   ;;  %s1422_s11 = scalar_lea.vmem %s1381_s24, %s1004_s8  ;;  %vm256_vm1 = vcmask 261120   ;;  %v1268_v15 = vld [vmem:[%s1538_s1] sm:$0xff]   ;;  %v1267_v17 = vld [vmem:[%s1538_s1 + $0x50] sm:$0xff]   ;;  %s1078_s26 = sshll.u32 %s1331_s28, 1  ;;  %vm832_vm2 = vcmask 257024  }
  0x14   : >> { %1142 = vmatpush3.bf16.msra.mxu0 %v1261_v2  ;;  %1113 = vmatprep.mubr.msk.bf16.mxu1 %vm1334_vm0, %v1333_v3  ;;  %v1265_v7 = vld [vmem:[%s1422_s11] ss:$0 sps:$4 sm:$0x77]   ;;  %v1266_v8 = vld [vmem:[%s1422_s11 + $0x4] ss:$0 sps:$4 sm:$0x77]   ;;  %s829_s29 = scalar_lea.vmem %s1376_s20, %s1078_s26 }
  0x15   : >> { %1110 = vmatpush3.bf16.msra.mxu1 %v1262_v4  ;;  %1143 = vmatprep.subr.bf16.mxu0 %v1333_v3  ;;  %v238_v9 = vshrl.u32 %v1265_v7, 16  ;;  %v240_v10 = vshll.u32 %v1265_v7, 16  ;;  %v496_v11 = vshrl.u32 %v1266_v8, 16  ;;  %v498_v12 = vshll.u32 %v1266_v8, 16  ;;  %v1270_v19 = vld [vmem:[%s1538_s1 + $0x8] sm:$0xff]   ;;  %v1269_v20 = vld [vmem:[%s1538_s1 + $0x58] sm:$0xff]  }
  0x16   : >> { %1111 = vmatprep.subr.bf16.mxu1 %v1333_v3  ;;  %1145 = vmatprep.mubr.msk.bf16.mxu0 %vm1334_vm0, %v1333_v3  ;;  %v1271_v21 = vld [vmem:[%s1422_s11 + $0x4] ss:$0 sps:$4 sm:$0x66]   ;;  %v223_v22 = vld [vmem:[%s1422_s11] sm:$0x3]  ;;  %v1275_v26 = vld [vmem:[%s1538_s1 + $0x28] sm:$0xff]  }
  0x17   : >> { %v242_v13 = vrot.slane %v240_v10, 1  ;;  %v500_v14 = vrot.slane %v498_v12, 1  ;;  %v567_v23 = vrot.slane %v1271_v21, 1  ;;  %v1273_v24 = vld [vmem:[%s1538_s1 + $0x20] sm:$0xff]   ;;  %v1274_v27 = vld [vmem:[%s1538_s1 + $0x68] sm:$0xff]   ;;  %v1278_v30 = vld [vmem:[%s1538_s1 + $0x30] sm:$0xff]  }
  0x18   : >> { %1144 = vmatpush3.bf16.msra.mxu0 %v1263_v5  ;;  %v1272_v25 = vld [vmem:[%s1538_s1 + $0x60] sm:$0xff]   ;;  %v1281_v31 = vld [vmem:[%s1422_s11 + $0x8] ss:$0 sps:$4 sm:$0x77]   ;;  %v1277_v33 = vld [vmem:[%s1538_s1 + $0x70] sm:$0xff]   ;;  %vm830_vm3 = vcmask 254976  }
  0x19   : >> { %1112 = vmatpush3.bf16.msra.mxu1 %v1264_v6  ;;  %1149 = vmatprep.subr.bf16.mxu0 %v1333_v3  ;;  %v243_v16 = vor.u32 %v242_v13, %v238_v9  ;;  %v501_v18 = vor.u32 %v500_v14, %v496_v11  ;;  %v1276_v28 = vld [vmem:[%s1422_s11] ss:$0 sps:$4 sm:$0x66]   ;;  %v1052_v32 = vld [vmem:[%s1422_s11 + $0x8] sm:$0x3]  ;;  %v1280_v34 = vld [vmem:[%s1538_s1 + $0x38] sm:$0xff]  }
  0x1a   : >> { %1117 = vmatprep.subr.bf16.mxu1 %v1333_v3  ;;  %v364_v29 = vrot.slane %v1276_v28, 1  ;;  %v701_v35 = vshll.u32 %v1281_v31, 16  ;;  %v1279_v36 = vld [vmem:[%s1538_s1 + $0x78] sm:$0xff]   ;;  %v699_v37 = vshrl.u32 %v1281_v31, 16  ;;  %v1025_v39 = vld [vmem:[%s1422_s11 + $0x4] sm:$0x3] }
  0x1b   : >> { %1146 = vmatmul.mubr.msk.bf16.vlgmr.msra.gmra.mrb[0].mxu0 %vm256_vm1, %v501_v18  ;;  %v1282_v41 = vld [vmem:[%s1538_s1 + $0x80] sm:$0xff]   ;;  %v1283_v42 = vld [vmem:[%s1538_s1 + $0x88] sm:$0xff]   ;;  %s217_s28 = sadd.s32 1, %s1331_s28  }
  0x1c   : >> { %1114 = vmatmul.mubr.msk.bf16.vlgmr.msra.gmra.mrb[0].mxu1 %vm256_vm1, %v243_v16  ;;  %1150 = vmatpush3.bf16.msra.mxu0 %v1267_v17  ;;  %v703_v38 = vrot.slane %v701_v35, 1  ;;  %v1284_v43 = vld [vmem:[%s1422_s11 + $0x8] ss:$0 sps:$4 sm:$0x66]   ;;  %p214_p5 = scmp.ge.s32.totalorder %s217_s28, 4  }
  0x1d   : >> { %1118 = vmatpush3.bf16.msra.mxu1 %v1268_v15  ;;  %1151 = vmatprep.subr.bf16.mxu0 %v1333_v3  ;;  %v770_v44 = vrot.slane %v1284_v43, 1  ;;  %vm850_vm4 = vcmask (%p214_p5), 253952  }
  0x1e   : >> { %1119 = vmatprep.subr.bf16.mxu1 %v1333_v3  ;;  %1121 = vmatprep.mubr.msk.bf16.mxu1 %vm1334_vm0, %v1333_v3  ;;  %v704_v40 = vor.u32 %v703_v38, %v699_v37 }
  0x1f   : >> { %1153 = vmatprep.mubr.msk.bf16.mxu0 %vm1334_vm0, %v1333_v3 }
  0x20   : >> { %1152 = vmatpush3.bf16.msra.mxu0 %v1269_v20 }
  0x21   : >> { %1120 = vmatpush3.bf16.msra.mxu1 %v1270_v19  ;;  %1157 = vmatprep.subr.bf16.mxu0 %v1333_v3 }
  0x22   : >> { %1125 = vmatprep.subr.bf16.mxu1 %v1333_v3 }
  0x27   : >> { %1154 = vmatmul.mubr.msk.bf16.vlgmr.msra.gmra.mrb[0].mxu0 %vm256_vm1, %v567_v23 }
  0x28   : >> { %1122 = vmatmul.mubr.msk.bf16.vlgmr.msra.gmra.mrb[0].mxu1 %vm256_vm1, %v223_v22  ;;  %1158 = vmatpush3.bf16.msra.mxu0 %v1272_v25 }
  0x29   : >> { %1126 = vmatpush3.bf16.msra.mxu1 %v1273_v24  ;;  %1159 = vmatprep.subr.bf16.mxu0 %v1333_v3 }
  0x2a   : >> { %1127 = vmatprep.subr.bf16.mxu1 %v1333_v3  ;;  %1129 = vmatprep.mubr.msk.bf16.mxu1 %vm1334_vm0, %v1333_v3 }
  0x2b   : >> { %1161 = vmatprep.mubr.msk.bf16.mxu0 %vm1334_vm0, %v1333_v3 }
  0x2c   : >> { %1160 = vmatpush3.bf16.msra.mxu0 %v1274_v27 }
  0x2d   : >> { %1128 = vmatpush3.bf16.msra.mxu1 %v1275_v26  ;;  %1165 = vmatprep.subr.bf16.mxu0 %v1333_v3 }
  0x2e   : >> { %1133 = vmatprep.subr.bf16.mxu1 %v1333_v3 }
  0x33   : >> { %1162 = vmatmul.mubr.msk.bf16.vlgmr.msra.gmra.mrb[0].mxu0 %vm256_vm1, %v1052_v32 }
  0x34   : >> { %1130 = vmatmul.mubr.msk.bf16.vlgmr.msra.gmra.mrb[0].mxu1 %vm256_vm1, %v364_v29  ;;  %1166 = vmatpush3.bf16.msra.mxu0 %v1277_v33 }
  0x35   : >> { %1134 = vmatpush3.bf16.msra.mxu1 %v1278_v30  ;;  %1167 = vmatprep.subr.bf16.mxu0 %v1333_v3 }
  0x36   : >> { %1135 = vmatprep.subr.bf16.mxu1 %v1333_v3  ;;  %1137 = vmatprep.mubr.msk.bf16.mxu1 %vm1334_vm0, %v1333_v3 }
  0x37   : >> { %1169 = vmatprep.mubr.msk.bf16.mxu0 %vm1334_vm0, %v1333_v3 }
  0x38   : >> { %1168 = vmatpush3.bf16.msra.mxu0 %v1279_v36 }
  0x39   : >> { %1136 = vmatpush3.bf16.msra.mxu1 %v1280_v34  ;;  %1173 = vmatprep.subr.bf16.mxu0 %v1333_v3 }
  0x3f   : >> { %1170 = vmatmul.mubr.msk.bf16.vlgmr.msra.gmra.mrb[0].mxu0 %vm256_vm1, %v704_v40 }
  0x40   : >> { %1138 = vmatmul.mubr.msk.bf16.vlgmr.msra.gmra.mrb[0].mxu1 %vm256_vm1, %v1025_v39  ;;  %1174 = vmatpush3.bf16.msra.mxu0 %v1282_v41 }
  0x41   : >> { %1177 = vmatprep.mubr.msk.bf16.mxu0 %vm1334_vm0, %v1333_v3  ;;  %1175 = vmatprep.subr.bf16.mxu0 %v1333_v3 }
  0x44   : >> { %1176 = vmatpush3.bf16.msra.mxu0 %v1283_v42 }
  0x4b   : >> { %1178 = vmatmul.mubr.msk.bf16.vlgmr.msra.gmra.mrb[0].mxu0 %vm256_vm1, %v770_v44 }
 0x113   : >> { %v479_v45 = vpop.f32.mrb[0].mxu1 }
 0x114   : >> { %v1139_v46 = vpop.f32.mrb[1].mxu1 }
 0x115   : >> { %v482_v47 = vpop.f32.mrb[2].mxu1 }
 0x116   : >> { %v1140_v48 = vpop.f32.mrb[3].mxu1 }
 0x11e   : >> { %v820_v49 = vpop.f32.mrb[0].mxu0 }
 0x11f   : >> { %v1181_v50 = vadd.f32 %v820_v49, %v479_v45  ;;  %v1179_v51 = vpop.f32.mrb[1].mxu0 }
 0x120   : >> { %v823_v52 = vpop.f32.mrb[2].mxu0 }
 0x121   : >> { %v827_v53 = vpack.c.bf16 %v1181_v50, %v1181_v50  ;;  %v833_v54 = vsel %vm832_vm2, %v1181_v50, 0.0  ;;  %v841_v55 = vmul.f32 %v1181_v50, %v1181_v50  ;;  %v1180_v56 = vpop.f32.mrb[3].mxu0 }
 0x122   : >> { %v834_v57 = vrot.slane %v833_v54, 4 }
 0x123   : >> { %831 = vst.msk [vmem:[%s829_s29] sm:$0x3] %vm830_vm3, %v827_v53  ;;  %v842_v58 = vsel %vm832_vm2, %v841_v55, 0.0 }
 0x124   : >> { %v835_v59 = vadd.f32 %v834_v57, %v833_v54  ;;  %v843_v60 = vrot.slane %v842_v58, 4 }
 0x126   : >> { %v836_v61 = vrot.slane %v835_v59, 2  ;;  %v844_v62 = vadd.f32 %v843_v60, %v842_v58 }
 0x128   : >> { %v837_v63 = vadd.f32 %v836_v61, %v835_v59  ;;  %v845_v2 = vrot.slane %v844_v62, 2 }
 0x12a   : >> { %v838_v3 = vrot.slane %v837_v63, 1  ;;  %v846_v4 = vadd.f32 %v845_v2, %v844_v62 }
 0x12c   : >> { %v839_v5 = vadd.f32 %v838_v3, %v837_v63  ;;  %v847_v6 = vrot.slane %v846_v4, 1  ;;  %216 = sbr.rel (!%p214_p5) target bundleno = 18 (0x12), region = 89 }
 0x12e   : >> { %v840_v7 = vadd.f32 %v1327_v1, %v839_v5   ;;  %v848_v8 = vadd.f32 %v847_v6, %v846_v4 }
 0x130   : >> { %v849_v9 = vadd.f32 %v1323_v0, %v848_v8   ;;  %v1542_v1 = vmov %v840_v7  ;;  %851 = vst.msk [vmem:[%s1386_s27] sm:$0x1] (%p214_p5), %vm850_vm4, %v840_v7 }
 0x132   : >> { %v1541_v0 = vmov %v849_v9  ;;  %852 = vst.msk [vmem:[%s1386_s27 + $0x1] sm:$0x1] (%p214_p5), %vm850_vm4, %v849_v9 }
 0x133 PF: > { %s14_s14 = sadd.s32 1, %s1319_s14   ;;  %s1543_s12 = smov %s1315_s13 }
 0x134   : > { %p11_p6 = scmp.ge.s32.totalorder %s14_s14, 4   ;;  %s1544_s13 = smov %s1546_s15 }
 0x136   :  { %13 = sbr.rel (!%p11_p6) target bundleno = 2 (0x2), region = 100 }

// kernel: resnet_generator_forward.21
= control target key start
LH: loop header
LB: loop body
LE: loop exit
PB: predicated region body
PF: predicated region fallthrough
CT: control target
= control target key end

     0   :  { %s882_s12 = smov 0   ;;  %s884_s13 = smov 0   ;;  %s992_s0 = inlined_call_operand.vmem [shape: bf16[2,5,5,32], index: 0, kind: input, shape index: {}]   ;;  %s993_s1 = inlined_call_operand.vmem [shape: bf16[4,32,64], index: 1, kind: input, shape index: {}]   ;;  %s994_s2 = inlined_call_operand.vmem [shape: bf16[2,4,4,64], index: 2, kind: output, shape index: {0}]   ;;  %s995_s3 = inlined_call_operand.vmem [shape: f32[2,2,64], index: 3, kind: output, shape index: {1}]  }
   0x1   :  { %s886_s14 = smov 0  }
   0x2 LB: > { %s26_s15 = sadd.s32 1, %s842_s13  ;;  %p659_p0 = scmp.ge.s32.totalorder %s846_s14, 1  ;;  %s846_s14 = sphi %s886_s14, %s14_s14   ;;  %s842_s13 = sphi %s884_s13, %s999_s13   ;;  %s838_s12 = sphi %s882_s12, %s998_s12  }
   0x3   : > { %p28_p1 = scmp.ge.s32.totalorder %s26_s15, 2  ;;  %p156_p2 = scmp.lt.s32.totalorder %s846_s14, 3 }
   0x5   : > { %s1001_s15 = smov (%p28_p1, %s26_s15), 0  ;;  %p157_p3 = pnand %p659_p0, %p156_p2 }
   0x6   : > { %p189_p4 = scmp.lt.s32.totalorder (!%p157_p3), %s838_s12, 1  ;;  %v915_v0 = vmov (!%p157_p3), 0.0   ;;  %v917_v1 = vmov (!%p157_p3), 0.0   ;;  %s919_s28 = smov (!%p157_p3), 0  }
   0x7   : > { %160 = sbr.rel (%p157_p3) target bundleno = 273 (0x111), region = 28 }
   0xe   : > { %s1003_s12 = smov (!%p189_p4, %s838_s12), 1 }
   0xf   : > { %s751_s16 = smul.u32 20, %s1003_s12  ;;  %s697_s17 = sshll.u32 %s1003_s12, 3 }
  0x10   : > { %s903_s20 = scalar_lea.vmem %s994_s2, %s697_s17  ;;  %s663_s21 = sshll.u32 %s1003_s12, 1 }
  0x11   : > { %s908_s24 = scalar_lea.vmem %s992_s0, %s751_s16  ;;  %s913_s27 = scalar_lea.vmem %s995_s3, %s663_s21 }
  0x12 LB: >> { %v802_v2 = vld [vmem:[%s993_s1 + $0x20] sm:$0xff]   ;;  %v860_v3 = vmov 0.0   ;;  %v803_v4 = vld [vmem:[%s993_s1 + $0x10] sm:$0xff]   ;;  %v804_v5 = vld [vmem:[%s993_s1 + $0x28] sm:$0xff]   ;;  %vm861_vm0 = vmmov 0   ;;  %s664_s8 = sshll.u32 %s858_s28, 2  ;;  %s858_s28 = sphi %s919_s28, %s217_s28   ;;  %v854_v1 = vphi %v917_v1, %v997_v1   ;;  %v850_v0 = vphi %v915_v0, %v996_v0  }
  0x13   : >> { %726 = vmatprep.subr.bf16.mxu0 %v860_v3  ;;  %710 = vmatprep.subr.bf16.mxu1 %v860_v3  ;;  %v805_v6 = vld [vmem:[%s993_s1 + $0x18] sm:$0xff]   ;;  %s945_s11 = scalar_lea.vmem %s908_s24, %s664_s8  ;;  %vm256_vm1 = vcmask 261120   ;;  %v809_v13 = vld [vmem:[%s993_s1 + $0x30] sm:$0xff]   ;;  %v808_v16 = vld [vmem:[%s993_s1] sm:$0xff]   ;;  %s694_s25 = sshll.u32 %s858_s28, 1  ;;  %vm497_vm2 = vcmask 519168  }
  0x14   : >> { %727 = vmatpush3.bf16.msra.mxu0 %v802_v2  ;;  %730 = vmatprep.mubr.msk.bf16.mxu0 %vm861_vm0, %v860_v3  ;;  %v677_v7 = vld [vmem:[%s945_s11 + $0x4] sm:$0x3]  ;;  %v807_v9 = vld [vmem:[%s945_s11] ss:$0 sps:$4 sm:$0x77]   ;;  %v811_v15 = vld [vmem:[%s993_s1 + $0x38] sm:$0xff]   ;;  %s494_s26 = scalar_lea.vmem %s903_s20, %s694_s25 }
  0x15   : >> { %711 = vmatpush3.bf16.msra.mxu1 %v803_v4  ;;  %728 = vmatprep.subr.bf16.mxu0 %v860_v3  ;;  %v806_v8 = vld [vmem:[%s945_s11 + $0x4] ss:$0 sps:$4 sm:$0x77]   ;;  %v238_v11 = vshrl.u32 %v807_v9, 16  ;;  %v240_v12 = vshll.u32 %v807_v9, 16  ;;  %v810_v20 = vld [vmem:[%s993_s1 + $0x8] sm:$0xff]  }
  0x16   : >> { %712 = vmatprep.subr.bf16.mxu1 %v860_v3  ;;  %714 = vmatprep.mubr.msk.bf16.mxu1 %vm861_vm0, %v860_v3  ;;  %v432_v10 = vshll.u32 %v806_v8, 16  ;;  %v430_v18 = vshrl.u32 %v806_v8, 16  ;;  %v223_v22 = vld [vmem:[%s945_s11] sm:$0x3]  ;;  %vm495_vm3 = vcmask 517120   ;;  %s217_s28 = sadd.s32 1, %s858_s28  }
  0x17   : >> { %v242_v14 = vrot.slane %v240_v12, 1  ;;  %p214_p5 = scmp.ge.s32.totalorder %s217_s28, 4  }
  0x18   : >> { %729 = vmatpush3.bf16.msra.mxu0 %v804_v5  ;;  %v434_v19 = vrot.slane %v432_v10, 1  ;;  %vm515_vm4 = vcmask (%p214_p5), 516096  }
  0x19   : >> { %713 = vmatpush3.bf16.msra.mxu1 %v805_v6  ;;  %734 = vmatprep.subr.bf16.mxu0 %v860_v3  ;;  %v243_v17 = vor.u32 %v242_v14, %v238_v11 }
  0x1a   : >> { %718 = vmatprep.subr.bf16.mxu1 %v860_v3  ;;  %v435_v21 = vor.u32 %v434_v19, %v430_v18 }
  0x1b   : >> { %731 = vmatmul.mubr.msk.bf16.vlgmr.msra.gmra.mrb[0].mxu0 %vm256_vm1, %v677_v7 }
  0x1c   : >> { %735 = vmatpush3.bf16.msra.mxu0 %v809_v13  ;;  %738 = vmatprep.mubr.msk.bf16.mxu0 %vm861_vm0, %v860_v3 }
  0x1d   : >> { %736 = vmatprep.subr.bf16.mxu0 %v860_v3  ;;  %715 = vmatmul.mubr.msk.bf16.vlgmr.msra.gmra.mrb[0].mxu1 %vm256_vm1, %v243_v17 }
  0x1e   : >> { %719 = vmatpush3.bf16.msra.mxu1 %v808_v16  ;;  %722 = vmatprep.mubr.msk.bf16.mxu1 %vm861_vm0, %v860_v3 }
  0x1f   : >> { %720 = vmatprep.subr.bf16.mxu1 %v860_v3 }
  0x20   : >> { %737 = vmatpush3.bf16.msra.mxu0 %v811_v15 }
  0x22   : >> { %721 = vmatpush3.bf16.msra.mxu1 %v810_v20 }
  0x27   : >> { %739 = vmatmul.mubr.msk.bf16.vlgmr.msra.gmra.mrb[0].mxu0 %vm256_vm1, %v435_v21 }
  0x29   : >> { %723 = vmatmul.mubr.msk.bf16.vlgmr.msra.gmra.mrb[0].mxu1 %vm256_vm1, %v223_v22 }
  0xfa   : >> { %v485_v23 = vpop.f32.mrb[0].mxu0 }
  0xfb   : >> { %v740_v24 = vpop.f32.mrb[1].mxu0 }
  0xfc   : >> { %v488_v25 = vpop.f32.mrb[2].mxu0  ;;  %v349_v27 = vpop.f32.mrb[0].mxu1 }
  0xfd   : >> { %v741_v26 = vpop.f32.mrb[3].mxu0  ;;  %v742_v28 = vadd.f32 %v485_v23, %v349_v27  ;;  %v724_v29 = vpop.f32.mrb[1].mxu1 }
  0xfe   : >> { %v352_v30 = vpop.f32.mrb[2].mxu1 }
  0xff   : >> { %v492_v31 = vpack.c.bf16 %v742_v28, %v742_v28  ;;  %v498_v32 = vsel %vm497_vm2, %v742_v28, 0.0  ;;  %v506_v33 = vmul.f32 %v742_v28, %v742_v28  ;;  %v725_v34 = vpop.f32.mrb[3].mxu1 }
 0x100   : >> { %v499_v35 = vrot.slane %v498_v32, 4 }
 0x101   : >> { %496 = vst.msk [vmem:[%s494_s26] sm:$0x3] %vm495_vm3, %v492_v31  ;;  %v507_v36 = vsel %vm497_vm2, %v506_v33, 0.0 }
 0x102   : >> { %v500_v37 = vadd.f32 %v499_v35, %v498_v32  ;;  %v508_v38 = vrot.slane %v507_v36, 4 }
 0x104   : >> { %v501_v39 = vrot.slane %v500_v37, 2  ;;  %v509_v40 = vadd.f32 %v508_v38, %v507_v36 }
 0x106   : >> { %v502_v41 = vadd.f32 %v501_v39, %v500_v37  ;;  %v510_v42 = vrot.slane %v509_v40, 2 }
 0x108   : >> { %v503_v43 = vrot.slane %v502_v41, 1  ;;  %v511_v44 = vadd.f32 %v510_v42, %v509_v40 }
 0x10a   : >> { %v504_v45 = vadd.f32 %v503_v43, %v502_v41  ;;  %v512_v46 = vrot.slane %v511_v44, 1  ;;  %216 = sbr.rel (!%p214_p5) target bundleno = 18 (0x12), region = 83 }
 0x10c   : >> { %v505_v47 = vadd.f32 %v854_v1, %v504_v45   ;;  %v513_v48 = vadd.f32 %v512_v46, %v511_v44 }
 0x10e   : >> { %v514_v49 = vadd.f32 %v850_v0, %v513_v48   ;;  %v997_v1 = vmov %v505_v47  ;;  %516 = vst.msk [vmem:[%s913_s27] sm:$0x1] (%p214_p5), %vm515_vm4, %v505_v47 }
 0x110   : >> { %v996_v0 = vmov %v514_v49  ;;  %517 = vst.msk [vmem:[%s913_s27 + $0x1] sm:$0x1] (%p214_p5), %vm515_vm4, %v514_v49 }
 0x111 PF: > { %s14_s14 = sadd.s32 1, %s846_s14   ;;  %s998_s12 = smov %s842_s13 }
 0x112   : > { %p11_p6 = scmp.ge.s32.totalorder %s14_s14, 4   ;;  %s999_s13 = smov %s1001_s15 }
 0x114   :  { %13 = sbr.rel (!%p11_p6) target bundleno = 2 (0x2), region = 94 }

// kernel: resnet_generator_forward.22
= control target key start
LH: loop header
LB: loop body
LE: loop exit
PB: predicated region body
PF: predicated region fallthrough
CT: control target
= control target key end

     0   :  { %s834_s12 = smov 0   ;;  %s836_s13 = smov 0   ;;  %s926_s0 = inlined_call_operand.vmem [shape: bf16[2,9,9,16], index: 0, kind: input, shape index: {}]   ;;  %s927_s1 = inlined_call_operand.vmem [shape: bf16[4,16,32], index: 1, kind: input, shape index: {}]   ;;  %s928_s2 = inlined_call_operand.vmem [shape: bf16[2,8,8,32], index: 2, kind: output, shape index: {0}]   ;;  %s929_s3 = inlined_call_operand.vmem [shape: f32[2,2,32], index: 3, kind: output, shape index: {1}]  }
   0x1   :  { %s838_s14 = smov 0  }
   0x2 LB: > { %s26_s15 = sadd.s32 1, %s794_s13  ;;  %p634_p0 = scmp.ge.s32.totalorder %s798_s14, 1  ;;  %s798_s14 = sphi %s838_s14, %s14_s14   ;;  %s794_s13 = sphi %s836_s13, %s933_s13   ;;  %s790_s12 = sphi %s834_s12, %s932_s12  }
   0x3   : > { %p28_p1 = scmp.ge.s32.totalorder %s26_s15, 2  ;;  %p156_p2 = scmp.lt.s32.totalorder %s798_s14, 3 }
   0x5   : > { %s935_s15 = smov (%p28_p1, %s26_s15), 0  ;;  %p157_p3 = pnand %p634_p0, %p156_p2 }
   0x6   : > { %p189_p4 = scmp.lt.s32.totalorder (!%p157_p3), %s790_s12, 1  ;;  %v867_v0 = vmov (!%p157_p3), 0.0   ;;  %v869_v1 = vmov (!%p157_p3), 0.0   ;;  %s871_s28 = smov (!%p157_p3), 0  }
   0x7   : > { %160 = sbr.rel (%p157_p3) target bundleno = 273 (0x111), region = 28 }
   0xe   : > { %s937_s12 = smov (!%p189_p4, %s790_s12), 1 }
   0xf   : > { %s707_s16 = smul.u32 72, %s937_s12  ;;  %s664_s17 = sshll.u32 %s937_s12, 5 }
  0x10   : > { %s855_s20 = scalar_lea.vmem %s928_s2, %s664_s17  ;;  %s638_s21 = sshll.u32 %s937_s12, 1 }
  0x11   : > { %s860_s24 = scalar_lea.vmem %s926_s0, %s707_s16  ;;  %s865_s27 = scalar_lea.vmem %s929_s3, %s638_s21 }
  0x12 LB: >> { %v758_v2 = vld [vmem:[%s927_s1 + $0x10] sm:$0xff]   ;;  %v812_v3 = vmov 0.0   ;;  %vm249_vm0 = vcmask 130048   ;;  %vm813_vm1 = vmmov 0   ;;  %s665_s4 = sshll.u32 %s810_s28, 3  ;;  %v759_v4 = vld [vmem:[%s927_s1 + $0x8] sm:$0xff]   ;;  %s810_s28 = sphi %s871_s28, %s217_s28   ;;  %v806_v1 = vphi %v869_v1, %v931_v1   ;;  %v802_v0 = vphi %v867_v0, %v930_v0  }
  0x13   : >> { %686 = vmatprep.subr.bf16.mxu0 %v812_v3  ;;  %674 = vmatprep.subr.bf16.mxu1 %v812_v3  ;;  %s223_s7 = scalar_lea.vmem %s860_s24, %s665_s4  ;;  %v762_v8 = vld [vmem:[%s927_s1 + $0x18] sm:$0xff]   ;;  %v761_v17 = vld [vmem:[%s927_s1] sm:$0xff]   ;;  %s661_s12 = sshll.u32 %s810_s28, 2  ;;  %vm472_vm2 = vcmask 261120   ;;  %vm470_vm3 = vcmask 257024  }
  0x14   : >> { %687 = vmatpush3.bf16.msra.mxu0 %v758_v2  ;;  %688 = vmatprep.mubr.msk.bf16.mxu0 %vm813_vm1, %v812_v3  ;;  %v649_v5 = vld [vmem:[%s223_s7 + $0x8] sm:$0xf]  ;;  %v224_v6 = vld [vmem:[%s223_s7] sm:$0xf]  ;;  %v227_v7 = vld [vmem:[%s223_s7 + $0x4] sm:$0x1]  ;;  %s469_s16 = scalar_lea.vmem %s855_s20, %s661_s12 }
  0x15   : >> { %676 = vmatprep.mubr.msk.bf16.mxu1 %vm813_vm1, %v812_v3  ;;  %692 = vmatprep.subr.bf16.mxu0 %v812_v3  ;;  %v643_v9 = vcombine.low %v224_v6, %v227_v7  ;;  %v763_v10 = vld [vmem:[%s223_s7 + $0x8] sm:$0x1f]   ;;  %s217_s28 = sadd.s32 1, %s810_s28  }
  0x16   : >> { %675 = vmatpush3.bf16.msra.mxu1 %v759_v4  ;;  %v413_v13 = vshll.u32 %v763_v10, 16  ;;  %v411_v14 = vshrl.u32 %v763_v10, 16  ;;  %p214_p5 = scmp.ge.s32.totalorder %s217_s28, 8  }
  0x17   : >> { %689 = vmatmul.mubr.msk.bf16.vlgmr.msra.gmra.mrb[0].mxu0 %vm249_vm0, %v649_v5  ;;  %680 = vmatprep.subr.bf16.mxu1 %v812_v3  ;;  %v237_v11 = vshrl.u32 %v643_v9, 16  ;;  %v239_v12 = vshll.u32 %v643_v9, 16  ;;  %vm490_vm4 = vcmask (%p214_p5), 253952  }
  0x18   : >> { %694 = vmatprep.mubr.msk.bf16.mxu0 %vm813_vm1, %v812_v3  ;;  %693 = vmatpush3.bf16.msra.mxu0 %v762_v8  ;;  %v415_v16 = vrot.slane %v413_v13, 1 }
  0x19   : >> { %v241_v15 = vrot.slane %v239_v12, 1 }
  0x1a   : >> { %v416_v19 = vor.u32 %v415_v16, %v411_v14 }
  0x1b   : >> { %v242_v18 = vor.u32 %v241_v15, %v237_v11 }
  0x1d   : >> { %677 = vmatmul.mubr.msk.bf16.vlgmr.msra.gmra.mrb[0].mxu1 %vm249_vm0, %v242_v18 }
  0x1e   : >> { %681 = vmatpush3.bf16.msra.mxu1 %v761_v17  ;;  %682 = vmatprep.mubr.msk.bf16.mxu1 %vm813_vm1, %v812_v3 }
  0x23   : >> { %695 = vmatmul.mubr.msk.bf16.vlgmr.msra.gmra.mrb[0].mxu0 %vm249_vm0, %v416_v19 }
  0x29   : >> { %683 = vmatmul.mubr.msk.bf16.vlgmr.msra.gmra.mrb[0].mxu1 %vm249_vm0, %v224_v6 }
  0xf6   : >> { %v460_v20 = vpop.f32.mrb[0].mxu0 }
  0xf7   : >> { %v696_v21 = vpop.f32.mrb[1].mxu0 }
  0xf8   : >> { %v463_v22 = vpop.f32.mrb[2].mxu0 }
  0xf9   : >> { %v697_v23 = vpop.f32.mrb[3].mxu0 }
  0xfc   : >> { %v336_v24 = vpop.f32.mrb[0].mxu1 }
  0xfd   : >> { %v698_v25 = vadd.f32 %v460_v20, %v336_v24  ;;  %v684_v26 = vpop.f32.mrb[1].mxu1 }
  0xfe   : >> { %v339_v27 = vpop.f32.mrb[2].mxu1 }
  0xff   : >> { %v467_v28 = vpack.c.bf16 %v698_v25, %v698_v25  ;;  %v473_v29 = vsel %vm472_vm2, %v698_v25, 0.0  ;;  %v481_v30 = vmul.f32 %v698_v25, %v698_v25  ;;  %v685_v31 = vpop.f32.mrb[3].mxu1 }
 0x100   : >> { %v474_v32 = vrot.slane %v473_v29, 4 }
 0x101   : >> { %471 = vst.msk [vmem:[%s469_s16] sm:$0xf] %vm470_vm3, %v467_v28  ;;  %v482_v33 = vsel %vm472_vm2, %v481_v30, 0.0 }
 0x102   : >> { %v475_v34 = vadd.f32 %v474_v32, %v473_v29  ;;  %v483_v35 = vrot.slane %v482_v33, 4 }
 0x104   : >> { %v476_v36 = vrot.slane %v475_v34, 2  ;;  %v484_v37 = vadd.f32 %v483_v35, %v482_v33 }
 0x106   : >> { %v477_v38 = vadd.f32 %v476_v36, %v475_v34  ;;  %v485_v39 = vrot.slane %v484_v37, 2 }
 0x108   : >> { %v478_v40 = vrot.slane %v477_v38, 1  ;;  %v486_v41 = vadd.f32 %v485_v39, %v484_v37 }
 0x10a   : >> { %v479_v42 = vadd.f32 %v478_v40, %v477_v38  ;;  %v487_v43 = vrot.slane %v486_v41, 1  ;;  %216 = sbr.rel (!%p214_p5) target bundleno = 18 (0x12), region = 83 }
 0x10c   : >> { %v480_v44 = vadd.f32 %v806_v1, %v479_v42   ;;  %v488_v45 = vadd.f32 %v487_v43, %v486_v41 }
 0x10e   : >> { %v489_v46 = vadd.f32 %v802_v0, %v488_v45   ;;  %v931_v1 = vmov %v480_v44  ;;  %491 = vst.msk [vmem:[%s865_s27] sm:$0x1] (%p214_p5), %vm490_vm4, %v480_v44 }
 0x110   : >> { %v930_v0 = vmov %v489_v46  ;;  %492 = vst.msk [vmem:[%s865_s27 + $0x1] sm:$0x1] (%p214_p5), %vm490_vm4, %v489_v46 }
 0x111 PF: > { %s14_s14 = sadd.s32 1, %s798_s14   ;;  %s932_s12 = smov %s794_s13 }
 0x112   : > { %p11_p6 = scmp.ge.s32.totalorder %s14_s14, 4   ;;  %s933_s13 = smov %s935_s15 }
 0x114   :  { %13 = sbr.rel (!%p11_p6) target bundleno = 2 (0x2), region = 94 }

// kernel: resnet_generator_forward.23
= control target key start
LH: loop header
LB: loop body
LE: loop exit
PB: predicated region body
PF: predicated region fallthrough
CT: control target
= control target key end

     0   :  { %s4470_s18 = smov 0   ;;  %s4472_s19 = smov 0   ;;  %s5323_s0 = inlined_call_operand.vmem [shape: bf16[2,22,22,8], index: 0, kind: input, shape index: {}]   ;;  %s5324_s1 = inlined_call_operand.vmem [shape: bf16[49,8,3], index: 1, kind: input, shape index: {}]   ;;  %s5325_s2 = inlined_call_operand.vmem [shape: f32[1,8], index: 2, kind: input, shape index: {}]   ;;  %s5326_s3 = inlined_call_operand.vmem [shape: f32[1,8], index: 3, kind: input, shape index: {}]   ;;  %s5327_s4 = inlined_call_operand.vmem [shape: f32[1,3], index: 4, kind: input, shape index: {}]   ;;  %s5328_s5 = inlined_call_operand.vmem [shape: f32[2,16,16,3], index: 5, kind: output, shape index: {}]  }
   0x1   :  { %s4474_s20 = smov 0  }
   0x2 LB: > { %s27_s21 = sadd.s32 1, %s4428_s19  ;;  %p3771_p0 = scmp.ge.s32.totalorder %s4432_s20, 1  ;;  %s4432_s20 = sphi %s4474_s20, %s15_s20   ;;  %s4428_s19 = sphi %s4472_s19, %s5330_s19   ;;  %s4424_s18 = sphi %s4470_s18, %s5329_s18  }
   0x3   : > { %p29_p1 = scmp.ge.s32.totalorder %s27_s21, 2  ;;  %p201_p2 = scmp.lt.s32.totalorder %s4432_s20, 3 }
   0x5   : > { %s5332_s21 = smov (%p29_p1, %s27_s21), 0  ;;  %p202_p3 = pnand %p3771_p0, %p201_p2 }
   0x6   : > { %p234_p4 = scmp.lt.s32.totalorder (!%p202_p3), %s4424_s18, 1  ;;  %v4491_v0 = vld [vmem:[%s5325_s2] ss:$0 sm:$0xff] (!%p202_p3)  ;;  %s4508_s9 = smov (!%p202_p3), 0  }
   0x7   : > { %205 = sbr.rel (%p202_p3) target bundleno = 462 (0x1ce), region = 40  ;;  %v4496_v1 = vld [vmem:[%s5326_s3] ss:$0 sm:$0xff] (!%p202_p3) }
   0xe   : > { %s5334_s18 = smov (!%p234_p4, %s4424_s18), 1 }
   0xf   : > { %s4367_s26 = smul.u32 264, %s5334_s18  ;;  %s3939_s27 = sshll.u32 %s5334_s18, 8 }
  0x10   : > { %s4501_s30 = scalar_lea.vmem %s5328_s5, %s3939_s27 }
  0x11   : > { %s4506_s8 = scalar_lea.vmem %s5323_s0, %s4367_s26 }
  0x12 LB: >> { %v3778_v2 = vld [vmem:[%s5324_s1 + $0x4] sm:$0xf]  ;;  %vm313_vm0 = vcmask 1043456   ;;  %v287_v3 = vld [vmem:[%s5324_s1] sm:$0xf]  ;;  %v4438_v4 = vmov 0.0   ;;  %s4436_s9 = sphi %s4508_s9, %s271_s9  }
  0x13   : >> { %4073 = vmatprep.subr.bf16.mxu0 %v4438_v4  ;;  %v315_v5 = vsel %vm313_vm0, %v3778_v2, 0  ;;  %4079 = vmatprep.subr.bf16.mxu1 %v4438_v4  ;;  %v361_v6 = vsel %vm313_vm0, %v287_v3, 0  ;;  %s3940_s14 = smul.u32 12, %s4436_s9  ;;  %vm4439_vm1 = vmmov 0   ;;  %v3783_v30 = vld [vmem:[%s5324_s1 + $0xc] sm:$0xf] }
  0x14   : >> { %4074 = vmatpush3.bf16.msra.mxu0 %v315_v5  ;;  %4080 = vmatpush3.bf16.msra.mxu1 %v361_v6  ;;  %v3781_v37 = vld [vmem:[%s5324_s1 + $0x8] sm:$0xf]  ;;  %vm309_vm2 = vcmask 64512   ;;  %v497_v44 = vsel %vm313_vm0, %v3783_v30, 0  ;;  %vm296_vm3 = vsmask.f32 7424 }
  0x15   : >> { %4075 = vmatprep.mubr.msk.bf16.mxu0 %vm4439_vm1, %v4438_v4  ;;  %4081 = vmatprep.mubr.msk.bf16.mxu1 %vm4439_vm1, %v4438_v4  ;;  %s4530_s15 = scalar_lea.vmem %s4506_s8, %s3940_s14  ;;  %v422_v46 = vsel %vm313_vm0, %v3781_v37, 0  ;;  %v3785_v52 = vld [vmem:[%s5324_s1 + $0x10] sm:$0xf]  ;;  %vm414_vm4 = vcmask 1046528   ;;  %v3787_v61 = vld [vmem:[%s5324_s1 + $0x14] sm:$0xf] }
  0x16   : >> { %4085 = vmatprep.subr.bf16.mxu0 %v4438_v4  ;;  %4091 = vmatprep.subr.bf16.mxu1 %v4438_v4  ;;  %v3942_v7 = vld [vmem:[%s4530_s15] sm:$0xff]   ;;  %v288_v8 = vld [vmem:[%s4530_s15 + $0x8] sm:$0x1]  ;;  %v4591_v63 = vsel %vm313_vm0, %v3785_v52, 0  ;;  %vm475_vm5 = vsmask.f32 6400 }
  0x17   : >> { %v404_v9 = vld [vmem:[%s4530_s15] sm:$0xe]  ;;  %v3943_v10 = vunpack.c.l.bf16 %v3942_v7  ;;  %v3944_v11 = vunpack.c.h.bf16 %v3942_v7  ;;  %v289_v12 = vunpack.c.l.bf16 %v288_v8  ;;  %v467_v14 = vld [vmem:[%s4530_s15 + $0x8] sm:$0x3]  ;;  %vm552_vm6 = vcmask 1045504   ;;  %s3936_s24 = sshll.u32 %s4436_s9, 4 }
  0x18   : >> { %v405_v13 = vunpack.c.l.bf16 %v404_v9  ;;  %v542_v15 = vld [vmem:[%s4530_s15] sm:$0xc]  ;;  %v468_v16 = vunpack.c.l.bf16 %v467_v14  ;;  %v605_v18 = vld [vmem:[%s4530_s15 + $0x8] sm:$0x7]  ;;  %vm613_vm7 = vsmask.f32 5376  ;;  %s3635_s25 = scalar_lea.vmem %s4501_s30, %s3936_s24 }
  0x19   : >> { %v543_v17 = vunpack.c.l.bf16 %v542_v15  ;;  %v280_v19 = vmul.f32 %v3943_v10, %v4491_v0  ;;  %v281_v20 = vmul.f32 %v3944_v11, %v4491_v0  ;;  %v290_v21 = vmul.f32 %v4491_v0, %v289_v12  ;;  %v680_v48 = vld [vmem:[%s4530_s15] sm:$0x8]  ;;  %v3800_v37 = vld [vmem:[%s4530_s15 + $0xc] sm:$0xe]  ;;  %s271_s9 = sadd.s32 1, %s4436_s9  }
  0x1a   : >> { %v406_v22 = vmul.f32 %v4491_v0, %v405_v13  ;;  %v469_v23 = vmul.f32 %v4491_v0, %v468_v16  ;;  %v606_v25 = vunpack.c.l.bf16 %v605_v18  ;;  %v681_v62 = vunpack.c.l.bf16 %v680_v48  ;;  %v3791_v13 = vld [vmem:[%s4530_s15 + $0xc] sm:$0xff]   ;;  %p268_p5 = scmp.ge.s32.totalorder %s271_s9, 16  }
  0x1b   : >> { %v544_v24 = vmul.f32 %v4491_v0, %v543_v17  ;;  %v282_v26 = vadd.f32 %v4496_v1, %v280_v19  ;;  %v283_v27 = vadd.f32 %v4496_v1, %v281_v20  ;;  %v291_v28 = vadd.f32 %v4496_v1, %v290_v21  ;;  %v3793_v17 = vld [vmem:[%s5324_s1 + $0x1c] sm:$0xf]  ;;  %v3806_v52 = vld [vmem:[%s4530_s15 + $0xc] sm:$0xc] }
  0x1c   : >> { %v407_v29 = vadd.f32 %v4496_v1, %v406_v22  ;;  %v470_v31 = vadd.f32 %v4496_v1, %v469_v23  ;;  %v607_v33 = vmul.f32 %v4491_v0, %v606_v25  ;;  %v635_v10 = vsel %vm313_vm0, %v3787_v61, 0  ;;  %v3795_v23 = vld [vmem:[%s4530_s15 + $0xc] sm:$0xff]   ;;  %v3809_v61 = vld [vmem:[%s4530_s15 + $0x14] sm:$0x7] }
  0x1d   : >> { %v545_v32 = vadd.f32 %v4496_v1, %v544_v24  ;;  %v284_v34 = vmax.f32 %v282_v26, 0.0  ;;  %v4555_v35 = vmax.f32 %v283_v27, 0.0  ;;  %v292_v36 = vmax.f32 %v291_v28, 0.0  ;;  %v3797_v28 = vld [vmem:[%s4530_s15 + $0x14] sm:$0x1] }
  0x1e   : >> { %v408_v38 = vmax.f32 %v407_v29, 0.0  ;;  %v471_v39 = vmax.f32 %v470_v31, 0.0  ;;  %v608_v41 = vadd.f32 %v4496_v1, %v607_v33  ;;  %v682_v18 = vmul.f32 %v4491_v0, %v681_v62 }
  0x1f   : >> { %v546_v40 = vmax.f32 %v545_v32, 0.0  ;;  %v286_v42 = vpack.c.bf16 %v4555_v35, %v284_v34  ;;  %v4562_v43 = vpack.c.bf16 %v292_v36, %v292_v36  ;;  %v749_v27 = vunpack.c.l.bf16 %v3791_v13 }
  0x20   : >> { %v4566_v45 = vpack.c.bf16 %v4555_v35, %v408_v38  ;;  %v4569_v47 = vpack.c.bf16 %v471_v39, %v471_v39  ;;  %v609_v53 = vmax.f32 %v608_v41, 0.0  ;;  %v764_v30 = vsel %vm313_vm0, %v3793_v17, 0 }
  0x21   : >> { %v298_v49 = vshrl.u32 %v286_v42, 16  ;;  %v300_v50 = vshll.u32 %v286_v42, 16  ;;  %v305_v51 = vshll.u32 %v4562_v43, 16  ;;  %4082 = vmatmul.mubr.msk.bf16.vlgmr.msra.gmra.mrb[0].mxu1 %vm309_vm2, %v286_v42  ;;  %v4583_v57 = vpack.c.bf16 %v4555_v35, %v546_v40 }
  0x22   : >> { %4092 = vmatpush3.bf16.msra.mxu1 %v497_v44  ;;  %4093 = vmatprep.mubr.msk.bf16.mxu1 %vm4439_vm1, %v4438_v4  ;;  %v477_v54 = vshrl.u32 %v4566_v45, 16  ;;  %v480_v55 = vshll.u32 %v4566_v45, 16  ;;  %v485_v56 = vshrl.u32 %v4569_v47, 16  ;;  %v488_v60 = vshll.u32 %v4569_v47, 16 }
  0x23   : >> { %v302_v58 = vrot.slane %v300_v50, 1  ;;  %v307_v59 = vrot.slane %v305_v51, 1  ;;  %4103 = vmatprep.subr.bf16.mxu1 %v4438_v4  ;;  %v4593_v8 = vpack.c.bf16 %v609_v53, %v609_v53  ;;  %v615_v11 = vshrl.u32 %v4583_v57, 16 }
  0x24   : >> { %v479_v2 = vrot.slane %v477_v54, 1  ;;  %v482_v3 = vrot.slane %v480_v55, 2  ;;  %v487_v5 = vrot.slane %v485_v56, 1  ;;  %v490_v7 = vrot.slane %v488_v60, 2 }
  0x25   : >> { %v303_v6 = vor.u32 %v302_v58, %v298_v49  ;;  %v618_v12 = vshll.u32 %v4583_v57, 16  ;;  %v623_v16 = vshrl.u32 %v4593_v8, 16  ;;  %v415_v19 = vrot.slane %v4566_v45, 1 }
  0x26   : >> { %v483_v9 = vor.u32 %v482_v3, %v479_v2  ;;  %v491_v15 = vor.u32 %v490_v7, %v487_v5  ;;  %v617_v20 = vrot.slane %v615_v11, 2  ;;  %v626_v22 = vshll.u32 %v4593_v8, 16 }
  0x27   : >> { %v308_v14 = vsel %vm296_vm3, %v303_v6, %v307_v59  ;;  %v620_v21 = vrot.slane %v618_v12, 3  ;;  %v416_v24 = vrot.slane %v4562_v43, 1  ;;  %v625_v26 = vrot.slane %v623_v16, 2 }
  0x28   : >> { %4076 = vmatmul.mubr.msk.bf16.vlgmr.msra.gmra.mrb[0].mxu0 %vm309_vm2, %v308_v14  ;;  %v492_v25 = vsel %vm475_vm5, %v483_v9, %v491_v15  ;;  %v628_v29 = vrot.slane %v626_v22, 3  ;;  %v750_v31 = vunpack.c.h.bf16 %v3791_v13  ;;  %v751_v33 = vmul.f32 %v4491_v0, %v749_v27 }
  0x29   : >> { %4086 = vmatpush3.bf16.msra.mxu0 %v422_v46  ;;  %4087 = vmatprep.mubr.msk.bf16.mxu0 %vm4439_vm1, %v4438_v4  ;;  %v621_v32 = vor.u32 %v620_v21, %v617_v20  ;;  %v812_v34 = vunpack.c.l.bf16 %v3795_v23  ;;  %v813_v36 = vunpack.c.h.bf16 %v3795_v23  ;;  %v683_v39 = vadd.f32 %v4496_v1, %v682_v18  ;;  %v3803_v46 = vld [vmem:[%s4530_s15 + $0x14] sm:$0x3]  ;;  %v3801_v18 = vld [vmem:[%s5324_s1 + $0x24] sm:$0xf] }
  0x2a   : >> { %4097 = vmatprep.subr.bf16.mxu0 %v4438_v4  ;;  %4094 = vmatmul.mubr.msk.bf16.vlgmr.msra.gmra.mrb[4].mxu1 %vm309_vm2, %v492_v25  ;;  %v629_v38 = vor.u32 %v628_v29, %v625_v26  ;;  %v752_v40 = vmul.f32 %v4491_v0, %v750_v31  ;;  %v814_v41 = vunpack.c.l.bf16 %v3797_v28  ;;  %v417_v42 = vsel %vm414_vm4, %v415_v19, %v416_v24  ;;  %v3812_v24 = vld [vmem:[%s4530_s15 + $0xc] sm:$0x8] }
  0x2b   : >> { %4104 = vmatpush3.bf16.msra.mxu1 %v635_v10  ;;  %4105 = vmatprep.mubr.msk.bf16.mxu1 %vm4439_vm1, %v4438_v4  ;;  %v753_v43 = vadd.f32 %v4496_v1, %v751_v33  ;;  %v815_v44 = vmul.f32 %v4491_v0, %v812_v34  ;;  %v816_v45 = vmul.f32 %v4491_v0, %v813_v36  ;;  %v553_v48 = vrot.slane %v4583_v57, 2  ;;  %v3798_v36 = vld [vmem:[%s5324_s1 + $0x20] sm:$0xf] }
  0x2c   : >> { %4115 = vmatprep.subr.bf16.mxu1 %v4438_v4  ;;  %v754_v49 = vadd.f32 %v4496_v1, %v752_v40  ;;  %v817_v50 = vmul.f32 %v4491_v0, %v814_v41  ;;  %v890_v51 = vunpack.c.l.bf16 %v3800_v37  ;;  %v554_v53 = vrot.slane %v4569_v47, 2  ;;  %v3804_v37 = vld [vmem:[%s5324_s1 + $0x28] sm:$0xf] }
  0x2d   : >> { %v630_v54 = vsel %vm613_vm7, %v621_v32, %v629_v38  ;;  %v818_v55 = vadd.f32 %v4496_v1, %v815_v44  ;;  %v819_v56 = vadd.f32 %v4496_v1, %v816_v45  ;;  %v684_v58 = vmax.f32 %v683_v39, 0.0 }
  0x2e   : >> { %v820_v59 = vadd.f32 %v4496_v1, %v817_v50  ;;  %v891_v57 = vmul.f32 %v4491_v0, %v890_v51  ;;  %v952_v60 = vunpack.c.l.bf16 %v3803_v46  ;;  %v755_v47 = vmax.f32 %v753_v43, 0.0  ;;  %v3969_v50 = vld [vmem:[%s4530_s15 + $0x18] sm:$0xff]  }
  0x2f   : >> { %v821_v62 = vmax.f32 %v818_v55, 0.0  ;;  %v4644_v2 = vmax.f32 %v819_v56, 0.0  ;;  %v1026_v3 = vunpack.c.l.bf16 %v3806_v52  ;;  %v756_v5 = vmax.f32 %v754_v49, 0.0 }
  0x30   : >> { %4088 = vmatmul.mubr.msk.bf16.vlgmr.msra.gmra.mrb[4].mxu0 %vm309_vm2, %v417_v42  ;;  %v823_v6 = vmax.f32 %v820_v59, 0.0  ;;  %v892_v7 = vadd.f32 %v4496_v1, %v891_v57  ;;  %v953_v9 = vmul.f32 %v4491_v0, %v952_v60  ;;  %v1088_v12 = vunpack.c.l.bf16 %v3809_v61  ;;  %v3807_v42 = vld [vmem:[%s5324_s1 + $0x2c] sm:$0xf]  ;;  %v3821_v57 = vld [vmem:[%s4530_s15 + $0x20] sm:$0x1] }
  0x31   : >> { %4098 = vmatpush3.bf16.msra.mxu0 %v4591_v63  ;;  %4099 = vmatprep.mubr.msk.bf16.mxu0 %vm4439_vm1, %v4438_v4  ;;  %v3789_v63 = vld [vmem:[%s5324_s1 + $0x18] sm:$0xf]  ;;  %v824_v10 = vpack.c.bf16 %v4644_v2, %v821_v62  ;;  %v1027_v11 = vmul.f32 %v4491_v0, %v1026_v3  ;;  %v555_v16 = vsel %vm552_vm6, %v553_v48, %v554_v53  ;;  %v692_v31 = vrot.slane %v4593_v8, 3  ;;  %v3813_v48 = vld [vmem:[%s5324_s1 + $0x34] sm:$0xf] }
  0x32   : >> { %4109 = vmatprep.subr.bf16.mxu0 %v4438_v4  ;;  %4106 = vmatmul.mubr.msk.bf16.vlgmr.msra.gmra.mrb[8].mxu1 %vm309_vm2, %v630_v54  ;;  %v825_v13 = vpack.c.bf16 %v823_v6, %v823_v6  ;;  %v893_v14 = vmax.f32 %v892_v7, 0.0  ;;  %v954_v15 = vadd.f32 %v4496_v1, %v953_v9  ;;  %v685_v17 = vpack.c.bf16 %v4555_v35, %v684_v58  ;;  %v3824_v3 = vld [vmem:[%s4530_s15 + $0x18] sm:$0xe] }
  0x33   : >> { %4116 = vmatpush3.bf16.msra.mxu1 %v764_v30  ;;  %4117 = vmatprep.mubr.msk.bf16.mxu1 %vm4439_vm1, %v4438_v4  ;;  %v831_v19 = vshll.u32 %v824_v10, 16  ;;  %v1028_v20 = vadd.f32 %v4496_v1, %v1027_v11  ;;  %v698_v21 = vsel %vm313_vm0, %v3789_v63, 0  ;;  %v757_v22 = vpack.c.bf16 %v756_v5, %v755_v47  ;;  %v3827_v63 = vld [vmem:[%s4530_s15 + $0x20] sm:$0x3] }
  0x34   : >> { %4127 = vmatprep.subr.bf16.mxu1 %v4438_v4  ;;  %v955_v23 = vmax.f32 %v954_v15, 0.0  ;;  %v894_v25 = vpack.c.bf16 %v4644_v2, %v893_v14  ;;  %v1089_v26 = vmul.f32 %v4491_v0, %v1088_v12  ;;  %v906_v35 = vsel %vm313_vm0, %v3801_v18, 0  ;;  %v3830_v18 = vld [vmem:[%s4530_s15 + $0x18] sm:$0xc] }
  0x35   : >> { %v829_v27 = vshrl.u32 %v824_v10, 16  ;;  %v833_v28 = vrot.slane %v831_v19, 1  ;;  %v836_v29 = vshll.u32 %v825_v13, 16  ;;  %v691_v30 = vrot.slane %v685_v17, 3 }
  0x36   : >> { %v1029_v32 = vmax.f32 %v1028_v20, 0.0  ;;  %v1162_v33 = vunpack.c.l.bf16 %v3812_v24  ;;  %vm690_vm8 = vcmask 1044480   ;;  %v956_v34 = vpack.c.bf16 %v955_v23, %v955_v23 }
  0x37   : >> { %v899_v8 = vrot.slane %v894_v25, 1  ;;  %v900_v38 = vrot.slane %v825_v13, 1  ;;  %v1090_v39 = vadd.f32 %v4496_v1, %v1089_v26  ;;  %v834_v40 = vor.u32 %v833_v28, %v829_v27 }
  0x38   : >> { %4100 = vmatmul.mubr.msk.bf16.vlgmr.msra.gmra.mrb[8].mxu0 %vm309_vm2, %v555_v16  ;;  %v838_v41 = vrot.slane %v836_v29, 1  ;;  %v960_v43 = vshrl.u32 %v894_v25, 16  ;;  %v693_v44 = vsel %vm690_vm8, %v691_v30, %v692_v31  ;;  %v963_v45 = vshll.u32 %v894_v25, 16  ;;  %v3833_v30 = vld [vmem:[%s4530_s15 + $0x20] sm:$0x7] }
  0x39   : >> { %4110 = vmatpush3.bf16.msra.mxu0 %v698_v21  ;;  %4111 = vmatprep.mubr.msk.bf16.mxu0 %vm4439_vm1, %v4438_v4  ;;  %v4691_v46 = vpack.c.bf16 %v4644_v2, %v1029_v32  ;;  %v1163_v49 = vmul.f32 %v4491_v0, %v1162_v33  ;;  %v844_v51 = vsel %vm313_vm0, %v3798_v36, 0  ;;  %v980_v52 = vsel %vm313_vm0, %v3804_v37, 0 }
  0x3a   : >> { %4121 = vmatprep.subr.bf16.mxu0 %v4438_v4  ;;  %4118 = vmatmul.mubr.msk.bf16.vlgmr.msra.gmra.mrb[12].mxu1 %vm309_vm2, %v757_v22  ;;  %v968_v53 = vshrl.u32 %v956_v34, 16  ;;  %v971_v54 = vshll.u32 %v956_v34, 16  ;;  %v901_v55 = vsel %vm414_vm4, %v899_v8, %v900_v38  ;;  %v1042_v56 = vsel %vm313_vm0, %v3807_v42, 0 }
  0x3b   : >> { %4128 = vmatpush3.bf16.msra.mxu1 %v906_v35  ;;  %4129 = vmatprep.mubr.msk.bf16.mxu1 %vm4439_vm1, %v4438_v4  ;;  %v1091_v58 = vmax.f32 %v1090_v39, 0.0  ;;  %v1164_v59 = vadd.f32 %v4496_v1, %v1163_v49  ;;  %v839_v60 = vsel %vm296_vm3, %v834_v40, %v838_v41  ;;  %v4706_v61 = vrot.slane %v960_v43, 1 }
  0x3c   : >> { %4139 = vmatprep.subr.bf16.mxu1 %v4438_v4  ;;  %v1178_v47 = vsel %vm313_vm0, %v3813_v48, 0  ;;  %v3947_v62 = vunpack.c.l.bf16 %v3969_v50  ;;  %v965_v5 = vrot.slane %v963_v45, 2  ;;  %v1035_v6 = vrot.slane %v4691_v46, 2 }
  0x3d   : >> { %v1036_v7 = vrot.slane %v956_v34, 2  ;;  %v3948_v9 = vunpack.c.h.bf16 %v3969_v50  ;;  %v970_v10 = vrot.slane %v968_v53, 1  ;;  %v973_v11 = vrot.slane %v971_v54, 2 }
  0x3e   : >> { %v1231_v12 = vmul.f32 %v3947_v62, %v4491_v0  ;;  %v1294_v13 = vunpack.c.l.bf16 %v3821_v57  ;;  %v1092_v14 = vpack.c.bf16 %v1091_v58, %v1091_v58  ;;  %v1165_v15 = vmax.f32 %v1164_v59, 0.0 }
  0x3f   : >> { %v1232_v16 = vmul.f32 %v3948_v9, %v4491_v0  ;;  %v1370_v17 = vunpack.c.l.bf16 %v3824_v3  ;;  %v1096_v19 = vshrl.u32 %v4691_v46, 16  ;;  %v1432_v22 = vunpack.c.l.bf16 %v3827_v63 }
  0x40   : >> { %4112 = vmatmul.mubr.msk.bf16.vlgmr.msra.gmra.mrb[12].mxu0 %vm309_vm2, %v693_v44  ;;  %v1233_v20 = vadd.f32 %v4496_v1, %v1231_v12  ;;  %v1297_v21 = vmul.f32 %v4491_v0, %v1294_v13  ;;  %v966_v23 = vor.u32 %v965_v5, %v4706_v61  ;;  %v1037_v24 = vsel %vm552_vm6, %v1035_v6, %v1036_v7  ;;  %v3810_v44 = vld [vmem:[%s5324_s1 + $0x30] sm:$0xf] }
  0x41   : >> { %4122 = vmatpush3.bf16.msra.mxu0 %v844_v51  ;;  %4123 = vmatprep.mubr.msk.bf16.mxu0 %vm4439_vm1, %v4438_v4  ;;  %v1234_v25 = vadd.f32 %v4496_v1, %v1232_v16  ;;  %v1371_v26 = vmul.f32 %v4491_v0, %v1370_v17  ;;  %v1433_v28 = vmul.f32 %v4491_v0, %v1432_v22  ;;  %v1506_v29 = vunpack.c.l.bf16 %v3830_v18 }
  0x42   : >> { %4133 = vmatprep.subr.bf16.mxu0 %v4438_v4  ;;  %4130 = vmatmul.mubr.msk.bf16.vlgmr.msra.gmra.mrb[16].mxu1 %vm309_vm2, %v901_v55  ;;  %v1235_v35 = vmax.f32 %v1233_v20, 0.0  ;;  %v1300_v27 = vadd.f32 %v4496_v1, %v1297_v21  ;;  %v1099_v31 = vshll.u32 %v4691_v46, 16  ;;  %v1166_v32 = vpack.c.bf16 %v4644_v2, %v1165_v15  ;;  %v3822_v55 = vld [vmem:[%s5324_s1 + $0x3c] sm:$0xf]  ;;  %v3828_v20 = vld [vmem:[%s5324_s1 + $0x44] sm:$0xf] }
  0x43   : >> { %4140 = vmatpush3.bf16.msra.mxu1 %v1042_v56  ;;  %4141 = vmatprep.mubr.msk.bf16.mxu1 %vm4439_vm1, %v4438_v4  ;;  %v4734_v33 = vmax.f32 %v1234_v25, 0.0  ;;  %v1372_v34 = vadd.f32 %v4496_v1, %v1371_v26  ;;  %v974_v36 = vor.u32 %v973_v11, %v970_v10  ;;  %v1104_v37 = vshrl.u32 %v1092_v14, 16  ;;  %v3817_v10 = vld [vmem:[%s5324_s1 + $0x38] sm:$0xf] }
  0x44   : >> { %4151 = vmatprep.subr.bf16.mxu1 %v4438_v4  ;;  %v1303_v8 = vmax.f32 %v1300_v27, 0.0  ;;  %v1434_v38 = vadd.f32 %v4496_v1, %v1433_v28  ;;  %v1107_v39 = vshll.u32 %v1092_v14, 16  ;;  %v1507_v2 = vmul.f32 %v4491_v0, %v1506_v29  ;;  %v3843_v28 = vld [vmem:[%s4530_s15 + $0x24] sm:$0xff]   ;;  %v3825_v29 = vld [vmem:[%s5324_s1 + $0x40] sm:$0xf] }
  0x45   : >> { %v4742_v40 = vpack.c.bf16 %v4734_v33, %v1235_v35  ;;  %v1568_v41 = vunpack.c.l.bf16 %v3833_v30  ;;  %v1373_v42 = vmax.f32 %v1372_v34, 0.0  ;;  %v1171_v45 = vrot.slane %v1166_v32, 3  ;;  %v3836_v34 = vld [vmem:[%s4530_s15 + $0x18] sm:$0x8] }
  0x46   : >> { %v1435_v43 = vmax.f32 %v1434_v38, 0.0  ;;  %v1172_v46 = vrot.slane %v1092_v14, 3  ;;  %v4752_v48 = vpack.c.bf16 %v1303_v8, %v1303_v8  ;;  %v975_v50 = vsel %vm475_vm5, %v966_v23, %v974_v36  ;;  %v3839_v38 = vld [vmem:[%s4530_s15 + $0x24] sm:$0xff]  }
  0x47   : >> { %v1311_v49 = vshll.u32 %v4742_v40, 16  ;;  %v1098_v51 = vrot.slane %v1096_v19, 2  ;;  %v1106_v53 = vrot.slane %v1104_v37, 2  ;;  %v1109_v54 = vrot.slane %v1107_v39, 3 }
  0x48   : >> { %4124 = vmatmul.mubr.msk.bf16.vlgmr.msra.gmra.mrb[16].mxu0 %vm309_vm2, %v839_v60  ;;  %v1508_v56 = vadd.f32 %v4496_v1, %v1507_v2  ;;  %v1569_v58 = vmul.f32 %v4491_v0, %v1568_v41  ;;  %v1116_v59 = vsel %vm313_vm0, %v3810_v44, 0  ;;  %v4764_v57 = vpack.c.bf16 %v4734_v33, %v1373_v42  ;;  %v3848_v41 = vld [vmem:[%s4530_s15 + $0x24] sm:$0xe] }
  0x49   : >> { %4134 = vmatpush3.bf16.msra.mxu0 %v980_v52  ;;  %4135 = vmatprep.mubr.msk.bf16.mxu0 %vm4439_vm1, %v4438_v4  ;;  %v1101_v52 = vrot.slane %v1099_v31, 3  ;;  %v4766_v60 = vpack.c.bf16 %v1435_v43, %v1435_v43  ;;  %v1173_v61 = vsel %vm690_vm8, %v1171_v45, %v1172_v46  ;;  %v1313_v62 = vrot.slane %v1311_v49, 1  ;;  %v3834_v43 = vld [vmem:[%s5324_s1 + $0x4c] sm:$0xf] }
  0x4a   : >> { %4145 = vmatprep.subr.bf16.mxu0 %v4438_v4  ;;  %4142 = vmatmul.mubr.msk.bf16.vlgmr.msra.gmra.mrb[20].mxu1 %vm309_vm2, %v1037_v24  ;;  %v1316_v3 = vshll.u32 %v4752_v48, 16  ;;  %v1324_v5 = vsel %vm313_vm0, %v3822_v55, 0  ;;  %v1110_v7 = vor.u32 %v1109_v54, %v1106_v53  ;;  %v1509_v9 = vmax.f32 %v1508_v56, 0.0  ;;  %v3845_v45 = vld [vmem:[%s4530_s15 + $0x2c] sm:$0x1] }
  0x4b   : >> { %4152 = vmatpush3.bf16.msra.mxu1 %v1178_v47  ;;  %4153 = vmatprep.mubr.msk.bf16.mxu1 %vm4439_vm1, %v4438_v4  ;;  %v1309_v47 = vshrl.u32 %v4742_v40, 16  ;;  %v1102_v6 = vor.u32 %v1101_v52, %v1098_v51  ;;  %v1570_v63 = vadd.f32 %v4496_v1, %v1569_v58  ;;  %v1440_v11 = vshrl.u32 %v4764_v57, 16 }
  0x4c   : >> { %4163 = vmatprep.subr.bf16.mxu1 %v4438_v4  ;;  %v1443_v12 = vshll.u32 %v4764_v57, 16  ;;  %v1448_v13 = vshrl.u32 %v4766_v60, 16  ;;  %v1451_v14 = vshll.u32 %v4766_v60, 16  ;;  %v1318_v16 = vrot.slane %v1316_v3, 1 }
  0x4d   : >> { %v1314_v15 = vor.u32 %v1313_v62, %v1309_v47  ;;  %v1571_v17 = vmax.f32 %v1570_v63, 0.0  ;;  %v1111_v18 = vsel %vm613_vm7, %v1102_v6, %v1110_v7  ;;  %v1244_v19 = vsel %vm313_vm0, %v3817_v10, 0  ;;  %v3851_v6 = vld [vmem:[%s4530_s15 + $0x2c] sm:$0x3]  ;;  %v3854_v7 = vld [vmem:[%s4530_s15 + $0x24] sm:$0xc] }
  0x4e   : >> { %v4794_v21 = vpack.c.bf16 %v4734_v33, %v1509_v9  ;;  %v1442_v22 = vrot.slane %v1440_v11, 1  ;;  %v1445_v23 = vrot.slane %v1443_v12, 2  ;;  %v1450_v24 = vrot.slane %v1448_v13, 1  ;;  %v3831_v9 = vld [vmem:[%s5324_s1 + $0x48] sm:$0xf] }
  0x4f   : >> { %v1453_v25 = vrot.slane %v1451_v14, 2  ;;  %v1319_v26 = vsel %vm296_vm3, %v1314_v15, %v1318_v16  ;;  %v4797_v35 = vpack.c.bf16 %v1571_v17, %v1571_v17  ;;  %v1460_v27 = vsel %vm313_vm0, %v3828_v20, 0  ;;  %v3841_v10 = vld [vmem:[%s5324_s1 + $0x54] sm:$0xf] }
  0x50   : >> { %4136 = vmatmul.mubr.msk.bf16.vlgmr.msra.gmra.mrb[20].mxu0 %vm309_vm2, %v975_v50  ;;  %v1446_v30 = vor.u32 %v1445_v23, %v1442_v22  ;;  %v1576_v32 = vshrl.u32 %v4794_v21, 16  ;;  %v1579_v36 = vshll.u32 %v4794_v21, 16  ;;  %v1772_v39 = vunpack.c.l.bf16 %v3843_v28 }
  0x51   : >> { %4146 = vmatpush3.bf16.msra.mxu0 %v1116_v59  ;;  %4147 = vmatprep.mubr.msk.bf16.mxu0 %vm4439_vm1, %v4438_v4  ;;  %v1454_v31 = vor.u32 %v1453_v25, %v1450_v24  ;;  %v1584_v37 = vshrl.u32 %v4797_v35, 16  ;;  %v1587_v8 = vshll.u32 %v4797_v35, 16  ;;  %v1773_v2 = vunpack.c.h.bf16 %v3843_v28 }
  0x52   : >> { %4157 = vmatprep.subr.bf16.mxu0 %v4438_v4  ;;  %4154 = vmatmul.mubr.msk.bf16.vlgmr.msra.gmra.mrb[24].mxu1 %vm309_vm2, %v1173_v61  ;;  %v1386_v42 = vsel %vm313_vm0, %v3825_v29, 0  ;;  %v1642_v44 = vunpack.c.l.bf16 %v3836_v34  ;;  %v1578_v49 = vrot.slane %v1576_v32, 2  ;;  %v1709_v50 = vunpack.c.l.bf16 %v3839_v38  ;;  %v3857_v34 = vld [vmem:[%s4530_s15 + $0x2c] sm:$0x7] }
  0x53   : >> { %4164 = vmatpush3.bf16.msra.mxu1 %v1324_v5  ;;  %4165 = vmatprep.mubr.msk.bf16.mxu1 %vm4439_vm1, %v4438_v4  ;;  %v1455_v46 = vsel %vm475_vm5, %v1446_v30, %v1454_v31  ;;  %v1710_v51 = vunpack.c.h.bf16 %v3839_v38  ;;  %v1581_v52 = vrot.slane %v1579_v36, 3  ;;  %v1586_v53 = vrot.slane %v1584_v37, 2  ;;  %v3837_v36 = vld [vmem:[%s5324_s1 + $0x50] sm:$0xf] }
  0x54   : >> { %4175 = vmatprep.subr.bf16.mxu1 %v4438_v4  ;;  %v1589_v54 = vrot.slane %v1587_v8, 3  ;;  %v1850_v55 = vunpack.c.l.bf16 %v3848_v41  ;;  %v1596_v56 = vsel %vm313_vm0, %v3834_v43, 0  ;;  %v1774_v58 = vunpack.c.l.bf16 %v3845_v45  ;;  %v3971_v8 = vld [vmem:[%s4530_s15 + $0x30] sm:$0xff]   ;;  %v3860_v41 = vld [vmem:[%s4530_s15 + $0x24] sm:$0x8] }
  0x55   : >> { %v1775_v59 = vmul.f32 %v4491_v0, %v1772_v39  ;;  %v1776_v61 = vmul.f32 %v4491_v0, %v1773_v2  ;;  %v1379_v47 = vrot.slane %v4764_v57, 1  ;;  %v1380_v62 = vrot.slane %v4752_v48, 1  ;;  %v3849_v43 = vld [vmem:[%s5324_s1 + $0x5c] sm:$0xf] }
  0x56   : >> { %v1643_v3 = vmul.f32 %v4491_v0, %v1642_v44  ;;  %v1712_v5 = vmul.f32 %v4491_v0, %v1710_v51  ;;  %v1582_v48 = vor.u32 %v1581_v52, %v1578_v49  ;;  %v1590_v57 = vor.u32 %v1589_v54, %v1586_v53 }
  0x57   : >> { %v1851_v63 = vmul.f32 %v4491_v0, %v1850_v55  ;;  %v1777_v11 = vmul.f32 %v4491_v0, %v1774_v58  ;;  %v1778_v12 = vadd.f32 %v4496_v1, %v1775_v59  ;;  %v1779_v13 = vadd.f32 %v4496_v1, %v1776_v61  ;;  %v3869_v59 = vld [vmem:[%s4530_s15 + $0x38] sm:$0x1] }
  0x58   : >> { %4148 = vmatmul.mubr.msk.bf16.vlgmr.msra.gmra.mrb[24].mxu0 %vm309_vm2, %v1111_v18  ;;  %v1381_v14 = vsel %vm414_vm4, %v1379_v47, %v1380_v62  ;;  %v1644_v15 = vadd.f32 %v4496_v1, %v1643_v3  ;;  %v1912_v16 = vunpack.c.l.bf16 %v3851_v6  ;;  %v1986_v17 = vunpack.c.l.bf16 %v3854_v7  ;;  %v3846_v47 = vld [vmem:[%s5324_s1 + $0x58] sm:$0xf] }
  0x59   : >> { %4158 = vmatpush3.bf16.msra.mxu0 %v1244_v19  ;;  %4159 = vmatprep.mubr.msk.bf16.mxu0 %vm4439_vm1, %v4438_v4  ;;  %v1522_v18 = vsel %vm313_vm0, %v3831_v9, 0  ;;  %v1714_v20 = vadd.f32 %v4496_v1, %v1712_v5  ;;  %v1515_v22 = vrot.slane %v4794_v21, 2  ;;  %v1591_v23 = vsel %vm613_vm7, %v1582_v48, %v1590_v57  ;;  %v3855_v9 = vld [vmem:[%s5324_s1 + $0x64] sm:$0xf] }
  0x5a   : >> { %4169 = vmatprep.subr.bf16.mxu0 %v4438_v4  ;;  %4166 = vmatmul.mubr.msk.bf16.vlgmr.msra.gmra.mrb[28].mxu1 %vm309_vm2, %v1319_v26  ;;  %v1724_v24 = vsel %vm313_vm0, %v3841_v10, 0  ;;  %v1852_v25 = vadd.f32 %v4496_v1, %v1851_v63  ;;  %v1516_v26 = vrot.slane %v4766_v60, 2  ;;  %v1781_v28 = vmax.f32 %v1778_v12, 0.0  ;;  %v3872_v63 = vld [vmem:[%s4530_s15 + $0x30] sm:$0xe] }
  0x5b   : >> { %4176 = vmatpush3.bf16.msra.mxu1 %v1460_v27  ;;  %4177 = vmatprep.mubr.msk.bf16.mxu1 %vm4439_vm1, %v4438_v4  ;;  %v1780_v27 = vadd.f32 %v4496_v1, %v1777_v11  ;;  %v4866_v29 = vmax.f32 %v1779_v13, 0.0  ;;  %v1645_v21 = vmax.f32 %v1644_v15, 0.0  ;;  %v1913_v30 = vmul.f32 %v4491_v0, %v1912_v16 }
  0x5c   : >> { %4187 = vmatprep.subr.bf16.mxu1 %v4438_v4  ;;  %v1987_v31 = vmul.f32 %v4491_v0, %v1986_v17  ;;  %v1716_v32 = vmax.f32 %v1714_v20, 0.0  ;;  %v1853_v37 = vmax.f32 %v1852_v25, 0.0  ;;  %v1517_v38 = vsel %vm552_vm6, %v1515_v22, %v1516_v26 }
  0x5d   : >> { %v1783_v39 = vmax.f32 %v1780_v27, 0.0  ;;  %v1784_v2 = vpack.c.bf16 %v4866_v29, %v1781_v28  ;;  %v1914_v44 = vadd.f32 %v4496_v1, %v1913_v30  ;;  %v1658_v49 = vsel %vm313_vm0, %v3837_v36, 0 }
  0x5e   : >> { %v1988_v45 = vadd.f32 %v4496_v1, %v1987_v31  ;;  %v3955_v51 = vunpack.c.l.bf16 %v3971_v8  ;;  %v3956_v52 = vunpack.c.h.bf16 %v3971_v8  ;;  %v4893_v53 = vpack.c.bf16 %v4866_v29, %v1853_v37 }
  0x5f   : >> { %v2122_v54 = vunpack.c.l.bf16 %v3860_v41  ;;  %v1866_v55 = vsel %vm313_vm0, %v3849_v43, 0  ;;  %v1791_v58 = vshll.u32 %v1784_v2, 16  ;;  %v1915_v62 = vmax.f32 %v1914_v44, 0.0  ;;  %v3878_v44 = vld [vmem:[%s4530_s15 + $0x30] sm:$0xc] }
  0x60   : >> { %4160 = vmatmul.mubr.msk.bf16.vlgmr.msra.gmra.mrb[28].mxu0 %vm309_vm2, %v4742_v40  ;;  %v1711_v40 = vmul.f32 %v4491_v0, %v1709_v50  ;;  %v1989_v3 = vmax.f32 %v1988_v45, 0.0  ;;  %v2192_v5 = vmul.f32 %v3956_v52, %v4491_v0  ;;  %v1859_v6 = vrot.slane %v4893_v53, 1 }
  0x61   : >> { %4170 = vmatpush3.bf16.msra.mxu0 %v1386_v42  ;;  %4171 = vmatprep.mubr.msk.bf16.mxu0 %vm4439_vm1, %v4438_v4  ;;  %v1646_v42 = vpack.c.bf16 %v4734_v33, %v1645_v21  ;;  %v1652_v33 = vrot.slane %v4797_v35, 3  ;;  %v2191_v35 = vmul.f32 %v3955_v51, %v4491_v0  ;;  %v2123_v48 = vmul.f32 %v4491_v0, %v2122_v54  ;;  %v3861_v54 = vld [vmem:[%s5324_s1 + $0x6c] sm:$0xf] }
  0x62   : >> { %4181 = vmatprep.subr.bf16.mxu0 %v4438_v4  ;;  %4178 = vmatmul.mubr.msk.bf16.vlgmr.msra.gmra.mrb[32].mxu1 %vm309_vm2, %v1455_v46  ;;  %v1713_v19 = vadd.f32 %v4496_v1, %v1711_v40  ;;  %v2048_v46 = vunpack.c.l.bf16 %v3857_v34  ;;  %v2254_v57 = vunpack.c.l.bf16 %v3869_v59  ;;  %v1804_v10 = vsel %vm313_vm0, %v3846_v47, 0 }
  0x63   : >> { %4188 = vmatpush3.bf16.msra.mxu1 %v1596_v56  ;;  %4189 = vmatprep.mubr.msk.bf16.mxu1 %vm4439_vm1, %v4438_v4  ;;  %v1785_v56 = vpack.c.bf16 %v1783_v39, %v1783_v39  ;;  %v1651_v61 = vrot.slane %v1646_v42, 3  ;;  %v1789_v11 = vshrl.u32 %v1784_v2, 16  ;;  %v1793_v12 = vrot.slane %v1791_v58, 1 }
  0x64   : >> { %4199 = vmatprep.subr.bf16.mxu1 %v4438_v4  ;;  %v1715_v60 = vmax.f32 %v1713_v19, 0.0  ;;  %v2049_v40 = vmul.f32 %v4491_v0, %v2048_v46  ;;  %v1916_v16 = vpack.c.bf16 %v1915_v62, %v1915_v62  ;;  %v4922_v17 = vpack.c.bf16 %v4866_v29, %v1989_v3 }
  0x65   : >> { %v1860_v7 = vrot.slane %v1785_v56, 1  ;;  %v1796_v13 = vshll.u32 %v1785_v56, 16  ;;  %v1653_v15 = vsel %vm690_vm8, %v1651_v61, %v1652_v33  ;;  %v2002_v19 = vsel %vm313_vm0, %v3855_v9, 0 }
  0x66   : >> { %v1717_v50 = vpack.c.bf16 %v1716_v32, %v1715_v60  ;;  %v2193_v20 = vadd.f32 %v4496_v1, %v2191_v35  ;;  %v2194_v22 = vadd.f32 %v4496_v1, %v2192_v5  ;;  %v2124_v25 = vadd.f32 %v4496_v1, %v2123_v48  ;;  %v3852_v60 = vld [vmem:[%s5324_s1 + $0x60] sm:$0xf] }
  0x67   : >> { %v2257_v26 = vmul.f32 %v4491_v0, %v2254_v57  ;;  %v1794_v28 = vor.u32 %v1793_v12, %v1789_v11  ;;  %v1798_v21 = vrot.slane %v1796_v13, 1  ;;  %v1920_v30 = vshrl.u32 %v4893_v53, 16 }
  0x68   : >> { %4172 = vmatmul.mubr.msk.bf16.vlgmr.msra.gmra.mrb[32].mxu0 %vm309_vm2, %v1381_v14  ;;  %v3875_v14 = vld [vmem:[%s4530_s15 + $0x38] sm:$0x3]  ;;  %v1923_v31 = vshll.u32 %v4893_v53, 16  ;;  %v1928_v32 = vshrl.u32 %v1916_v16, 16  ;;  %v1931_v34 = vshll.u32 %v1916_v16, 16  ;;  %v1995_v36 = vrot.slane %v4922_v17, 2 }
  0x69   : >> { %4182 = vmatpush3.bf16.msra.mxu0 %v1522_v18  ;;  %4183 = vmatprep.mubr.msk.bf16.mxu0 %vm4439_vm1, %v4438_v4  ;;  %v2050_v18 = vadd.f32 %v4496_v1, %v2049_v40  ;;  %v2392_v27 = vunpack.c.l.bf16 %v3875_v14  ;;  %v1996_v8 = vrot.slane %v1916_v16, 2  ;;  %v4942_v39 = vmax.f32 %v2194_v22, 0.0 }
  0x6a   : >> { %4193 = vmatprep.subr.bf16.mxu0 %v4438_v4  ;;  %4190 = vmatmul.mubr.msk.bf16.vlgmr.msra.gmra.mrb[36].mxu1 %vm309_vm2, %v1591_v23  ;;  %v2330_v23 = vunpack.c.l.bf16 %v3872_v63  ;;  %v2125_v41 = vmax.f32 %v2124_v25, 0.0  ;;  %v2260_v42 = vadd.f32 %v4496_v1, %v2257_v26  ;;  %v1799_v45 = vsel %vm296_vm3, %v1794_v28, %v1798_v21 }
  0x6b   : >> { %4200 = vmatpush3.bf16.msra.mxu1 %v1724_v24  ;;  %4201 = vmatprep.mubr.msk.bf16.mxu1 %vm4439_vm1, %v4438_v4  ;;  %v1861_v24 = vsel %vm414_vm4, %v1859_v6, %v1860_v7  ;;  %v2051_v37 = vmax.f32 %v2050_v18, 0.0  ;;  %v2393_v43 = vmul.f32 %v4491_v0, %v2392_v27  ;;  %v1940_v46 = vsel %vm313_vm0, %v3852_v60, 0 }
  0x6c   : >> { %4211 = vmatprep.subr.bf16.mxu1 %v4438_v4  ;;  %v2331_v2 = vmul.f32 %v4491_v0, %v2330_v23  ;;  %v1925_v51 = vrot.slane %v1923_v31, 2  ;;  %v1930_v52 = vrot.slane %v1928_v32, 1  ;;  %v1933_v53 = vrot.slane %v1931_v34, 2  ;;  %v3870_v23 = vld [vmem:[%s5324_s1 + $0x74] sm:$0xf] }
  0x6d   : >> { %v2052_v33 = vpack.c.bf16 %v2051_v37, %v2051_v37  ;;  %v2466_v59 = vunpack.c.l.bf16 %v3878_v44  ;;  %v2126_v61 = vpack.c.bf16 %v4866_v29, %v2125_v41  ;;  %v2263_v47 = vmax.f32 %v2260_v42, 0.0  ;;  %v3858_v29 = vld [vmem:[%s5324_s1 + $0x68] sm:$0xf] }
  0x6e   : >> { %v2332_v58 = vadd.f32 %v4496_v1, %v2331_v2  ;;  %v2394_v62 = vadd.f32 %v4496_v1, %v2393_v43  ;;  %v2138_v40 = vsel %vm313_vm0, %v3861_v54, 0  ;;  %v2056_v35 = vshrl.u32 %v4922_v17, 16  ;;  %v3865_v2 = vld [vmem:[%s5324_s1 + $0x70] sm:$0xf] }
  0x6f   : >> { %v2059_v5 = vshll.u32 %v4922_v17, 16  ;;  %v1934_v7 = vor.u32 %v1933_v53, %v1930_v52  ;;  %v2064_v9 = vshrl.u32 %v2052_v33, 16  ;;  %v2067_v48 = vshll.u32 %v2052_v33, 16 }
  0x70   : >> { %4184 = vmatmul.mubr.msk.bf16.vlgmr.msra.gmra.mrb[36].mxu0 %vm309_vm2, %v1517_v38  ;;  %v2195_v38 = vmax.f32 %v2193_v20, 0.0  ;;  %v2132_v57 = vrot.slane %v2052_v33, 3  ;;  %v2467_v11 = vmul.f32 %v4491_v0, %v2466_v59  ;;  %v2131_v12 = vrot.slane %v2126_v61, 3  ;;  %v3884_v59 = vld [vmem:[%s4530_s15 + $0x30] sm:$0x8] }
  0x71   : >> { %4194 = vmatpush3.bf16.msra.mxu0 %v1658_v49  ;;  %4195 = vmatprep.mubr.msk.bf16.mxu0 %vm4439_vm1, %v4438_v4  ;;  %v1922_v49 = vrot.slane %v1920_v30, 1  ;;  %v4979_v13 = vpack.c.bf16 %v2263_v47, %v2263_v47  ;;  %v2395_v14 = vmax.f32 %v2394_v62, 0.0  ;;  %v2076_v16 = vsel %vm313_vm0, %v3858_v29, 0  ;;  %v3873_v61 = vld [vmem:[%s5324_s1 + $0x78] sm:$0xf] }
  0x72   : >> { %4205 = vmatprep.subr.bf16.mxu0 %v4438_v4  ;;  %4202 = vmatmul.mubr.msk.bf16.vlgmr.msra.gmra.mrb[40].mxu1 %vm309_vm2, %v1717_v50  ;;  %v3881_v50 = vld [vmem:[%s4530_s15 + $0x38] sm:$0x7]  ;;  %v4959_v56 = vpack.c.bf16 %v4942_v39, %v2195_v38  ;;  %v2058_v17 = vrot.slane %v2056_v35, 2  ;;  %v2066_v20 = vrot.slane %v2064_v9, 2  ;;  %v2069_v22 = vrot.slane %v2067_v48, 3 }
  0x73   : >> { %4212 = vmatpush3.bf16.msra.mxu1 %v1866_v55  ;;  %4213 = vmatprep.mubr.msk.bf16.mxu1 %vm4439_vm1, %v4438_v4  ;;  %v1997_v55 = vsel %vm552_vm6, %v1995_v36, %v1996_v8  ;;  %v2528_v3 = vunpack.c.l.bf16 %v3881_v50  ;;  %v1926_v6 = vor.u32 %v1925_v51, %v1922_v49  ;;  %v2468_v27 = vadd.f32 %v4496_v1, %v2467_v11  ;;  %v3896_v29 = vld [vmem:[%s4530_s15 + $0x3c] sm:$0xe] }
  0x74   : >> { %4223 = vmatprep.subr.bf16.mxu1 %v4438_v4  ;;  %v2271_v63 = vshll.u32 %v4959_v56, 16  ;;  %v2133_v28 = vsel %vm690_vm8, %v2131_v12, %v2132_v57  ;;  %v2276_v21 = vshll.u32 %v4979_v13, 16  ;;  %v4995_v30 = vpack.c.bf16 %v2395_v14, %v2395_v14  ;;  %v3882_v57 = vld [vmem:[%s5324_s1 + $0x84] sm:$0xf] }
  0x75   : >> { %v1935_v18 = vsel %vm475_vm5, %v1926_v6, %v1934_v7  ;;  %v2284_v60 = vsel %vm313_vm0, %v3870_v23, 0  ;;  %v2070_v34 = vor.u32 %v2069_v22, %v2066_v20  ;;  %v2469_v38 = vmax.f32 %v2468_v27, 0.0  ;;  %v3887_v7 = vld [vmem:[%s4530_s15 + $0x3c] sm:$0xff]  }
  0x76   : >> { %v2273_v25 = vrot.slane %v2271_v63, 1  ;;  %v2278_v41 = vrot.slane %v2276_v21, 1  ;;  %v2408_v42 = vshrl.u32 %v4995_v30, 16  ;;  %v2411_v43 = vshll.u32 %v4995_v30, 16  ;;  %v3893_v63 = vld [vmem:[%s4530_s15 + $0x44] sm:$0x1] }
  0x77   : >> { %v2204_v49 = vsel %vm313_vm0, %v3865_v2, 0  ;;  %v5020_v52 = vpack.c.bf16 %v4942_v39, %v2469_v38  ;;  %v2602_v9 = vunpack.c.l.bf16 %v3884_v59  ;;  %v2346_v48 = vsel %vm313_vm0, %v3873_v61, 0  ;;  %v3889_v2 = vld [vmem:[%s5324_s1 + $0x8c] sm:$0xf] }
  0x78   : >> { %4196 = vmatmul.mubr.msk.bf16.vlgmr.msra.gmra.mrb[40].mxu0 %vm309_vm2, %v1653_v15  ;;  %v2529_v15 = vmul.f32 %v4491_v0, %v2528_v3  ;;  %v2410_v54 = vrot.slane %v2408_v42, 1  ;;  %v2413_v33 = vrot.slane %v2411_v43, 2  ;;  %v3891_v3 = vld [vmem:[%s4530_s15 + $0x3c] sm:$0xff]   ;;  %v2669_v14 = vunpack.c.l.bf16 %v3887_v7 }
  0x79   : >> { %4206 = vmatpush3.bf16.msra.mxu0 %v1804_v10  ;;  %4207 = vmatprep.mubr.msk.bf16.mxu0 %vm4439_vm1, %v4438_v4  ;;  %v2333_v10 = vmax.f32 %v2332_v58, 0.0  ;;  %v2536_v62 = vshrl.u32 %v5020_v52, 16  ;;  %v2539_v35 = vshll.u32 %v5020_v52, 16  ;;  %v2733_v11 = vunpack.c.h.bf16 %v3891_v3 }
  0x7a   : >> { %4217 = vmatprep.subr.bf16.mxu0 %v4438_v4  ;;  %4214 = vmatmul.mubr.msk.bf16.vlgmr.msra.gmra.mrb[44].mxu1 %vm309_vm2, %v1861_v24  ;;  %v2269_v24 = vshrl.u32 %v4959_v56, 16  ;;  %v2530_v31 = vadd.f32 %v4496_v1, %v2529_v15  ;;  %v2670_v15 = vunpack.c.h.bf16 %v3887_v7  ;;  %v2556_v22 = vsel %vm313_vm0, %v3882_v57, 0  ;;  %v3897_v57 = vld [vmem:[%s5324_s1 + $0x94] sm:$0xf] }
  0x7b   : >> { %4224 = vmatpush3.bf16.msra.mxu1 %v2002_v19  ;;  %4225 = vmatprep.mubr.msk.bf16.mxu1 %vm4439_vm1, %v4438_v4  ;;  %v2061_v19 = vrot.slane %v2059_v5, 3  ;;  %v4990_v26 = vpack.c.bf16 %v4942_v39, %v2333_v10  ;;  %v2732_v10 = vunpack.c.l.bf16 %v3891_v3  ;;  %v2538_v12 = vrot.slane %v2536_v62, 2 }
  0x7c   : >> { %4235 = vmatprep.subr.bf16.mxu1 %v4438_v4  ;;  %v2274_v36 = vor.u32 %v2273_v25, %v2269_v24  ;;  %v2531_v44 = vmax.f32 %v2530_v31, 0.0  ;;  %v2603_v23 = vmul.f32 %v4491_v0, %v2602_v9  ;;  %v2734_v24 = vunpack.c.l.bf16 %v3893_v63  ;;  %v3973_v9 = vld [vmem:[%s4530_s15 + $0x48] sm:$0xff]  }
  0x7d   : >> { %v2062_v32 = vor.u32 %v2061_v19, %v2058_v17  ;;  %v2400_v37 = vshrl.u32 %v4990_v26, 16  ;;  %v2403_v8 = vshll.u32 %v4990_v26, 16  ;;  %v2339_v25 = vrot.slane %v4990_v26, 1 }
  0x7e   : >> { %v2279_v53 = vsel %vm296_vm3, %v2274_v36, %v2278_v41  ;;  %v2340_v27 = vrot.slane %v4979_v13, 1  ;;  %v2736_v21 = vmul.f32 %v4491_v0, %v2733_v11  ;;  %v2672_v31 = vmul.f32 %v4491_v0, %v2670_v15  ;;  %v3879_v13 = vld [vmem:[%s5324_s1 + $0x80] sm:$0xf] }
  0x7f   : >> { %v2402_v50 = vrot.slane %v2400_v37, 1  ;;  %v2405_v51 = vrot.slane %v2403_v8, 2  ;;  %v2604_v36 = vadd.f32 %v4496_v1, %v2603_v23  ;;  %v2737_v37 = vmul.f32 %v4491_v0, %v2734_v24  ;;  %v3902_v8 = vld [vmem:[%s4530_s15 + $0x3c] sm:$0xc] }
  0x80   : >> { %4208 = vmatmul.mubr.msk.bf16.vlgmr.msra.gmra.mrb[44].mxu0 %vm309_vm2, %v1799_v45  ;;  %v2071_v45 = vsel %vm613_vm7, %v2062_v32, %v2070_v34  ;;  %v3899_v32 = vld [vmem:[%s4530_s15 + $0x44] sm:$0x3]  ;;  %v2341_v38 = vsel %vm414_vm4, %v2339_v25, %v2340_v27  ;;  %v2739_v42 = vadd.f32 %v4496_v1, %v2736_v21  ;;  %v2476_v59 = vrot.slane %v4995_v30, 2  ;;  %v3894_v25 = vld [vmem:[%s5324_s1 + $0x90] sm:$0xf] }
  0x81   : >> { %4218 = vmatpush3.bf16.msra.mxu0 %v1940_v46  ;;  %4219 = vmatprep.mubr.msk.bf16.mxu0 %vm4439_vm1, %v4438_v4  ;;  %v3876_v46 = vld [vmem:[%s5324_s1 + $0x7c] sm:$0xf]  ;;  %v2406_v47 = vor.u32 %v2405_v51, %v2402_v50  ;;  %v2872_v43 = vunpack.c.l.bf16 %v3899_v32  ;;  %v2946_v51 = vunpack.c.l.bf16 %v3902_v8  ;;  %v2826_v23 = vsel %vm313_vm0, %v3897_v57, 0 }
  0x82   : >> { %4229 = vmatprep.subr.bf16.mxu0 %v4438_v4  ;;  %4226 = vmatmul.mubr.msk.bf16.vlgmr.msra.gmra.mrb[48].mxu1 %vm309_vm2, %v1997_v55  ;;  %v5023_v55 = vpack.c.bf16 %v2531_v44, %v2531_v44  ;;  %v2420_v58 = vsel %vm313_vm0, %v3876_v46, 0  ;;  %v2482_v44 = vsel %vm313_vm0, %v3879_v13, 0  ;;  %v2674_v46 = vadd.f32 %v4496_v1, %v2672_v31 }
  0x83   : >> { %4236 = vmatpush3.bf16.msra.mxu1 %v2138_v40  ;;  %4237 = vmatprep.mubr.msk.bf16.mxu1 %vm4439_vm1, %v4438_v4  ;;  %v2414_v40 = vor.u32 %v2413_v33, %v2410_v54  ;;  %v2684_v54 = vsel %vm313_vm0, %v3889_v2, 0  ;;  %v2605_v33 = vmax.f32 %v2604_v36, 0.0  ;;  %v2873_v62 = vmul.f32 %v4491_v0, %v2872_v43 }
  0x84   : >> { %4247 = vmatprep.subr.bf16.mxu1 %v4438_v4  ;;  %v2544_v5 = vshrl.u32 %v5023_v55, 16  ;;  %v2547_v6 = vshll.u32 %v5023_v55, 16  ;;  %v2676_v3 = vmax.f32 %v2674_v46, 0.0  ;;  %v2947_v30 = vmul.f32 %v4491_v0, %v2946_v51 }
  0x85   : >> { %v2415_v17 = vsel %vm475_vm5, %v2406_v47, %v2414_v40  ;;  %v5094_v47 = vmax.f32 %v2739_v42, 0.0  ;;  %v2606_v7 = vpack.c.bf16 %v4942_v39, %v2605_v33  ;;  %v3903_v42 = vld [vmem:[%s5324_s1 + $0x9c] sm:$0xf]  ;;  %vm3636_vm9 = vcmask 23552  }
  0x86   : >> { %v2546_v19 = vrot.slane %v2544_v5, 2  ;;  %v2549_v20 = vrot.slane %v2547_v6, 3  ;;  %v3885_v5 = vld [vmem:[%s5324_s1 + $0x88] sm:$0xf]  ;;  %v3908_v6 = vld [vmem:[%s4530_s15 + $0x3c] sm:$0x8] }
  0x87   : >> { %v3082_v15 = vunpack.c.l.bf16 %v3908_v6 }
  0x88   : >> { %4220 = vmatmul.mubr.msk.bf16.vlgmr.msra.gmra.mrb[48].mxu0 %vm309_vm2, %v1935_v18  ;;  %v2541_v18 = vrot.slane %v2539_v35, 3  ;;  %v2550_v34 = vor.u32 %v2549_v20, %v2546_v19  ;;  %v3905_v35 = vld [vmem:[%s4530_s15 + $0x44] sm:$0x7]  ;;  %v3917_v19 = vld [vmem:[%s4530_s15 + $0x50] sm:$0x1]  ;;  %v2611_v20 = vrot.slane %v2606_v7, 3 }
  0x89   : >> { %4230 = vmatpush3.bf16.msra.mxu0 %v2076_v16  ;;  %4231 = vmatprep.mubr.msk.bf16.mxu0 %vm4439_vm1, %v4438_v4  ;;  %v2810_v16 = vunpack.c.l.bf16 %v3896_v29  ;;  %v3008_v11 = vunpack.c.l.bf16 %v3905_v35  ;;  %v3083_v31 = vmul.f32 %v4491_v0, %v3082_v15 }
  0x8a   : >> { %4241 = vmatprep.subr.bf16.mxu0 %v4438_v4  ;;  %4238 = vmatmul.mubr.msk.bf16.vlgmr.msra.gmra.mrb[52].mxu1 %vm309_vm2, %v2133_v28  ;;  %v2735_v28 = vmul.f32 %v4491_v0, %v2732_v10  ;;  %v2542_v26 = vor.u32 %v2541_v18, %v2538_v12  ;;  %v2874_v10 = vadd.f32 %v4496_v1, %v2873_v62  ;;  %v2618_v12 = vsel %vm313_vm0, %v3885_v5, 0 }
  0x8b   : >> { %4248 = vmatpush3.bf16.msra.mxu1 %v2284_v60  ;;  %4249 = vmatprep.mubr.msk.bf16.mxu1 %vm4439_vm1, %v4438_v4  ;;  %v2811_v60 = vmul.f32 %v4491_v0, %v2810_v16  ;;  %v2948_v16 = vadd.f32 %v4496_v1, %v2947_v30  ;;  %v3964_v18 = vunpack.c.h.bf16 %v3973_v9  ;;  %v3009_v21 = vmul.f32 %v4491_v0, %v3008_v11 }
  0x8c   : >> { %4259 = vmatprep.subr.bf16.mxu1 %v4438_v4  ;;  %v2738_v41 = vadd.f32 %v4496_v1, %v2735_v28  ;;  %v2551_v50 = vsel %vm613_vm7, %v2542_v26, %v2550_v34  ;;  %v2875_v28 = vmax.f32 %v2874_v10, 0.0  ;;  %v3920_v34 = vld [vmem:[%s4530_s15 + $0x48] sm:$0xe]  ;;  %v3084_v46 = vadd.f32 %v4496_v1, %v3083_v31 }
  0x8d   : >> { %v2949_v32 = vmax.f32 %v2948_v16, 0.0  ;;  %v3152_v26 = vmul.f32 %v3964_v18, %v4491_v0  ;;  %v3926_v10 = vld [vmem:[%s4530_s15 + $0x48] sm:$0xc]  ;;  %v3909_v18 = vld [vmem:[%s5324_s1 + $0xa4] sm:$0xf] }
  0x8e   : >> { %v2741_v61 = vmax.f32 %v2738_v41, 0.0  ;;  %v2876_v43 = vpack.c.bf16 %v2875_v28, %v2875_v28  ;;  %v3085_v6 = vmax.f32 %v3084_v46, 0.0 }
  0x8f   : >> { %v5152_v51 = vpack.c.bf16 %v5094_v47, %v2949_v32  ;;  %v3906_v32 = vld [vmem:[%s5324_s1 + $0xa0] sm:$0xf] }
  0x90   : >> { %4232 = vmatmul.mubr.msk.bf16.vlgmr.msra.gmra.mrb[52].mxu0 %vm309_vm2, %v2071_v45  ;;  %v2744_v63 = vpack.c.bf16 %v5094_v47, %v2741_v61  ;;  %v2891_v35 = vshll.u32 %v2876_v43, 16  ;;  %v2956_v30 = vrot.slane %v2876_v43, 2 }
  0x91   : >> { %4242 = vmatpush3.bf16.msra.mxu0 %v2204_v49  ;;  %4243 = vmatprep.mubr.msk.bf16.mxu0 %vm4439_vm1, %v4438_v4  ;;  %v2812_v49 = vadd.f32 %v4496_v1, %v2811_v60  ;;  %v3214_v60 = vunpack.c.l.bf16 %v3917_v19  ;;  %v3016_v31 = vshrl.u32 %v5152_v51, 16 }
  0x92   : >> { %4253 = vmatprep.subr.bf16.mxu0 %v4438_v4  ;;  %4250 = vmatmul.mubr.msk.bf16.vlgmr.msra.gmra.mrb[56].mxu1 %vm309_vm2, %v2279_v53  ;;  %v2475_v53 = vrot.slane %v5020_v52, 2  ;;  %v2751_v27 = vshll.u32 %v2744_v63, 16  ;;  %v2749_v2 = vshrl.u32 %v2744_v63, 16 }
  0x93   : >> { %4260 = vmatpush3.bf16.msra.mxu1 %v2420_v58  ;;  %4261 = vmatprep.mubr.msk.bf16.mxu1 %vm4439_vm1, %v4438_v4  ;;  %v2740_v58 = vadd.f32 %v4496_v1, %v2737_v37  ;;  %v2813_v40 = vmax.f32 %v2812_v49, 0.0  ;;  %v2764_v37 = vsel %vm313_vm0, %v3894_v25, 0  ;;  %v3217_v49 = vmul.f32 %v4491_v0, %v3214_v60 }
  0x94   : >> { %4271 = vmatprep.subr.bf16.mxu1 %v4438_v4  ;;  %v2753_v41 = vrot.slane %v2751_v27, 1 }
  0x95   : >> { %v2743_v29 = vmax.f32 %v2740_v58, 0.0  ;;  %v5118_v39 = vpack.c.bf16 %v5094_v47, %v2813_v40  ;;  %v2888_v40 = vshrl.u32 %v2876_v43, 16  ;;  %v3220_v7 = vadd.f32 %v4496_v1, %v3217_v49 }
  0x96   : >> { %v3036_v43 = vsel %vm313_vm0, %v3906_v32, 0 }
  0x97   : >> { %v2745_v24 = vpack.c.bf16 %v2743_v29, %v2743_v29  ;;  %v2880_v61 = vshrl.u32 %v5118_v39, 16  ;;  %v2883_v62 = vshll.u32 %v5118_v39, 16  ;;  %v2890_v16 = vrot.slane %v2888_v40, 1 }
  0x98   : >> { %4244 = vmatmul.mubr.msk.bf16.vlgmr.msra.gmra.mrb[56].mxu0 %vm309_vm2, %v4959_v56  ;;  %v2671_v56 = vmul.f32 %v4491_v0, %v2669_v14 }
  0x99   : >> { %4254 = vmatpush3.bf16.msra.mxu0 %v2346_v48  ;;  %4255 = vmatprep.mubr.msk.bf16.mxu0 %vm4439_vm1, %v4438_v4  ;;  %v2477_v48 = vsel %vm552_vm6, %v2475_v53, %v2476_v59  ;;  %v2756_v8 = vshll.u32 %v2745_v24, 16  ;;  %v2962_v59 = vsel %vm313_vm0, %v3903_v42, 0 }
  0x9a   : >> { %4265 = vmatprep.subr.bf16.mxu0 %v4438_v4  ;;  %4262 = vmatmul.mubr.msk.bf16.vlgmr.msra.gmra.mrb[60].mxu1 %vm309_vm2, %v2415_v17  ;;  %v2673_v45 = vadd.f32 %v4496_v1, %v2671_v56  ;;  %v3963_v17 = vunpack.c.l.bf16 %v3973_v9  ;;  %v2820_v56 = vrot.slane %v2745_v24, 1  ;;  %v2955_v9 = vrot.slane %v5152_v51, 2 }
  0x9b   : >> { %4272 = vmatpush3.bf16.msra.mxu1 %v2556_v22  ;;  %4273 = vmatprep.mubr.msk.bf16.mxu1 %vm4439_vm1, %v4438_v4  ;;  %v2612_v22 = vrot.slane %v5023_v55, 3  ;;  %v2819_v55 = vrot.slane %v5118_v39, 1  ;;  %v2758_v58 = vrot.slane %v2756_v8, 1  ;;  %v3929_v39 = vld [vmem:[%s4530_s15 + $0x50] sm:$0x7]  ;;  %v3426_v24 = vunpack.c.l.bf16 %v3926_v10 }
  0x9c   : >> { %4283 = vmatprep.subr.bf16.mxu1 %v4438_v4  ;;  %v2675_v52 = vmax.f32 %v2673_v45, 0.0  ;;  %v3151_v13 = vmul.f32 %v3963_v17, %v4491_v0  ;;  %v2893_v17 = vrot.slane %v2891_v35, 2  ;;  %v2957_v25 = vsel %vm552_vm6, %v2955_v9, %v2956_v30 }
  0x9d   : >> { %v2613_v36 = vsel %vm690_vm8, %v2611_v20, %v2612_v22  ;;  %v2821_v45 = vsel %vm414_vm4, %v2819_v55, %v2820_v56  ;;  %v3086_v20 = vpack.c.bf16 %v5094_v47, %v3085_v6  ;;  %v3223_v22 = vmax.f32 %v3220_v7, 0.0 }
  0x9e   : >> { %v2677_v14 = vpack.c.bf16 %v2676_v3, %v2675_v52  ;;  %v3153_v53 = vadd.f32 %v4496_v1, %v3151_v13  ;;  %v2754_v52 = vor.u32 %v2753_v41, %v2749_v2  ;;  %v3900_v3 = vld [vmem:[%s5324_s1 + $0x98] sm:$0xf]  ;;  %v3098_v56 = vsel %vm313_vm0, %v3909_v18, 0 }
  0x9f   : >> { %v2900_v11 = vsel %vm313_vm0, %v3900_v3, 0  ;;  %v3019_v47 = vshll.u32 %v5152_v51, 16  ;;  %v2894_v60 = vor.u32 %v2893_v17, %v2890_v16  ;;  %v3918_v51 = vld [vmem:[%s5324_s1 + $0xac] sm:$0xf] }
  0xa0   : >> { %4256 = vmatmul.mubr.msk.bf16.vlgmr.msra.gmra.mrb[60].mxu0 %vm309_vm2, %v2341_v38  ;;  %v3923_v38 = vld [vmem:[%s4530_s15 + $0x50] sm:$0x3]  ;;  %v2759_v15 = vsel %vm296_vm3, %v2754_v52, %v2758_v58  ;;  %v3244_v3 = vsel %vm313_vm0, %v3918_v51, 0 }
  0xa1   : >> { %4266 = vmatpush3.bf16.msra.mxu0 %v2482_v44  ;;  %4267 = vmatprep.mubr.msk.bf16.mxu0 %vm4439_vm1, %v4438_v4  ;;  %v3010_v44 = vadd.f32 %v4496_v1, %v3009_v21  ;;  %v3352_v33 = vunpack.c.l.bf16 %v3923_v38  ;;  %v3488_v21 = vunpack.c.l.bf16 %v3929_v39  ;;  %v3427_v38 = vmul.f32 %v4491_v0, %v3426_v24 }
  0xa2   : >> { %4277 = vmatprep.subr.bf16.mxu0 %v4438_v4  ;;  %4274 = vmatmul.mubr.msk.bf16.vlgmr.msra.gmra.mrb[64].mxu1 %vm309_vm2, %v2551_v50  ;;  %v3290_v50 = vunpack.c.l.bf16 %v3920_v34  ;;  %v3021_v46 = vrot.slane %v3019_v47, 3  ;;  %v3930_v47 = vld [vmem:[%s5324_s1 + $0xbc] sm:$0xf] }
  0xa3   : >> { %4284 = vmatpush3.bf16.msra.mxu1 %v2684_v54  ;;  %4285 = vmatprep.mubr.msk.bf16.mxu1 %vm4439_vm1, %v4438_v4  ;;  %v3154_v54 = vadd.f32 %v4496_v1, %v3152_v26  ;;  %v3011_v5 = vmax.f32 %v3010_v44, 0.0  ;;  %v3353_v63 = vmul.f32 %v4491_v0, %v3352_v33  ;;  %v3489_v42 = vmul.f32 %v4491_v0, %v3488_v21 }
  0xa4   : >> { %4295 = vmatprep.subr.bf16.mxu1 %v4438_v4  ;;  %v3291_v29 = vmul.f32 %v4491_v0, %v3290_v50  ;;  %v3018_v44 = vrot.slane %v3016_v31, 2  ;;  %v3428_v58 = vadd.f32 %v4496_v1, %v3427_v38  ;;  %v3516_v38 = vsel %vm313_vm0, %v3930_v47, 0 }
  0xa5   : >> { %v5172_v57 = vmax.f32 %v3154_v54, 0.0  ;;  %v3012_v19 = vpack.c.bf16 %v3011_v5, %v3011_v5  ;;  %v3354_v28 = vadd.f32 %v4496_v1, %v3353_v63  ;;  %v3490_v52 = vadd.f32 %v4496_v1, %v3489_v42 }
  0xa6   : >> { %v3022_v40 = vor.u32 %v3021_v46, %v3018_v44  ;;  %v3429_v7 = vmax.f32 %v3428_v58, 0.0 }
  0xa7   : >> { %v3024_v13 = vshrl.u32 %v3012_v19, 16  ;;  %v3027_v26 = vshll.u32 %v3012_v19, 16  ;;  %v3092_v34 = vrot.slane %v3012_v19, 3  ;;  %v3355_v41 = vmax.f32 %v3354_v28, 0.0  ;;  %v3921_v28 = vld [vmem:[%s5324_s1 + $0xb0] sm:$0xf] }
  0xa8   : >> { %4268 = vmatmul.mubr.msk.bf16.vlgmr.msra.gmra.mrb[64].mxu0 %vm309_vm2, %v2477_v48  ;;  %v3155_v48 = vmax.f32 %v3153_v53, 0.0  ;;  %v3491_v10 = vmax.f32 %v3490_v52, 0.0  ;;  %v3430_v16 = vpack.c.bf16 %v5172_v57, %v3429_v7  ;;  %v3306_v32 = vsel %vm313_vm0, %v3921_v28, 0 }
  0xa9   : >> { %4278 = vmatpush3.bf16.msra.mxu0 %v2618_v12  ;;  %4279 = vmatprep.mubr.msk.bf16.mxu0 %vm4439_vm1, %v4438_v4  ;;  %v2882_v12 = vrot.slane %v2880_v61, 1  ;;  %v3026_v49 = vrot.slane %v3024_v13, 2  ;;  %v3029_v50 = vrot.slane %v3027_v26, 3 }
  0xaa   : >> { %4289 = vmatprep.subr.bf16.mxu0 %v4438_v4  ;;  %4286 = vmatmul.mubr.msk.bf16.vlgmr.msra.gmra.mrb[68].mxu1 %vm309_vm2, %v2677_v14  ;;  %v2885_v14 = vrot.slane %v2883_v62, 2  ;;  %v5187_v27 = vpack.c.bf16 %v5172_v57, %v3155_v48  ;;  %v5221_v62 = vpack.c.bf16 %v3355_v41, %v3355_v41  ;;  %v3496_v24 = vshrl.u32 %v3430_v16, 16 }
  0xab   : >> { %4296 = vmatpush3.bf16.msra.mxu1 %v2826_v23  ;;  %4297 = vmatprep.mubr.msk.bf16.mxu1 %vm4439_vm1, %v4438_v4  ;;  %v3292_v23 = vadd.f32 %v4496_v1, %v3291_v29  ;;  %v3030_v35 = vor.u32 %v3029_v50, %v3026_v49  ;;  %v3913_v29 = vld [vmem:[%s5324_s1 + $0xa8] sm:$0xf]  ;;  %v3435_v50 = vrot.slane %v3430_v16, 2 }
  0xac   : >> { %4307 = vmatprep.subr.bf16.mxu1 %v4438_v4  ;;  %v2886_v55 = vor.u32 %v2885_v14, %v2882_v12  ;;  %v3231_v2 = vshll.u32 %v5187_v27, 16  ;;  %v3368_v48 = vshrl.u32 %v5221_v62, 16  ;;  %v3371_v63 = vshll.u32 %v5221_v62, 16  ;;  %v3924_v12 = vld [vmem:[%s5324_s1 + $0xb4] sm:$0xf] }
  0xad   : >> { %v3293_v8 = vmax.f32 %v3292_v23, 0.0  ;;  %v3164_v14 = vsel %vm313_vm0, %v3913_v29, 0  ;;  %v3498_v13 = vrot.slane %v3496_v24, 2  ;;  %v3436_v51 = vrot.slane %v5221_v62, 2 }
  0xae   : >> { %v3233_v61 = vrot.slane %v3231_v2, 1  ;;  %v3370_v18 = vrot.slane %v3368_v48, 1  ;;  %v3373_v19 = vrot.slane %v3371_v63, 2 }
  0xaf   : >> { %v5217_v33 = vpack.c.bf16 %v5172_v57, %v3293_v8 }
  0xb0   : >> { %4280 = vmatmul.mubr.msk.bf16.vlgmr.msra.gmra.mrb[68].mxu0 %vm309_vm2, %v2613_v36  ;;  %v3091_v36 = vrot.slane %v3086_v20, 3  ;;  %v5247_v20 = vpack.c.bf16 %v3491_v10, %v3491_v10  ;;  %v3374_v21 = vor.u32 %v3373_v19, %v3370_v18 }
  0xb1   : >> { %4290 = vmatpush3.bf16.msra.mxu0 %v2764_v37  ;;  %4291 = vmatprep.mubr.msk.bf16.mxu0 %vm4439_vm1, %v4438_v4  ;;  %v5201_v37 = vpack.c.bf16 %v3223_v22, %v3223_v22  ;;  %v3360_v30 = vshrl.u32 %v5217_v33, 16  ;;  %v3363_v6 = vshll.u32 %v5217_v33, 16  ;;  %v3380_v22 = vsel %vm313_vm0, %v3924_v12, 0 }
  0xb2   : >> { %4301 = vmatprep.subr.bf16.mxu0 %v4438_v4  ;;  %4298 = vmatmul.mubr.msk.bf16.vlgmr.msra.gmra.mrb[72].mxu1 %vm309_vm2, %v2821_v45  ;;  %v2895_v45 = vsel %vm475_vm5, %v2886_v55, %v2894_v60  ;;  %v3093_v53 = vsel %vm690_vm8, %v3091_v36, %v3092_v34  ;;  %v3499_v55 = vshll.u32 %v3430_v16, 16  ;;  %v3507_v31 = vshll.u32 %v5247_v20, 16 }
  0xb3   : >> { %4308 = vmatpush3.bf16.msra.mxu1 %v2962_v59  ;;  %4309 = vmatprep.mubr.msk.bf16.mxu1 %vm4439_vm1, %v4438_v4  ;;  %v3236_v54 = vshll.u32 %v5201_v37, 16  ;;  %v3229_v59 = vshrl.u32 %v5187_v27, 16  ;;  %v3362_v39 = vrot.slane %v3360_v30, 1  ;;  %v3299_v2 = vrot.slane %v5217_v33, 1 }
  0xb4   : >> { %4319 = vmatprep.subr.bf16.mxu1 %v4438_v4  ;;  %v3501_v34 = vrot.slane %v3499_v55, 3  ;;  %v3509_v8 = vrot.slane %v3507_v31, 3  ;;  %v3300_v41 = vrot.slane %v5201_v37, 1  ;;  %v3437_v33 = vsel %vm552_vm6, %v3435_v50, %v3436_v51 }
  0xb5   : >> { %v3238_v5 = vrot.slane %v3236_v54, 1  ;;  %v3234_v9 = vor.u32 %v3233_v61, %v3229_v59  ;;  %v3933_v54 = vld [vmem:[%s5324_s1 + $0xc0] sm:$0xf]  ;;  %v3572_v62 = vrot.slane %v5247_v20, 3 }
  0xb6   : >> { %v3578_v59 = vsel %vm313_vm0, %v3933_v54, 0 }
  0xb7   : >> { %v3239_v17 = vsel %vm296_vm3, %v3234_v9, %v3238_v5 }
  0xb8   : >> { %4292 = vmatmul.mubr.msk.bf16.vlgmr.msra.gmra.mrb[72].mxu0 %vm309_vm2, %v2759_v15  ;;  %v3365_v15 = vrot.slane %v3363_v6, 2 }
  0xb9   : >> { %4302 = vmatpush3.bf16.msra.mxu0 %v2900_v11  ;;  %4303 = vmatprep.mubr.msk.bf16.mxu0 %vm4439_vm1, %v4438_v4  ;;  %v3031_v11 = vsel %vm613_vm7, %v3022_v40, %v3030_v35 }
  0xba   : >> { %4313 = vmatprep.subr.bf16.mxu0 %v4438_v4  ;;  %4310 = vmatmul.mubr.msk.bf16.vlgmr.msra.gmra.mrb[76].mxu1 %vm309_vm2, %v2957_v25  ;;  %v3366_v23 = vor.u32 %v3365_v15, %v3362_v39  ;;  %v3932_v25 = vld [vmem:[%s4530_s15 + $0x48] sm:$0x8] }
  0xbb   : >> { %4320 = vmatpush3.bf16.msra.mxu1 %v3098_v56  ;;  %4321 = vmatprep.mubr.msk.bf16.mxu1 %vm4439_vm1, %v4438_v4  ;;  %v3504_v56 = vshrl.u32 %v5247_v20, 16  ;;  %v3562_v60 = vunpack.c.l.bf16 %v3932_v25 }
  0xbc   : >> { %4331 = vmatprep.subr.bf16.mxu1 %v4438_v4  ;;  %v3375_v26 = vsel %vm475_vm5, %v3366_v23, %v3374_v21 }
  0xbd   : >> { %v3506_v36 = vrot.slane %v3504_v56, 2  ;;  %v3563_v42 = vmul.f32 %v4491_v0, %v3562_v60 }
  0xbf   : >> { %v3510_v44 = vor.u32 %v3509_v8, %v3506_v36  ;;  %v3564_v37 = vadd.f32 %v4496_v1, %v3563_v42 }
  0xc0   : >> { %4304 = vmatmul.mubr.msk.bf16.vlgmr.msra.gmra.mrb[76].mxu0 %vm309_vm2, %v2895_v45  ;;  %v3301_v45 = vsel %vm414_vm4, %v3299_v2, %v3300_v41 }
  0xc1   : >> { %4314 = vmatpush3.bf16.msra.mxu0 %v3036_v43  ;;  %4315 = vmatprep.mubr.msk.bf16.mxu0 %vm4439_vm1, %v4438_v4  ;;  %v3502_v43 = vor.u32 %v3501_v34, %v3498_v13 }
  0xc2   : >> { %4325 = vmatprep.subr.bf16.mxu0 %v4438_v4  ;;  %4322 = vmatmul.mubr.msk.bf16.vlgmr.msra.gmra.mrb[80].mxu1 %vm309_vm2, %v3093_v53  ;;  %v3565_v53 = vmax.f32 %v3564_v37, 0.0 }
  0xc3   : >> { %4332 = vmatpush3.bf16.msra.mxu1 %v3244_v3  ;;  %4333 = vmatprep.mubr.msk.bf16.mxu1 %vm4439_vm1, %v4438_v4  ;;  %v3511_v49 = vsel %vm613_vm7, %v3502_v43, %v3510_v44 }
  0xc4   : >> { %4343 = vmatprep.subr.bf16.mxu1 %v4438_v4  ;;  %v3566_v58 = vpack.c.bf16 %v5172_v57, %v3565_v53 }
  0xc6   : >> { %v3571_v61 = vrot.slane %v3566_v58, 3 }
  0xc8   : >> { %4316 = vmatmul.mubr.msk.bf16.vlgmr.msra.gmra.mrb[80].mxu0 %vm309_vm2, %v3031_v11  ;;  %v3573_v52 = vsel %vm690_vm8, %v3571_v61, %v3572_v62 }
  0xc9   : >> { %4326 = vmatpush3.bf16.msra.mxu0 %v3164_v14  ;;  %4327 = vmatprep.mubr.msk.bf16.mxu0 %vm4439_vm1, %v4438_v4 }
  0xca   : >> { %4337 = vmatprep.subr.bf16.mxu0 %v4438_v4  ;;  %4334 = vmatmul.mubr.msk.bf16.vlgmr.msra.gmra.mrb[84].mxu1 %vm309_vm2, %v3239_v17 }
  0xcb   : >> { %4344 = vmatpush3.bf16.msra.mxu1 %v3380_v22  ;;  %4345 = vmatprep.mubr.msk.bf16.mxu1 %vm4439_vm1, %v4438_v4 }
  0xcc   : >> { %4355 = vmatprep.subr.bf16.mxu1 %v4438_v4 }
  0xd0   : >> { %4328 = vmatmul.mubr.msk.bf16.vlgmr.msra.gmra.mrb[84].mxu0 %vm309_vm2, %v5187_v27  ;;  %v3927_v27 = vld [vmem:[%s5324_s1 + $0xb8] sm:$0xf] }
  0xd1   : >> { %4338 = vmatpush3.bf16.msra.mxu0 %v3306_v32  ;;  %4339 = vmatprep.mubr.msk.bf16.mxu0 %vm4439_vm1, %v4438_v4  ;;  %v3442_v46 = vsel %vm313_vm0, %v3927_v27, 0 }
  0xd2   : >> { %4349 = vmatprep.subr.bf16.mxu0 %v4438_v4  ;;  %4346 = vmatmul.mubr.msk.bf16.vlgmr.msra.gmra.mrb[88].mxu1 %vm309_vm2, %v3375_v26 }
  0xd3   : >> { %4356 = vmatpush3.bf16.msra.mxu1 %v3516_v38  ;;  %4357 = vmatprep.mubr.msk.bf16.mxu1 %vm4439_vm1, %v4438_v4 }
  0xd8   : >> { %4340 = vmatmul.mubr.msk.bf16.vlgmr.msra.gmra.mrb[88].mxu0 %vm309_vm2, %v3301_v45 }
  0xd9   : >> { %4350 = vmatpush3.bf16.msra.mxu0 %v3442_v46  ;;  %4351 = vmatprep.mubr.msk.bf16.mxu0 %vm4439_vm1, %v4438_v4 }
  0xda   : >> { %4361 = vmatprep.subr.bf16.mxu0 %v4438_v4  ;;  %4358 = vmatmul.mubr.msk.bf16.vlgmr.msra.gmra.mrb[92].mxu1 %vm309_vm2, %v3511_v49 }
  0xe0   : >> { %4352 = vmatmul.mubr.msk.bf16.vlgmr.msra.gmra.mrb[92].mxu0 %vm309_vm2, %v3437_v33 }
  0xe1   : >> { %4362 = vmatpush3.bf16.msra.mxu0 %v3578_v59  ;;  %4363 = vmatprep.mubr.msk.bf16.mxu0 %vm4439_vm1, %v4438_v4 }
  0xe8   : >> { %4364 = vmatmul.mubr.msk.bf16.vlgmr.msra.gmra.mrb[96].mxu0 %vm309_vm2, %v3573_v52 }
  0xf4   : >> { %v397_v3 = vpop.f32.mrb[0].mxu1 }
  0xf5   : >> { %v4083_v40 = vpop.f32.mrb[1].mxu1 }
  0xf6   : >> { %v400_v35 = vpop.f32.mrb[2].mxu1 }
  0xf7   : >> { %v4084_v5 = vpop.f32.mrb[3].mxu1 }
  0xfb   : >> { %v351_v57 = vpop.f32.mrb[0].mxu0 }
  0xfc   : >> { %v398_v30 = vadd.f32 %v397_v3, %v351_v57  ;;  %v4077_v6 = vpop.f32.mrb[1].mxu0 }
  0xfd   : >> { %v354_v7 = vpop.f32.mrb[2].mxu0  ;;  %v533_v29 = vpop.f32.mrb[4].mxu1 }
  0xfe   : >> { %v401_v9 = vadd.f32 %v400_v35, %v354_v7  ;;  %v4078_v48 = vpop.f32.mrb[3].mxu0  ;;  %v4095_v63 = vpop.f32.mrb[5].mxu1 }
  0xff   : >> { %v536_v4 = vpop.f32.mrb[6].mxu1 }
 0x100   : >> { %v4096_v10 = vpop.f32.mrb[7].mxu1 }
 0x103   : >> { %v458_v11 = vpop.f32.mrb[4].mxu0 }
 0x104   : >> { %v465_v12 = vadd.f32 %v458_v11, %v398_v30  ;;  %v4089_v14 = vpop.f32.mrb[5].mxu0 }
 0x105   : >> { %v461_v39 = vpop.f32.mrb[6].mxu0  ;;  %v671_v15 = vpop.f32.mrb[8].mxu1 }
 0x106   : >> { %v466_v16 = vadd.f32 %v461_v39, %v401_v9  ;;  %v540_v17 = vadd.f32 %v533_v29, %v465_v12  ;;  %v4090_v18 = vpop.f32.mrb[7].mxu0  ;;  %v4107_v19 = vpop.f32.mrb[9].mxu1 }
 0x107   : >> { %v674_v20 = vpop.f32.mrb[10].mxu1 }
 0x108   : >> { %v541_v22 = vadd.f32 %v536_v4, %v466_v16  ;;  %v4108_v23 = vpop.f32.mrb[11].mxu1 }
 0x10b   : >> { %v596_v24 = vpop.f32.mrb[8].mxu0 }
 0x10c   : >> { %v603_v25 = vadd.f32 %v596_v24, %v540_v17  ;;  %v4101_v28 = vpop.f32.mrb[9].mxu0 }
 0x10d   : >> { %v599_v21 = vpop.f32.mrb[10].mxu0  ;;  %v800_v55 = vpop.f32.mrb[12].mxu1 }
 0x10e   : >> { %v604_v56 = vadd.f32 %v599_v21, %v541_v22  ;;  %v678_v31 = vadd.f32 %v671_v15, %v603_v25  ;;  %v4102_v47 = vpop.f32.mrb[11].mxu0  ;;  %v4119_v60 = vpop.f32.mrb[13].mxu1 }
 0x10f   : >> { %v803_v32 = vpop.f32.mrb[14].mxu1 }
 0x110   : >> { %v679_v13 = vadd.f32 %v674_v20, %v604_v56  ;;  %v4120_v26 = vpop.f32.mrb[15].mxu1 }
 0x113   : >> { %v734_v34 = vpop.f32.mrb[12].mxu0 }
 0x114   : >> { %v741_v36 = vadd.f32 %v734_v34, %v678_v31  ;;  %v4113_v8 = vpop.f32.mrb[13].mxu0 }
 0x115   : >> { %v737_v38 = vpop.f32.mrb[14].mxu0  ;;  %v942_v2 = vpop.f32.mrb[16].mxu1 }
 0x116   : >> { %v742_v41 = vadd.f32 %v737_v38, %v679_v13  ;;  %v807_v42 = vadd.f32 %v800_v55, %v741_v36  ;;  %v4114_v27 = vpop.f32.mrb[15].mxu0  ;;  %v4131_v43 = vpop.f32.mrb[17].mxu1 }
 0x117   : >> { %v945_v44 = vpop.f32.mrb[18].mxu1 }
 0x118   : >> { %v808_v45 = vadd.f32 %v803_v32, %v742_v41  ;;  %v4132_v37 = vpop.f32.mrb[19].mxu1 }
 0x11b   : >> { %v880_v46 = vpop.f32.mrb[16].mxu0 }
 0x11c   : >> { %v887_v49 = vadd.f32 %v880_v46, %v807_v42  ;;  %v4125_v50 = vpop.f32.mrb[17].mxu0 }
 0x11d   : >> { %v883_v51 = vpop.f32.mrb[18].mxu0  ;;  %v1078_v53 = vpop.f32.mrb[20].mxu1 }
 0x11e   : >> { %v888_v54 = vadd.f32 %v883_v51, %v808_v45  ;;  %v949_v33 = vadd.f32 %v942_v2, %v887_v49  ;;  %v4126_v58 = vpop.f32.mrb[19].mxu0  ;;  %v4143_v59 = vpop.f32.mrb[21].mxu1 }
 0x11f   : >> { %v1081_v61 = vpop.f32.mrb[22].mxu1 }
 0x120   : >> { %v950_v62 = vadd.f32 %v945_v44, %v888_v54  ;;  %v4144_v52 = vpop.f32.mrb[23].mxu1 }
 0x123   : >> { %v1016_v3 = vpop.f32.mrb[20].mxu0 }
 0x124   : >> { %v1023_v40 = vadd.f32 %v1016_v3, %v949_v33  ;;  %v4137_v35 = vpop.f32.mrb[21].mxu0 }
 0x125   : >> { %v1019_v5 = vpop.f32.mrb[22].mxu0  ;;  %v1214_v57 = vpop.f32.mrb[24].mxu1 }
 0x126   : >> { %v1024_v30 = vadd.f32 %v1019_v5, %v950_v62  ;;  %v1085_v6 = vadd.f32 %v1078_v53, %v1023_v40  ;;  %v4138_v7 = vpop.f32.mrb[23].mxu0  ;;  %v4155_v29 = vpop.f32.mrb[25].mxu1 }
 0x127   : >> { %v1217_v9 = vpop.f32.mrb[26].mxu1 }
 0x128   : >> { %v1086_v48 = vadd.f32 %v1081_v61, %v1024_v30  ;;  %v4156_v63 = vpop.f32.mrb[27].mxu1 }
 0x12b   : >> { %v1152_v4 = vpop.f32.mrb[24].mxu0 }
 0x12c   : >> { %v1159_v10 = vadd.f32 %v1152_v4, %v1085_v6  ;;  %v4149_v11 = vpop.f32.mrb[25].mxu0 }
 0x12d   : >> { %v1155_v12 = vpop.f32.mrb[26].mxu0  ;;  %v1360_v14 = vpop.f32.mrb[28].mxu1 }
 0x12e   : >> { %v1160_v39 = vadd.f32 %v1155_v12, %v1086_v48  ;;  %v1221_v15 = vadd.f32 %v1214_v57, %v1159_v10  ;;  %v4150_v16 = vpop.f32.mrb[27].mxu0  ;;  %v4167_v17 = vpop.f32.mrb[29].mxu1 }
 0x12f   : >> { %v1363_v18 = vpop.f32.mrb[30].mxu1 }
 0x130   : >> { %v1222_v19 = vadd.f32 %v1217_v9, %v1160_v39  ;;  %v4168_v20 = vpop.f32.mrb[31].mxu1 }
 0x133   : >> { %v1280_v22 = vpop.f32.mrb[28].mxu0 }
 0x134   : >> { %v1287_v23 = vadd.f32 %v1280_v22, %v1221_v15  ;;  %v4161_v24 = vpop.f32.mrb[29].mxu0 }
 0x135   : >> { %v1283_v25 = vpop.f32.mrb[30].mxu0  ;;  %v1496_v28 = vpop.f32.mrb[32].mxu1 }
 0x136   : >> { %v1288_v21 = vadd.f32 %v1283_v25, %v1222_v19  ;;  %v1367_v55 = vadd.f32 %v1360_v14, %v1287_v23  ;;  %v4162_v56 = vpop.f32.mrb[31].mxu0  ;;  %v4179_v31 = vpop.f32.mrb[33].mxu1 }
 0x137   : >> { %v1499_v47 = vpop.f32.mrb[34].mxu1 }
 0x138   : >> { %v1368_v60 = vadd.f32 %v1363_v18, %v1288_v21  ;;  %v4180_v32 = vpop.f32.mrb[35].mxu1 }
 0x13b   : >> { %v1422_v13 = vpop.f32.mrb[32].mxu0 }
 0x13c   : >> { %v1429_v26 = vadd.f32 %v1422_v13, %v1367_v55  ;;  %v4173_v34 = vpop.f32.mrb[33].mxu0 }
 0x13d   : >> { %v1425_v36 = vpop.f32.mrb[34].mxu0  ;;  %v1632_v8 = vpop.f32.mrb[36].mxu1 }
 0x13e   : >> { %v1430_v38 = vadd.f32 %v1425_v36, %v1368_v60  ;;  %v1503_v2 = vadd.f32 %v1496_v28, %v1429_v26  ;;  %v4174_v41 = vpop.f32.mrb[35].mxu0  ;;  %v4191_v42 = vpop.f32.mrb[37].mxu1 }
 0x13f   : >> { %v1635_v27 = vpop.f32.mrb[38].mxu1 }
 0x140   : >> { %v1504_v43 = vadd.f32 %v1499_v47, %v1430_v38  ;;  %v4192_v44 = vpop.f32.mrb[39].mxu1 }
 0x143   : >> { %v1558_v45 = vpop.f32.mrb[36].mxu0 }
 0x144   : >> { %v1565_v37 = vadd.f32 %v1558_v45, %v1503_v2  ;;  %v4185_v46 = vpop.f32.mrb[37].mxu0 }
 0x145   : >> { %v1561_v49 = vpop.f32.mrb[38].mxu0  ;;  %v1760_v50 = vpop.f32.mrb[40].mxu1 }
 0x146   : >> { %v1566_v51 = vadd.f32 %v1561_v49, %v1504_v43  ;;  %v1639_v53 = vadd.f32 %v1632_v8, %v1565_v37  ;;  %v4186_v54 = vpop.f32.mrb[39].mxu0  ;;  %v4203_v33 = vpop.f32.mrb[41].mxu1 }
 0x147   : >> { %v1763_v58 = vpop.f32.mrb[42].mxu1 }
 0x148   : >> { %v1640_v59 = vadd.f32 %v1635_v27, %v1566_v51  ;;  %v4204_v61 = vpop.f32.mrb[43].mxu1 }
 0x14b   : >> { %v1694_v62 = vpop.f32.mrb[40].mxu0 }
 0x14c   : >> { %v1701_v52 = vadd.f32 %v1694_v62, %v1639_v53  ;;  %v4197_v3 = vpop.f32.mrb[41].mxu0 }
 0x14d   : >> { %v1697_v40 = vpop.f32.mrb[42].mxu0  ;;  %v1902_v35 = vpop.f32.mrb[44].mxu1 }
 0x14e   : >> { %v1702_v5 = vadd.f32 %v1697_v40, %v1640_v59  ;;  %v1767_v57 = vadd.f32 %v1760_v50, %v1701_v52  ;;  %v4198_v30 = vpop.f32.mrb[43].mxu0  ;;  %v4215_v6 = vpop.f32.mrb[45].mxu1 }
 0x14f   : >> { %v1905_v7 = vpop.f32.mrb[46].mxu1 }
 0x150   : >> { %v1768_v29 = vadd.f32 %v1763_v58, %v1702_v5  ;;  %v4216_v9 = vpop.f32.mrb[47].mxu1 }
 0x153   : >> { %v1840_v48 = vpop.f32.mrb[44].mxu0 }
 0x154   : >> { %v1847_v63 = vadd.f32 %v1840_v48, %v1767_v57  ;;  %v4209_v4 = vpop.f32.mrb[45].mxu0 }
 0x155   : >> { %v1843_v10 = vpop.f32.mrb[46].mxu0  ;;  %v2038_v11 = vpop.f32.mrb[48].mxu1 }
 0x156   : >> { %v1848_v12 = vadd.f32 %v1843_v10, %v1768_v29  ;;  %v1909_v14 = vadd.f32 %v1902_v35, %v1847_v63  ;;  %v4210_v39 = vpop.f32.mrb[47].mxu0  ;;  %v4227_v15 = vpop.f32.mrb[49].mxu1 }
 0x157   : >> { %v2041_v16 = vpop.f32.mrb[50].mxu1 }
 0x158   : >> { %v1910_v17 = vadd.f32 %v1905_v7, %v1848_v12  ;;  %v4228_v18 = vpop.f32.mrb[51].mxu1 }
 0x15b   : >> { %v1976_v19 = vpop.f32.mrb[48].mxu0 }
 0x15c   : >> { %v1983_v20 = vadd.f32 %v1976_v19, %v1909_v14  ;;  %v4221_v22 = vpop.f32.mrb[49].mxu0 }
 0x15d   : >> { %v1979_v23 = vpop.f32.mrb[50].mxu0  ;;  %v2174_v24 = vpop.f32.mrb[52].mxu1 }
 0x15e   : >> { %v1984_v25 = vadd.f32 %v1979_v23, %v1910_v17  ;;  %v2045_v28 = vadd.f32 %v2038_v11, %v1983_v20  ;;  %v4222_v21 = vpop.f32.mrb[51].mxu0  ;;  %v4239_v55 = vpop.f32.mrb[53].mxu1 }
 0x15f   : >> { %v2177_v56 = vpop.f32.mrb[54].mxu1 }
 0x160   : >> { %v2046_v31 = vadd.f32 %v2041_v16, %v1984_v25  ;;  %v4240_v47 = vpop.f32.mrb[55].mxu1 }
 0x163   : >> { %v2112_v60 = vpop.f32.mrb[52].mxu0 }
 0x164   : >> { %v2119_v32 = vadd.f32 %v2112_v60, %v2045_v28  ;;  %v4233_v13 = vpop.f32.mrb[53].mxu0 }
 0x165   : >> { %v2115_v26 = vpop.f32.mrb[54].mxu0  ;;  %v2320_v34 = vpop.f32.mrb[56].mxu1 }
 0x166   : >> { %v2120_v36 = vadd.f32 %v2115_v26, %v2046_v31  ;;  %v2181_v8 = vadd.f32 %v2174_v24, %v2119_v32  ;;  %v4234_v38 = vpop.f32.mrb[55].mxu0  ;;  %v4251_v2 = vpop.f32.mrb[57].mxu1 }
 0x167   : >> { %v2323_v41 = vpop.f32.mrb[58].mxu1 }
 0x168   : >> { %v2182_v42 = vadd.f32 %v2177_v56, %v2120_v36  ;;  %v4252_v27 = vpop.f32.mrb[59].mxu1 }
 0x16b   : >> { %v2240_v43 = vpop.f32.mrb[56].mxu0 }
 0x16c   : >> { %v2247_v44 = vadd.f32 %v2240_v43, %v2181_v8  ;;  %v4245_v45 = vpop.f32.mrb[57].mxu0 }
 0x16d   : >> { %v2243_v37 = vpop.f32.mrb[58].mxu0  ;;  %v2456_v46 = vpop.f32.mrb[60].mxu1 }
 0x16e   : >> { %v2248_v49 = vadd.f32 %v2243_v37, %v2182_v42  ;;  %v2327_v50 = vadd.f32 %v2320_v34, %v2247_v44  ;;  %v4246_v51 = vpop.f32.mrb[59].mxu0  ;;  %v4263_v53 = vpop.f32.mrb[61].mxu1 }
 0x16f   : >> { %v2459_v54 = vpop.f32.mrb[62].mxu1 }
 0x170   : >> { %v2328_v33 = vadd.f32 %v2323_v41, %v2248_v49  ;;  %v4264_v58 = vpop.f32.mrb[63].mxu1 }
 0x173   : >> { %v2382_v59 = vpop.f32.mrb[60].mxu0 }
 0x174   : >> { %v2389_v61 = vadd.f32 %v2382_v59, %v2327_v50  ;;  %v4257_v62 = vpop.f32.mrb[61].mxu0 }
 0x175   : >> { %v2385_v52 = vpop.f32.mrb[62].mxu0  ;;  %v2592_v3 = vpop.f32.mrb[64].mxu1 }
 0x176   : >> { %v2390_v40 = vadd.f32 %v2385_v52, %v2328_v33  ;;  %v2463_v35 = vadd.f32 %v2456_v46, %v2389_v61  ;;  %v4258_v5 = vpop.f32.mrb[63].mxu0  ;;  %v4275_v57 = vpop.f32.mrb[65].mxu1 }
 0x177   : >> { %v2595_v30 = vpop.f32.mrb[66].mxu1 }
 0x178   : >> { %v2464_v6 = vadd.f32 %v2459_v54, %v2390_v40  ;;  %v4276_v7 = vpop.f32.mrb[67].mxu1 }
 0x17b   : >> { %v2518_v29 = vpop.f32.mrb[64].mxu0 }
 0x17c   : >> { %v2525_v9 = vadd.f32 %v2518_v29, %v2463_v35  ;;  %v4269_v48 = vpop.f32.mrb[65].mxu0 }
 0x17d   : >> { %v2521_v63 = vpop.f32.mrb[66].mxu0  ;;  %v2720_v4 = vpop.f32.mrb[68].mxu1 }
 0x17e   : >> { %v2526_v10 = vadd.f32 %v2521_v63, %v2464_v6  ;;  %v2599_v11 = vadd.f32 %v2592_v3, %v2525_v9  ;;  %v4270_v12 = vpop.f32.mrb[67].mxu0  ;;  %v4287_v14 = vpop.f32.mrb[69].mxu1 }
 0x17f   : >> { %v2723_v39 = vpop.f32.mrb[70].mxu1 }
 0x180   : >> { %v2600_v15 = vadd.f32 %v2595_v30, %v2526_v10  ;;  %v4288_v16 = vpop.f32.mrb[71].mxu1 }
 0x183   : >> { %v2654_v17 = vpop.f32.mrb[68].mxu0 }
 0x184   : >> { %v2661_v18 = vadd.f32 %v2654_v17, %v2599_v11  ;;  %v4281_v19 = vpop.f32.mrb[69].mxu0 }
 0x185   : >> { %v2657_v20 = vpop.f32.mrb[70].mxu0  ;;  %v2862_v22 = vpop.f32.mrb[72].mxu1 }
 0x186   : >> { %v2662_v23 = vadd.f32 %v2657_v20, %v2600_v15  ;;  %v2727_v24 = vadd.f32 %v2720_v4, %v2661_v18  ;;  %v4282_v25 = vpop.f32.mrb[71].mxu0  ;;  %v4299_v28 = vpop.f32.mrb[73].mxu1 }
 0x187   : >> { %v2865_v21 = vpop.f32.mrb[74].mxu1 }
 0x188   : >> { %v2728_v55 = vadd.f32 %v2723_v39, %v2662_v23  ;;  %v4300_v56 = vpop.f32.mrb[75].mxu1 }
 0x18b   : >> { %v2800_v31 = vpop.f32.mrb[72].mxu0 }
 0x18c   : >> { %v2807_v47 = vadd.f32 %v2800_v31, %v2727_v24  ;;  %v4293_v60 = vpop.f32.mrb[73].mxu0 }
 0x18d   : >> { %v2803_v32 = vpop.f32.mrb[74].mxu0  ;;  %v2998_v13 = vpop.f32.mrb[76].mxu1 }
 0x18e   : >> { %v2808_v26 = vadd.f32 %v2803_v32, %v2728_v55  ;;  %v2869_v34 = vadd.f32 %v2862_v22, %v2807_v47  ;;  %v4294_v36 = vpop.f32.mrb[75].mxu0  ;;  %v4311_v8 = vpop.f32.mrb[77].mxu1 }
 0x18f   : >> { %v3001_v38 = vpop.f32.mrb[78].mxu1  ;;  %v3935_v36 = vld [vmem:[%s5327_s4] ss:$0 sm:$0xff] }
 0x190   : >> { %v2870_v2 = vadd.f32 %v2865_v21, %v2808_v26  ;;  %v4312_v41 = vpop.f32.mrb[79].mxu1 }
 0x193   : >> { %v2936_v42 = vpop.f32.mrb[76].mxu0 }
 0x194   : >> { %v2943_v27 = vadd.f32 %v2936_v42, %v2869_v34  ;;  %v4305_v43 = vpop.f32.mrb[77].mxu0 }
 0x195   : >> { %v2939_v44 = vpop.f32.mrb[78].mxu0  ;;  %v3134_v45 = vpop.f32.mrb[80].mxu1 }
 0x196   : >> { %v2944_v37 = vadd.f32 %v2939_v44, %v2870_v2  ;;  %v3005_v46 = vadd.f32 %v2998_v13, %v2943_v27  ;;  %v4306_v49 = vpop.f32.mrb[79].mxu0  ;;  %v4323_v50 = vpop.f32.mrb[81].mxu1 }
 0x197   : >> { %v3137_v51 = vpop.f32.mrb[82].mxu1 }
 0x198   : >> { %v3006_v53 = vadd.f32 %v3001_v38, %v2944_v37  ;;  %v4324_v54 = vpop.f32.mrb[83].mxu1 }
 0x19b   : >> { %v3072_v33 = vpop.f32.mrb[80].mxu0 }
 0x19c   : >> { %v3079_v58 = vadd.f32 %v3072_v33, %v3005_v46  ;;  %v4317_v59 = vpop.f32.mrb[81].mxu0 }
 0x19d   : >> { %v3075_v61 = vpop.f32.mrb[82].mxu0  ;;  %v3280_v62 = vpop.f32.mrb[84].mxu1 }
 0x19e   : >> { %v3080_v52 = vadd.f32 %v3075_v61, %v3006_v53  ;;  %v3141_v3 = vadd.f32 %v3134_v45, %v3079_v58  ;;  %v4318_v40 = vpop.f32.mrb[83].mxu0  ;;  %v4335_v35 = vpop.f32.mrb[85].mxu1 }
 0x19f   : >> { %v3283_v5 = vpop.f32.mrb[86].mxu1 }
 0x1a0   : >> { %v3142_v57 = vadd.f32 %v3137_v51, %v3080_v52  ;;  %v4336_v30 = vpop.f32.mrb[87].mxu1 }
 0x1a3   : >> { %v3200_v6 = vpop.f32.mrb[84].mxu0 }
 0x1a4   : >> { %v3207_v7 = vadd.f32 %v3200_v6, %v3141_v3  ;;  %v4329_v29 = vpop.f32.mrb[85].mxu0 }
 0x1a5   : >> { %v3203_v9 = vpop.f32.mrb[86].mxu0  ;;  %v3416_v48 = vpop.f32.mrb[88].mxu1 }
 0x1a6   : >> { %v3208_v63 = vadd.f32 %v3203_v9, %v3142_v57  ;;  %v3287_v4 = vadd.f32 %v3280_v62, %v3207_v7  ;;  %v4330_v10 = vpop.f32.mrb[87].mxu0  ;;  %v4347_v11 = vpop.f32.mrb[89].mxu1 }
 0x1a7   : >> { %v3419_v12 = vpop.f32.mrb[90].mxu1 }
 0x1a8   : >> { %v3288_v14 = vadd.f32 %v3283_v5, %v3208_v63  ;;  %v4348_v39 = vpop.f32.mrb[91].mxu1 }
 0x1ab   : >> { %v3342_v15 = vpop.f32.mrb[88].mxu0 }
 0x1ac   : >> { %v3349_v16 = vadd.f32 %v3342_v15, %v3287_v4  ;;  %v4341_v17 = vpop.f32.mrb[89].mxu0 }
 0x1ad   : >> { %v3345_v18 = vpop.f32.mrb[90].mxu0  ;;  %v3552_v19 = vpop.f32.mrb[92].mxu1 }
 0x1ae   : >> { %v3350_v20 = vadd.f32 %v3345_v18, %v3288_v14  ;;  %v3423_v22 = vadd.f32 %v3416_v48, %v3349_v16  ;;  %v4342_v23 = vpop.f32.mrb[91].mxu0  ;;  %v4359_v24 = vpop.f32.mrb[93].mxu1 }
 0x1af   : >> { %v3555_v25 = vpop.f32.mrb[94].mxu1 }
 0x1b0   : >> { %v3424_v28 = vadd.f32 %v3419_v12, %v3350_v20  ;;  %v4360_v21 = vpop.f32.mrb[95].mxu1 }
 0x1b3   : >> { %v3478_v55 = vpop.f32.mrb[92].mxu0 }
 0x1b4   : >> { %v3485_v56 = vadd.f32 %v3478_v55, %v3423_v22  ;;  %v4353_v31 = vpop.f32.mrb[93].mxu0 }
 0x1b5   : >> { %v3481_v47 = vpop.f32.mrb[94].mxu0 }
 0x1b6   : >> { %v3486_v60 = vadd.f32 %v3481_v47, %v3424_v28  ;;  %v3559_v32 = vadd.f32 %v3552_v19, %v3485_v56  ;;  %v4354_v13 = vpop.f32.mrb[95].mxu0 }
 0x1b8   : >> { %v3560_v26 = vadd.f32 %v3555_v25, %v3486_v60 }
 0x1bb   : >> { %v3614_v34 = vpop.f32.mrb[96].mxu0 }
 0x1bc   : >> { %v3621_v8 = vadd.f32 %v3614_v34, %v3559_v32  ;;  %v4365_v38 = vpop.f32.mrb[97].mxu0 }
 0x1bd   : >> { %v3617_v2 = vpop.f32.mrb[98].mxu0 }
 0x1be   : >> { %v3630_v41 = vadd.f32 %v3935_v36, %v3621_v8  ;;  %v3622_v42 = vadd.f32 %v3617_v2, %v3560_v26  ;;  %v4366_v27 = vpop.f32.mrb[99].mxu0 }
 0x1c0   : >> { %4402 = vtanh.f32 %v3630_v41  ;;  %v3631_v43 = vadd.f32 %v3935_v36, %v3622_v42 }
 0x1c2   : >> { %4404 = vtanh.f32 %v3631_v43 }
 0x1c7   : > { %270 = sbr.rel (!%p268_p5) target bundleno = 18 (0x12), region = 133 }
 0x1ca   : >> { %v4403_v44 = vpop.eup %4402 }
 0x1cb   : >> { %3637 = vst.msk [vmem:[%s3635_s25] sm:$0xff] %vm3636_vm9, %v4403_v44 }
 0x1cc   : >> { %v4405_v45 = vpop.eup %4404 }
 0x1cd   : >> { %3638 = vst.msk [vmem:[%s3635_s25 + $0x8] sm:$0xff] %vm3636_vm9, %v4405_v45 }
 0x1ce PF: > { %s15_s20 = sadd.s32 1, %s4432_s20   ;;  %s5329_s18 = smov %s4428_s19 }
 0x1cf   : > { %p12_p6 = scmp.ge.s32.totalorder %s15_s20, 4   ;;  %s5330_s19 = smov %s5332_s21 }
 0x1d1   :  { %14 = sbr.rel (!%p12_p6) target bundleno = 2 (0x2), region = 144 }

</bundles_post_ra>
